<compile_context>
chip_gen: v7x
topology: tpu7x:2x2x1
jax: 0.10.0
libtpu: 0.0.40
codegen_flags: <defaults>
</compile_context>

<pallas_src>
import jax
import jax.numpy as jnp
from jax.experimental import pallas as pl
from jax.experimental.pallas import tpu as pltpu


# ----------------------------------------------------------------------------
# In-kernel helpers (traced inside the Pallas kernel)
# ----------------------------------------------------------------------------

def _onehot_embed(ids, table, n_rows):
    """Embedding lookup as an exact one-hot matmul on the MXU.

    ids: [R, S] int32, table: [V, E] bf16  ->  [R*S, E] f32
    """
    R, S = ids.shape
    iota = jax.lax.broadcasted_iota(jnp.int32, (R, S, n_rows), 2)
    onehot = jnp.where(iota == ids[:, :, None], 1.0, 0.0)        # [R, S, V] f32
    return jnp.dot(onehot.reshape(R * S, n_rows).astype(jnp.bfloat16), table,
                   preferred_element_type=jnp.float32)


def _lstm_seq(x, wih, whh, b):
    """Single-layer batch-first LSTM; returns the full hidden sequence.

    x: [B, S, E] f32, wih: [E, 4H] bf16, whh: [H, 4H] bf16, b: [1, 4H] f32
    -> [B, S, H] f32 (kept entirely in vregs; no VMEM scratch round-trip)
    """
    B, S, E = x.shape
    H = whh.shape[0]
    # Hoisted input projection: one [B*S,E]x[E,4H] matmul instead of S tiny ones.
    gx = jnp.dot(x.reshape(B * S, E).astype(jnp.bfloat16), wih,
                 preferred_element_type=jnp.float32).reshape(B, S, 4 * H) + b
    h = jnp.zeros((B, H), jnp.float32)
    c = jnp.zeros((B, H), jnp.float32)
    hseq = jnp.zeros((B, S, H), jnp.float32)
    t_pos = jax.lax.broadcasted_iota(jnp.int32, (1, S, 1), 1)
    for t in range(S):  # static trip count, fully unrolled (S is small)
        gates = gx[:, t, :] + jnp.dot(h.astype(jnp.bfloat16), whh,
                                      preferred_element_type=jnp.float32)
        i_g = jax.nn.sigmoid(gates[:, 0 * H:1 * H])
        f_g = jax.nn.sigmoid(gates[:, 1 * H:2 * H])
        g_g = jnp.tanh(gates[:, 2 * H:3 * H])
        o_g = jax.nn.sigmoid(gates[:, 3 * H:4 * H])
        c = f_g * c + i_g * g_g
        h = o_g * jnp.tanh(c)
        # Register-resident merge of h into the sequence (no VMEM store).
        hseq = jnp.where(t_pos == t, h[:, None, :], hseq)
    return hseq


def _attention(hseq, w, ab, au):
    """HAN attention: softmax(tanh(h W + b) . u) weighted sum of h.

    hseq: [B, S, H] f32, w: [H, H] bf16, ab/au: [1, H] f32  ->  [B, H] f32
    """
    B, S, H = hseq.shape
    u_it = jnp.tanh(
        jnp.dot(hseq.reshape(B * S, H).astype(jnp.bfloat16), w,
                preferred_element_type=jnp.float32) + ab).reshape(B, S, H)
    scores = jnp.sum(u_it * au.reshape(1, 1, H), axis=-1)        # [B, S]
    scores = scores - jnp.max(scores, axis=-1, keepdims=True)
    e = jnp.exp(scores)
    # approx reciprocal goes to the EUP slot; tiny deviation vs exact softmax.
    alpha = e * pl.reciprocal(jnp.sum(e, axis=-1, keepdims=True), approx=True)
    return jnp.sum(alpha[:, :, None] * hseq, axis=1)             # [B, H]


# ----------------------------------------------------------------------------
# The single fused Pallas kernel
# ----------------------------------------------------------------------------

def _han_kernel(x_ref, xt_ref, emb_ref, temb_ref,
                sent_w_ref, sent_aw_ref, doc_w_ref, doc_aw_ref,
                title_w_ref, title_aw_ref, w1_ref, w2_ref, w3_ref,
                bias_ref, out_ref):
    B, D, S = x_ref.shape
    _, T = xt_ref.shape
    V, E = emb_ref.shape
    TV = temb_ref.shape[0]
    WH = sent_aw_ref.shape[1]
    SH = doc_aw_ref.shape[0]
    TH = title_aw_ref.shape[0]
    L2 = w2_ref.shape[0]
    L1 = w3_ref.shape[0]
    C = out_ref.shape[1]

    bias = bias_ref[...]                                   # [3D+9, Wmax] f32

    # --- word-token embeddings: one fused one-hot gather for all sentences ---
    x_emb = _onehot_embed(x_ref[...].reshape(B * D, S), emb_ref[...], V)
    x_emb = x_emb.reshape(B, D, S, E)                      # [B, D, S, E] f32

    # --- per-sentence word LSTM + attention (static unroll over doc_len) -----
    doc_repr = jnp.zeros((B, D, WH), jnp.float32)
    d_pos = jax.lax.broadcasted_iota(jnp.int32, (1, D, 1), 1)
    for d in range(D):
        w_d = sent_w_ref[d]                                # [E+WH, 4WH] bf16
        hseq = _lstm_seq(x_emb[:, d], w_d[:E], w_d[E:], bias[d:d + 1, :4 * WH])
        att_d = _attention(hseq, sent_aw_ref[d],
                           bias[D + 2 + d:D + 3 + d, :WH],
                           bias[2 * D + 2 + d:2 * D + 3 + d, :WH])
        doc_repr = jnp.where(d_pos == d, att_d[:, None, :], doc_repr)

    # --- sentence-level (doc) LSTM + attention -------------------------------
    doc_w = doc_w_ref[...]                                 # [WH+SH, 4SH] bf16
    doc_seq = _lstm_seq(doc_repr, doc_w[:WH], doc_w[WH:], bias[D:D + 1, :4 * SH])
    att_doc = _attention(doc_seq, doc_aw_ref[...],
                         bias[3 * D + 2:3 * D + 3, :SH],
                         bias[3 * D + 3:3 * D + 4, :SH])

    # --- title LSTM + attention ----------------------------------------------
    t_emb = _onehot_embed(xt_ref[...], temb_ref[...], TV).reshape(B, T, E)
    title_w = title_w_ref[...]                             # [E+TH, 4TH] bf16
    title_seq = _lstm_seq(t_emb, title_w[:E], title_w[E:],
                          bias[D + 1:D + 2, :4 * TH])
    att_title = _attention(title_seq, title_aw_ref[...],
                           bias[3 * D + 4:3 * D + 5, :TH],
                           bias[3 * D + 5:3 * D + 6, :TH])

    # --- MLP head (concat avoided by splitting W1 into doc/title halves) -----
    w1 = w1_ref[...]                                       # [SH+TH, L2] bf16
    h1 = jnp.maximum(
        jnp.dot(att_doc.astype(jnp.bfloat16), w1[:SH],
                preferred_element_type=jnp.float32)
        + jnp.dot(att_title.astype(jnp.bfloat16), w1[SH:],
                  preferred_element_type=jnp.float32)
        + bias[3 * D + 6:3 * D + 7, :L2], 0.0)
    h2 = jnp.maximum(
        jnp.dot(h1.astype(jnp.bfloat16), w2_ref[...],
                preferred_element_type=jnp.float32)
        + bias[3 * D + 7:3 * D + 8, :L1], 0.0)
    out_ref[...] = (jnp.dot(h2.astype(jnp.bfloat16), w3_ref[...],
                            preferred_element_type=jnp.float32)
                    + bias[3 * D + 8:3 * D + 9, :C])
    # Dropout layers are identity in eval mode.


# ----------------------------------------------------------------------------
# Parameter construction (deterministic, synthetic) + one-time packing
# ----------------------------------------------------------------------------

def _normal(key, shape, scale=0.1):
    return scale * jax.random.normal(key, shape, dtype=jnp.float32)


def init_params(key, *, doc_len, vocab_size, title_vocab_size, embed_dim,
                word_hidden, sent_hidden, title_hidden, l2, l1, num_classes):
    k = iter(jax.random.split(key, 32))
    p = {}
    p["embedding"] = _normal(next(k), (vocab_size, embed_dim), 1.0)
    p["title_embedding"] = _normal(next(k), (title_vocab_size, embed_dim), 1.0)
    # Per-sentence word LSTM + attention, stacked along the doc axis.
    p["sent_wih"] = _normal(next(k), (doc_len, embed_dim, 4 * word_hidden))
    p["sent_whh"] = _normal(next(k), (doc_len, word_hidden, 4 * word_hidden))
    p["sent_b"] = _normal(next(k), (doc_len, 1, 4 * word_hidden))
    p["sent_aw"] = _normal(next(k), (doc_len, word_hidden, word_hidden))
    p["sent_ab"] = _normal(next(k), (doc_len, 1, word_hidden))
    p["sent_au"] = _normal(next(k), (doc_len, 1, word_hidden))
    # Sentence-level (doc) LSTM + attention.
    p["doc_wih"] = _normal(next(k), (word_hidden, 4 * sent_hidden))
    p["doc_whh"] = _normal(next(k), (sent_hidden, 4 * sent_hidden))
    p["doc_b"] = _normal(next(k), (1, 4 * sent_hidden))
    p["doc_aw"] = _normal(next(k), (sent_hidden, sent_hidden))
    p["doc_ab"] = _normal(next(k), (1, sent_hidden))
    p["doc_au"] = _normal(next(k), (1, sent_hidden))
    # Title LSTM + attention.
    p["title_wih"] = _normal(next(k), (embed_dim, 4 * title_hidden))
    p["title_whh"] = _normal(next(k), (title_hidden, 4 * title_hidden))
    p["title_b"] = _normal(next(k), (1, 4 * title_hidden))
    p["title_aw"] = _normal(next(k), (title_hidden, title_hidden))
    p["title_ab"] = _normal(next(k), (1, title_hidden))
    p["title_au"] = _normal(next(k), (1, title_hidden))
    # MLP head.  NOTE: weights are [in, out] (already transposed vs. PyTorch).
    p["w1"] = _normal(next(k), (sent_hidden + title_hidden, l2))
    p["b1"] = _normal(next(k), (1, l2))
    p["w2"] = _normal(next(k), (l2, l1))
    p["b2"] = _normal(next(k), (1, l1))
    p["w3"] = _normal(next(k), (l1, num_classes))
    p["b3"] = _normal(next(k), (1, num_classes))
    return p


def pack_params(p):
    """One-time packing (outside jit): bf16 weights + a single f32 bias slab."""
    bf = lambda a: a.astype(jnp.bfloat16)
    D = p["sent_wih"].shape[0]
    WH = p["sent_whh"].shape[1]
    SH = p["doc_whh"].shape[0]
    TH = p["title_whh"].shape[0]
    L2 = p["w2"].shape[0]
    L1 = p["w3"].shape[0]
    C = p["w3"].shape[1]
    wmax = max(4 * WH, 4 * SH, 4 * TH, L2, L1, C)
    bias = jnp.zeros((3 * D + 9, wmax), jnp.float32)

    def put(b, r, v):
        v = jnp.asarray(v, jnp.float32).reshape(1, -1)
        return b.at[r:r + 1, :v.shape[1]].set(v)

    for d in range(D):
        bias = put(bias, d, p["sent_b"][d])
        bias = put(bias, D + 2 + d, p["sent_ab"][d])
        bias = put(bias, 2 * D + 2 + d, p["sent_au"][d])
    bias = put(bias, D, p["doc_b"])
    bias = put(bias, D + 1, p["title_b"])
    bias = put(bias, 3 * D + 2, p["doc_ab"])
    bias = put(bias, 3 * D + 3, p["doc_au"])
    bias = put(bias, 3 * D + 4, p["title_ab"])
    bias = put(bias, 3 * D + 5, p["title_au"])
    bias = put(bias, 3 * D + 6, p["b1"])
    bias = put(bias, 3 * D + 7, p["b2"])
    bias = put(bias, 3 * D + 8, p["b3"])

    return {
        "emb": bf(p["embedding"]),
        "temb": bf(p["title_embedding"]),
        "sent_w": bf(jnp.concatenate([p["sent_wih"], p["sent_whh"]], axis=1)),
        "sent_aw": bf(p["sent_aw"]),
        "doc_w": bf(jnp.concatenate([p["doc_wih"], p["doc_whh"]], axis=0)),
        "doc_aw": bf(p["doc_aw"]),
        "title_w": bf(jnp.concatenate([p["title_wih"], p["title_whh"]], axis=0)),
        "title_aw": bf(p["title_aw"]),
        "w1": bf(p["w1"]),
        "w2": bf(p["w2"]),
        "w3": bf(p["w3"]),
        "bias": bias,
    }


# ----------------------------------------------------------------------------
# Forward pass: exactly one pallas_call, zero XLA glue ops
# ----------------------------------------------------------------------------

_VMEM = pl.BlockSpec(memory_space=pltpu.MemorySpace.VMEM)


def han_lstm_forward(packed, x, xt):
    B = x.shape[0]
    C = packed["w3"].shape[1]
    return pl.pallas_call(
        _han_kernel,
        out_shape=jax.ShapeDtypeStruct((B, C), jnp.float32),
        in_specs=[_VMEM] * 14,
        out_specs=_VMEM,
    )(x, xt, packed["emb"], packed["temb"],
      packed["sent_w"], packed["sent_aw"],
      packed["doc_w"], packed["doc_aw"],
      packed["title_w"], packed["title_aw"],
      packed["w1"], packed["w2"], packed["w3"], packed["bias"])


# ----------------------------------------------------------------------------
# Main
# ----------------------------------------------------------------------------

if __name__ == "__main__":
    # Small, forward-consistent shapes.
    B = 2            # batch
    DOC_LEN = 3      # sentences per document
    TEXT_LEN = 8     # words per sentence
    TITLE_LEN = 8    # words in title
    VOCAB = 50
    TITLE_VOCAB = 40
    EMBED = 16
    WORD_HIDDEN = 32     # 4H = 128 -> lane-dense gate slab
    SENT_HIDDEN = 32
    TITLE_HIDDEN = 32
    L2 = 32
    L1 = 16
    NUM_CLASSES = 4

    key = jax.random.PRNGKey(0)
    kx, kt, kp = jax.random.split(key, 3)
    x = jax.random.randint(kx, (B, DOC_LEN, TEXT_LEN), 0, VOCAB, dtype=jnp.int32)
    xt = jax.random.randint(kt, (B, TITLE_LEN), 0, TITLE_VOCAB, dtype=jnp.int32)

    params = init_params(
        kp, doc_len=DOC_LEN, vocab_size=VOCAB, title_vocab_size=TITLE_VOCAB,
        embed_dim=EMBED, word_hidden=WORD_HIDDEN, sent_hidden=SENT_HIDDEN,
        title_hidden=TITLE_HIDDEN, l2=L2, l1=L1, num_classes=NUM_CLASSES)
    packed = jax.block_until_ready(pack_params(params))   # one-time, outside jit

    fwd = jax.jit(han_lstm_forward)
    y = fwd(packed, x, xt)
    y = jax.block_until_ready(y)
    assert y.shape == (B, NUM_CLASSES), y.shape
    assert bool(jnp.all(jnp.isfinite(y)))
    print("KERNEL_OK")
</pallas_src>

<mosaic_0001>
module attributes {stable_mosaic.version = 11 : i64} {
  func.func @_han_kernel(%arg0: memref<2x3x8xi32, #tpu.memory_space<vmem>>, %arg1: memref<2x8xi32, #tpu.memory_space<vmem>>, %arg2: memref<50x16xbf16, #tpu.memory_space<vmem>>, %arg3: memref<40x16xbf16, #tpu.memory_space<vmem>>, %arg4: memref<3x48x128xbf16, #tpu.memory_space<vmem>>, %arg5: memref<3x32x32xbf16, #tpu.memory_space<vmem>>, %arg6: memref<64x128xbf16, #tpu.memory_space<vmem>>, %arg7: memref<32x32xbf16, #tpu.memory_space<vmem>>, %arg8: memref<48x128xbf16, #tpu.memory_space<vmem>>, %arg9: memref<32x32xbf16, #tpu.memory_space<vmem>>, %arg10: memref<64x32xbf16, #tpu.memory_space<vmem>>, %arg11: memref<32x16xbf16, #tpu.memory_space<vmem>>, %arg12: memref<16x4xbf16, #tpu.memory_space<vmem>>, %arg13: memref<18x128xf32, #tpu.memory_space<vmem>>, %arg14: memref<2x4xf32, #tpu.memory_space<vmem>>) attributes {dimension_semantics = [], scalar_prefetch = 0 : i64, scratch_operands = 0 : i64, tpu.core_type = #tpu.core_type<tc>} {
    %c0 = arith.constant 0 : index
    %c0_0 = arith.constant 0 : index
    %0 = vector.load %arg13[%c0, %c0_0] : memref<18x128xf32, #tpu.memory_space<vmem>>, vector<18x128xf32>
    %c0_1 = arith.constant 0 : index
    %c0_2 = arith.constant 0 : index
    %c0_3 = arith.constant 0 : index
    %1 = vector.load %arg0[%c0_1, %c0_2, %c0_3] : memref<2x3x8xi32, #tpu.memory_space<vmem>>, vector<2x3x8xi32>
    %2 = vector.shape_cast %1 : vector<2x3x8xi32> to vector<6x8xi32>
    %c0_4 = arith.constant 0 : index
    %c0_5 = arith.constant 0 : index
    %3 = vector.load %arg2[%c0_4, %c0_5] : memref<50x16xbf16, #tpu.memory_space<vmem>>, vector<50x16xbf16>
    %4 = tpu.iota {dimensions = array<i32: 2>} : vector<6x8x50xi32>
    %5 = vector.shape_cast %2 : vector<6x8xi32> to vector<6x8x1xi32>
    %6 = vector.broadcast %5 : vector<6x8x1xi32> to vector<6x8x50xi32>
    %7 = arith.cmpi eq, %4, %6 : vector<6x8x50xi32>
    %cst = arith.constant 1.000000e+00 : f32
    %cst_6 = arith.constant 0.000000e+00 : f32
    %8 = vector.broadcast %cst : f32 to vector<6x8x50xf32>
    %9 = vector.broadcast %cst_6 : f32 to vector<6x8x50xf32>
    %10 = arith.select %7, %8, %9 : vector<6x8x50xi1>, vector<6x8x50xf32>
    %11 = vector.shape_cast %10 : vector<6x8x50xf32> to vector<48x50xf32>
    %12 = arith.truncf %11 : vector<48x50xf32> to vector<48x50xbf16>
    %cst_7 = arith.constant dense<0.000000e+00> : vector<48x16xf32>
    %13 = tpu.matmul %12, %3, %cst_7 {dimension_numbers = #tpu.dot_dimension_numbers<[1], [0], [0], [1], [0, 0, 1, 1], [], []>} : vector<48x50xbf16>, vector<50x16xbf16>, vector<48x16xf32> -> vector<48x16xf32>
    %14 = vector.shape_cast %13 : vector<48x16xf32> to vector<2x3x8x16xf32>
    %cst_8 = arith.constant 0.000000e+00 : f32
    %15 = vector.broadcast %cst_8 : f32 to vector<2x3x32xf32>
    %16 = tpu.iota {dimensions = array<i32: 1>} : vector<1x3x1xi32>
    %c0_9 = arith.constant 0 : index
    %c0_10 = arith.constant 0 : index
    %c0_11 = arith.constant 0 : index
    %17 = vector.load %arg4[%c0_9, %c0_10, %c0_11] : memref<3x48x128xbf16, #tpu.memory_space<vmem>>, vector<1x48x128xbf16>
    %18 = vector.shape_cast %17 : vector<1x48x128xbf16> to vector<48x128xbf16>
    %19 = vector.extract_strided_slice %14 {offsets = [0, 0, 0, 0], sizes = [2, 1, 8, 16], strides = [1, 1, 1, 1]} : vector<2x3x8x16xf32> to vector<2x1x8x16xf32>
    %20 = vector.shape_cast %19 : vector<2x1x8x16xf32> to vector<2x8x16xf32>
    %21 = vector.extract_strided_slice %18 {offsets = [0, 0], sizes = [16, 128], strides = [1, 1]} : vector<48x128xbf16> to vector<16x128xbf16>
    %22 = vector.extract_strided_slice %18 {offsets = [16, 0], sizes = [32, 128], strides = [1, 1]} : vector<48x128xbf16> to vector<32x128xbf16>
    %23 = vector.extract_strided_slice %0 {offsets = [0, 0], sizes = [1, 128], strides = [1, 1]} : vector<18x128xf32> to vector<1x128xf32>
    %24 = vector.shape_cast %20 : vector<2x8x16xf32> to vector<16x16xf32>
    %25 = arith.truncf %24 : vector<16x16xf32> to vector<16x16xbf16>
    %cst_12 = arith.constant dense<0.000000e+00> : vector<16x128xf32>
    %26 = tpu.matmul %25, %21, %cst_12 {dimension_numbers = #tpu.dot_dimension_numbers<[1], [0], [0], [1], [0, 0, 1, 1], [], []>} : vector<16x16xbf16>, vector<16x128xbf16>, vector<16x128xf32> -> vector<16x128xf32>
    %27 = vector.shape_cast %26 : vector<16x128xf32> to vector<2x8x128xf32>
    %28 = vector.shape_cast %23 : vector<1x128xf32> to vector<1x1x128xf32>
    %29 = vector.broadcast %28 : vector<1x1x128xf32> to vector<2x8x128xf32>
    %30 = arith.addf %27, %29 : vector<2x8x128xf32>
    %cst_13 = arith.constant 0.000000e+00 : f32
    %31 = vector.broadcast %cst_13 : f32 to vector<2x32xf32>
    %cst_14 = arith.constant 0.000000e+00 : f32
    %32 = vector.broadcast %cst_14 : f32 to vector<2x32xf32>
    %cst_15 = arith.constant 0.000000e+00 : f32
    %33 = vector.broadcast %cst_15 : f32 to vector<2x8x32xf32>
    %34 = tpu.iota {dimensions = array<i32: 1>} : vector<1x8x1xi32>
    %35 = vector.extract_strided_slice %30 {offsets = [0, 0, 0], sizes = [2, 1, 128], strides = [1, 1, 1]} : vector<2x8x128xf32> to vector<2x1x128xf32>
    %36 = vector.shape_cast %35 : vector<2x1x128xf32> to vector<2x128xf32>
    %37 = arith.truncf %31 : vector<2x32xf32> to vector<2x32xbf16>
    %cst_16 = arith.constant dense<0.000000e+00> : vector<2x128xf32>
    %38 = tpu.matmul %37, %22, %cst_16 {dimension_numbers = #tpu.dot_dimension_numbers<[1], [0], [0], [1], [0, 0, 1, 1], [], []>} : vector<2x32xbf16>, vector<32x128xbf16>, vector<2x128xf32> -> vector<2x128xf32>
    %39 = arith.addf %36, %38 : vector<2x128xf32>
    %40 = vector.extract_strided_slice %39 {offsets = [0, 0], sizes = [2, 32], strides = [1, 1]} : vector<2x128xf32> to vector<2x32xf32>
    %41 = arith.negf %40 : vector<2x32xf32>
    %42 = math.exp %41 : vector<2x32xf32>
    %cst_17 = arith.constant 1.000000e+00 : f32
    %43 = vector.broadcast %cst_17 : f32 to vector<2x32xf32>
    %44 = arith.addf %43, %42 : vector<2x32xf32>
    %45 = arith.divf %43, %44 : vector<2x32xf32>
    %46 = vector.extract_strided_slice %39 {offsets = [0, 32], sizes = [2, 32], strides = [1, 1]} : vector<2x128xf32> to vector<2x32xf32>
    %47 = arith.negf %46 : vector<2x32xf32>
    %48 = math.exp %47 : vector<2x32xf32>
    %cst_18 = arith.constant 1.000000e+00 : f32
    %49 = vector.broadcast %cst_18 : f32 to vector<2x32xf32>
    %50 = arith.addf %49, %48 : vector<2x32xf32>
    %51 = arith.divf %49, %50 : vector<2x32xf32>
    %52 = vector.extract_strided_slice %39 {offsets = [0, 64], sizes = [2, 32], strides = [1, 1]} : vector<2x128xf32> to vector<2x32xf32>
    %53 = math.tanh %52 : vector<2x32xf32>
    %54 = vector.extract_strided_slice %39 {offsets = [0, 96], sizes = [2, 32], strides = [1, 1]} : vector<2x128xf32> to vector<2x32xf32>
    %55 = arith.negf %54 : vector<2x32xf32>
    %56 = math.exp %55 : vector<2x32xf32>
    %cst_19 = arith.constant 1.000000e+00 : f32
    %57 = vector.broadcast %cst_19 : f32 to vector<2x32xf32>
    %58 = arith.addf %57, %56 : vector<2x32xf32>
    %59 = arith.divf %57, %58 : vector<2x32xf32>
    %60 = arith.mulf %51, %32 : vector<2x32xf32>
    %61 = arith.mulf %45, %53 : vector<2x32xf32>
    %62 = arith.addf %60, %61 : vector<2x32xf32>
    %63 = math.tanh %62 : vector<2x32xf32>
    %64 = arith.mulf %59, %63 : vector<2x32xf32>
    %c0_i32 = arith.constant 0 : i32
    %65 = vector.broadcast %c0_i32 : i32 to vector<1x8x1xi32>
    %66 = arith.cmpi eq, %34, %65 : vector<1x8x1xi32>
    %67 = vector.shape_cast %64 : vector<2x32xf32> to vector<2x1x32xf32>
    %68 = vector.shape_cast %66 : vector<1x8x1xi1> to vector<1x8x1xi1>
    %69 = vector.broadcast %68 : vector<1x8x1xi1> to vector<2x8x32xi1>
    %70 = vector.shape_cast %67 : vector<2x1x32xf32> to vector<2x1x32xf32>
    %71 = vector.broadcast %70 : vector<2x1x32xf32> to vector<2x8x32xf32>
    %72 = arith.select %69, %71, %33 : vector<2x8x32xi1>, vector<2x8x32xf32>
    %73 = vector.extract_strided_slice %30 {offsets = [0, 1, 0], sizes = [2, 1, 128], strides = [1, 1, 1]} : vector<2x8x128xf32> to vector<2x1x128xf32>
    %74 = vector.shape_cast %73 : vector<2x1x128xf32> to vector<2x128xf32>
    %75 = arith.truncf %64 : vector<2x32xf32> to vector<2x32xbf16>
    %cst_20 = arith.constant dense<0.000000e+00> : vector<2x128xf32>
    %76 = tpu.matmul %75, %22, %cst_20 {dimension_numbers = #tpu.dot_dimension_numbers<[1], [0], [0], [1], [0, 0, 1, 1], [], []>} : vector<2x32xbf16>, vector<32x128xbf16>, vector<2x128xf32> -> vector<2x128xf32>
    %77 = arith.addf %74, %76 : vector<2x128xf32>
    %78 = vector.extract_strided_slice %77 {offsets = [0, 0], sizes = [2, 32], strides = [1, 1]} : vector<2x128xf32> to vector<2x32xf32>
    %79 = arith.negf %78 : vector<2x32xf32>
    %80 = math.exp %79 : vector<2x32xf32>
    %cst_21 = arith.constant 1.000000e+00 : f32
    %81 = vector.broadcast %cst_21 : f32 to vector<2x32xf32>
    %82 = arith.addf %81, %80 : vector<2x32xf32>
    %83 = arith.divf %81, %82 : vector<2x32xf32>
    %84 = vector.extract_strided_slice %77 {offsets = [0, 32], sizes = [2, 32], strides = [1, 1]} : vector<2x128xf32> to vector<2x32xf32>
    %85 = arith.negf %84 : vector<2x32xf32>
    %86 = math.exp %85 : vector<2x32xf32>
    %cst_22 = arith.constant 1.000000e+00 : f32
    %87 = vector.broadcast %cst_22 : f32 to vector<2x32xf32>
    %88 = arith.addf %87, %86 : vector<2x32xf32>
    %89 = arith.divf %87, %88 : vector<2x32xf32>
    %90 = vector.extract_strided_slice %77 {offsets = [0, 64], sizes = [2, 32], strides = [1, 1]} : vector<2x128xf32> to vector<2x32xf32>
    %91 = math.tanh %90 : vector<2x32xf32>
    %92 = vector.extract_strided_slice %77 {offsets = [0, 96], sizes = [2, 32], strides = [1, 1]} : vector<2x128xf32> to vector<2x32xf32>
    %93 = arith.negf %92 : vector<2x32xf32>
    %94 = math.exp %93 : vector<2x32xf32>
    %cst_23 = arith.constant 1.000000e+00 : f32
    %95 = vector.broadcast %cst_23 : f32 to vector<2x32xf32>
    %96 = arith.addf %95, %94 : vector<2x32xf32>
    %97 = arith.divf %95, %96 : vector<2x32xf32>
    %98 = arith.mulf %89, %62 : vector<2x32xf32>
    %99 = arith.mulf %83, %91 : vector<2x32xf32>
    %100 = arith.addf %98, %99 : vector<2x32xf32>
    %101 = math.tanh %100 : vector<2x32xf32>
    %102 = arith.mulf %97, %101 : vector<2x32xf32>
    %c1_i32 = arith.constant 1 : i32
    %103 = vector.broadcast %c1_i32 : i32 to vector<1x8x1xi32>
    %104 = arith.cmpi eq, %34, %103 : vector<1x8x1xi32>
    %105 = vector.shape_cast %102 : vector<2x32xf32> to vector<2x1x32xf32>
    %106 = vector.shape_cast %104 : vector<1x8x1xi1> to vector<1x8x1xi1>
    %107 = vector.broadcast %106 : vector<1x8x1xi1> to vector<2x8x32xi1>
    %108 = vector.shape_cast %105 : vector<2x1x32xf32> to vector<2x1x32xf32>
    %109 = vector.broadcast %108 : vector<2x1x32xf32> to vector<2x8x32xf32>
    %110 = arith.select %107, %109, %72 : vector<2x8x32xi1>, vector<2x8x32xf32>
    %111 = vector.extract_strided_slice %30 {offsets = [0, 2, 0], sizes = [2, 1, 128], strides = [1, 1, 1]} : vector<2x8x128xf32> to vector<2x1x128xf32>
    %112 = vector.shape_cast %111 : vector<2x1x128xf32> to vector<2x128xf32>
    %113 = arith.truncf %102 : vector<2x32xf32> to vector<2x32xbf16>
    %cst_24 = arith.constant dense<0.000000e+00> : vector<2x128xf32>
    %114 = tpu.matmul %113, %22, %cst_24 {dimension_numbers = #tpu.dot_dimension_numbers<[1], [0], [0], [1], [0, 0, 1, 1], [], []>} : vector<2x32xbf16>, vector<32x128xbf16>, vector<2x128xf32> -> vector<2x128xf32>
    %115 = arith.addf %112, %114 : vector<2x128xf32>
    %116 = vector.extract_strided_slice %115 {offsets = [0, 0], sizes = [2, 32], strides = [1, 1]} : vector<2x128xf32> to vector<2x32xf32>
    %117 = arith.negf %116 : vector<2x32xf32>
    %118 = math.exp %117 : vector<2x32xf32>
    %cst_25 = arith.constant 1.000000e+00 : f32
    %119 = vector.broadcast %cst_25 : f32 to vector<2x32xf32>
    %120 = arith.addf %119, %118 : vector<2x32xf32>
    %121 = arith.divf %119, %120 : vector<2x32xf32>
    %122 = vector.extract_strided_slice %115 {offsets = [0, 32], sizes = [2, 32], strides = [1, 1]} : vector<2x128xf32> to vector<2x32xf32>
    %123 = arith.negf %122 : vector<2x32xf32>
    %124 = math.exp %123 : vector<2x32xf32>
    %cst_26 = arith.constant 1.000000e+00 : f32
    %125 = vector.broadcast %cst_26 : f32 to vector<2x32xf32>
    %126 = arith.addf %125, %124 : vector<2x32xf32>
    %127 = arith.divf %125, %126 : vector<2x32xf32>
    %128 = vector.extract_strided_slice %115 {offsets = [0, 64], sizes = [2, 32], strides = [1, 1]} : vector<2x128xf32> to vector<2x32xf32>
    %129 = math.tanh %128 : vector<2x32xf32>
    %130 = vector.extract_strided_slice %115 {offsets = [0, 96], sizes = [2, 32], strides = [1, 1]} : vector<2x128xf32> to vector<2x32xf32>
    %131 = arith.negf %130 : vector<2x32xf32>
    %132 = math.exp %131 : vector<2x32xf32>
    %cst_27 = arith.constant 1.000000e+00 : f32
    %133 = vector.broadcast %cst_27 : f32 to vector<2x32xf32>
    %134 = arith.addf %133, %132 : vector<2x32xf32>
    %135 = arith.divf %133, %134 : vector<2x32xf32>
    %136 = arith.mulf %127, %100 : vector<2x32xf32>
    %137 = arith.mulf %121, %129 : vector<2x32xf32>
    %138 = arith.addf %136, %137 : vector<2x32xf32>
    %139 = math.tanh %138 : vector<2x32xf32>
    %140 = arith.mulf %135, %139 : vector<2x32xf32>
    %c2_i32 = arith.constant 2 : i32
    %141 = vector.broadcast %c2_i32 : i32 to vector<1x8x1xi32>
    %142 = arith.cmpi eq, %34, %141 : vector<1x8x1xi32>
    %143 = vector.shape_cast %140 : vector<2x32xf32> to vector<2x1x32xf32>
    %144 = vector.shape_cast %142 : vector<1x8x1xi1> to vector<1x8x1xi1>
    %145 = vector.broadcast %144 : vector<1x8x1xi1> to vector<2x8x32xi1>
    %146 = vector.shape_cast %143 : vector<2x1x32xf32> to vector<2x1x32xf32>
    %147 = vector.broadcast %146 : vector<2x1x32xf32> to vector<2x8x32xf32>
    %148 = arith.select %145, %147, %110 : vector<2x8x32xi1>, vector<2x8x32xf32>
    %149 = vector.extract_strided_slice %30 {offsets = [0, 3, 0], sizes = [2, 1, 128], strides = [1, 1, 1]} : vector<2x8x128xf32> to vector<2x1x128xf32>
    %150 = vector.shape_cast %149 : vector<2x1x128xf32> to vector<2x128xf32>
    %151 = arith.truncf %140 : vector<2x32xf32> to vector<2x32xbf16>
    %cst_28 = arith.constant dense<0.000000e+00> : vector<2x128xf32>
    %152 = tpu.matmul %151, %22, %cst_28 {dimension_numbers = #tpu.dot_dimension_numbers<[1], [0], [0], [1], [0, 0, 1, 1], [], []>} : vector<2x32xbf16>, vector<32x128xbf16>, vector<2x128xf32> -> vector<2x128xf32>
    %153 = arith.addf %150, %152 : vector<2x128xf32>
    %154 = vector.extract_strided_slice %153 {offsets = [0, 0], sizes = [2, 32], strides = [1, 1]} : vector<2x128xf32> to vector<2x32xf32>
    %155 = arith.negf %154 : vector<2x32xf32>
    %156 = math.exp %155 : vector<2x32xf32>
    %cst_29 = arith.constant 1.000000e+00 : f32
    %157 = vector.broadcast %cst_29 : f32 to vector<2x32xf32>
    %158 = arith.addf %157, %156 : vector<2x32xf32>
    %159 = arith.divf %157, %158 : vector<2x32xf32>
    %160 = vector.extract_strided_slice %153 {offsets = [0, 32], sizes = [2, 32], strides = [1, 1]} : vector<2x128xf32> to vector<2x32xf32>
    %161 = arith.negf %160 : vector<2x32xf32>
    %162 = math.exp %161 : vector<2x32xf32>
    %cst_30 = arith.constant 1.000000e+00 : f32
    %163 = vector.broadcast %cst_30 : f32 to vector<2x32xf32>
    %164 = arith.addf %163, %162 : vector<2x32xf32>
    %165 = arith.divf %163, %164 : vector<2x32xf32>
    %166 = vector.extract_strided_slice %153 {offsets = [0, 64], sizes = [2, 32], strides = [1, 1]} : vector<2x128xf32> to vector<2x32xf32>
    %167 = math.tanh %166 : vector<2x32xf32>
    %168 = vector.extract_strided_slice %153 {offsets = [0, 96], sizes = [2, 32], strides = [1, 1]} : vector<2x128xf32> to vector<2x32xf32>
    %169 = arith.negf %168 : vector<2x32xf32>
    %170 = math.exp %169 : vector<2x32xf32>
    %cst_31 = arith.constant 1.000000e+00 : f32
    %171 = vector.broadcast %cst_31 : f32 to vector<2x32xf32>
    %172 = arith.addf %171, %170 : vector<2x32xf32>
    %173 = arith.divf %171, %172 : vector<2x32xf32>
    %174 = arith.mulf %165, %138 : vector<2x32xf32>
    %175 = arith.mulf %159, %167 : vector<2x32xf32>
    %176 = arith.addf %174, %175 : vector<2x32xf32>
    %177 = math.tanh %176 : vector<2x32xf32>
    %178 = arith.mulf %173, %177 : vector<2x32xf32>
    %c3_i32 = arith.constant 3 : i32
    %179 = vector.broadcast %c3_i32 : i32 to vector<1x8x1xi32>
    %180 = arith.cmpi eq, %34, %179 : vector<1x8x1xi32>
    %181 = vector.shape_cast %178 : vector<2x32xf32> to vector<2x1x32xf32>
    %182 = vector.shape_cast %180 : vector<1x8x1xi1> to vector<1x8x1xi1>
    %183 = vector.broadcast %182 : vector<1x8x1xi1> to vector<2x8x32xi1>
    %184 = vector.shape_cast %181 : vector<2x1x32xf32> to vector<2x1x32xf32>
    %185 = vector.broadcast %184 : vector<2x1x32xf32> to vector<2x8x32xf32>
    %186 = arith.select %183, %185, %148 : vector<2x8x32xi1>, vector<2x8x32xf32>
    %187 = vector.extract_strided_slice %30 {offsets = [0, 4, 0], sizes = [2, 1, 128], strides = [1, 1, 1]} : vector<2x8x128xf32> to vector<2x1x128xf32>
    %188 = vector.shape_cast %187 : vector<2x1x128xf32> to vector<2x128xf32>
    %189 = arith.truncf %178 : vector<2x32xf32> to vector<2x32xbf16>
    %cst_32 = arith.constant dense<0.000000e+00> : vector<2x128xf32>
    %190 = tpu.matmul %189, %22, %cst_32 {dimension_numbers = #tpu.dot_dimension_numbers<[1], [0], [0], [1], [0, 0, 1, 1], [], []>} : vector<2x32xbf16>, vector<32x128xbf16>, vector<2x128xf32> -> vector<2x128xf32>
    %191 = arith.addf %188, %190 : vector<2x128xf32>
    %192 = vector.extract_strided_slice %191 {offsets = [0, 0], sizes = [2, 32], strides = [1, 1]} : vector<2x128xf32> to vector<2x32xf32>
    %193 = arith.negf %192 : vector<2x32xf32>
    %194 = math.exp %193 : vector<2x32xf32>
    %cst_33 = arith.constant 1.000000e+00 : f32
    %195 = vector.broadcast %cst_33 : f32 to vector<2x32xf32>
    %196 = arith.addf %195, %194 : vector<2x32xf32>
    %197 = arith.divf %195, %196 : vector<2x32xf32>
    %198 = vector.extract_strided_slice %191 {offsets = [0, 32], sizes = [2, 32], strides = [1, 1]} : vector<2x128xf32> to vector<2x32xf32>
    %199 = arith.negf %198 : vector<2x32xf32>
    %200 = math.exp %199 : vector<2x32xf32>
    %cst_34 = arith.constant 1.000000e+00 : f32
    %201 = vector.broadcast %cst_34 : f32 to vector<2x32xf32>
    %202 = arith.addf %201, %200 : vector<2x32xf32>
    %203 = arith.divf %201, %202 : vector<2x32xf32>
    %204 = vector.extract_strided_slice %191 {offsets = [0, 64], sizes = [2, 32], strides = [1, 1]} : vector<2x128xf32> to vector<2x32xf32>
    %205 = math.tanh %204 : vector<2x32xf32>
    %206 = vector.extract_strided_slice %191 {offsets = [0, 96], sizes = [2, 32], strides = [1, 1]} : vector<2x128xf32> to vector<2x32xf32>
    %207 = arith.negf %206 : vector<2x32xf32>
    %208 = math.exp %207 : vector<2x32xf32>
    %cst_35 = arith.constant 1.000000e+00 : f32
    %209 = vector.broadcast %cst_35 : f32 to vector<2x32xf32>
    %210 = arith.addf %209, %208 : vector<2x32xf32>
    %211 = arith.divf %209, %210 : vector<2x32xf32>
    %212 = arith.mulf %203, %176 : vector<2x32xf32>
    %213 = arith.mulf %197, %205 : vector<2x32xf32>
    %214 = arith.addf %212, %213 : vector<2x32xf32>
    %215 = math.tanh %214 : vector<2x32xf32>
    %216 = arith.mulf %211, %215 : vector<2x32xf32>
    %c4_i32 = arith.constant 4 : i32
    %217 = vector.broadcast %c4_i32 : i32 to vector<1x8x1xi32>
    %218 = arith.cmpi eq, %34, %217 : vector<1x8x1xi32>
    %219 = vector.shape_cast %216 : vector<2x32xf32> to vector<2x1x32xf32>
    %220 = vector.shape_cast %218 : vector<1x8x1xi1> to vector<1x8x1xi1>
    %221 = vector.broadcast %220 : vector<1x8x1xi1> to vector<2x8x32xi1>
    %222 = vector.shape_cast %219 : vector<2x1x32xf32> to vector<2x1x32xf32>
    %223 = vector.broadcast %222 : vector<2x1x32xf32> to vector<2x8x32xf32>
    %224 = arith.select %221, %223, %186 : vector<2x8x32xi1>, vector<2x8x32xf32>
    %225 = vector.extract_strided_slice %30 {offsets = [0, 5, 0], sizes = [2, 1, 128], strides = [1, 1, 1]} : vector<2x8x128xf32> to vector<2x1x128xf32>
    %226 = vector.shape_cast %225 : vector<2x1x128xf32> to vector<2x128xf32>
    %227 = arith.truncf %216 : vector<2x32xf32> to vector<2x32xbf16>
    %cst_36 = arith.constant dense<0.000000e+00> : vector<2x128xf32>
    %228 = tpu.matmul %227, %22, %cst_36 {dimension_numbers = #tpu.dot_dimension_numbers<[1], [0], [0], [1], [0, 0, 1, 1], [], []>} : vector<2x32xbf16>, vector<32x128xbf16>, vector<2x128xf32> -> vector<2x128xf32>
    %229 = arith.addf %226, %228 : vector<2x128xf32>
    %230 = vector.extract_strided_slice %229 {offsets = [0, 0], sizes = [2, 32], strides = [1, 1]} : vector<2x128xf32> to vector<2x32xf32>
    %231 = arith.negf %230 : vector<2x32xf32>
    %232 = math.exp %231 : vector<2x32xf32>
    %cst_37 = arith.constant 1.000000e+00 : f32
    %233 = vector.broadcast %cst_37 : f32 to vector<2x32xf32>
    %234 = arith.addf %233, %232 : vector<2x32xf32>
    %235 = arith.divf %233, %234 : vector<2x32xf32>
    %236 = vector.extract_strided_slice %229 {offsets = [0, 32], sizes = [2, 32], strides = [1, 1]} : vector<2x128xf32> to vector<2x32xf32>
    %237 = arith.negf %236 : vector<2x32xf32>
    %238 = math.exp %237 : vector<2x32xf32>
    %cst_38 = arith.constant 1.000000e+00 : f32
    %239 = vector.broadcast %cst_38 : f32 to vector<2x32xf32>
    %240 = arith.addf %239, %238 : vector<2x32xf32>
    %241 = arith.divf %239, %240 : vector<2x32xf32>
    %242 = vector.extract_strided_slice %229 {offsets = [0, 64], sizes = [2, 32], strides = [1, 1]} : vector<2x128xf32> to vector<2x32xf32>
    %243 = math.tanh %242 : vector<2x32xf32>
    %244 = vector.extract_strided_slice %229 {offsets = [0, 96], sizes = [2, 32], strides = [1, 1]} : vector<2x128xf32> to vector<2x32xf32>
    %245 = arith.negf %244 : vector<2x32xf32>
    %246 = math.exp %245 : vector<2x32xf32>
    %cst_39 = arith.constant 1.000000e+00 : f32
    %247 = vector.broadcast %cst_39 : f32 to vector<2x32xf32>
    %248 = arith.addf %247, %246 : vector<2x32xf32>
    %249 = arith.divf %247, %248 : vector<2x32xf32>
    %250 = arith.mulf %241, %214 : vector<2x32xf32>
    %251 = arith.mulf %235, %243 : vector<2x32xf32>
    %252 = arith.addf %250, %251 : vector<2x32xf32>
    %253 = math.tanh %252 : vector<2x32xf32>
    %254 = arith.mulf %249, %253 : vector<2x32xf32>
    %c5_i32 = arith.constant 5 : i32
    %255 = vector.broadcast %c5_i32 : i32 to vector<1x8x1xi32>
    %256 = arith.cmpi eq, %34, %255 : vector<1x8x1xi32>
    %257 = vector.shape_cast %254 : vector<2x32xf32> to vector<2x1x32xf32>
    %258 = vector.shape_cast %256 : vector<1x8x1xi1> to vector<1x8x1xi1>
    %259 = vector.broadcast %258 : vector<1x8x1xi1> to vector<2x8x32xi1>
    %260 = vector.shape_cast %257 : vector<2x1x32xf32> to vector<2x1x32xf32>
    %261 = vector.broadcast %260 : vector<2x1x32xf32> to vector<2x8x32xf32>
    %262 = arith.select %259, %261, %224 : vector<2x8x32xi1>, vector<2x8x32xf32>
    %263 = vector.extract_strided_slice %30 {offsets = [0, 6, 0], sizes = [2, 1, 128], strides = [1, 1, 1]} : vector<2x8x128xf32> to vector<2x1x128xf32>
    %264 = vector.shape_cast %263 : vector<2x1x128xf32> to vector<2x128xf32>
    %265 = arith.truncf %254 : vector<2x32xf32> to vector<2x32xbf16>
    %cst_40 = arith.constant dense<0.000000e+00> : vector<2x128xf32>
    %266 = tpu.matmul %265, %22, %cst_40 {dimension_numbers = #tpu.dot_dimension_numbers<[1], [0], [0], [1], [0, 0, 1, 1], [], []>} : vector<2x32xbf16>, vector<32x128xbf16>, vector<2x128xf32> -> vector<2x128xf32>
    %267 = arith.addf %264, %266 : vector<2x128xf32>
    %268 = vector.extract_strided_slice %267 {offsets = [0, 0], sizes = [2, 32], strides = [1, 1]} : vector<2x128xf32> to vector<2x32xf32>
    %269 = arith.negf %268 : vector<2x32xf32>
    %270 = math.exp %269 : vector<2x32xf32>
    %cst_41 = arith.constant 1.000000e+00 : f32
    %271 = vector.broadcast %cst_41 : f32 to vector<2x32xf32>
    %272 = arith.addf %271, %270 : vector<2x32xf32>
    %273 = arith.divf %271, %272 : vector<2x32xf32>
    %274 = vector.extract_strided_slice %267 {offsets = [0, 32], sizes = [2, 32], strides = [1, 1]} : vector<2x128xf32> to vector<2x32xf32>
    %275 = arith.negf %274 : vector<2x32xf32>
    %276 = math.exp %275 : vector<2x32xf32>
    %cst_42 = arith.constant 1.000000e+00 : f32
    %277 = vector.broadcast %cst_42 : f32 to vector<2x32xf32>
    %278 = arith.addf %277, %276 : vector<2x32xf32>
    %279 = arith.divf %277, %278 : vector<2x32xf32>
    %280 = vector.extract_strided_slice %267 {offsets = [0, 64], sizes = [2, 32], strides = [1, 1]} : vector<2x128xf32> to vector<2x32xf32>
    %281 = math.tanh %280 : vector<2x32xf32>
    %282 = vector.extract_strided_slice %267 {offsets = [0, 96], sizes = [2, 32], strides = [1, 1]} : vector<2x128xf32> to vector<2x32xf32>
    %283 = arith.negf %282 : vector<2x32xf32>
    %284 = math.exp %283 : vector<2x32xf32>
    %cst_43 = arith.constant 1.000000e+00 : f32
    %285 = vector.broadcast %cst_43 : f32 to vector<2x32xf32>
    %286 = arith.addf %285, %284 : vector<2x32xf32>
    %287 = arith.divf %285, %286 : vector<2x32xf32>
    %288 = arith.mulf %279, %252 : vector<2x32xf32>
    %289 = arith.mulf %273, %281 : vector<2x32xf32>
    %290 = arith.addf %288, %289 : vector<2x32xf32>
    %291 = math.tanh %290 : vector<2x32xf32>
    %292 = arith.mulf %287, %291 : vector<2x32xf32>
    %c6_i32 = arith.constant 6 : i32
    %293 = vector.broadcast %c6_i32 : i32 to vector<1x8x1xi32>
    %294 = arith.cmpi eq, %34, %293 : vector<1x8x1xi32>
    %295 = vector.shape_cast %292 : vector<2x32xf32> to vector<2x1x32xf32>
    %296 = vector.shape_cast %294 : vector<1x8x1xi1> to vector<1x8x1xi1>
    %297 = vector.broadcast %296 : vector<1x8x1xi1> to vector<2x8x32xi1>
    %298 = vector.shape_cast %295 : vector<2x1x32xf32> to vector<2x1x32xf32>
    %299 = vector.broadcast %298 : vector<2x1x32xf32> to vector<2x8x32xf32>
    %300 = arith.select %297, %299, %262 : vector<2x8x32xi1>, vector<2x8x32xf32>
    %301 = vector.extract_strided_slice %30 {offsets = [0, 7, 0], sizes = [2, 1, 128], strides = [1, 1, 1]} : vector<2x8x128xf32> to vector<2x1x128xf32>
    %302 = vector.shape_cast %301 : vector<2x1x128xf32> to vector<2x128xf32>
    %303 = arith.truncf %292 : vector<2x32xf32> to vector<2x32xbf16>
    %cst_44 = arith.constant dense<0.000000e+00> : vector<2x128xf32>
    %304 = tpu.matmul %303, %22, %cst_44 {dimension_numbers = #tpu.dot_dimension_numbers<[1], [0], [0], [1], [0, 0, 1, 1], [], []>} : vector<2x32xbf16>, vector<32x128xbf16>, vector<2x128xf32> -> vector<2x128xf32>
    %305 = arith.addf %302, %304 : vector<2x128xf32>
    %306 = vector.extract_strided_slice %305 {offsets = [0, 0], sizes = [2, 32], strides = [1, 1]} : vector<2x128xf32> to vector<2x32xf32>
    %307 = arith.negf %306 : vector<2x32xf32>
    %308 = math.exp %307 : vector<2x32xf32>
    %cst_45 = arith.constant 1.000000e+00 : f32
    %309 = vector.broadcast %cst_45 : f32 to vector<2x32xf32>
    %310 = arith.addf %309, %308 : vector<2x32xf32>
    %311 = arith.divf %309, %310 : vector<2x32xf32>
    %312 = vector.extract_strided_slice %305 {offsets = [0, 32], sizes = [2, 32], strides = [1, 1]} : vector<2x128xf32> to vector<2x32xf32>
    %313 = arith.negf %312 : vector<2x32xf32>
    %314 = math.exp %313 : vector<2x32xf32>
    %cst_46 = arith.constant 1.000000e+00 : f32
    %315 = vector.broadcast %cst_46 : f32 to vector<2x32xf32>
    %316 = arith.addf %315, %314 : vector<2x32xf32>
    %317 = arith.divf %315, %316 : vector<2x32xf32>
    %318 = vector.extract_strided_slice %305 {offsets = [0, 64], sizes = [2, 32], strides = [1, 1]} : vector<2x128xf32> to vector<2x32xf32>
    %319 = math.tanh %318 : vector<2x32xf32>
    %320 = vector.extract_strided_slice %305 {offsets = [0, 96], sizes = [2, 32], strides = [1, 1]} : vector<2x128xf32> to vector<2x32xf32>
    %321 = arith.negf %320 : vector<2x32xf32>
    %322 = math.exp %321 : vector<2x32xf32>
    %cst_47 = arith.constant 1.000000e+00 : f32
    %323 = vector.broadcast %cst_47 : f32 to vector<2x32xf32>
    %324 = arith.addf %323, %322 : vector<2x32xf32>
    %325 = arith.divf %323, %324 : vector<2x32xf32>
    %326 = arith.mulf %317, %290 : vector<2x32xf32>
    %327 = arith.mulf %311, %319 : vector<2x32xf32>
    %328 = arith.addf %326, %327 : vector<2x32xf32>
    %329 = math.tanh %328 : vector<2x32xf32>
    %330 = arith.mulf %325, %329 : vector<2x32xf32>
    %c7_i32 = arith.constant 7 : i32
    %331 = vector.broadcast %c7_i32 : i32 to vector<1x8x1xi32>
    %332 = arith.cmpi eq, %34, %331 : vector<1x8x1xi32>
    %333 = vector.shape_cast %330 : vector<2x32xf32> to vector<2x1x32xf32>
    %334 = vector.shape_cast %332 : vector<1x8x1xi1> to vector<1x8x1xi1>
    %335 = vector.broadcast %334 : vector<1x8x1xi1> to vector<2x8x32xi1>
    %336 = vector.shape_cast %333 : vector<2x1x32xf32> to vector<2x1x32xf32>
    %337 = vector.broadcast %336 : vector<2x1x32xf32> to vector<2x8x32xf32>
    %338 = arith.select %335, %337, %300 : vector<2x8x32xi1>, vector<2x8x32xf32>
    %c0_48 = arith.constant 0 : index
    %c0_49 = arith.constant 0 : index
    %c0_50 = arith.constant 0 : index
    %339 = vector.load %arg5[%c0_48, %c0_49, %c0_50] : memref<3x32x32xbf16, #tpu.memory_space<vmem>>, vector<1x32x32xbf16>
    %340 = vector.shape_cast %339 : vector<1x32x32xbf16> to vector<32x32xbf16>
    %341 = vector.extract_strided_slice %0 {offsets = [5, 0], sizes = [1, 32], strides = [1, 1]} : vector<18x128xf32> to vector<1x32xf32>
    %342 = vector.extract_strided_slice %0 {offsets = [8, 0], sizes = [1, 32], strides = [1, 1]} : vector<18x128xf32> to vector<1x32xf32>
    %343 = vector.shape_cast %338 : vector<2x8x32xf32> to vector<16x32xf32>
    %344 = arith.truncf %343 : vector<16x32xf32> to vector<16x32xbf16>
    %cst_51 = arith.constant dense<0.000000e+00> : vector<16x32xf32>
    %345 = tpu.matmul %344, %340, %cst_51 {dimension_numbers = #tpu.dot_dimension_numbers<[1], [0], [0], [1], [0, 0, 1, 1], [], []>} : vector<16x32xbf16>, vector<32x32xbf16>, vector<16x32xf32> -> vector<16x32xf32>
    %346 = vector.broadcast %341 : vector<1x32xf32> to vector<16x32xf32>
    %347 = arith.addf %345, %346 : vector<16x32xf32>
    %348 = math.tanh %347 : vector<16x32xf32>
    %349 = vector.shape_cast %348 : vector<16x32xf32> to vector<2x8x32xf32>
    %350 = vector.shape_cast %342 : vector<1x32xf32> to vector<1x1x32xf32>
    %351 = vector.broadcast %350 : vector<1x1x32xf32> to vector<2x8x32xf32>
    %352 = arith.mulf %349, %351 : vector<2x8x32xf32>
    %cst_52 = arith.constant dense<0.000000e+00> : vector<2x8xf32>
    %353 = vector.multi_reduction <add>, %352, %cst_52 [2] : vector<2x8x32xf32> to vector<2x8xf32>
    %cst_53 = arith.constant dense<0xFF800000> : vector<2xf32>
    %354 = vector.multi_reduction <maximumf>, %353, %cst_53 [1] : vector<2x8xf32> to vector<2xf32>
    %355 = vector.shape_cast %354 : vector<2xf32> to vector<2x1xf32>
    %356 = vector.broadcast %355 : vector<2x1xf32> to vector<2x8xf32>
    %357 = arith.subf %353, %356 : vector<2x8xf32>
    %358 = math.exp %357 : vector<2x8xf32>
    %cst_54 = arith.constant dense<0.000000e+00> : vector<2xf32>
    %359 = vector.multi_reduction <add>, %358, %cst_54 [1] : vector<2x8xf32> to vector<2xf32>
    %360 = vector.shape_cast %359 : vector<2xf32> to vector<2x1xf32>
    %361 = tpu.reciprocal %360 {approx = true} : vector<2x1xf32> -> vector<2x1xf32>
    %362 = vector.broadcast %361 : vector<2x1xf32> to vector<2x8xf32>
    %363 = arith.mulf %358, %362 : vector<2x8xf32>
    %364 = vector.shape_cast %363 : vector<2x8xf32> to vector<2x8x1xf32>
    %365 = vector.broadcast %364 : vector<2x8x1xf32> to vector<2x8x32xf32>
    %366 = arith.mulf %365, %338 : vector<2x8x32xf32>
    %cst_55 = arith.constant dense<0.000000e+00> : vector<2x32xf32>
    %367 = vector.multi_reduction <add>, %366, %cst_55 [1] : vector<2x8x32xf32> to vector<2x32xf32>
    %c0_i32_56 = arith.constant 0 : i32
    %368 = vector.broadcast %c0_i32_56 : i32 to vector<1x3x1xi32>
    %369 = arith.cmpi eq, %16, %368 : vector<1x3x1xi32>
    %370 = vector.shape_cast %367 : vector<2x32xf32> to vector<2x1x32xf32>
    %371 = vector.shape_cast %369 : vector<1x3x1xi1> to vector<1x3x1xi1>
    %372 = vector.broadcast %371 : vector<1x3x1xi1> to vector<2x3x32xi1>
    %373 = vector.shape_cast %370 : vector<2x1x32xf32> to vector<2x1x32xf32>
    %374 = vector.broadcast %373 : vector<2x1x32xf32> to vector<2x3x32xf32>
    %375 = arith.select %372, %374, %15 : vector<2x3x32xi1>, vector<2x3x32xf32>
    %c1 = arith.constant 1 : index
    %c0_57 = arith.constant 0 : index
    %c0_58 = arith.constant 0 : index
    %376 = vector.load %arg4[%c1, %c0_57, %c0_58] : memref<3x48x128xbf16, #tpu.memory_space<vmem>>, vector<1x48x128xbf16>
    %377 = vector.shape_cast %376 : vector<1x48x128xbf16> to vector<48x128xbf16>
    %378 = vector.extract_strided_slice %14 {offsets = [0, 1, 0, 0], sizes = [2, 1, 8, 16], strides = [1, 1, 1, 1]} : vector<2x3x8x16xf32> to vector<2x1x8x16xf32>
    %379 = vector.shape_cast %378 : vector<2x1x8x16xf32> to vector<2x8x16xf32>
    %380 = vector.extract_strided_slice %377 {offsets = [0, 0], sizes = [16, 128], strides = [1, 1]} : vector<48x128xbf16> to vector<16x128xbf16>
    %381 = vector.extract_strided_slice %377 {offsets = [16, 0], sizes = [32, 128], strides = [1, 1]} : vector<48x128xbf16> to vector<32x128xbf16>
    %382 = vector.extract_strided_slice %0 {offsets = [1, 0], sizes = [1, 128], strides = [1, 1]} : vector<18x128xf32> to vector<1x128xf32>
    %383 = vector.shape_cast %379 : vector<2x8x16xf32> to vector<16x16xf32>
    %384 = arith.truncf %383 : vector<16x16xf32> to vector<16x16xbf16>
    %cst_59 = arith.constant dense<0.000000e+00> : vector<16x128xf32>
    %385 = tpu.matmul %384, %380, %cst_59 {dimension_numbers = #tpu.dot_dimension_numbers<[1], [0], [0], [1], [0, 0, 1, 1], [], []>} : vector<16x16xbf16>, vector<16x128xbf16>, vector<16x128xf32> -> vector<16x128xf32>
    %386 = vector.shape_cast %385 : vector<16x128xf32> to vector<2x8x128xf32>
    %387 = vector.shape_cast %382 : vector<1x128xf32> to vector<1x1x128xf32>
    %388 = vector.broadcast %387 : vector<1x1x128xf32> to vector<2x8x128xf32>
    %389 = arith.addf %386, %388 : vector<2x8x128xf32>
    %cst_60 = arith.constant 0.000000e+00 : f32
    %390 = vector.broadcast %cst_60 : f32 to vector<2x32xf32>
    %cst_61 = arith.constant 0.000000e+00 : f32
    %391 = vector.broadcast %cst_61 : f32 to vector<2x32xf32>
    %cst_62 = arith.constant 0.000000e+00 : f32
    %392 = vector.broadcast %cst_62 : f32 to vector<2x8x32xf32>
    %393 = tpu.iota {dimensions = array<i32: 1>} : vector<1x8x1xi32>
    %394 = vector.extract_strided_slice %389 {offsets = [0, 0, 0], sizes = [2, 1, 128], strides = [1, 1, 1]} : vector<2x8x128xf32> to vector<2x1x128xf32>
    %395 = vector.shape_cast %394 : vector<2x1x128xf32> to vector<2x128xf32>
    %396 = arith.truncf %390 : vector<2x32xf32> to vector<2x32xbf16>
    %cst_63 = arith.constant dense<0.000000e+00> : vector<2x128xf32>
    %397 = tpu.matmul %396, %381, %cst_63 {dimension_numbers = #tpu.dot_dimension_numbers<[1], [0], [0], [1], [0, 0, 1, 1], [], []>} : vector<2x32xbf16>, vector<32x128xbf16>, vector<2x128xf32> -> vector<2x128xf32>
    %398 = arith.addf %395, %397 : vector<2x128xf32>
    %399 = vector.extract_strided_slice %398 {offsets = [0, 0], sizes = [2, 32], strides = [1, 1]} : vector<2x128xf32> to vector<2x32xf32>
    %400 = arith.negf %399 : vector<2x32xf32>
    %401 = math.exp %400 : vector<2x32xf32>
    %cst_64 = arith.constant 1.000000e+00 : f32
    %402 = vector.broadcast %cst_64 : f32 to vector<2x32xf32>
    %403 = arith.addf %402, %401 : vector<2x32xf32>
    %404 = arith.divf %402, %403 : vector<2x32xf32>
    %405 = vector.extract_strided_slice %398 {offsets = [0, 32], sizes = [2, 32], strides = [1, 1]} : vector<2x128xf32> to vector<2x32xf32>
    %406 = arith.negf %405 : vector<2x32xf32>
    %407 = math.exp %406 : vector<2x32xf32>
    %cst_65 = arith.constant 1.000000e+00 : f32
    %408 = vector.broadcast %cst_65 : f32 to vector<2x32xf32>
    %409 = arith.addf %408, %407 : vector<2x32xf32>
    %410 = arith.divf %408, %409 : vector<2x32xf32>
    %411 = vector.extract_strided_slice %398 {offsets = [0, 64], sizes = [2, 32], strides = [1, 1]} : vector<2x128xf32> to vector<2x32xf32>
    %412 = math.tanh %411 : vector<2x32xf32>
    %413 = vector.extract_strided_slice %398 {offsets = [0, 96], sizes = [2, 32], strides = [1, 1]} : vector<2x128xf32> to vector<2x32xf32>
    %414 = arith.negf %413 : vector<2x32xf32>
    %415 = math.exp %414 : vector<2x32xf32>
    %cst_66 = arith.constant 1.000000e+00 : f32
    %416 = vector.broadcast %cst_66 : f32 to vector<2x32xf32>
    %417 = arith.addf %416, %415 : vector<2x32xf32>
    %418 = arith.divf %416, %417 : vector<2x32xf32>
    %419 = arith.mulf %410, %391 : vector<2x32xf32>
    %420 = arith.mulf %404, %412 : vector<2x32xf32>
    %421 = arith.addf %419, %420 : vector<2x32xf32>
    %422 = math.tanh %421 : vector<2x32xf32>
    %423 = arith.mulf %418, %422 : vector<2x32xf32>
    %c0_i32_67 = arith.constant 0 : i32
    %424 = vector.broadcast %c0_i32_67 : i32 to vector<1x8x1xi32>
    %425 = arith.cmpi eq, %393, %424 : vector<1x8x1xi32>
    %426 = vector.shape_cast %423 : vector<2x32xf32> to vector<2x1x32xf32>
    %427 = vector.shape_cast %425 : vector<1x8x1xi1> to vector<1x8x1xi1>
    %428 = vector.broadcast %427 : vector<1x8x1xi1> to vector<2x8x32xi1>
    %429 = vector.shape_cast %426 : vector<2x1x32xf32> to vector<2x1x32xf32>
    %430 = vector.broadcast %429 : vector<2x1x32xf32> to vector<2x8x32xf32>
    %431 = arith.select %428, %430, %392 : vector<2x8x32xi1>, vector<2x8x32xf32>
    %432 = vector.extract_strided_slice %389 {offsets = [0, 1, 0], sizes = [2, 1, 128], strides = [1, 1, 1]} : vector<2x8x128xf32> to vector<2x1x128xf32>
    %433 = vector.shape_cast %432 : vector<2x1x128xf32> to vector<2x128xf32>
    %434 = arith.truncf %423 : vector<2x32xf32> to vector<2x32xbf16>
    %cst_68 = arith.constant dense<0.000000e+00> : vector<2x128xf32>
    %435 = tpu.matmul %434, %381, %cst_68 {dimension_numbers = #tpu.dot_dimension_numbers<[1], [0], [0], [1], [0, 0, 1, 1], [], []>} : vector<2x32xbf16>, vector<32x128xbf16>, vector<2x128xf32> -> vector<2x128xf32>
    %436 = arith.addf %433, %435 : vector<2x128xf32>
    %437 = vector.extract_strided_slice %436 {offsets = [0, 0], sizes = [2, 32], strides = [1, 1]} : vector<2x128xf32> to vector<2x32xf32>
    %438 = arith.negf %437 : vector<2x32xf32>
    %439 = math.exp %438 : vector<2x32xf32>
    %cst_69 = arith.constant 1.000000e+00 : f32
    %440 = vector.broadcast %cst_69 : f32 to vector<2x32xf32>
    %441 = arith.addf %440, %439 : vector<2x32xf32>
    %442 = arith.divf %440, %441 : vector<2x32xf32>
    %443 = vector.extract_strided_slice %436 {offsets = [0, 32], sizes = [2, 32], strides = [1, 1]} : vector<2x128xf32> to vector<2x32xf32>
    %444 = arith.negf %443 : vector<2x32xf32>
    %445 = math.exp %444 : vector<2x32xf32>
    %cst_70 = arith.constant 1.000000e+00 : f32
    %446 = vector.broadcast %cst_70 : f32 to vector<2x32xf32>
    %447 = arith.addf %446, %445 : vector<2x32xf32>
    %448 = arith.divf %446, %447 : vector<2x32xf32>
    %449 = vector.extract_strided_slice %436 {offsets = [0, 64], sizes = [2, 32], strides = [1, 1]} : vector<2x128xf32> to vector<2x32xf32>
    %450 = math.tanh %449 : vector<2x32xf32>
    %451 = vector.extract_strided_slice %436 {offsets = [0, 96], sizes = [2, 32], strides = [1, 1]} : vector<2x128xf32> to vector<2x32xf32>
    %452 = arith.negf %451 : vector<2x32xf32>
    %453 = math.exp %452 : vector<2x32xf32>
    %cst_71 = arith.constant 1.000000e+00 : f32
    %454 = vector.broadcast %cst_71 : f32 to vector<2x32xf32>
    %455 = arith.addf %454, %453 : vector<2x32xf32>
    %456 = arith.divf %454, %455 : vector<2x32xf32>
    %457 = arith.mulf %448, %421 : vector<2x32xf32>
    %458 = arith.mulf %442, %450 : vector<2x32xf32>
    %459 = arith.addf %457, %458 : vector<2x32xf32>
    %460 = math.tanh %459 : vector<2x32xf32>
    %461 = arith.mulf %456, %460 : vector<2x32xf32>
    %c1_i32_72 = arith.constant 1 : i32
    %462 = vector.broadcast %c1_i32_72 : i32 to vector<1x8x1xi32>
    %463 = arith.cmpi eq, %393, %462 : vector<1x8x1xi32>
    %464 = vector.shape_cast %461 : vector<2x32xf32> to vector<2x1x32xf32>
    %465 = vector.shape_cast %463 : vector<1x8x1xi1> to vector<1x8x1xi1>
    %466 = vector.broadcast %465 : vector<1x8x1xi1> to vector<2x8x32xi1>
    %467 = vector.shape_cast %464 : vector<2x1x32xf32> to vector<2x1x32xf32>
    %468 = vector.broadcast %467 : vector<2x1x32xf32> to vector<2x8x32xf32>
    %469 = arith.select %466, %468, %431 : vector<2x8x32xi1>, vector<2x8x32xf32>
    %470 = vector.extract_strided_slice %389 {offsets = [0, 2, 0], sizes = [2, 1, 128], strides = [1, 1, 1]} : vector<2x8x128xf32> to vector<2x1x128xf32>
    %471 = vector.shape_cast %470 : vector<2x1x128xf32> to vector<2x128xf32>
    %472 = arith.truncf %461 : vector<2x32xf32> to vector<2x32xbf16>
    %cst_73 = arith.constant dense<0.000000e+00> : vector<2x128xf32>
    %473 = tpu.matmul %472, %381, %cst_73 {dimension_numbers = #tpu.dot_dimension_numbers<[1], [0], [0], [1], [0, 0, 1, 1], [], []>} : vector<2x32xbf16>, vector<32x128xbf16>, vector<2x128xf32> -> vector<2x128xf32>
    %474 = arith.addf %471, %473 : vector<2x128xf32>
    %475 = vector.extract_strided_slice %474 {offsets = [0, 0], sizes = [2, 32], strides = [1, 1]} : vector<2x128xf32> to vector<2x32xf32>
    %476 = arith.negf %475 : vector<2x32xf32>
    %477 = math.exp %476 : vector<2x32xf32>
    %cst_74 = arith.constant 1.000000e+00 : f32
    %478 = vector.broadcast %cst_74 : f32 to vector<2x32xf32>
    %479 = arith.addf %478, %477 : vector<2x32xf32>
    %480 = arith.divf %478, %479 : vector<2x32xf32>
    %481 = vector.extract_strided_slice %474 {offsets = [0, 32], sizes = [2, 32], strides = [1, 1]} : vector<2x128xf32> to vector<2x32xf32>
    %482 = arith.negf %481 : vector<2x32xf32>
    %483 = math.exp %482 : vector<2x32xf32>
    %cst_75 = arith.constant 1.000000e+00 : f32
    %484 = vector.broadcast %cst_75 : f32 to vector<2x32xf32>
    %485 = arith.addf %484, %483 : vector<2x32xf32>
    %486 = arith.divf %484, %485 : vector<2x32xf32>
    %487 = vector.extract_strided_slice %474 {offsets = [0, 64], sizes = [2, 32], strides = [1, 1]} : vector<2x128xf32> to vector<2x32xf32>
    %488 = math.tanh %487 : vector<2x32xf32>
    %489 = vector.extract_strided_slice %474 {offsets = [0, 96], sizes = [2, 32], strides = [1, 1]} : vector<2x128xf32> to vector<2x32xf32>
    %490 = arith.negf %489 : vector<2x32xf32>
    %491 = math.exp %490 : vector<2x32xf32>
    %cst_76 = arith.constant 1.000000e+00 : f32
    %492 = vector.broadcast %cst_76 : f32 to vector<2x32xf32>
    %493 = arith.addf %492, %491 : vector<2x32xf32>
    %494 = arith.divf %492, %493 : vector<2x32xf32>
    %495 = arith.mulf %486, %459 : vector<2x32xf32>
    %496 = arith.mulf %480, %488 : vector<2x32xf32>
    %497 = arith.addf %495, %496 : vector<2x32xf32>
    %498 = math.tanh %497 : vector<2x32xf32>
    %499 = arith.mulf %494, %498 : vector<2x32xf32>
    %c2_i32_77 = arith.constant 2 : i32
    %500 = vector.broadcast %c2_i32_77 : i32 to vector<1x8x1xi32>
    %501 = arith.cmpi eq, %393, %500 : vector<1x8x1xi32>
    %502 = vector.shape_cast %499 : vector<2x32xf32> to vector<2x1x32xf32>
    %503 = vector.shape_cast %501 : vector<1x8x1xi1> to vector<1x8x1xi1>
    %504 = vector.broadcast %503 : vector<1x8x1xi1> to vector<2x8x32xi1>
    %505 = vector.shape_cast %502 : vector<2x1x32xf32> to vector<2x1x32xf32>
    %506 = vector.broadcast %505 : vector<2x1x32xf32> to vector<2x8x32xf32>
    %507 = arith.select %504, %506, %469 : vector<2x8x32xi1>, vector<2x8x32xf32>
    %508 = vector.extract_strided_slice %389 {offsets = [0, 3, 0], sizes = [2, 1, 128], strides = [1, 1, 1]} : vector<2x8x128xf32> to vector<2x1x128xf32>
    %509 = vector.shape_cast %508 : vector<2x1x128xf32> to vector<2x128xf32>
    %510 = arith.truncf %499 : vector<2x32xf32> to vector<2x32xbf16>
    %cst_78 = arith.constant dense<0.000000e+00> : vector<2x128xf32>
    %511 = tpu.matmul %510, %381, %cst_78 {dimension_numbers = #tpu.dot_dimension_numbers<[1], [0], [0], [1], [0, 0, 1, 1], [], []>} : vector<2x32xbf16>, vector<32x128xbf16>, vector<2x128xf32> -> vector<2x128xf32>
    %512 = arith.addf %509, %511 : vector<2x128xf32>
    %513 = vector.extract_strided_slice %512 {offsets = [0, 0], sizes = [2, 32], strides = [1, 1]} : vector<2x128xf32> to vector<2x32xf32>
    %514 = arith.negf %513 : vector<2x32xf32>
    %515 = math.exp %514 : vector<2x32xf32>
    %cst_79 = arith.constant 1.000000e+00 : f32
    %516 = vector.broadcast %cst_79 : f32 to vector<2x32xf32>
    %517 = arith.addf %516, %515 : vector<2x32xf32>
    %518 = arith.divf %516, %517 : vector<2x32xf32>
    %519 = vector.extract_strided_slice %512 {offsets = [0, 32], sizes = [2, 32], strides = [1, 1]} : vector<2x128xf32> to vector<2x32xf32>
    %520 = arith.negf %519 : vector<2x32xf32>
    %521 = math.exp %520 : vector<2x32xf32>
    %cst_80 = arith.constant 1.000000e+00 : f32
    %522 = vector.broadcast %cst_80 : f32 to vector<2x32xf32>
    %523 = arith.addf %522, %521 : vector<2x32xf32>
    %524 = arith.divf %522, %523 : vector<2x32xf32>
    %525 = vector.extract_strided_slice %512 {offsets = [0, 64], sizes = [2, 32], strides = [1, 1]} : vector<2x128xf32> to vector<2x32xf32>
    %526 = math.tanh %525 : vector<2x32xf32>
    %527 = vector.extract_strided_slice %512 {offsets = [0, 96], sizes = [2, 32], strides = [1, 1]} : vector<2x128xf32> to vector<2x32xf32>
    %528 = arith.negf %527 : vector<2x32xf32>
    %529 = math.exp %528 : vector<2x32xf32>
    %cst_81 = arith.constant 1.000000e+00 : f32
    %530 = vector.broadcast %cst_81 : f32 to vector<2x32xf32>
    %531 = arith.addf %530, %529 : vector<2x32xf32>
    %532 = arith.divf %530, %531 : vector<2x32xf32>
    %533 = arith.mulf %524, %497 : vector<2x32xf32>
    %534 = arith.mulf %518, %526 : vector<2x32xf32>
    %535 = arith.addf %533, %534 : vector<2x32xf32>
    %536 = math.tanh %535 : vector<2x32xf32>
    %537 = arith.mulf %532, %536 : vector<2x32xf32>
    %c3_i32_82 = arith.constant 3 : i32
    %538 = vector.broadcast %c3_i32_82 : i32 to vector<1x8x1xi32>
    %539 = arith.cmpi eq, %393, %538 : vector<1x8x1xi32>
    %540 = vector.shape_cast %537 : vector<2x32xf32> to vector<2x1x32xf32>
    %541 = vector.shape_cast %539 : vector<1x8x1xi1> to vector<1x8x1xi1>
    %542 = vector.broadcast %541 : vector<1x8x1xi1> to vector<2x8x32xi1>
    %543 = vector.shape_cast %540 : vector<2x1x32xf32> to vector<2x1x32xf32>
    %544 = vector.broadcast %543 : vector<2x1x32xf32> to vector<2x8x32xf32>
    %545 = arith.select %542, %544, %507 : vector<2x8x32xi1>, vector<2x8x32xf32>
    %546 = vector.extract_strided_slice %389 {offsets = [0, 4, 0], sizes = [2, 1, 128], strides = [1, 1, 1]} : vector<2x8x128xf32> to vector<2x1x128xf32>
    %547 = vector.shape_cast %546 : vector<2x1x128xf32> to vector<2x128xf32>
    %548 = arith.truncf %537 : vector<2x32xf32> to vector<2x32xbf16>
    %cst_83 = arith.constant dense<0.000000e+00> : vector<2x128xf32>
    %549 = tpu.matmul %548, %381, %cst_83 {dimension_numbers = #tpu.dot_dimension_numbers<[1], [0], [0], [1], [0, 0, 1, 1], [], []>} : vector<2x32xbf16>, vector<32x128xbf16>, vector<2x128xf32> -> vector<2x128xf32>
    %550 = arith.addf %547, %549 : vector<2x128xf32>
    %551 = vector.extract_strided_slice %550 {offsets = [0, 0], sizes = [2, 32], strides = [1, 1]} : vector<2x128xf32> to vector<2x32xf32>
    %552 = arith.negf %551 : vector<2x32xf32>
    %553 = math.exp %552 : vector<2x32xf32>
    %cst_84 = arith.constant 1.000000e+00 : f32
    %554 = vector.broadcast %cst_84 : f32 to vector<2x32xf32>
    %555 = arith.addf %554, %553 : vector<2x32xf32>
    %556 = arith.divf %554, %555 : vector<2x32xf32>
    %557 = vector.extract_strided_slice %550 {offsets = [0, 32], sizes = [2, 32], strides = [1, 1]} : vector<2x128xf32> to vector<2x32xf32>
    %558 = arith.negf %557 : vector<2x32xf32>
    %559 = math.exp %558 : vector<2x32xf32>
    %cst_85 = arith.constant 1.000000e+00 : f32
    %560 = vector.broadcast %cst_85 : f32 to vector<2x32xf32>
    %561 = arith.addf %560, %559 : vector<2x32xf32>
    %562 = arith.divf %560, %561 : vector<2x32xf32>
    %563 = vector.extract_strided_slice %550 {offsets = [0, 64], sizes = [2, 32], strides = [1, 1]} : vector<2x128xf32> to vector<2x32xf32>
    %564 = math.tanh %563 : vector<2x32xf32>
    %565 = vector.extract_strided_slice %550 {offsets = [0, 96], sizes = [2, 32], strides = [1, 1]} : vector<2x128xf32> to vector<2x32xf32>
    %566 = arith.negf %565 : vector<2x32xf32>
    %567 = math.exp %566 : vector<2x32xf32>
    %cst_86 = arith.constant 1.000000e+00 : f32
    %568 = vector.broadcast %cst_86 : f32 to vector<2x32xf32>
    %569 = arith.addf %568, %567 : vector<2x32xf32>
    %570 = arith.divf %568, %569 : vector<2x32xf32>
    %571 = arith.mulf %562, %535 : vector<2x32xf32>
    %572 = arith.mulf %556, %564 : vector<2x32xf32>
    %573 = arith.addf %571, %572 : vector<2x32xf32>
    %574 = math.tanh %573 : vector<2x32xf32>
    %575 = arith.mulf %570, %574 : vector<2x32xf32>
    %c4_i32_87 = arith.constant 4 : i32
    %576 = vector.broadcast %c4_i32_87 : i32 to vector<1x8x1xi32>
    %577 = arith.cmpi eq, %393, %576 : vector<1x8x1xi32>
    %578 = vector.shape_cast %575 : vector<2x32xf32> to vector<2x1x32xf32>
    %579 = vector.shape_cast %577 : vector<1x8x1xi1> to vector<1x8x1xi1>
    %580 = vector.broadcast %579 : vector<1x8x1xi1> to vector<2x8x32xi1>
    %581 = vector.shape_cast %578 : vector<2x1x32xf32> to vector<2x1x32xf32>
    %582 = vector.broadcast %581 : vector<2x1x32xf32> to vector<2x8x32xf32>
    %583 = arith.select %580, %582, %545 : vector<2x8x32xi1>, vector<2x8x32xf32>
    %584 = vector.extract_strided_slice %389 {offsets = [0, 5, 0], sizes = [2, 1, 128], strides = [1, 1, 1]} : vector<2x8x128xf32> to vector<2x1x128xf32>
    %585 = vector.shape_cast %584 : vector<2x1x128xf32> to vector<2x128xf32>
    %586 = arith.truncf %575 : vector<2x32xf32> to vector<2x32xbf16>
    %cst_88 = arith.constant dense<0.000000e+00> : vector<2x128xf32>
    %587 = tpu.matmul %586, %381, %cst_88 {dimension_numbers = #tpu.dot_dimension_numbers<[1], [0], [0], [1], [0, 0, 1, 1], [], []>} : vector<2x32xbf16>, vector<32x128xbf16>, vector<2x128xf32> -> vector<2x128xf32>
    %588 = arith.addf %585, %587 : vector<2x128xf32>
    %589 = vector.extract_strided_slice %588 {offsets = [0, 0], sizes = [2, 32], strides = [1, 1]} : vector<2x128xf32> to vector<2x32xf32>
    %590 = arith.negf %589 : vector<2x32xf32>
    %591 = math.exp %590 : vector<2x32xf32>
    %cst_89 = arith.constant 1.000000e+00 : f32
    %592 = vector.broadcast %cst_89 : f32 to vector<2x32xf32>
    %593 = arith.addf %592, %591 : vector<2x32xf32>
    %594 = arith.divf %592, %593 : vector<2x32xf32>
    %595 = vector.extract_strided_slice %588 {offsets = [0, 32], sizes = [2, 32], strides = [1, 1]} : vector<2x128xf32> to vector<2x32xf32>
    %596 = arith.negf %595 : vector<2x32xf32>
    %597 = math.exp %596 : vector<2x32xf32>
    %cst_90 = arith.constant 1.000000e+00 : f32
    %598 = vector.broadcast %cst_90 : f32 to vector<2x32xf32>
    %599 = arith.addf %598, %597 : vector<2x32xf32>
    %600 = arith.divf %598, %599 : vector<2x32xf32>
    %601 = vector.extract_strided_slice %588 {offsets = [0, 64], sizes = [2, 32], strides = [1, 1]} : vector<2x128xf32> to vector<2x32xf32>
    %602 = math.tanh %601 : vector<2x32xf32>
    %603 = vector.extract_strided_slice %588 {offsets = [0, 96], sizes = [2, 32], strides = [1, 1]} : vector<2x128xf32> to vector<2x32xf32>
    %604 = arith.negf %603 : vector<2x32xf32>
    %605 = math.exp %604 : vector<2x32xf32>
    %cst_91 = arith.constant 1.000000e+00 : f32
    %606 = vector.broadcast %cst_91 : f32 to vector<2x32xf32>
    %607 = arith.addf %606, %605 : vector<2x32xf32>
    %608 = arith.divf %606, %607 : vector<2x32xf32>
    %609 = arith.mulf %600, %573 : vector<2x32xf32>
    %610 = arith.mulf %594, %602 : vector<2x32xf32>
    %611 = arith.addf %609, %610 : vector<2x32xf32>
    %612 = math.tanh %611 : vector<2x32xf32>
    %613 = arith.mulf %608, %612 : vector<2x32xf32>
    %c5_i32_92 = arith.constant 5 : i32
    %614 = vector.broadcast %c5_i32_92 : i32 to vector<1x8x1xi32>
    %615 = arith.cmpi eq, %393, %614 : vector<1x8x1xi32>
    %616 = vector.shape_cast %613 : vector<2x32xf32> to vector<2x1x32xf32>
    %617 = vector.shape_cast %615 : vector<1x8x1xi1> to vector<1x8x1xi1>
    %618 = vector.broadcast %617 : vector<1x8x1xi1> to vector<2x8x32xi1>
    %619 = vector.shape_cast %616 : vector<2x1x32xf32> to vector<2x1x32xf32>
    %620 = vector.broadcast %619 : vector<2x1x32xf32> to vector<2x8x32xf32>
    %621 = arith.select %618, %620, %583 : vector<2x8x32xi1>, vector<2x8x32xf32>
    %622 = vector.extract_strided_slice %389 {offsets = [0, 6, 0], sizes = [2, 1, 128], strides = [1, 1, 1]} : vector<2x8x128xf32> to vector<2x1x128xf32>
    %623 = vector.shape_cast %622 : vector<2x1x128xf32> to vector<2x128xf32>
    %624 = arith.truncf %613 : vector<2x32xf32> to vector<2x32xbf16>
    %cst_93 = arith.constant dense<0.000000e+00> : vector<2x128xf32>
    %625 = tpu.matmul %624, %381, %cst_93 {dimension_numbers = #tpu.dot_dimension_numbers<[1], [0], [0], [1], [0, 0, 1, 1], [], []>} : vector<2x32xbf16>, vector<32x128xbf16>, vector<2x128xf32> -> vector<2x128xf32>
    %626 = arith.addf %623, %625 : vector<2x128xf32>
    %627 = vector.extract_strided_slice %626 {offsets = [0, 0], sizes = [2, 32], strides = [1, 1]} : vector<2x128xf32> to vector<2x32xf32>
    %628 = arith.negf %627 : vector<2x32xf32>
    %629 = math.exp %628 : vector<2x32xf32>
    %cst_94 = arith.constant 1.000000e+00 : f32
    %630 = vector.broadcast %cst_94 : f32 to vector<2x32xf32>
    %631 = arith.addf %630, %629 : vector<2x32xf32>
    %632 = arith.divf %630, %631 : vector<2x32xf32>
    %633 = vector.extract_strided_slice %626 {offsets = [0, 32], sizes = [2, 32], strides = [1, 1]} : vector<2x128xf32> to vector<2x32xf32>
    %634 = arith.negf %633 : vector<2x32xf32>
    %635 = math.exp %634 : vector<2x32xf32>
    %cst_95 = arith.constant 1.000000e+00 : f32
    %636 = vector.broadcast %cst_95 : f32 to vector<2x32xf32>
    %637 = arith.addf %636, %635 : vector<2x32xf32>
    %638 = arith.divf %636, %637 : vector<2x32xf32>
    %639 = vector.extract_strided_slice %626 {offsets = [0, 64], sizes = [2, 32], strides = [1, 1]} : vector<2x128xf32> to vector<2x32xf32>
    %640 = math.tanh %639 : vector<2x32xf32>
    %641 = vector.extract_strided_slice %626 {offsets = [0, 96], sizes = [2, 32], strides = [1, 1]} : vector<2x128xf32> to vector<2x32xf32>
    %642 = arith.negf %641 : vector<2x32xf32>
    %643 = math.exp %642 : vector<2x32xf32>
    %cst_96 = arith.constant 1.000000e+00 : f32
    %644 = vector.broadcast %cst_96 : f32 to vector<2x32xf32>
    %645 = arith.addf %644, %643 : vector<2x32xf32>
    %646 = arith.divf %644, %645 : vector<2x32xf32>
    %647 = arith.mulf %638, %611 : vector<2x32xf32>
    %648 = arith.mulf %632, %640 : vector<2x32xf32>
    %649 = arith.addf %647, %648 : vector<2x32xf32>
    %650 = math.tanh %649 : vector<2x32xf32>
    %651 = arith.mulf %646, %650 : vector<2x32xf32>
    %c6_i32_97 = arith.constant 6 : i32
    %652 = vector.broadcast %c6_i32_97 : i32 to vector<1x8x1xi32>
    %653 = arith.cmpi eq, %393, %652 : vector<1x8x1xi32>
    %654 = vector.shape_cast %651 : vector<2x32xf32> to vector<2x1x32xf32>
    %655 = vector.shape_cast %653 : vector<1x8x1xi1> to vector<1x8x1xi1>
    %656 = vector.broadcast %655 : vector<1x8x1xi1> to vector<2x8x32xi1>
    %657 = vector.shape_cast %654 : vector<2x1x32xf32> to vector<2x1x32xf32>
    %658 = vector.broadcast %657 : vector<2x1x32xf32> to vector<2x8x32xf32>
    %659 = arith.select %656, %658, %621 : vector<2x8x32xi1>, vector<2x8x32xf32>
    %660 = vector.extract_strided_slice %389 {offsets = [0, 7, 0], sizes = [2, 1, 128], strides = [1, 1, 1]} : vector<2x8x128xf32> to vector<2x1x128xf32>
    %661 = vector.shape_cast %660 : vector<2x1x128xf32> to vector<2x128xf32>
    %662 = arith.truncf %651 : vector<2x32xf32> to vector<2x32xbf16>
    %cst_98 = arith.constant dense<0.000000e+00> : vector<2x128xf32>
    %663 = tpu.matmul %662, %381, %cst_98 {dimension_numbers = #tpu.dot_dimension_numbers<[1], [0], [0], [1], [0, 0, 1, 1], [], []>} : vector<2x32xbf16>, vector<32x128xbf16>, vector<2x128xf32> -> vector<2x128xf32>
    %664 = arith.addf %661, %663 : vector<2x128xf32>
    %665 = vector.extract_strided_slice %664 {offsets = [0, 0], sizes = [2, 32], strides = [1, 1]} : vector<2x128xf32> to vector<2x32xf32>
    %666 = arith.negf %665 : vector<2x32xf32>
    %667 = math.exp %666 : vector<2x32xf32>
    %cst_99 = arith.constant 1.000000e+00 : f32
    %668 = vector.broadcast %cst_99 : f32 to vector<2x32xf32>
    %669 = arith.addf %668, %667 : vector<2x32xf32>
    %670 = arith.divf %668, %669 : vector<2x32xf32>
    %671 = vector.extract_strided_slice %664 {offsets = [0, 32], sizes = [2, 32], strides = [1, 1]} : vector<2x128xf32> to vector<2x32xf32>
    %672 = arith.negf %671 : vector<2x32xf32>
    %673 = math.exp %672 : vector<2x32xf32>
    %cst_100 = arith.constant 1.000000e+00 : f32
    %674 = vector.broadcast %cst_100 : f32 to vector<2x32xf32>
    %675 = arith.addf %674, %673 : vector<2x32xf32>
    %676 = arith.divf %674, %675 : vector<2x32xf32>
    %677 = vector.extract_strided_slice %664 {offsets = [0, 64], sizes = [2, 32], strides = [1, 1]} : vector<2x128xf32> to vector<2x32xf32>
    %678 = math.tanh %677 : vector<2x32xf32>
    %679 = vector.extract_strided_slice %664 {offsets = [0, 96], sizes = [2, 32], strides = [1, 1]} : vector<2x128xf32> to vector<2x32xf32>
    %680 = arith.negf %679 : vector<2x32xf32>
    %681 = math.exp %680 : vector<2x32xf32>
    %cst_101 = arith.constant 1.000000e+00 : f32
    %682 = vector.broadcast %cst_101 : f32 to vector<2x32xf32>
    %683 = arith.addf %682, %681 : vector<2x32xf32>
    %684 = arith.divf %682, %683 : vector<2x32xf32>
    %685 = arith.mulf %676, %649 : vector<2x32xf32>
    %686 = arith.mulf %670, %678 : vector<2x32xf32>
    %687 = arith.addf %685, %686 : vector<2x32xf32>
    %688 = math.tanh %687 : vector<2x32xf32>
    %689 = arith.mulf %684, %688 : vector<2x32xf32>
    %c7_i32_102 = arith.constant 7 : i32
    %690 = vector.broadcast %c7_i32_102 : i32 to vector<1x8x1xi32>
    %691 = arith.cmpi eq, %393, %690 : vector<1x8x1xi32>
    %692 = vector.shape_cast %689 : vector<2x32xf32> to vector<2x1x32xf32>
    %693 = vector.shape_cast %691 : vector<1x8x1xi1> to vector<1x8x1xi1>
    %694 = vector.broadcast %693 : vector<1x8x1xi1> to vector<2x8x32xi1>
    %695 = vector.shape_cast %692 : vector<2x1x32xf32> to vector<2x1x32xf32>
    %696 = vector.broadcast %695 : vector<2x1x32xf32> to vector<2x8x32xf32>
    %697 = arith.select %694, %696, %659 : vector<2x8x32xi1>, vector<2x8x32xf32>
    %c1_103 = arith.constant 1 : index
    %c0_104 = arith.constant 0 : index
    %c0_105 = arith.constant 0 : index
    %698 = vector.load %arg5[%c1_103, %c0_104, %c0_105] : memref<3x32x32xbf16, #tpu.memory_space<vmem>>, vector<1x32x32xbf16>
    %699 = vector.shape_cast %698 : vector<1x32x32xbf16> to vector<32x32xbf16>
    %700 = vector.extract_strided_slice %0 {offsets = [6, 0], sizes = [1, 32], strides = [1, 1]} : vector<18x128xf32> to vector<1x32xf32>
    %701 = vector.extract_strided_slice %0 {offsets = [9, 0], sizes = [1, 32], strides = [1, 1]} : vector<18x128xf32> to vector<1x32xf32>
    %702 = vector.shape_cast %697 : vector<2x8x32xf32> to vector<16x32xf32>
    %703 = arith.truncf %702 : vector<16x32xf32> to vector<16x32xbf16>
    %cst_106 = arith.constant dense<0.000000e+00> : vector<16x32xf32>
    %704 = tpu.matmul %703, %699, %cst_106 {dimension_numbers = #tpu.dot_dimension_numbers<[1], [0], [0], [1], [0, 0, 1, 1], [], []>} : vector<16x32xbf16>, vector<32x32xbf16>, vector<16x32xf32> -> vector<16x32xf32>
    %705 = vector.broadcast %700 : vector<1x32xf32> to vector<16x32xf32>
    %706 = arith.addf %704, %705 : vector<16x32xf32>
    %707 = math.tanh %706 : vector<16x32xf32>
    %708 = vector.shape_cast %707 : vector<16x32xf32> to vector<2x8x32xf32>
    %709 = vector.shape_cast %701 : vector<1x32xf32> to vector<1x1x32xf32>
    %710 = vector.broadcast %709 : vector<1x1x32xf32> to vector<2x8x32xf32>
    %711 = arith.mulf %708, %710 : vector<2x8x32xf32>
    %cst_107 = arith.constant dense<0.000000e+00> : vector<2x8xf32>
    %712 = vector.multi_reduction <add>, %711, %cst_107 [2] : vector<2x8x32xf32> to vector<2x8xf32>
    %cst_108 = arith.constant dense<0xFF800000> : vector<2xf32>
    %713 = vector.multi_reduction <maximumf>, %712, %cst_108 [1] : vector<2x8xf32> to vector<2xf32>
    %714 = vector.shape_cast %713 : vector<2xf32> to vector<2x1xf32>
    %715 = vector.broadcast %714 : vector<2x1xf32> to vector<2x8xf32>
    %716 = arith.subf %712, %715 : vector<2x8xf32>
    %717 = math.exp %716 : vector<2x8xf32>
    %cst_109 = arith.constant dense<0.000000e+00> : vector<2xf32>
    %718 = vector.multi_reduction <add>, %717, %cst_109 [1] : vector<2x8xf32> to vector<2xf32>
    %719 = vector.shape_cast %718 : vector<2xf32> to vector<2x1xf32>
    %720 = tpu.reciprocal %719 {approx = true} : vector<2x1xf32> -> vector<2x1xf32>
    %721 = vector.broadcast %720 : vector<2x1xf32> to vector<2x8xf32>
    %722 = arith.mulf %717, %721 : vector<2x8xf32>
    %723 = vector.shape_cast %722 : vector<2x8xf32> to vector<2x8x1xf32>
    %724 = vector.broadcast %723 : vector<2x8x1xf32> to vector<2x8x32xf32>
    %725 = arith.mulf %724, %697 : vector<2x8x32xf32>
    %cst_110 = arith.constant dense<0.000000e+00> : vector<2x32xf32>
    %726 = vector.multi_reduction <add>, %725, %cst_110 [1] : vector<2x8x32xf32> to vector<2x32xf32>
    %c1_i32_111 = arith.constant 1 : i32
    %727 = vector.broadcast %c1_i32_111 : i32 to vector<1x3x1xi32>
    %728 = arith.cmpi eq, %16, %727 : vector<1x3x1xi32>
    %729 = vector.shape_cast %726 : vector<2x32xf32> to vector<2x1x32xf32>
    %730 = vector.shape_cast %728 : vector<1x3x1xi1> to vector<1x3x1xi1>
    %731 = vector.broadcast %730 : vector<1x3x1xi1> to vector<2x3x32xi1>
    %732 = vector.shape_cast %729 : vector<2x1x32xf32> to vector<2x1x32xf32>
    %733 = vector.broadcast %732 : vector<2x1x32xf32> to vector<2x3x32xf32>
    %734 = arith.select %731, %733, %375 : vector<2x3x32xi1>, vector<2x3x32xf32>
    %c2 = arith.constant 2 : index
    %c0_112 = arith.constant 0 : index
    %c0_113 = arith.constant 0 : index
    %735 = vector.load %arg4[%c2, %c0_112, %c0_113] : memref<3x48x128xbf16, #tpu.memory_space<vmem>>, vector<1x48x128xbf16>
    %736 = vector.shape_cast %735 : vector<1x48x128xbf16> to vector<48x128xbf16>
    %737 = vector.extract_strided_slice %14 {offsets = [0, 2, 0, 0], sizes = [2, 1, 8, 16], strides = [1, 1, 1, 1]} : vector<2x3x8x16xf32> to vector<2x1x8x16xf32>
    %738 = vector.shape_cast %737 : vector<2x1x8x16xf32> to vector<2x8x16xf32>
    %739 = vector.extract_strided_slice %736 {offsets = [0, 0], sizes = [16, 128], strides = [1, 1]} : vector<48x128xbf16> to vector<16x128xbf16>
    %740 = vector.extract_strided_slice %736 {offsets = [16, 0], sizes = [32, 128], strides = [1, 1]} : vector<48x128xbf16> to vector<32x128xbf16>
    %741 = vector.extract_strided_slice %0 {offsets = [2, 0], sizes = [1, 128], strides = [1, 1]} : vector<18x128xf32> to vector<1x128xf32>
    %742 = vector.shape_cast %738 : vector<2x8x16xf32> to vector<16x16xf32>
    %743 = arith.truncf %742 : vector<16x16xf32> to vector<16x16xbf16>
    %cst_114 = arith.constant dense<0.000000e+00> : vector<16x128xf32>
    %744 = tpu.matmul %743, %739, %cst_114 {dimension_numbers = #tpu.dot_dimension_numbers<[1], [0], [0], [1], [0, 0, 1, 1], [], []>} : vector<16x16xbf16>, vector<16x128xbf16>, vector<16x128xf32> -> vector<16x128xf32>
    %745 = vector.shape_cast %744 : vector<16x128xf32> to vector<2x8x128xf32>
    %746 = vector.shape_cast %741 : vector<1x128xf32> to vector<1x1x128xf32>
    %747 = vector.broadcast %746 : vector<1x1x128xf32> to vector<2x8x128xf32>
    %748 = arith.addf %745, %747 : vector<2x8x128xf32>
    %cst_115 = arith.constant 0.000000e+00 : f32
    %749 = vector.broadcast %cst_115 : f32 to vector<2x32xf32>
    %cst_116 = arith.constant 0.000000e+00 : f32
    %750 = vector.broadcast %cst_116 : f32 to vector<2x32xf32>
    %cst_117 = arith.constant 0.000000e+00 : f32
    %751 = vector.broadcast %cst_117 : f32 to vector<2x8x32xf32>
    %752 = tpu.iota {dimensions = array<i32: 1>} : vector<1x8x1xi32>
    %753 = vector.extract_strided_slice %748 {offsets = [0, 0, 0], sizes = [2, 1, 128], strides = [1, 1, 1]} : vector<2x8x128xf32> to vector<2x1x128xf32>
    %754 = vector.shape_cast %753 : vector<2x1x128xf32> to vector<2x128xf32>
    %755 = arith.truncf %749 : vector<2x32xf32> to vector<2x32xbf16>
    %cst_118 = arith.constant dense<0.000000e+00> : vector<2x128xf32>
    %756 = tpu.matmul %755, %740, %cst_118 {dimension_numbers = #tpu.dot_dimension_numbers<[1], [0], [0], [1], [0, 0, 1, 1], [], []>} : vector<2x32xbf16>, vector<32x128xbf16>, vector<2x128xf32> -> vector<2x128xf32>
    %757 = arith.addf %754, %756 : vector<2x128xf32>
    %758 = vector.extract_strided_slice %757 {offsets = [0, 0], sizes = [2, 32], strides = [1, 1]} : vector<2x128xf32> to vector<2x32xf32>
    %759 = arith.negf %758 : vector<2x32xf32>
    %760 = math.exp %759 : vector<2x32xf32>
    %cst_119 = arith.constant 1.000000e+00 : f32
    %761 = vector.broadcast %cst_119 : f32 to vector<2x32xf32>
    %762 = arith.addf %761, %760 : vector<2x32xf32>
    %763 = arith.divf %761, %762 : vector<2x32xf32>
    %764 = vector.extract_strided_slice %757 {offsets = [0, 32], sizes = [2, 32], strides = [1, 1]} : vector<2x128xf32> to vector<2x32xf32>
    %765 = arith.negf %764 : vector<2x32xf32>
    %766 = math.exp %765 : vector<2x32xf32>
    %cst_120 = arith.constant 1.000000e+00 : f32
    %767 = vector.broadcast %cst_120 : f32 to vector<2x32xf32>
    %768 = arith.addf %767, %766 : vector<2x32xf32>
    %769 = arith.divf %767, %768 : vector<2x32xf32>
    %770 = vector.extract_strided_slice %757 {offsets = [0, 64], sizes = [2, 32], strides = [1, 1]} : vector<2x128xf32> to vector<2x32xf32>
    %771 = math.tanh %770 : vector<2x32xf32>
    %772 = vector.extract_strided_slice %757 {offsets = [0, 96], sizes = [2, 32], strides = [1, 1]} : vector<2x128xf32> to vector<2x32xf32>
    %773 = arith.negf %772 : vector<2x32xf32>
    %774 = math.exp %773 : vector<2x32xf32>
    %cst_121 = arith.constant 1.000000e+00 : f32
    %775 = vector.broadcast %cst_121 : f32 to vector<2x32xf32>
    %776 = arith.addf %775, %774 : vector<2x32xf32>
    %777 = arith.divf %775, %776 : vector<2x32xf32>
    %778 = arith.mulf %769, %750 : vector<2x32xf32>
    %779 = arith.mulf %763, %771 : vector<2x32xf32>
    %780 = arith.addf %778, %779 : vector<2x32xf32>
    %781 = math.tanh %780 : vector<2x32xf32>
    %782 = arith.mulf %777, %781 : vector<2x32xf32>
    %c0_i32_122 = arith.constant 0 : i32
    %783 = vector.broadcast %c0_i32_122 : i32 to vector<1x8x1xi32>
    %784 = arith.cmpi eq, %752, %783 : vector<1x8x1xi32>
    %785 = vector.shape_cast %782 : vector<2x32xf32> to vector<2x1x32xf32>
    %786 = vector.shape_cast %784 : vector<1x8x1xi1> to vector<1x8x1xi1>
    %787 = vector.broadcast %786 : vector<1x8x1xi1> to vector<2x8x32xi1>
    %788 = vector.shape_cast %785 : vector<2x1x32xf32> to vector<2x1x32xf32>
    %789 = vector.broadcast %788 : vector<2x1x32xf32> to vector<2x8x32xf32>
    %790 = arith.select %787, %789, %751 : vector<2x8x32xi1>, vector<2x8x32xf32>
    %791 = vector.extract_strided_slice %748 {offsets = [0, 1, 0], sizes = [2, 1, 128], strides = [1, 1, 1]} : vector<2x8x128xf32> to vector<2x1x128xf32>
    %792 = vector.shape_cast %791 : vector<2x1x128xf32> to vector<2x128xf32>
    %793 = arith.truncf %782 : vector<2x32xf32> to vector<2x32xbf16>
    %cst_123 = arith.constant dense<0.000000e+00> : vector<2x128xf32>
    %794 = tpu.matmul %793, %740, %cst_123 {dimension_numbers = #tpu.dot_dimension_numbers<[1], [0], [0], [1], [0, 0, 1, 1], [], []>} : vector<2x32xbf16>, vector<32x128xbf16>, vector<2x128xf32> -> vector<2x128xf32>
    %795 = arith.addf %792, %794 : vector<2x128xf32>
    %796 = vector.extract_strided_slice %795 {offsets = [0, 0], sizes = [2, 32], strides = [1, 1]} : vector<2x128xf32> to vector<2x32xf32>
    %797 = arith.negf %796 : vector<2x32xf32>
    %798 = math.exp %797 : vector<2x32xf32>
    %cst_124 = arith.constant 1.000000e+00 : f32
    %799 = vector.broadcast %cst_124 : f32 to vector<2x32xf32>
    %800 = arith.addf %799, %798 : vector<2x32xf32>
    %801 = arith.divf %799, %800 : vector<2x32xf32>
    %802 = vector.extract_strided_slice %795 {offsets = [0, 32], sizes = [2, 32], strides = [1, 1]} : vector<2x128xf32> to vector<2x32xf32>
    %803 = arith.negf %802 : vector<2x32xf32>
    %804 = math.exp %803 : vector<2x32xf32>
    %cst_125 = arith.constant 1.000000e+00 : f32
    %805 = vector.broadcast %cst_125 : f32 to vector<2x32xf32>
    %806 = arith.addf %805, %804 : vector<2x32xf32>
    %807 = arith.divf %805, %806 : vector<2x32xf32>
    %808 = vector.extract_strided_slice %795 {offsets = [0, 64], sizes = [2, 32], strides = [1, 1]} : vector<2x128xf32> to vector<2x32xf32>
    %809 = math.tanh %808 : vector<2x32xf32>
    %810 = vector.extract_strided_slice %795 {offsets = [0, 96], sizes = [2, 32], strides = [1, 1]} : vector<2x128xf32> to vector<2x32xf32>
    %811 = arith.negf %810 : vector<2x32xf32>
    %812 = math.exp %811 : vector<2x32xf32>
    %cst_126 = arith.constant 1.000000e+00 : f32
    %813 = vector.broadcast %cst_126 : f32 to vector<2x32xf32>
    %814 = arith.addf %813, %812 : vector<2x32xf32>
    %815 = arith.divf %813, %814 : vector<2x32xf32>
    %816 = arith.mulf %807, %780 : vector<2x32xf32>
    %817 = arith.mulf %801, %809 : vector<2x32xf32>
    %818 = arith.addf %816, %817 : vector<2x32xf32>
    %819 = math.tanh %818 : vector<2x32xf32>
    %820 = arith.mulf %815, %819 : vector<2x32xf32>
    %c1_i32_127 = arith.constant 1 : i32
    %821 = vector.broadcast %c1_i32_127 : i32 to vector<1x8x1xi32>
    %822 = arith.cmpi eq, %752, %821 : vector<1x8x1xi32>
    %823 = vector.shape_cast %820 : vector<2x32xf32> to vector<2x1x32xf32>
    %824 = vector.shape_cast %822 : vector<1x8x1xi1> to vector<1x8x1xi1>
    %825 = vector.broadcast %824 : vector<1x8x1xi1> to vector<2x8x32xi1>
    %826 = vector.shape_cast %823 : vector<2x1x32xf32> to vector<2x1x32xf32>
    %827 = vector.broadcast %826 : vector<2x1x32xf32> to vector<2x8x32xf32>
    %828 = arith.select %825, %827, %790 : vector<2x8x32xi1>, vector<2x8x32xf32>
    %829 = vector.extract_strided_slice %748 {offsets = [0, 2, 0], sizes = [2, 1, 128], strides = [1, 1, 1]} : vector<2x8x128xf32> to vector<2x1x128xf32>
    %830 = vector.shape_cast %829 : vector<2x1x128xf32> to vector<2x128xf32>
    %831 = arith.truncf %820 : vector<2x32xf32> to vector<2x32xbf16>
    %cst_128 = arith.constant dense<0.000000e+00> : vector<2x128xf32>
    %832 = tpu.matmul %831, %740, %cst_128 {dimension_numbers = #tpu.dot_dimension_numbers<[1], [0], [0], [1], [0, 0, 1, 1], [], []>} : vector<2x32xbf16>, vector<32x128xbf16>, vector<2x128xf32> -> vector<2x128xf32>
    %833 = arith.addf %830, %832 : vector<2x128xf32>
    %834 = vector.extract_strided_slice %833 {offsets = [0, 0], sizes = [2, 32], strides = [1, 1]} : vector<2x128xf32> to vector<2x32xf32>
    %835 = arith.negf %834 : vector<2x32xf32>
    %836 = math.exp %835 : vector<2x32xf32>
    %cst_129 = arith.constant 1.000000e+00 : f32
    %837 = vector.broadcast %cst_129 : f32 to vector<2x32xf32>
    %838 = arith.addf %837, %836 : vector<2x32xf32>
    %839 = arith.divf %837, %838 : vector<2x32xf32>
    %840 = vector.extract_strided_slice %833 {offsets = [0, 32], sizes = [2, 32], strides = [1, 1]} : vector<2x128xf32> to vector<2x32xf32>
    %841 = arith.negf %840 : vector<2x32xf32>
    %842 = math.exp %841 : vector<2x32xf32>
    %cst_130 = arith.constant 1.000000e+00 : f32
    %843 = vector.broadcast %cst_130 : f32 to vector<2x32xf32>
    %844 = arith.addf %843, %842 : vector<2x32xf32>
    %845 = arith.divf %843, %844 : vector<2x32xf32>
    %846 = vector.extract_strided_slice %833 {offsets = [0, 64], sizes = [2, 32], strides = [1, 1]} : vector<2x128xf32> to vector<2x32xf32>
    %847 = math.tanh %846 : vector<2x32xf32>
    %848 = vector.extract_strided_slice %833 {offsets = [0, 96], sizes = [2, 32], strides = [1, 1]} : vector<2x128xf32> to vector<2x32xf32>
    %849 = arith.negf %848 : vector<2x32xf32>
    %850 = math.exp %849 : vector<2x32xf32>
    %cst_131 = arith.constant 1.000000e+00 : f32
    %851 = vector.broadcast %cst_131 : f32 to vector<2x32xf32>
    %852 = arith.addf %851, %850 : vector<2x32xf32>
    %853 = arith.divf %851, %852 : vector<2x32xf32>
    %854 = arith.mulf %845, %818 : vector<2x32xf32>
    %855 = arith.mulf %839, %847 : vector<2x32xf32>
    %856 = arith.addf %854, %855 : vector<2x32xf32>
    %857 = math.tanh %856 : vector<2x32xf32>
    %858 = arith.mulf %853, %857 : vector<2x32xf32>
    %c2_i32_132 = arith.constant 2 : i32
    %859 = vector.broadcast %c2_i32_132 : i32 to vector<1x8x1xi32>
    %860 = arith.cmpi eq, %752, %859 : vector<1x8x1xi32>
    %861 = vector.shape_cast %858 : vector<2x32xf32> to vector<2x1x32xf32>
    %862 = vector.shape_cast %860 : vector<1x8x1xi1> to vector<1x8x1xi1>
    %863 = vector.broadcast %862 : vector<1x8x1xi1> to vector<2x8x32xi1>
    %864 = vector.shape_cast %861 : vector<2x1x32xf32> to vector<2x1x32xf32>
    %865 = vector.broadcast %864 : vector<2x1x32xf32> to vector<2x8x32xf32>
    %866 = arith.select %863, %865, %828 : vector<2x8x32xi1>, vector<2x8x32xf32>
    %867 = vector.extract_strided_slice %748 {offsets = [0, 3, 0], sizes = [2, 1, 128], strides = [1, 1, 1]} : vector<2x8x128xf32> to vector<2x1x128xf32>
    %868 = vector.shape_cast %867 : vector<2x1x128xf32> to vector<2x128xf32>
    %869 = arith.truncf %858 : vector<2x32xf32> to vector<2x32xbf16>
    %cst_133 = arith.constant dense<0.000000e+00> : vector<2x128xf32>
    %870 = tpu.matmul %869, %740, %cst_133 {dimension_numbers = #tpu.dot_dimension_numbers<[1], [0], [0], [1], [0, 0, 1, 1], [], []>} : vector<2x32xbf16>, vector<32x128xbf16>, vector<2x128xf32> -> vector<2x128xf32>
    %871 = arith.addf %868, %870 : vector<2x128xf32>
    %872 = vector.extract_strided_slice %871 {offsets = [0, 0], sizes = [2, 32], strides = [1, 1]} : vector<2x128xf32> to vector<2x32xf32>
    %873 = arith.negf %872 : vector<2x32xf32>
    %874 = math.exp %873 : vector<2x32xf32>
    %cst_134 = arith.constant 1.000000e+00 : f32
    %875 = vector.broadcast %cst_134 : f32 to vector<2x32xf32>
    %876 = arith.addf %875, %874 : vector<2x32xf32>
    %877 = arith.divf %875, %876 : vector<2x32xf32>
    %878 = vector.extract_strided_slice %871 {offsets = [0, 32], sizes = [2, 32], strides = [1, 1]} : vector<2x128xf32> to vector<2x32xf32>
    %879 = arith.negf %878 : vector<2x32xf32>
    %880 = math.exp %879 : vector<2x32xf32>
    %cst_135 = arith.constant 1.000000e+00 : f32
    %881 = vector.broadcast %cst_135 : f32 to vector<2x32xf32>
    %882 = arith.addf %881, %880 : vector<2x32xf32>
    %883 = arith.divf %881, %882 : vector<2x32xf32>
    %884 = vector.extract_strided_slice %871 {offsets = [0, 64], sizes = [2, 32], strides = [1, 1]} : vector<2x128xf32> to vector<2x32xf32>
    %885 = math.tanh %884 : vector<2x32xf32>
    %886 = vector.extract_strided_slice %871 {offsets = [0, 96], sizes = [2, 32], strides = [1, 1]} : vector<2x128xf32> to vector<2x32xf32>
    %887 = arith.negf %886 : vector<2x32xf32>
    %888 = math.exp %887 : vector<2x32xf32>
    %cst_136 = arith.constant 1.000000e+00 : f32
    %889 = vector.broadcast %cst_136 : f32 to vector<2x32xf32>
    %890 = arith.addf %889, %888 : vector<2x32xf32>
    %891 = arith.divf %889, %890 : vector<2x32xf32>
    %892 = arith.mulf %883, %856 : vector<2x32xf32>
    %893 = arith.mulf %877, %885 : vector<2x32xf32>
    %894 = arith.addf %892, %893 : vector<2x32xf32>
    %895 = math.tanh %894 : vector<2x32xf32>
    %896 = arith.mulf %891, %895 : vector<2x32xf32>
    %c3_i32_137 = arith.constant 3 : i32
    %897 = vector.broadcast %c3_i32_137 : i32 to vector<1x8x1xi32>
    %898 = arith.cmpi eq, %752, %897 : vector<1x8x1xi32>
    %899 = vector.shape_cast %896 : vector<2x32xf32> to vector<2x1x32xf32>
    %900 = vector.shape_cast %898 : vector<1x8x1xi1> to vector<1x8x1xi1>
    %901 = vector.broadcast %900 : vector<1x8x1xi1> to vector<2x8x32xi1>
    %902 = vector.shape_cast %899 : vector<2x1x32xf32> to vector<2x1x32xf32>
    %903 = vector.broadcast %902 : vector<2x1x32xf32> to vector<2x8x32xf32>
    %904 = arith.select %901, %903, %866 : vector<2x8x32xi1>, vector<2x8x32xf32>
    %905 = vector.extract_strided_slice %748 {offsets = [0, 4, 0], sizes = [2, 1, 128], strides = [1, 1, 1]} : vector<2x8x128xf32> to vector<2x1x128xf32>
    %906 = vector.shape_cast %905 : vector<2x1x128xf32> to vector<2x128xf32>
    %907 = arith.truncf %896 : vector<2x32xf32> to vector<2x32xbf16>
    %cst_138 = arith.constant dense<0.000000e+00> : vector<2x128xf32>
    %908 = tpu.matmul %907, %740, %cst_138 {dimension_numbers = #tpu.dot_dimension_numbers<[1], [0], [0], [1], [0, 0, 1, 1], [], []>} : vector<2x32xbf16>, vector<32x128xbf16>, vector<2x128xf32> -> vector<2x128xf32>
    %909 = arith.addf %906, %908 : vector<2x128xf32>
    %910 = vector.extract_strided_slice %909 {offsets = [0, 0], sizes = [2, 32], strides = [1, 1]} : vector<2x128xf32> to vector<2x32xf32>
    %911 = arith.negf %910 : vector<2x32xf32>
    %912 = math.exp %911 : vector<2x32xf32>
    %cst_139 = arith.constant 1.000000e+00 : f32
    %913 = vector.broadcast %cst_139 : f32 to vector<2x32xf32>
    %914 = arith.addf %913, %912 : vector<2x32xf32>
    %915 = arith.divf %913, %914 : vector<2x32xf32>
    %916 = vector.extract_strided_slice %909 {offsets = [0, 32], sizes = [2, 32], strides = [1, 1]} : vector<2x128xf32> to vector<2x32xf32>
    %917 = arith.negf %916 : vector<2x32xf32>
    %918 = math.exp %917 : vector<2x32xf32>
    %cst_140 = arith.constant 1.000000e+00 : f32
    %919 = vector.broadcast %cst_140 : f32 to vector<2x32xf32>
    %920 = arith.addf %919, %918 : vector<2x32xf32>
    %921 = arith.divf %919, %920 : vector<2x32xf32>
    %922 = vector.extract_strided_slice %909 {offsets = [0, 64], sizes = [2, 32], strides = [1, 1]} : vector<2x128xf32> to vector<2x32xf32>
    %923 = math.tanh %922 : vector<2x32xf32>
    %924 = vector.extract_strided_slice %909 {offsets = [0, 96], sizes = [2, 32], strides = [1, 1]} : vector<2x128xf32> to vector<2x32xf32>
    %925 = arith.negf %924 : vector<2x32xf32>
    %926 = math.exp %925 : vector<2x32xf32>
    %cst_141 = arith.constant 1.000000e+00 : f32
    %927 = vector.broadcast %cst_141 : f32 to vector<2x32xf32>
    %928 = arith.addf %927, %926 : vector<2x32xf32>
    %929 = arith.divf %927, %928 : vector<2x32xf32>
    %930 = arith.mulf %921, %894 : vector<2x32xf32>
    %931 = arith.mulf %915, %923 : vector<2x32xf32>
    %932 = arith.addf %930, %931 : vector<2x32xf32>
    %933 = math.tanh %932 : vector<2x32xf32>
    %934 = arith.mulf %929, %933 : vector<2x32xf32>
    %c4_i32_142 = arith.constant 4 : i32
    %935 = vector.broadcast %c4_i32_142 : i32 to vector<1x8x1xi32>
    %936 = arith.cmpi eq, %752, %935 : vector<1x8x1xi32>
    %937 = vector.shape_cast %934 : vector<2x32xf32> to vector<2x1x32xf32>
    %938 = vector.shape_cast %936 : vector<1x8x1xi1> to vector<1x8x1xi1>
    %939 = vector.broadcast %938 : vector<1x8x1xi1> to vector<2x8x32xi1>
    %940 = vector.shape_cast %937 : vector<2x1x32xf32> to vector<2x1x32xf32>
    %941 = vector.broadcast %940 : vector<2x1x32xf32> to vector<2x8x32xf32>
    %942 = arith.select %939, %941, %904 : vector<2x8x32xi1>, vector<2x8x32xf32>
    %943 = vector.extract_strided_slice %748 {offsets = [0, 5, 0], sizes = [2, 1, 128], strides = [1, 1, 1]} : vector<2x8x128xf32> to vector<2x1x128xf32>
    %944 = vector.shape_cast %943 : vector<2x1x128xf32> to vector<2x128xf32>
    %945 = arith.truncf %934 : vector<2x32xf32> to vector<2x32xbf16>
    %cst_143 = arith.constant dense<0.000000e+00> : vector<2x128xf32>
    %946 = tpu.matmul %945, %740, %cst_143 {dimension_numbers = #tpu.dot_dimension_numbers<[1], [0], [0], [1], [0, 0, 1, 1], [], []>} : vector<2x32xbf16>, vector<32x128xbf16>, vector<2x128xf32> -> vector<2x128xf32>
    %947 = arith.addf %944, %946 : vector<2x128xf32>
    %948 = vector.extract_strided_slice %947 {offsets = [0, 0], sizes = [2, 32], strides = [1, 1]} : vector<2x128xf32> to vector<2x32xf32>
    %949 = arith.negf %948 : vector<2x32xf32>
    %950 = math.exp %949 : vector<2x32xf32>
    %cst_144 = arith.constant 1.000000e+00 : f32
    %951 = vector.broadcast %cst_144 : f32 to vector<2x32xf32>
    %952 = arith.addf %951, %950 : vector<2x32xf32>
    %953 = arith.divf %951, %952 : vector<2x32xf32>
    %954 = vector.extract_strided_slice %947 {offsets = [0, 32], sizes = [2, 32], strides = [1, 1]} : vector<2x128xf32> to vector<2x32xf32>
    %955 = arith.negf %954 : vector<2x32xf32>
    %956 = math.exp %955 : vector<2x32xf32>
    %cst_145 = arith.constant 1.000000e+00 : f32
    %957 = vector.broadcast %cst_145 : f32 to vector<2x32xf32>
    %958 = arith.addf %957, %956 : vector<2x32xf32>
    %959 = arith.divf %957, %958 : vector<2x32xf32>
    %960 = vector.extract_strided_slice %947 {offsets = [0, 64], sizes = [2, 32], strides = [1, 1]} : vector<2x128xf32> to vector<2x32xf32>
    %961 = math.tanh %960 : vector<2x32xf32>
    %962 = vector.extract_strided_slice %947 {offsets = [0, 96], sizes = [2, 32], strides = [1, 1]} : vector<2x128xf32> to vector<2x32xf32>
    %963 = arith.negf %962 : vector<2x32xf32>
    %964 = math.exp %963 : vector<2x32xf32>
    %cst_146 = arith.constant 1.000000e+00 : f32
    %965 = vector.broadcast %cst_146 : f32 to vector<2x32xf32>
    %966 = arith.addf %965, %964 : vector<2x32xf32>
    %967 = arith.divf %965, %966 : vector<2x32xf32>
    %968 = arith.mulf %959, %932 : vector<2x32xf32>
    %969 = arith.mulf %953, %961 : vector<2x32xf32>
    %970 = arith.addf %968, %969 : vector<2x32xf32>
    %971 = math.tanh %970 : vector<2x32xf32>
    %972 = arith.mulf %967, %971 : vector<2x32xf32>
    %c5_i32_147 = arith.constant 5 : i32
    %973 = vector.broadcast %c5_i32_147 : i32 to vector<1x8x1xi32>
    %974 = arith.cmpi eq, %752, %973 : vector<1x8x1xi32>
    %975 = vector.shape_cast %972 : vector<2x32xf32> to vector<2x1x32xf32>
    %976 = vector.shape_cast %974 : vector<1x8x1xi1> to vector<1x8x1xi1>
    %977 = vector.broadcast %976 : vector<1x8x1xi1> to vector<2x8x32xi1>
    %978 = vector.shape_cast %975 : vector<2x1x32xf32> to vector<2x1x32xf32>
    %979 = vector.broadcast %978 : vector<2x1x32xf32> to vector<2x8x32xf32>
    %980 = arith.select %977, %979, %942 : vector<2x8x32xi1>, vector<2x8x32xf32>
    %981 = vector.extract_strided_slice %748 {offsets = [0, 6, 0], sizes = [2, 1, 128], strides = [1, 1, 1]} : vector<2x8x128xf32> to vector<2x1x128xf32>
    %982 = vector.shape_cast %981 : vector<2x1x128xf32> to vector<2x128xf32>
    %983 = arith.truncf %972 : vector<2x32xf32> to vector<2x32xbf16>
    %cst_148 = arith.constant dense<0.000000e+00> : vector<2x128xf32>
    %984 = tpu.matmul %983, %740, %cst_148 {dimension_numbers = #tpu.dot_dimension_numbers<[1], [0], [0], [1], [0, 0, 1, 1], [], []>} : vector<2x32xbf16>, vector<32x128xbf16>, vector<2x128xf32> -> vector<2x128xf32>
    %985 = arith.addf %982, %984 : vector<2x128xf32>
    %986 = vector.extract_strided_slice %985 {offsets = [0, 0], sizes = [2, 32], strides = [1, 1]} : vector<2x128xf32> to vector<2x32xf32>
    %987 = arith.negf %986 : vector<2x32xf32>
    %988 = math.exp %987 : vector<2x32xf32>
    %cst_149 = arith.constant 1.000000e+00 : f32
    %989 = vector.broadcast %cst_149 : f32 to vector<2x32xf32>
    %990 = arith.addf %989, %988 : vector<2x32xf32>
    %991 = arith.divf %989, %990 : vector<2x32xf32>
    %992 = vector.extract_strided_slice %985 {offsets = [0, 32], sizes = [2, 32], strides = [1, 1]} : vector<2x128xf32> to vector<2x32xf32>
    %993 = arith.negf %992 : vector<2x32xf32>
    %994 = math.exp %993 : vector<2x32xf32>
    %cst_150 = arith.constant 1.000000e+00 : f32
    %995 = vector.broadcast %cst_150 : f32 to vector<2x32xf32>
    %996 = arith.addf %995, %994 : vector<2x32xf32>
    %997 = arith.divf %995, %996 : vector<2x32xf32>
    %998 = vector.extract_strided_slice %985 {offsets = [0, 64], sizes = [2, 32], strides = [1, 1]} : vector<2x128xf32> to vector<2x32xf32>
    %999 = math.tanh %998 : vector<2x32xf32>
    %1000 = vector.extract_strided_slice %985 {offsets = [0, 96], sizes = [2, 32], strides = [1, 1]} : vector<2x128xf32> to vector<2x32xf32>
    %1001 = arith.negf %1000 : vector<2x32xf32>
    %1002 = math.exp %1001 : vector<2x32xf32>
    %cst_151 = arith.constant 1.000000e+00 : f32
    %1003 = vector.broadcast %cst_151 : f32 to vector<2x32xf32>
    %1004 = arith.addf %1003, %1002 : vector<2x32xf32>
    %1005 = arith.divf %1003, %1004 : vector<2x32xf32>
    %1006 = arith.mulf %997, %970 : vector<2x32xf32>
    %1007 = arith.mulf %991, %999 : vector<2x32xf32>
    %1008 = arith.addf %1006, %1007 : vector<2x32xf32>
    %1009 = math.tanh %1008 : vector<2x32xf32>
    %1010 = arith.mulf %1005, %1009 : vector<2x32xf32>
    %c6_i32_152 = arith.constant 6 : i32
    %1011 = vector.broadcast %c6_i32_152 : i32 to vector<1x8x1xi32>
    %1012 = arith.cmpi eq, %752, %1011 : vector<1x8x1xi32>
    %1013 = vector.shape_cast %1010 : vector<2x32xf32> to vector<2x1x32xf32>
    %1014 = vector.shape_cast %1012 : vector<1x8x1xi1> to vector<1x8x1xi1>
    %1015 = vector.broadcast %1014 : vector<1x8x1xi1> to vector<2x8x32xi1>
    %1016 = vector.shape_cast %1013 : vector<2x1x32xf32> to vector<2x1x32xf32>
    %1017 = vector.broadcast %1016 : vector<2x1x32xf32> to vector<2x8x32xf32>
    %1018 = arith.select %1015, %1017, %980 : vector<2x8x32xi1>, vector<2x8x32xf32>
    %1019 = vector.extract_strided_slice %748 {offsets = [0, 7, 0], sizes = [2, 1, 128], strides = [1, 1, 1]} : vector<2x8x128xf32> to vector<2x1x128xf32>
    %1020 = vector.shape_cast %1019 : vector<2x1x128xf32> to vector<2x128xf32>
    %1021 = arith.truncf %1010 : vector<2x32xf32> to vector<2x32xbf16>
    %cst_153 = arith.constant dense<0.000000e+00> : vector<2x128xf32>
    %1022 = tpu.matmul %1021, %740, %cst_153 {dimension_numbers = #tpu.dot_dimension_numbers<[1], [0], [0], [1], [0, 0, 1, 1], [], []>} : vector<2x32xbf16>, vector<32x128xbf16>, vector<2x128xf32> -> vector<2x128xf32>
    %1023 = arith.addf %1020, %1022 : vector<2x128xf32>
    %1024 = vector.extract_strided_slice %1023 {offsets = [0, 0], sizes = [2, 32], strides = [1, 1]} : vector<2x128xf32> to vector<2x32xf32>
    %1025 = arith.negf %1024 : vector<2x32xf32>
    %1026 = math.exp %1025 : vector<2x32xf32>
    %cst_154 = arith.constant 1.000000e+00 : f32
    %1027 = vector.broadcast %cst_154 : f32 to vector<2x32xf32>
    %1028 = arith.addf %1027, %1026 : vector<2x32xf32>
    %1029 = arith.divf %1027, %1028 : vector<2x32xf32>
    %1030 = vector.extract_strided_slice %1023 {offsets = [0, 32], sizes = [2, 32], strides = [1, 1]} : vector<2x128xf32> to vector<2x32xf32>
    %1031 = arith.negf %1030 : vector<2x32xf32>
    %1032 = math.exp %1031 : vector<2x32xf32>
    %cst_155 = arith.constant 1.000000e+00 : f32
    %1033 = vector.broadcast %cst_155 : f32 to vector<2x32xf32>
    %1034 = arith.addf %1033, %1032 : vector<2x32xf32>
    %1035 = arith.divf %1033, %1034 : vector<2x32xf32>
    %1036 = vector.extract_strided_slice %1023 {offsets = [0, 64], sizes = [2, 32], strides = [1, 1]} : vector<2x128xf32> to vector<2x32xf32>
    %1037 = math.tanh %1036 : vector<2x32xf32>
    %1038 = vector.extract_strided_slice %1023 {offsets = [0, 96], sizes = [2, 32], strides = [1, 1]} : vector<2x128xf32> to vector<2x32xf32>
    %1039 = arith.negf %1038 : vector<2x32xf32>
    %1040 = math.exp %1039 : vector<2x32xf32>
    %cst_156 = arith.constant 1.000000e+00 : f32
    %1041 = vector.broadcast %cst_156 : f32 to vector<2x32xf32>
    %1042 = arith.addf %1041, %1040 : vector<2x32xf32>
    %1043 = arith.divf %1041, %1042 : vector<2x32xf32>
    %1044 = arith.mulf %1035, %1008 : vector<2x32xf32>
    %1045 = arith.mulf %1029, %1037 : vector<2x32xf32>
    %1046 = arith.addf %1044, %1045 : vector<2x32xf32>
    %1047 = math.tanh %1046 : vector<2x32xf32>
    %1048 = arith.mulf %1043, %1047 : vector<2x32xf32>
    %c7_i32_157 = arith.constant 7 : i32
    %1049 = vector.broadcast %c7_i32_157 : i32 to vector<1x8x1xi32>
    %1050 = arith.cmpi eq, %752, %1049 : vector<1x8x1xi32>
    %1051 = vector.shape_cast %1048 : vector<2x32xf32> to vector<2x1x32xf32>
    %1052 = vector.shape_cast %1050 : vector<1x8x1xi1> to vector<1x8x1xi1>
    %1053 = vector.broadcast %1052 : vector<1x8x1xi1> to vector<2x8x32xi1>
    %1054 = vector.shape_cast %1051 : vector<2x1x32xf32> to vector<2x1x32xf32>
    %1055 = vector.broadcast %1054 : vector<2x1x32xf32> to vector<2x8x32xf32>
    %1056 = arith.select %1053, %1055, %1018 : vector<2x8x32xi1>, vector<2x8x32xf32>
    %c2_158 = arith.constant 2 : index
    %c0_159 = arith.constant 0 : index
    %c0_160 = arith.constant 0 : index
    %1057 = vector.load %arg5[%c2_158, %c0_159, %c0_160] : memref<3x32x32xbf16, #tpu.memory_space<vmem>>, vector<1x32x32xbf16>
    %1058 = vector.shape_cast %1057 : vector<1x32x32xbf16> to vector<32x32xbf16>
    %1059 = vector.extract_strided_slice %0 {offsets = [7, 0], sizes = [1, 32], strides = [1, 1]} : vector<18x128xf32> to vector<1x32xf32>
    %1060 = vector.extract_strided_slice %0 {offsets = [10, 0], sizes = [1, 32], strides = [1, 1]} : vector<18x128xf32> to vector<1x32xf32>
    %1061 = vector.shape_cast %1056 : vector<2x8x32xf32> to vector<16x32xf32>
    %1062 = arith.truncf %1061 : vector<16x32xf32> to vector<16x32xbf16>
    %cst_161 = arith.constant dense<0.000000e+00> : vector<16x32xf32>
    %1063 = tpu.matmul %1062, %1058, %cst_161 {dimension_numbers = #tpu.dot_dimension_numbers<[1], [0], [0], [1], [0, 0, 1, 1], [], []>} : vector<16x32xbf16>, vector<32x32xbf16>, vector<16x32xf32> -> vector<16x32xf32>
    %1064 = vector.broadcast %1059 : vector<1x32xf32> to vector<16x32xf32>
    %1065 = arith.addf %1063, %1064 : vector<16x32xf32>
    %1066 = math.tanh %1065 : vector<16x32xf32>
    %1067 = vector.shape_cast %1066 : vector<16x32xf32> to vector<2x8x32xf32>
    %1068 = vector.shape_cast %1060 : vector<1x32xf32> to vector<1x1x32xf32>
    %1069 = vector.broadcast %1068 : vector<1x1x32xf32> to vector<2x8x32xf32>
    %1070 = arith.mulf %1067, %1069 : vector<2x8x32xf32>
    %cst_162 = arith.constant dense<0.000000e+00> : vector<2x8xf32>
    %1071 = vector.multi_reduction <add>, %1070, %cst_162 [2] : vector<2x8x32xf32> to vector<2x8xf32>
    %cst_163 = arith.constant dense<0xFF800000> : vector<2xf32>
    %1072 = vector.multi_reduction <maximumf>, %1071, %cst_163 [1] : vector<2x8xf32> to vector<2xf32>
    %1073 = vector.shape_cast %1072 : vector<2xf32> to vector<2x1xf32>
    %1074 = vector.broadcast %1073 : vector<2x1xf32> to vector<2x8xf32>
    %1075 = arith.subf %1071, %1074 : vector<2x8xf32>
    %1076 = math.exp %1075 : vector<2x8xf32>
    %cst_164 = arith.constant dense<0.000000e+00> : vector<2xf32>
    %1077 = vector.multi_reduction <add>, %1076, %cst_164 [1] : vector<2x8xf32> to vector<2xf32>
    %1078 = vector.shape_cast %1077 : vector<2xf32> to vector<2x1xf32>
    %1079 = tpu.reciprocal %1078 {approx = true} : vector<2x1xf32> -> vector<2x1xf32>
    %1080 = vector.broadcast %1079 : vector<2x1xf32> to vector<2x8xf32>
    %1081 = arith.mulf %1076, %1080 : vector<2x8xf32>
    %1082 = vector.shape_cast %1081 : vector<2x8xf32> to vector<2x8x1xf32>
    %1083 = vector.broadcast %1082 : vector<2x8x1xf32> to vector<2x8x32xf32>
    %1084 = arith.mulf %1083, %1056 : vector<2x8x32xf32>
    %cst_165 = arith.constant dense<0.000000e+00> : vector<2x32xf32>
    %1085 = vector.multi_reduction <add>, %1084, %cst_165 [1] : vector<2x8x32xf32> to vector<2x32xf32>
    %c2_i32_166 = arith.constant 2 : i32
    %1086 = vector.broadcast %c2_i32_166 : i32 to vector<1x3x1xi32>
    %1087 = arith.cmpi eq, %16, %1086 : vector<1x3x1xi32>
    %1088 = vector.shape_cast %1085 : vector<2x32xf32> to vector<2x1x32xf32>
    %1089 = vector.shape_cast %1087 : vector<1x3x1xi1> to vector<1x3x1xi1>
    %1090 = vector.broadcast %1089 : vector<1x3x1xi1> to vector<2x3x32xi1>
    %1091 = vector.shape_cast %1088 : vector<2x1x32xf32> to vector<2x1x32xf32>
    %1092 = vector.broadcast %1091 : vector<2x1x32xf32> to vector<2x3x32xf32>
    %1093 = arith.select %1090, %1092, %734 : vector<2x3x32xi1>, vector<2x3x32xf32>
    %c0_167 = arith.constant 0 : index
    %c0_168 = arith.constant 0 : index
    %1094 = vector.load %arg6[%c0_167, %c0_168] : memref<64x128xbf16, #tpu.memory_space<vmem>>, vector<64x128xbf16>
    %1095 = vector.extract_strided_slice %1094 {offsets = [0, 0], sizes = [32, 128], strides = [1, 1]} : vector<64x128xbf16> to vector<32x128xbf16>
    %1096 = vector.extract_strided_slice %1094 {offsets = [32, 0], sizes = [32, 128], strides = [1, 1]} : vector<64x128xbf16> to vector<32x128xbf16>
    %1097 = vector.extract_strided_slice %0 {offsets = [3, 0], sizes = [1, 128], strides = [1, 1]} : vector<18x128xf32> to vector<1x128xf32>
    %1098 = vector.shape_cast %1093 : vector<2x3x32xf32> to vector<6x32xf32>
    %1099 = arith.truncf %1098 : vector<6x32xf32> to vector<6x32xbf16>
    %cst_169 = arith.constant dense<0.000000e+00> : vector<6x128xf32>
    %1100 = tpu.matmul %1099, %1095, %cst_169 {dimension_numbers = #tpu.dot_dimension_numbers<[1], [0], [0], [1], [0, 0, 1, 1], [], []>} : vector<6x32xbf16>, vector<32x128xbf16>, vector<6x128xf32> -> vector<6x128xf32>
    %1101 = vector.shape_cast %1100 : vector<6x128xf32> to vector<2x3x128xf32>
    %1102 = vector.shape_cast %1097 : vector<1x128xf32> to vector<1x1x128xf32>
    %1103 = vector.broadcast %1102 : vector<1x1x128xf32> to vector<2x3x128xf32>
    %1104 = arith.addf %1101, %1103 : vector<2x3x128xf32>
    %cst_170 = arith.constant 0.000000e+00 : f32
    %1105 = vector.broadcast %cst_170 : f32 to vector<2x32xf32>
    %cst_171 = arith.constant 0.000000e+00 : f32
    %1106 = vector.broadcast %cst_171 : f32 to vector<2x32xf32>
    %cst_172 = arith.constant 0.000000e+00 : f32
    %1107 = vector.broadcast %cst_172 : f32 to vector<2x3x32xf32>
    %1108 = tpu.iota {dimensions = array<i32: 1>} : vector<1x3x1xi32>
    %1109 = vector.extract_strided_slice %1104 {offsets = [0, 0, 0], sizes = [2, 1, 128], strides = [1, 1, 1]} : vector<2x3x128xf32> to vector<2x1x128xf32>
    %1110 = vector.shape_cast %1109 : vector<2x1x128xf32> to vector<2x128xf32>
    %1111 = arith.truncf %1105 : vector<2x32xf32> to vector<2x32xbf16>
    %cst_173 = arith.constant dense<0.000000e+00> : vector<2x128xf32>
    %1112 = tpu.matmul %1111, %1096, %cst_173 {dimension_numbers = #tpu.dot_dimension_numbers<[1], [0], [0], [1], [0, 0, 1, 1], [], []>} : vector<2x32xbf16>, vector<32x128xbf16>, vector<2x128xf32> -> vector<2x128xf32>
    %1113 = arith.addf %1110, %1112 : vector<2x128xf32>
    %1114 = vector.extract_strided_slice %1113 {offsets = [0, 0], sizes = [2, 32], strides = [1, 1]} : vector<2x128xf32> to vector<2x32xf32>
    %1115 = arith.negf %1114 : vector<2x32xf32>
    %1116 = math.exp %1115 : vector<2x32xf32>
    %cst_174 = arith.constant 1.000000e+00 : f32
    %1117 = vector.broadcast %cst_174 : f32 to vector<2x32xf32>
    %1118 = arith.addf %1117, %1116 : vector<2x32xf32>
    %1119 = arith.divf %1117, %1118 : vector<2x32xf32>
    %1120 = vector.extract_strided_slice %1113 {offsets = [0, 32], sizes = [2, 32], strides = [1, 1]} : vector<2x128xf32> to vector<2x32xf32>
    %1121 = arith.negf %1120 : vector<2x32xf32>
    %1122 = math.exp %1121 : vector<2x32xf32>
    %cst_175 = arith.constant 1.000000e+00 : f32
    %1123 = vector.broadcast %cst_175 : f32 to vector<2x32xf32>
    %1124 = arith.addf %1123, %1122 : vector<2x32xf32>
    %1125 = arith.divf %1123, %1124 : vector<2x32xf32>
    %1126 = vector.extract_strided_slice %1113 {offsets = [0, 64], sizes = [2, 32], strides = [1, 1]} : vector<2x128xf32> to vector<2x32xf32>
    %1127 = math.tanh %1126 : vector<2x32xf32>
    %1128 = vector.extract_strided_slice %1113 {offsets = [0, 96], sizes = [2, 32], strides = [1, 1]} : vector<2x128xf32> to vector<2x32xf32>
    %1129 = arith.negf %1128 : vector<2x32xf32>
    %1130 = math.exp %1129 : vector<2x32xf32>
    %cst_176 = arith.constant 1.000000e+00 : f32
    %1131 = vector.broadcast %cst_176 : f32 to vector<2x32xf32>
    %1132 = arith.addf %1131, %1130 : vector<2x32xf32>
    %1133 = arith.divf %1131, %1132 : vector<2x32xf32>
    %1134 = arith.mulf %1125, %1106 : vector<2x32xf32>
    %1135 = arith.mulf %1119, %1127 : vector<2x32xf32>
    %1136 = arith.addf %1134, %1135 : vector<2x32xf32>
    %1137 = math.tanh %1136 : vector<2x32xf32>
    %1138 = arith.mulf %1133, %1137 : vector<2x32xf32>
    %c0_i32_177 = arith.constant 0 : i32
    %1139 = vector.broadcast %c0_i32_177 : i32 to vector<1x3x1xi32>
    %1140 = arith.cmpi eq, %1108, %1139 : vector<1x3x1xi32>
    %1141 = vector.shape_cast %1138 : vector<2x32xf32> to vector<2x1x32xf32>
    %1142 = vector.shape_cast %1140 : vector<1x3x1xi1> to vector<1x3x1xi1>
    %1143 = vector.broadcast %1142 : vector<1x3x1xi1> to vector<2x3x32xi1>
    %1144 = vector.shape_cast %1141 : vector<2x1x32xf32> to vector<2x1x32xf32>
    %1145 = vector.broadcast %1144 : vector<2x1x32xf32> to vector<2x3x32xf32>
    %1146 = arith.select %1143, %1145, %1107 : vector<2x3x32xi1>, vector<2x3x32xf32>
    %1147 = vector.extract_strided_slice %1104 {offsets = [0, 1, 0], sizes = [2, 1, 128], strides = [1, 1, 1]} : vector<2x3x128xf32> to vector<2x1x128xf32>
    %1148 = vector.shape_cast %1147 : vector<2x1x128xf32> to vector<2x128xf32>
    %1149 = arith.truncf %1138 : vector<2x32xf32> to vector<2x32xbf16>
    %cst_178 = arith.constant dense<0.000000e+00> : vector<2x128xf32>
    %1150 = tpu.matmul %1149, %1096, %cst_178 {dimension_numbers = #tpu.dot_dimension_numbers<[1], [0], [0], [1], [0, 0, 1, 1], [], []>} : vector<2x32xbf16>, vector<32x128xbf16>, vector<2x128xf32> -> vector<2x128xf32>
    %1151 = arith.addf %1148, %1150 : vector<2x128xf32>
    %1152 = vector.extract_strided_slice %1151 {offsets = [0, 0], sizes = [2, 32], strides = [1, 1]} : vector<2x128xf32> to vector<2x32xf32>
    %1153 = arith.negf %1152 : vector<2x32xf32>
    %1154 = math.exp %1153 : vector<2x32xf32>
    %cst_179 = arith.constant 1.000000e+00 : f32
    %1155 = vector.broadcast %cst_179 : f32 to vector<2x32xf32>
    %1156 = arith.addf %1155, %1154 : vector<2x32xf32>
    %1157 = arith.divf %1155, %1156 : vector<2x32xf32>
    %1158 = vector.extract_strided_slice %1151 {offsets = [0, 32], sizes = [2, 32], strides = [1, 1]} : vector<2x128xf32> to vector<2x32xf32>
    %1159 = arith.negf %1158 : vector<2x32xf32>
    %1160 = math.exp %1159 : vector<2x32xf32>
    %cst_180 = arith.constant 1.000000e+00 : f32
    %1161 = vector.broadcast %cst_180 : f32 to vector<2x32xf32>
    %1162 = arith.addf %1161, %1160 : vector<2x32xf32>
    %1163 = arith.divf %1161, %1162 : vector<2x32xf32>
    %1164 = vector.extract_strided_slice %1151 {offsets = [0, 64], sizes = [2, 32], strides = [1, 1]} : vector<2x128xf32> to vector<2x32xf32>
    %1165 = math.tanh %1164 : vector<2x32xf32>
    %1166 = vector.extract_strided_slice %1151 {offsets = [0, 96], sizes = [2, 32], strides = [1, 1]} : vector<2x128xf32> to vector<2x32xf32>
    %1167 = arith.negf %1166 : vector<2x32xf32>
    %1168 = math.exp %1167 : vector<2x32xf32>
    %cst_181 = arith.constant 1.000000e+00 : f32
    %1169 = vector.broadcast %cst_181 : f32 to vector<2x32xf32>
    %1170 = arith.addf %1169, %1168 : vector<2x32xf32>
    %1171 = arith.divf %1169, %1170 : vector<2x32xf32>
    %1172 = arith.mulf %1163, %1136 : vector<2x32xf32>
    %1173 = arith.mulf %1157, %1165 : vector<2x32xf32>
    %1174 = arith.addf %1172, %1173 : vector<2x32xf32>
    %1175 = math.tanh %1174 : vector<2x32xf32>
    %1176 = arith.mulf %1171, %1175 : vector<2x32xf32>
    %c1_i32_182 = arith.constant 1 : i32
    %1177 = vector.broadcast %c1_i32_182 : i32 to vector<1x3x1xi32>
    %1178 = arith.cmpi eq, %1108, %1177 : vector<1x3x1xi32>
    %1179 = vector.shape_cast %1176 : vector<2x32xf32> to vector<2x1x32xf32>
    %1180 = vector.shape_cast %1178 : vector<1x3x1xi1> to vector<1x3x1xi1>
    %1181 = vector.broadcast %1180 : vector<1x3x1xi1> to vector<2x3x32xi1>
    %1182 = vector.shape_cast %1179 : vector<2x1x32xf32> to vector<2x1x32xf32>
    %1183 = vector.broadcast %1182 : vector<2x1x32xf32> to vector<2x3x32xf32>
    %1184 = arith.select %1181, %1183, %1146 : vector<2x3x32xi1>, vector<2x3x32xf32>
    %1185 = vector.extract_strided_slice %1104 {offsets = [0, 2, 0], sizes = [2, 1, 128], strides = [1, 1, 1]} : vector<2x3x128xf32> to vector<2x1x128xf32>
    %1186 = vector.shape_cast %1185 : vector<2x1x128xf32> to vector<2x128xf32>
    %1187 = arith.truncf %1176 : vector<2x32xf32> to vector<2x32xbf16>
    %cst_183 = arith.constant dense<0.000000e+00> : vector<2x128xf32>
    %1188 = tpu.matmul %1187, %1096, %cst_183 {dimension_numbers = #tpu.dot_dimension_numbers<[1], [0], [0], [1], [0, 0, 1, 1], [], []>} : vector<2x32xbf16>, vector<32x128xbf16>, vector<2x128xf32> -> vector<2x128xf32>
    %1189 = arith.addf %1186, %1188 : vector<2x128xf32>
    %1190 = vector.extract_strided_slice %1189 {offsets = [0, 0], sizes = [2, 32], strides = [1, 1]} : vector<2x128xf32> to vector<2x32xf32>
    %1191 = arith.negf %1190 : vector<2x32xf32>
    %1192 = math.exp %1191 : vector<2x32xf32>
    %cst_184 = arith.constant 1.000000e+00 : f32
    %1193 = vector.broadcast %cst_184 : f32 to vector<2x32xf32>
    %1194 = arith.addf %1193, %1192 : vector<2x32xf32>
    %1195 = arith.divf %1193, %1194 : vector<2x32xf32>
    %1196 = vector.extract_strided_slice %1189 {offsets = [0, 32], sizes = [2, 32], strides = [1, 1]} : vector<2x128xf32> to vector<2x32xf32>
    %1197 = arith.negf %1196 : vector<2x32xf32>
    %1198 = math.exp %1197 : vector<2x32xf32>
    %cst_185 = arith.constant 1.000000e+00 : f32
    %1199 = vector.broadcast %cst_185 : f32 to vector<2x32xf32>
    %1200 = arith.addf %1199, %1198 : vector<2x32xf32>
    %1201 = arith.divf %1199, %1200 : vector<2x32xf32>
    %1202 = vector.extract_strided_slice %1189 {offsets = [0, 64], sizes = [2, 32], strides = [1, 1]} : vector<2x128xf32> to vector<2x32xf32>
    %1203 = math.tanh %1202 : vector<2x32xf32>
    %1204 = vector.extract_strided_slice %1189 {offsets = [0, 96], sizes = [2, 32], strides = [1, 1]} : vector<2x128xf32> to vector<2x32xf32>
    %1205 = arith.negf %1204 : vector<2x32xf32>
    %1206 = math.exp %1205 : vector<2x32xf32>
    %cst_186 = arith.constant 1.000000e+00 : f32
    %1207 = vector.broadcast %cst_186 : f32 to vector<2x32xf32>
    %1208 = arith.addf %1207, %1206 : vector<2x32xf32>
    %1209 = arith.divf %1207, %1208 : vector<2x32xf32>
    %1210 = arith.mulf %1201, %1174 : vector<2x32xf32>
    %1211 = arith.mulf %1195, %1203 : vector<2x32xf32>
    %1212 = arith.addf %1210, %1211 : vector<2x32xf32>
    %1213 = math.tanh %1212 : vector<2x32xf32>
    %1214 = arith.mulf %1209, %1213 : vector<2x32xf32>
    %c2_i32_187 = arith.constant 2 : i32
    %1215 = vector.broadcast %c2_i32_187 : i32 to vector<1x3x1xi32>
    %1216 = arith.cmpi eq, %1108, %1215 : vector<1x3x1xi32>
    %1217 = vector.shape_cast %1214 : vector<2x32xf32> to vector<2x1x32xf32>
    %1218 = vector.shape_cast %1216 : vector<1x3x1xi1> to vector<1x3x1xi1>
    %1219 = vector.broadcast %1218 : vector<1x3x1xi1> to vector<2x3x32xi1>
    %1220 = vector.shape_cast %1217 : vector<2x1x32xf32> to vector<2x1x32xf32>
    %1221 = vector.broadcast %1220 : vector<2x1x32xf32> to vector<2x3x32xf32>
    %1222 = arith.select %1219, %1221, %1184 : vector<2x3x32xi1>, vector<2x3x32xf32>
    %c0_188 = arith.constant 0 : index
    %c0_189 = arith.constant 0 : index
    %1223 = vector.load %arg7[%c0_188, %c0_189] : memref<32x32xbf16, #tpu.memory_space<vmem>>, vector<32x32xbf16>
    %1224 = vector.extract_strided_slice %0 {offsets = [11, 0], sizes = [1, 32], strides = [1, 1]} : vector<18x128xf32> to vector<1x32xf32>
    %1225 = vector.extract_strided_slice %0 {offsets = [12, 0], sizes = [1, 32], strides = [1, 1]} : vector<18x128xf32> to vector<1x32xf32>
    %1226 = vector.shape_cast %1222 : vector<2x3x32xf32> to vector<6x32xf32>
    %1227 = arith.truncf %1226 : vector<6x32xf32> to vector<6x32xbf16>
    %cst_190 = arith.constant dense<0.000000e+00> : vector<6x32xf32>
    %1228 = tpu.matmul %1227, %1223, %cst_190 {dimension_numbers = #tpu.dot_dimension_numbers<[1], [0], [0], [1], [0, 0, 1, 1], [], []>} : vector<6x32xbf16>, vector<32x32xbf16>, vector<6x32xf32> -> vector<6x32xf32>
    %1229 = vector.broadcast %1224 : vector<1x32xf32> to vector<6x32xf32>
    %1230 = arith.addf %1228, %1229 : vector<6x32xf32>
    %1231 = math.tanh %1230 : vector<6x32xf32>
    %1232 = vector.shape_cast %1231 : vector<6x32xf32> to vector<2x3x32xf32>
    %1233 = vector.shape_cast %1225 : vector<1x32xf32> to vector<1x1x32xf32>
    %1234 = vector.broadcast %1233 : vector<1x1x32xf32> to vector<2x3x32xf32>
    %1235 = arith.mulf %1232, %1234 : vector<2x3x32xf32>
    %cst_191 = arith.constant dense<0.000000e+00> : vector<2x3xf32>
    %1236 = vector.multi_reduction <add>, %1235, %cst_191 [2] : vector<2x3x32xf32> to vector<2x3xf32>
    %cst_192 = arith.constant dense<0xFF800000> : vector<2xf32>
    %1237 = vector.multi_reduction <maximumf>, %1236, %cst_192 [1] : vector<2x3xf32> to vector<2xf32>
    %1238 = vector.shape_cast %1237 : vector<2xf32> to vector<2x1xf32>
    %1239 = vector.broadcast %1238 : vector<2x1xf32> to vector<2x3xf32>
    %1240 = arith.subf %1236, %1239 : vector<2x3xf32>
    %1241 = math.exp %1240 : vector<2x3xf32>
    %cst_193 = arith.constant dense<0.000000e+00> : vector<2xf32>
    %1242 = vector.multi_reduction <add>, %1241, %cst_193 [1] : vector<2x3xf32> to vector<2xf32>
    %1243 = vector.shape_cast %1242 : vector<2xf32> to vector<2x1xf32>
    %1244 = tpu.reciprocal %1243 {approx = true} : vector<2x1xf32> -> vector<2x1xf32>
    %1245 = vector.broadcast %1244 : vector<2x1xf32> to vector<2x3xf32>
    %1246 = arith.mulf %1241, %1245 : vector<2x3xf32>
    %1247 = vector.shape_cast %1246 : vector<2x3xf32> to vector<2x3x1xf32>
    %1248 = vector.broadcast %1247 : vector<2x3x1xf32> to vector<2x3x32xf32>
    %1249 = arith.mulf %1248, %1222 : vector<2x3x32xf32>
    %cst_194 = arith.constant dense<0.000000e+00> : vector<2x32xf32>
    %1250 = vector.multi_reduction <add>, %1249, %cst_194 [1] : vector<2x3x32xf32> to vector<2x32xf32>
    %c0_195 = arith.constant 0 : index
    %c0_196 = arith.constant 0 : index
    %1251 = vector.load %arg1[%c0_195, %c0_196] : memref<2x8xi32, #tpu.memory_space<vmem>>, vector<2x8xi32>
    %c0_197 = arith.constant 0 : index
    %c0_198 = arith.constant 0 : index
    %1252 = vector.load %arg3[%c0_197, %c0_198] : memref<40x16xbf16, #tpu.memory_space<vmem>>, vector<40x16xbf16>
    %1253 = tpu.iota {dimensions = array<i32: 2>} : vector<2x8x40xi32>
    %1254 = vector.shape_cast %1251 : vector<2x8xi32> to vector<2x8x1xi32>
    %1255 = vector.broadcast %1254 : vector<2x8x1xi32> to vector<2x8x40xi32>
    %1256 = arith.cmpi eq, %1253, %1255 : vector<2x8x40xi32>
    %cst_199 = arith.constant 1.000000e+00 : f32
    %cst_200 = arith.constant 0.000000e+00 : f32
    %1257 = vector.broadcast %cst_199 : f32 to vector<2x8x40xf32>
    %1258 = vector.broadcast %cst_200 : f32 to vector<2x8x40xf32>
    %1259 = arith.select %1256, %1257, %1258 : vector<2x8x40xi1>, vector<2x8x40xf32>
    %1260 = vector.shape_cast %1259 : vector<2x8x40xf32> to vector<16x40xf32>
    %1261 = arith.truncf %1260 : vector<16x40xf32> to vector<16x40xbf16>
    %cst_201 = arith.constant dense<0.000000e+00> : vector<16x16xf32>
    %1262 = tpu.matmul %1261, %1252, %cst_201 {dimension_numbers = #tpu.dot_dimension_numbers<[1], [0], [0], [1], [0, 0, 1, 1], [], []>} : vector<16x40xbf16>, vector<40x16xbf16>, vector<16x16xf32> -> vector<16x16xf32>
    %1263 = vector.shape_cast %1262 : vector<16x16xf32> to vector<2x8x16xf32>
    %c0_202 = arith.constant 0 : index
    %c0_203 = arith.constant 0 : index
    %1264 = vector.load %arg8[%c0_202, %c0_203] : memref<48x128xbf16, #tpu.memory_space<vmem>>, vector<48x128xbf16>
    %1265 = vector.extract_strided_slice %1264 {offsets = [0, 0], sizes = [16, 128], strides = [1, 1]} : vector<48x128xbf16> to vector<16x128xbf16>
    %1266 = vector.extract_strided_slice %1264 {offsets = [16, 0], sizes = [32, 128], strides = [1, 1]} : vector<48x128xbf16> to vector<32x128xbf16>
    %1267 = vector.extract_strided_slice %0 {offsets = [4, 0], sizes = [1, 128], strides = [1, 1]} : vector<18x128xf32> to vector<1x128xf32>
    %1268 = vector.shape_cast %1263 : vector<2x8x16xf32> to vector<16x16xf32>
    %1269 = arith.truncf %1268 : vector<16x16xf32> to vector<16x16xbf16>
    %cst_204 = arith.constant dense<0.000000e+00> : vector<16x128xf32>
    %1270 = tpu.matmul %1269, %1265, %cst_204 {dimension_numbers = #tpu.dot_dimension_numbers<[1], [0], [0], [1], [0, 0, 1, 1], [], []>} : vector<16x16xbf16>, vector<16x128xbf16>, vector<16x128xf32> -> vector<16x128xf32>
    %1271 = vector.shape_cast %1270 : vector<16x128xf32> to vector<2x8x128xf32>
    %1272 = vector.shape_cast %1267 : vector<1x128xf32> to vector<1x1x128xf32>
    %1273 = vector.broadcast %1272 : vector<1x1x128xf32> to vector<2x8x128xf32>
    %1274 = arith.addf %1271, %1273 : vector<2x8x128xf32>
    %cst_205 = arith.constant 0.000000e+00 : f32
    %1275 = vector.broadcast %cst_205 : f32 to vector<2x32xf32>
    %cst_206 = arith.constant 0.000000e+00 : f32
    %1276 = vector.broadcast %cst_206 : f32 to vector<2x32xf32>
    %cst_207 = arith.constant 0.000000e+00 : f32
    %1277 = vector.broadcast %cst_207 : f32 to vector<2x8x32xf32>
    %1278 = tpu.iota {dimensions = array<i32: 1>} : vector<1x8x1xi32>
    %1279 = vector.extract_strided_slice %1274 {offsets = [0, 0, 0], sizes = [2, 1, 128], strides = [1, 1, 1]} : vector<2x8x128xf32> to vector<2x1x128xf32>
    %1280 = vector.shape_cast %1279 : vector<2x1x128xf32> to vector<2x128xf32>
    %1281 = arith.truncf %1275 : vector<2x32xf32> to vector<2x32xbf16>
    %cst_208 = arith.constant dense<0.000000e+00> : vector<2x128xf32>
    %1282 = tpu.matmul %1281, %1266, %cst_208 {dimension_numbers = #tpu.dot_dimension_numbers<[1], [0], [0], [1], [0, 0, 1, 1], [], []>} : vector<2x32xbf16>, vector<32x128xbf16>, vector<2x128xf32> -> vector<2x128xf32>
    %1283 = arith.addf %1280, %1282 : vector<2x128xf32>
    %1284 = vector.extract_strided_slice %1283 {offsets = [0, 0], sizes = [2, 32], strides = [1, 1]} : vector<2x128xf32> to vector<2x32xf32>
    %1285 = arith.negf %1284 : vector<2x32xf32>
    %1286 = math.exp %1285 : vector<2x32xf32>
    %cst_209 = arith.constant 1.000000e+00 : f32
    %1287 = vector.broadcast %cst_209 : f32 to vector<2x32xf32>
    %1288 = arith.addf %1287, %1286 : vector<2x32xf32>
    %1289 = arith.divf %1287, %1288 : vector<2x32xf32>
    %1290 = vector.extract_strided_slice %1283 {offsets = [0, 32], sizes = [2, 32], strides = [1, 1]} : vector<2x128xf32> to vector<2x32xf32>
    %1291 = arith.negf %1290 : vector<2x32xf32>
    %1292 = math.exp %1291 : vector<2x32xf32>
    %cst_210 = arith.constant 1.000000e+00 : f32
    %1293 = vector.broadcast %cst_210 : f32 to vector<2x32xf32>
    %1294 = arith.addf %1293, %1292 : vector<2x32xf32>
    %1295 = arith.divf %1293, %1294 : vector<2x32xf32>
    %1296 = vector.extract_strided_slice %1283 {offsets = [0, 64], sizes = [2, 32], strides = [1, 1]} : vector<2x128xf32> to vector<2x32xf32>
    %1297 = math.tanh %1296 : vector<2x32xf32>
    %1298 = vector.extract_strided_slice %1283 {offsets = [0, 96], sizes = [2, 32], strides = [1, 1]} : vector<2x128xf32> to vector<2x32xf32>
    %1299 = arith.negf %1298 : vector<2x32xf32>
    %1300 = math.exp %1299 : vector<2x32xf32>
    %cst_211 = arith.constant 1.000000e+00 : f32
    %1301 = vector.broadcast %cst_211 : f32 to vector<2x32xf32>
    %1302 = arith.addf %1301, %1300 : vector<2x32xf32>
    %1303 = arith.divf %1301, %1302 : vector<2x32xf32>
    %1304 = arith.mulf %1295, %1276 : vector<2x32xf32>
    %1305 = arith.mulf %1289, %1297 : vector<2x32xf32>
    %1306 = arith.addf %1304, %1305 : vector<2x32xf32>
    %1307 = math.tanh %1306 : vector<2x32xf32>
    %1308 = arith.mulf %1303, %1307 : vector<2x32xf32>
    %c0_i32_212 = arith.constant 0 : i32
    %1309 = vector.broadcast %c0_i32_212 : i32 to vector<1x8x1xi32>
    %1310 = arith.cmpi eq, %1278, %1309 : vector<1x8x1xi32>
    %1311 = vector.shape_cast %1308 : vector<2x32xf32> to vector<2x1x32xf32>
    %1312 = vector.shape_cast %1310 : vector<1x8x1xi1> to vector<1x8x1xi1>
    %1313 = vector.broadcast %1312 : vector<1x8x1xi1> to vector<2x8x32xi1>
    %1314 = vector.shape_cast %1311 : vector<2x1x32xf32> to vector<2x1x32xf32>
    %1315 = vector.broadcast %1314 : vector<2x1x32xf32> to vector<2x8x32xf32>
    %1316 = arith.select %1313, %1315, %1277 : vector<2x8x32xi1>, vector<2x8x32xf32>
    %1317 = vector.extract_strided_slice %1274 {offsets = [0, 1, 0], sizes = [2, 1, 128], strides = [1, 1, 1]} : vector<2x8x128xf32> to vector<2x1x128xf32>
    %1318 = vector.shape_cast %1317 : vector<2x1x128xf32> to vector<2x128xf32>
    %1319 = arith.truncf %1308 : vector<2x32xf32> to vector<2x32xbf16>
    %cst_213 = arith.constant dense<0.000000e+00> : vector<2x128xf32>
    %1320 = tpu.matmul %1319, %1266, %cst_213 {dimension_numbers = #tpu.dot_dimension_numbers<[1], [0], [0], [1], [0, 0, 1, 1], [], []>} : vector<2x32xbf16>, vector<32x128xbf16>, vector<2x128xf32> -> vector<2x128xf32>
    %1321 = arith.addf %1318, %1320 : vector<2x128xf32>
    %1322 = vector.extract_strided_slice %1321 {offsets = [0, 0], sizes = [2, 32], strides = [1, 1]} : vector<2x128xf32> to vector<2x32xf32>
    %1323 = arith.negf %1322 : vector<2x32xf32>
    %1324 = math.exp %1323 : vector<2x32xf32>
    %cst_214 = arith.constant 1.000000e+00 : f32
    %1325 = vector.broadcast %cst_214 : f32 to vector<2x32xf32>
    %1326 = arith.addf %1325, %1324 : vector<2x32xf32>
    %1327 = arith.divf %1325, %1326 : vector<2x32xf32>
    %1328 = vector.extract_strided_slice %1321 {offsets = [0, 32], sizes = [2, 32], strides = [1, 1]} : vector<2x128xf32> to vector<2x32xf32>
    %1329 = arith.negf %1328 : vector<2x32xf32>
    %1330 = math.exp %1329 : vector<2x32xf32>
    %cst_215 = arith.constant 1.000000e+00 : f32
    %1331 = vector.broadcast %cst_215 : f32 to vector<2x32xf32>
    %1332 = arith.addf %1331, %1330 : vector<2x32xf32>
    %1333 = arith.divf %1331, %1332 : vector<2x32xf32>
    %1334 = vector.extract_strided_slice %1321 {offsets = [0, 64], sizes = [2, 32], strides = [1, 1]} : vector<2x128xf32> to vector<2x32xf32>
    %1335 = math.tanh %1334 : vector<2x32xf32>
    %1336 = vector.extract_strided_slice %1321 {offsets = [0, 96], sizes = [2, 32], strides = [1, 1]} : vector<2x128xf32> to vector<2x32xf32>
    %1337 = arith.negf %1336 : vector<2x32xf32>
    %1338 = math.exp %1337 : vector<2x32xf32>
    %cst_216 = arith.constant 1.000000e+00 : f32
    %1339 = vector.broadcast %cst_216 : f32 to vector<2x32xf32>
    %1340 = arith.addf %1339, %1338 : vector<2x32xf32>
    %1341 = arith.divf %1339, %1340 : vector<2x32xf32>
    %1342 = arith.mulf %1333, %1306 : vector<2x32xf32>
    %1343 = arith.mulf %1327, %1335 : vector<2x32xf32>
    %1344 = arith.addf %1342, %1343 : vector<2x32xf32>
    %1345 = math.tanh %1344 : vector<2x32xf32>
    %1346 = arith.mulf %1341, %1345 : vector<2x32xf32>
    %c1_i32_217 = arith.constant 1 : i32
    %1347 = vector.broadcast %c1_i32_217 : i32 to vector<1x8x1xi32>
    %1348 = arith.cmpi eq, %1278, %1347 : vector<1x8x1xi32>
    %1349 = vector.shape_cast %1346 : vector<2x32xf32> to vector<2x1x32xf32>
    %1350 = vector.shape_cast %1348 : vector<1x8x1xi1> to vector<1x8x1xi1>
    %1351 = vector.broadcast %1350 : vector<1x8x1xi1> to vector<2x8x32xi1>
    %1352 = vector.shape_cast %1349 : vector<2x1x32xf32> to vector<2x1x32xf32>
    %1353 = vector.broadcast %1352 : vector<2x1x32xf32> to vector<2x8x32xf32>
    %1354 = arith.select %1351, %1353, %1316 : vector<2x8x32xi1>, vector<2x8x32xf32>
    %1355 = vector.extract_strided_slice %1274 {offsets = [0, 2, 0], sizes = [2, 1, 128], strides = [1, 1, 1]} : vector<2x8x128xf32> to vector<2x1x128xf32>
    %1356 = vector.shape_cast %1355 : vector<2x1x128xf32> to vector<2x128xf32>
    %1357 = arith.truncf %1346 : vector<2x32xf32> to vector<2x32xbf16>
    %cst_218 = arith.constant dense<0.000000e+00> : vector<2x128xf32>
    %1358 = tpu.matmul %1357, %1266, %cst_218 {dimension_numbers = #tpu.dot_dimension_numbers<[1], [0], [0], [1], [0, 0, 1, 1], [], []>} : vector<2x32xbf16>, vector<32x128xbf16>, vector<2x128xf32> -> vector<2x128xf32>
    %1359 = arith.addf %1356, %1358 : vector<2x128xf32>
    %1360 = vector.extract_strided_slice %1359 {offsets = [0, 0], sizes = [2, 32], strides = [1, 1]} : vector<2x128xf32> to vector<2x32xf32>
    %1361 = arith.negf %1360 : vector<2x32xf32>
    %1362 = math.exp %1361 : vector<2x32xf32>
    %cst_219 = arith.constant 1.000000e+00 : f32
    %1363 = vector.broadcast %cst_219 : f32 to vector<2x32xf32>
    %1364 = arith.addf %1363, %1362 : vector<2x32xf32>
    %1365 = arith.divf %1363, %1364 : vector<2x32xf32>
    %1366 = vector.extract_strided_slice %1359 {offsets = [0, 32], sizes = [2, 32], strides = [1, 1]} : vector<2x128xf32> to vector<2x32xf32>
    %1367 = arith.negf %1366 : vector<2x32xf32>
    %1368 = math.exp %1367 : vector<2x32xf32>
    %cst_220 = arith.constant 1.000000e+00 : f32
    %1369 = vector.broadcast %cst_220 : f32 to vector<2x32xf32>
    %1370 = arith.addf %1369, %1368 : vector<2x32xf32>
    %1371 = arith.divf %1369, %1370 : vector<2x32xf32>
    %1372 = vector.extract_strided_slice %1359 {offsets = [0, 64], sizes = [2, 32], strides = [1, 1]} : vector<2x128xf32> to vector<2x32xf32>
    %1373 = math.tanh %1372 : vector<2x32xf32>
    %1374 = vector.extract_strided_slice %1359 {offsets = [0, 96], sizes = [2, 32], strides = [1, 1]} : vector<2x128xf32> to vector<2x32xf32>
    %1375 = arith.negf %1374 : vector<2x32xf32>
    %1376 = math.exp %1375 : vector<2x32xf32>
    %cst_221 = arith.constant 1.000000e+00 : f32
    %1377 = vector.broadcast %cst_221 : f32 to vector<2x32xf32>
    %1378 = arith.addf %1377, %1376 : vector<2x32xf32>
    %1379 = arith.divf %1377, %1378 : vector<2x32xf32>
    %1380 = arith.mulf %1371, %1344 : vector<2x32xf32>
    %1381 = arith.mulf %1365, %1373 : vector<2x32xf32>
    %1382 = arith.addf %1380, %1381 : vector<2x32xf32>
    %1383 = math.tanh %1382 : vector<2x32xf32>
    %1384 = arith.mulf %1379, %1383 : vector<2x32xf32>
    %c2_i32_222 = arith.constant 2 : i32
    %1385 = vector.broadcast %c2_i32_222 : i32 to vector<1x8x1xi32>
    %1386 = arith.cmpi eq, %1278, %1385 : vector<1x8x1xi32>
    %1387 = vector.shape_cast %1384 : vector<2x32xf32> to vector<2x1x32xf32>
    %1388 = vector.shape_cast %1386 : vector<1x8x1xi1> to vector<1x8x1xi1>
    %1389 = vector.broadcast %1388 : vector<1x8x1xi1> to vector<2x8x32xi1>
    %1390 = vector.shape_cast %1387 : vector<2x1x32xf32> to vector<2x1x32xf32>
    %1391 = vector.broadcast %1390 : vector<2x1x32xf32> to vector<2x8x32xf32>
    %1392 = arith.select %1389, %1391, %1354 : vector<2x8x32xi1>, vector<2x8x32xf32>
    %1393 = vector.extract_strided_slice %1274 {offsets = [0, 3, 0], sizes = [2, 1, 128], strides = [1, 1, 1]} : vector<2x8x128xf32> to vector<2x1x128xf32>
    %1394 = vector.shape_cast %1393 : vector<2x1x128xf32> to vector<2x128xf32>
    %1395 = arith.truncf %1384 : vector<2x32xf32> to vector<2x32xbf16>
    %cst_223 = arith.constant dense<0.000000e+00> : vector<2x128xf32>
    %1396 = tpu.matmul %1395, %1266, %cst_223 {dimension_numbers = #tpu.dot_dimension_numbers<[1], [0], [0], [1], [0, 0, 1, 1], [], []>} : vector<2x32xbf16>, vector<32x128xbf16>, vector<2x128xf32> -> vector<2x128xf32>
    %1397 = arith.addf %1394, %1396 : vector<2x128xf32>
    %1398 = vector.extract_strided_slice %1397 {offsets = [0, 0], sizes = [2, 32], strides = [1, 1]} : vector<2x128xf32> to vector<2x32xf32>
    %1399 = arith.negf %1398 : vector<2x32xf32>
    %1400 = math.exp %1399 : vector<2x32xf32>
    %cst_224 = arith.constant 1.000000e+00 : f32
    %1401 = vector.broadcast %cst_224 : f32 to vector<2x32xf32>
    %1402 = arith.addf %1401, %1400 : vector<2x32xf32>
    %1403 = arith.divf %1401, %1402 : vector<2x32xf32>
    %1404 = vector.extract_strided_slice %1397 {offsets = [0, 32], sizes = [2, 32], strides = [1, 1]} : vector<2x128xf32> to vector<2x32xf32>
    %1405 = arith.negf %1404 : vector<2x32xf32>
    %1406 = math.exp %1405 : vector<2x32xf32>
    %cst_225 = arith.constant 1.000000e+00 : f32
    %1407 = vector.broadcast %cst_225 : f32 to vector<2x32xf32>
    %1408 = arith.addf %1407, %1406 : vector<2x32xf32>
    %1409 = arith.divf %1407, %1408 : vector<2x32xf32>
    %1410 = vector.extract_strided_slice %1397 {offsets = [0, 64], sizes = [2, 32], strides = [1, 1]} : vector<2x128xf32> to vector<2x32xf32>
    %1411 = math.tanh %1410 : vector<2x32xf32>
    %1412 = vector.extract_strided_slice %1397 {offsets = [0, 96], sizes = [2, 32], strides = [1, 1]} : vector<2x128xf32> to vector<2x32xf32>
    %1413 = arith.negf %1412 : vector<2x32xf32>
    %1414 = math.exp %1413 : vector<2x32xf32>
    %cst_226 = arith.constant 1.000000e+00 : f32
    %1415 = vector.broadcast %cst_226 : f32 to vector<2x32xf32>
    %1416 = arith.addf %1415, %1414 : vector<2x32xf32>
    %1417 = arith.divf %1415, %1416 : vector<2x32xf32>
    %1418 = arith.mulf %1409, %1382 : vector<2x32xf32>
    %1419 = arith.mulf %1403, %1411 : vector<2x32xf32>
    %1420 = arith.addf %1418, %1419 : vector<2x32xf32>
    %1421 = math.tanh %1420 : vector<2x32xf32>
    %1422 = arith.mulf %1417, %1421 : vector<2x32xf32>
    %c3_i32_227 = arith.constant 3 : i32
    %1423 = vector.broadcast %c3_i32_227 : i32 to vector<1x8x1xi32>
    %1424 = arith.cmpi eq, %1278, %1423 : vector<1x8x1xi32>
    %1425 = vector.shape_cast %1422 : vector<2x32xf32> to vector<2x1x32xf32>
    %1426 = vector.shape_cast %1424 : vector<1x8x1xi1> to vector<1x8x1xi1>
    %1427 = vector.broadcast %1426 : vector<1x8x1xi1> to vector<2x8x32xi1>
    %1428 = vector.shape_cast %1425 : vector<2x1x32xf32> to vector<2x1x32xf32>
    %1429 = vector.broadcast %1428 : vector<2x1x32xf32> to vector<2x8x32xf32>
    %1430 = arith.select %1427, %1429, %1392 : vector<2x8x32xi1>, vector<2x8x32xf32>
    %1431 = vector.extract_strided_slice %1274 {offsets = [0, 4, 0], sizes = [2, 1, 128], strides = [1, 1, 1]} : vector<2x8x128xf32> to vector<2x1x128xf32>
    %1432 = vector.shape_cast %1431 : vector<2x1x128xf32> to vector<2x128xf32>
    %1433 = arith.truncf %1422 : vector<2x32xf32> to vector<2x32xbf16>
    %cst_228 = arith.constant dense<0.000000e+00> : vector<2x128xf32>
    %1434 = tpu.matmul %1433, %1266, %cst_228 {dimension_numbers = #tpu.dot_dimension_numbers<[1], [0], [0], [1], [0, 0, 1, 1], [], []>} : vector<2x32xbf16>, vector<32x128xbf16>, vector<2x128xf32> -> vector<2x128xf32>
    %1435 = arith.addf %1432, %1434 : vector<2x128xf32>
    %1436 = vector.extract_strided_slice %1435 {offsets = [0, 0], sizes = [2, 32], strides = [1, 1]} : vector<2x128xf32> to vector<2x32xf32>
    %1437 = arith.negf %1436 : vector<2x32xf32>
    %1438 = math.exp %1437 : vector<2x32xf32>
    %cst_229 = arith.constant 1.000000e+00 : f32
    %1439 = vector.broadcast %cst_229 : f32 to vector<2x32xf32>
    %1440 = arith.addf %1439, %1438 : vector<2x32xf32>
    %1441 = arith.divf %1439, %1440 : vector<2x32xf32>
    %1442 = vector.extract_strided_slice %1435 {offsets = [0, 32], sizes = [2, 32], strides = [1, 1]} : vector<2x128xf32> to vector<2x32xf32>
    %1443 = arith.negf %1442 : vector<2x32xf32>
    %1444 = math.exp %1443 : vector<2x32xf32>
    %cst_230 = arith.constant 1.000000e+00 : f32
    %1445 = vector.broadcast %cst_230 : f32 to vector<2x32xf32>
    %1446 = arith.addf %1445, %1444 : vector<2x32xf32>
    %1447 = arith.divf %1445, %1446 : vector<2x32xf32>
    %1448 = vector.extract_strided_slice %1435 {offsets = [0, 64], sizes = [2, 32], strides = [1, 1]} : vector<2x128xf32> to vector<2x32xf32>
    %1449 = math.tanh %1448 : vector<2x32xf32>
    %1450 = vector.extract_strided_slice %1435 {offsets = [0, 96], sizes = [2, 32], strides = [1, 1]} : vector<2x128xf32> to vector<2x32xf32>
    %1451 = arith.negf %1450 : vector<2x32xf32>
    %1452 = math.exp %1451 : vector<2x32xf32>
    %cst_231 = arith.constant 1.000000e+00 : f32
    %1453 = vector.broadcast %cst_231 : f32 to vector<2x32xf32>
    %1454 = arith.addf %1453, %1452 : vector<2x32xf32>
    %1455 = arith.divf %1453, %1454 : vector<2x32xf32>
    %1456 = arith.mulf %1447, %1420 : vector<2x32xf32>
    %1457 = arith.mulf %1441, %1449 : vector<2x32xf32>
    %1458 = arith.addf %1456, %1457 : vector<2x32xf32>
    %1459 = math.tanh %1458 : vector<2x32xf32>
    %1460 = arith.mulf %1455, %1459 : vector<2x32xf32>
    %c4_i32_232 = arith.constant 4 : i32
    %1461 = vector.broadcast %c4_i32_232 : i32 to vector<1x8x1xi32>
    %1462 = arith.cmpi eq, %1278, %1461 : vector<1x8x1xi32>
    %1463 = vector.shape_cast %1460 : vector<2x32xf32> to vector<2x1x32xf32>
    %1464 = vector.shape_cast %1462 : vector<1x8x1xi1> to vector<1x8x1xi1>
    %1465 = vector.broadcast %1464 : vector<1x8x1xi1> to vector<2x8x32xi1>
    %1466 = vector.shape_cast %1463 : vector<2x1x32xf32> to vector<2x1x32xf32>
    %1467 = vector.broadcast %1466 : vector<2x1x32xf32> to vector<2x8x32xf32>
    %1468 = arith.select %1465, %1467, %1430 : vector<2x8x32xi1>, vector<2x8x32xf32>
    %1469 = vector.extract_strided_slice %1274 {offsets = [0, 5, 0], sizes = [2, 1, 128], strides = [1, 1, 1]} : vector<2x8x128xf32> to vector<2x1x128xf32>
    %1470 = vector.shape_cast %1469 : vector<2x1x128xf32> to vector<2x128xf32>
    %1471 = arith.truncf %1460 : vector<2x32xf32> to vector<2x32xbf16>
    %cst_233 = arith.constant dense<0.000000e+00> : vector<2x128xf32>
    %1472 = tpu.matmul %1471, %1266, %cst_233 {dimension_numbers = #tpu.dot_dimension_numbers<[1], [0], [0], [1], [0, 0, 1, 1], [], []>} : vector<2x32xbf16>, vector<32x128xbf16>, vector<2x128xf32> -> vector<2x128xf32>
    %1473 = arith.addf %1470, %1472 : vector<2x128xf32>
    %1474 = vector.extract_strided_slice %1473 {offsets = [0, 0], sizes = [2, 32], strides = [1, 1]} : vector<2x128xf32> to vector<2x32xf32>
    %1475 = arith.negf %1474 : vector<2x32xf32>
    %1476 = math.exp %1475 : vector<2x32xf32>
    %cst_234 = arith.constant 1.000000e+00 : f32
    %1477 = vector.broadcast %cst_234 : f32 to vector<2x32xf32>
    %1478 = arith.addf %1477, %1476 : vector<2x32xf32>
    %1479 = arith.divf %1477, %1478 : vector<2x32xf32>
    %1480 = vector.extract_strided_slice %1473 {offsets = [0, 32], sizes = [2, 32], strides = [1, 1]} : vector<2x128xf32> to vector<2x32xf32>
    %1481 = arith.negf %1480 : vector<2x32xf32>
    %1482 = math.exp %1481 : vector<2x32xf32>
    %cst_235 = arith.constant 1.000000e+00 : f32
    %1483 = vector.broadcast %cst_235 : f32 to vector<2x32xf32>
    %1484 = arith.addf %1483, %1482 : vector<2x32xf32>
    %1485 = arith.divf %1483, %1484 : vector<2x32xf32>
    %1486 = vector.extract_strided_slice %1473 {offsets = [0, 64], sizes = [2, 32], strides = [1, 1]} : vector<2x128xf32> to vector<2x32xf32>
    %1487 = math.tanh %1486 : vector<2x32xf32>
    %1488 = vector.extract_strided_slice %1473 {offsets = [0, 96], sizes = [2, 32], strides = [1, 1]} : vector<2x128xf32> to vector<2x32xf32>
    %1489 = arith.negf %1488 : vector<2x32xf32>
    %1490 = math.exp %1489 : vector<2x32xf32>
    %cst_236 = arith.constant 1.000000e+00 : f32
    %1491 = vector.broadcast %cst_236 : f32 to vector<2x32xf32>
    %1492 = arith.addf %1491, %1490 : vector<2x32xf32>
    %1493 = arith.divf %1491, %1492 : vector<2x32xf32>
    %1494 = arith.mulf %1485, %1458 : vector<2x32xf32>
    %1495 = arith.mulf %1479, %1487 : vector<2x32xf32>
    %1496 = arith.addf %1494, %1495 : vector<2x32xf32>
    %1497 = math.tanh %1496 : vector<2x32xf32>
    %1498 = arith.mulf %1493, %1497 : vector<2x32xf32>
    %c5_i32_237 = arith.constant 5 : i32
    %1499 = vector.broadcast %c5_i32_237 : i32 to vector<1x8x1xi32>
    %1500 = arith.cmpi eq, %1278, %1499 : vector<1x8x1xi32>
    %1501 = vector.shape_cast %1498 : vector<2x32xf32> to vector<2x1x32xf32>
    %1502 = vector.shape_cast %1500 : vector<1x8x1xi1> to vector<1x8x1xi1>
    %1503 = vector.broadcast %1502 : vector<1x8x1xi1> to vector<2x8x32xi1>
    %1504 = vector.shape_cast %1501 : vector<2x1x32xf32> to vector<2x1x32xf32>
    %1505 = vector.broadcast %1504 : vector<2x1x32xf32> to vector<2x8x32xf32>
    %1506 = arith.select %1503, %1505, %1468 : vector<2x8x32xi1>, vector<2x8x32xf32>
    %1507 = vector.extract_strided_slice %1274 {offsets = [0, 6, 0], sizes = [2, 1, 128], strides = [1, 1, 1]} : vector<2x8x128xf32> to vector<2x1x128xf32>
    %1508 = vector.shape_cast %1507 : vector<2x1x128xf32> to vector<2x128xf32>
    %1509 = arith.truncf %1498 : vector<2x32xf32> to vector<2x32xbf16>
    %cst_238 = arith.constant dense<0.000000e+00> : vector<2x128xf32>
    %1510 = tpu.matmul %1509, %1266, %cst_238 {dimension_numbers = #tpu.dot_dimension_numbers<[1], [0], [0], [1], [0, 0, 1, 1], [], []>} : vector<2x32xbf16>, vector<32x128xbf16>, vector<2x128xf32> -> vector<2x128xf32>
    %1511 = arith.addf %1508, %1510 : vector<2x128xf32>
    %1512 = vector.extract_strided_slice %1511 {offsets = [0, 0], sizes = [2, 32], strides = [1, 1]} : vector<2x128xf32> to vector<2x32xf32>
    %1513 = arith.negf %1512 : vector<2x32xf32>
    %1514 = math.exp %1513 : vector<2x32xf32>
    %cst_239 = arith.constant 1.000000e+00 : f32
    %1515 = vector.broadcast %cst_239 : f32 to vector<2x32xf32>
    %1516 = arith.addf %1515, %1514 : vector<2x32xf32>
    %1517 = arith.divf %1515, %1516 : vector<2x32xf32>
    %1518 = vector.extract_strided_slice %1511 {offsets = [0, 32], sizes = [2, 32], strides = [1, 1]} : vector<2x128xf32> to vector<2x32xf32>
    %1519 = arith.negf %1518 : vector<2x32xf32>
    %1520 = math.exp %1519 : vector<2x32xf32>
    %cst_240 = arith.constant 1.000000e+00 : f32
    %1521 = vector.broadcast %cst_240 : f32 to vector<2x32xf32>
    %1522 = arith.addf %1521, %1520 : vector<2x32xf32>
    %1523 = arith.divf %1521, %1522 : vector<2x32xf32>
    %1524 = vector.extract_strided_slice %1511 {offsets = [0, 64], sizes = [2, 32], strides = [1, 1]} : vector<2x128xf32> to vector<2x32xf32>
    %1525 = math.tanh %1524 : vector<2x32xf32>
    %1526 = vector.extract_strided_slice %1511 {offsets = [0, 96], sizes = [2, 32], strides = [1, 1]} : vector<2x128xf32> to vector<2x32xf32>
    %1527 = arith.negf %1526 : vector<2x32xf32>
    %1528 = math.exp %1527 : vector<2x32xf32>
    %cst_241 = arith.constant 1.000000e+00 : f32
    %1529 = vector.broadcast %cst_241 : f32 to vector<2x32xf32>
    %1530 = arith.addf %1529, %1528 : vector<2x32xf32>
    %1531 = arith.divf %1529, %1530 : vector<2x32xf32>
    %1532 = arith.mulf %1523, %1496 : vector<2x32xf32>
    %1533 = arith.mulf %1517, %1525 : vector<2x32xf32>
    %1534 = arith.addf %1532, %1533 : vector<2x32xf32>
    %1535 = math.tanh %1534 : vector<2x32xf32>
    %1536 = arith.mulf %1531, %1535 : vector<2x32xf32>
    %c6_i32_242 = arith.constant 6 : i32
    %1537 = vector.broadcast %c6_i32_242 : i32 to vector<1x8x1xi32>
    %1538 = arith.cmpi eq, %1278, %1537 : vector<1x8x1xi32>
    %1539 = vector.shape_cast %1536 : vector<2x32xf32> to vector<2x1x32xf32>
    %1540 = vector.shape_cast %1538 : vector<1x8x1xi1> to vector<1x8x1xi1>
    %1541 = vector.broadcast %1540 : vector<1x8x1xi1> to vector<2x8x32xi1>
    %1542 = vector.shape_cast %1539 : vector<2x1x32xf32> to vector<2x1x32xf32>
    %1543 = vector.broadcast %1542 : vector<2x1x32xf32> to vector<2x8x32xf32>
    %1544 = arith.select %1541, %1543, %1506 : vector<2x8x32xi1>, vector<2x8x32xf32>
    %1545 = vector.extract_strided_slice %1274 {offsets = [0, 7, 0], sizes = [2, 1, 128], strides = [1, 1, 1]} : vector<2x8x128xf32> to vector<2x1x128xf32>
    %1546 = vector.shape_cast %1545 : vector<2x1x128xf32> to vector<2x128xf32>
    %1547 = arith.truncf %1536 : vector<2x32xf32> to vector<2x32xbf16>
    %cst_243 = arith.constant dense<0.000000e+00> : vector<2x128xf32>
    %1548 = tpu.matmul %1547, %1266, %cst_243 {dimension_numbers = #tpu.dot_dimension_numbers<[1], [0], [0], [1], [0, 0, 1, 1], [], []>} : vector<2x32xbf16>, vector<32x128xbf16>, vector<2x128xf32> -> vector<2x128xf32>
    %1549 = arith.addf %1546, %1548 : vector<2x128xf32>
    %1550 = vector.extract_strided_slice %1549 {offsets = [0, 0], sizes = [2, 32], strides = [1, 1]} : vector<2x128xf32> to vector<2x32xf32>
    %1551 = arith.negf %1550 : vector<2x32xf32>
    %1552 = math.exp %1551 : vector<2x32xf32>
    %cst_244 = arith.constant 1.000000e+00 : f32
    %1553 = vector.broadcast %cst_244 : f32 to vector<2x32xf32>
    %1554 = arith.addf %1553, %1552 : vector<2x32xf32>
    %1555 = arith.divf %1553, %1554 : vector<2x32xf32>
    %1556 = vector.extract_strided_slice %1549 {offsets = [0, 32], sizes = [2, 32], strides = [1, 1]} : vector<2x128xf32> to vector<2x32xf32>
    %1557 = arith.negf %1556 : vector<2x32xf32>
    %1558 = math.exp %1557 : vector<2x32xf32>
    %cst_245 = arith.constant 1.000000e+00 : f32
    %1559 = vector.broadcast %cst_245 : f32 to vector<2x32xf32>
    %1560 = arith.addf %1559, %1558 : vector<2x32xf32>
    %1561 = arith.divf %1559, %1560 : vector<2x32xf32>
    %1562 = vector.extract_strided_slice %1549 {offsets = [0, 64], sizes = [2, 32], strides = [1, 1]} : vector<2x128xf32> to vector<2x32xf32>
    %1563 = math.tanh %1562 : vector<2x32xf32>
    %1564 = vector.extract_strided_slice %1549 {offsets = [0, 96], sizes = [2, 32], strides = [1, 1]} : vector<2x128xf32> to vector<2x32xf32>
    %1565 = arith.negf %1564 : vector<2x32xf32>
    %1566 = math.exp %1565 : vector<2x32xf32>
    %cst_246 = arith.constant 1.000000e+00 : f32
    %1567 = vector.broadcast %cst_246 : f32 to vector<2x32xf32>
    %1568 = arith.addf %1567, %1566 : vector<2x32xf32>
    %1569 = arith.divf %1567, %1568 : vector<2x32xf32>
    %1570 = arith.mulf %1561, %1534 : vector<2x32xf32>
    %1571 = arith.mulf %1555, %1563 : vector<2x32xf32>
    %1572 = arith.addf %1570, %1571 : vector<2x32xf32>
    %1573 = math.tanh %1572 : vector<2x32xf32>
    %1574 = arith.mulf %1569, %1573 : vector<2x32xf32>
    %c7_i32_247 = arith.constant 7 : i32
    %1575 = vector.broadcast %c7_i32_247 : i32 to vector<1x8x1xi32>
    %1576 = arith.cmpi eq, %1278, %1575 : vector<1x8x1xi32>
    %1577 = vector.shape_cast %1574 : vector<2x32xf32> to vector<2x1x32xf32>
    %1578 = vector.shape_cast %1576 : vector<1x8x1xi1> to vector<1x8x1xi1>
    %1579 = vector.broadcast %1578 : vector<1x8x1xi1> to vector<2x8x32xi1>
    %1580 = vector.shape_cast %1577 : vector<2x1x32xf32> to vector<2x1x32xf32>
    %1581 = vector.broadcast %1580 : vector<2x1x32xf32> to vector<2x8x32xf32>
    %1582 = arith.select %1579, %1581, %1544 : vector<2x8x32xi1>, vector<2x8x32xf32>
    %c0_248 = arith.constant 0 : index
    %c0_249 = arith.constant 0 : index
    %1583 = vector.load %arg9[%c0_248, %c0_249] : memref<32x32xbf16, #tpu.memory_space<vmem>>, vector<32x32xbf16>
    %1584 = vector.extract_strided_slice %0 {offsets = [13, 0], sizes = [1, 32], strides = [1, 1]} : vector<18x128xf32> to vector<1x32xf32>
    %1585 = vector.extract_strided_slice %0 {offsets = [14, 0], sizes = [1, 32], strides = [1, 1]} : vector<18x128xf32> to vector<1x32xf32>
    %1586 = vector.shape_cast %1582 : vector<2x8x32xf32> to vector<16x32xf32>
    %1587 = arith.truncf %1586 : vector<16x32xf32> to vector<16x32xbf16>
    %cst_250 = arith.constant dense<0.000000e+00> : vector<16x32xf32>
    %1588 = tpu.matmul %1587, %1583, %cst_250 {dimension_numbers = #tpu.dot_dimension_numbers<[1], [0], [0], [1], [0, 0, 1, 1], [], []>} : vector<16x32xbf16>, vector<32x32xbf16>, vector<16x32xf32> -> vector<16x32xf32>
    %1589 = vector.broadcast %1584 : vector<1x32xf32> to vector<16x32xf32>
    %1590 = arith.addf %1588, %1589 : vector<16x32xf32>
    %1591 = math.tanh %1590 : vector<16x32xf32>
    %1592 = vector.shape_cast %1591 : vector<16x32xf32> to vector<2x8x32xf32>
    %1593 = vector.shape_cast %1585 : vector<1x32xf32> to vector<1x1x32xf32>
    %1594 = vector.broadcast %1593 : vector<1x1x32xf32> to vector<2x8x32xf32>
    %1595 = arith.mulf %1592, %1594 : vector<2x8x32xf32>
    %cst_251 = arith.constant dense<0.000000e+00> : vector<2x8xf32>
    %1596 = vector.multi_reduction <add>, %1595, %cst_251 [2] : vector<2x8x32xf32> to vector<2x8xf32>
    %cst_252 = arith.constant dense<0xFF800000> : vector<2xf32>
    %1597 = vector.multi_reduction <maximumf>, %1596, %cst_252 [1] : vector<2x8xf32> to vector<2xf32>
    %1598 = vector.shape_cast %1597 : vector<2xf32> to vector<2x1xf32>
    %1599 = vector.broadcast %1598 : vector<2x1xf32> to vector<2x8xf32>
    %1600 = arith.subf %1596, %1599 : vector<2x8xf32>
    %1601 = math.exp %1600 : vector<2x8xf32>
    %cst_253 = arith.constant dense<0.000000e+00> : vector<2xf32>
    %1602 = vector.multi_reduction <add>, %1601, %cst_253 [1] : vector<2x8xf32> to vector<2xf32>
    %1603 = vector.shape_cast %1602 : vector<2xf32> to vector<2x1xf32>
    %1604 = tpu.reciprocal %1603 {approx = true} : vector<2x1xf32> -> vector<2x1xf32>
    %1605 = vector.broadcast %1604 : vector<2x1xf32> to vector<2x8xf32>
    %1606 = arith.mulf %1601, %1605 : vector<2x8xf32>
    %1607 = vector.shape_cast %1606 : vector<2x8xf32> to vector<2x8x1xf32>
    %1608 = vector.broadcast %1607 : vector<2x8x1xf32> to vector<2x8x32xf32>
    %1609 = arith.mulf %1608, %1582 : vector<2x8x32xf32>
    %cst_254 = arith.constant dense<0.000000e+00> : vector<2x32xf32>
    %1610 = vector.multi_reduction <add>, %1609, %cst_254 [1] : vector<2x8x32xf32> to vector<2x32xf32>
    %c0_255 = arith.constant 0 : index
    %c0_256 = arith.constant 0 : index
    %1611 = vector.load %arg10[%c0_255, %c0_256] : memref<64x32xbf16, #tpu.memory_space<vmem>>, vector<64x32xbf16>
    %1612 = arith.truncf %1250 : vector<2x32xf32> to vector<2x32xbf16>
    %1613 = vector.extract_strided_slice %1611 {offsets = [0, 0], sizes = [32, 32], strides = [1, 1]} : vector<64x32xbf16> to vector<32x32xbf16>
    %cst_257 = arith.constant dense<0.000000e+00> : vector<2x32xf32>
    %1614 = tpu.matmul %1612, %1613, %cst_257 {dimension_numbers = #tpu.dot_dimension_numbers<[1], [0], [0], [1], [0, 0, 1, 1], [], []>} : vector<2x32xbf16>, vector<32x32xbf16>, vector<2x32xf32> -> vector<2x32xf32>
    %1615 = arith.truncf %1610 : vector<2x32xf32> to vector<2x32xbf16>
    %1616 = vector.extract_strided_slice %1611 {offsets = [32, 0], sizes = [32, 32], strides = [1, 1]} : vector<64x32xbf16> to vector<32x32xbf16>
    %cst_258 = arith.constant dense<0.000000e+00> : vector<2x32xf32>
    %1617 = tpu.matmul %1615, %1616, %cst_258 {dimension_numbers = #tpu.dot_dimension_numbers<[1], [0], [0], [1], [0, 0, 1, 1], [], []>} : vector<2x32xbf16>, vector<32x32xbf16>, vector<2x32xf32> -> vector<2x32xf32>
    %1618 = arith.addf %1614, %1617 : vector<2x32xf32>
    %1619 = vector.extract_strided_slice %0 {offsets = [15, 0], sizes = [1, 32], strides = [1, 1]} : vector<18x128xf32> to vector<1x32xf32>
    %1620 = vector.broadcast %1619 : vector<1x32xf32> to vector<2x32xf32>
    %1621 = arith.addf %1618, %1620 : vector<2x32xf32>
    %cst_259 = arith.constant 0.000000e+00 : f32
    %1622 = vector.broadcast %cst_259 : f32 to vector<2x32xf32>
    %1623 = arith.maximumf %1621, %1622 : vector<2x32xf32>
    %1624 = arith.truncf %1623 : vector<2x32xf32> to vector<2x32xbf16>
    %c0_260 = arith.constant 0 : index
    %c0_261 = arith.constant 0 : index
    %1625 = vector.load %arg11[%c0_260, %c0_261] : memref<32x16xbf16, #tpu.memory_space<vmem>>, vector<32x16xbf16>
    %cst_262 = arith.constant dense<0.000000e+00> : vector<2x16xf32>
    %1626 = tpu.matmul %1624, %1625, %cst_262 {dimension_numbers = #tpu.dot_dimension_numbers<[1], [0], [0], [1], [0, 0, 1, 1], [], []>} : vector<2x32xbf16>, vector<32x16xbf16>, vector<2x16xf32> -> vector<2x16xf32>
    %1627 = vector.extract_strided_slice %0 {offsets = [16, 0], sizes = [1, 16], strides = [1, 1]} : vector<18x128xf32> to vector<1x16xf32>
    %1628 = vector.broadcast %1627 : vector<1x16xf32> to vector<2x16xf32>
    %1629 = arith.addf %1626, %1628 : vector<2x16xf32>
    %cst_263 = arith.constant 0.000000e+00 : f32
    %1630 = vector.broadcast %cst_263 : f32 to vector<2x16xf32>
    %1631 = arith.maximumf %1629, %1630 : vector<2x16xf32>
    %1632 = arith.truncf %1631 : vector<2x16xf32> to vector<2x16xbf16>
    %c0_264 = arith.constant 0 : index
    %c0_265 = arith.constant 0 : index
    %1633 = vector.load %arg12[%c0_264, %c0_265] : memref<16x4xbf16, #tpu.memory_space<vmem>>, vector<16x4xbf16>
    %cst_266 = arith.constant dense<0.000000e+00> : vector<2x4xf32>
    %1634 = tpu.matmul %1632, %1633, %cst_266 {dimension_numbers = #tpu.dot_dimension_numbers<[1], [0], [0], [1], [0, 0, 1, 1], [], []>} : vector<2x16xbf16>, vector<16x4xbf16>, vector<2x4xf32> -> vector<2x4xf32>
    %1635 = vector.extract_strided_slice %0 {offsets = [17, 0], sizes = [1, 4], strides = [1, 1]} : vector<18x128xf32> to vector<1x4xf32>
    %1636 = vector.broadcast %1635 : vector<1x4xf32> to vector<2x4xf32>
    %1637 = arith.addf %1634, %1636 : vector<2x4xf32>
    %c0_267 = arith.constant 0 : index
    %c0_268 = arith.constant 0 : index
    %1638 = vector.load %arg14[%c0_267, %c0_268] : memref<2x4xf32, #tpu.memory_space<vmem>>, vector<2x4xf32>
    tpu.vector_store %arg14[%c0_267, %c0_268], %1637 {strides = array<i32>} : memref<2x4xf32, #tpu.memory_space<vmem>>, vector<2x4xf32>,
    return
  }
}

</mosaic_0001>

<bundles_post_ra>
// kernel: han_lstm_forward.1
= control target key start
LH: loop header
LB: loop body
LE: loop exit
PB: predicated region body
PF: predicated region fallthrough
CT: control target
= control target key end

     0   :  { %19 = vsyncpa [#allocation3], 0  ;;  %s10170_s0 = inlined_call_operand.vmem [shape: s32[2,3,8], index: 0, kind: input, shape index: {}]   ;;  %s10171_s1 = inlined_call_operand.vmem [shape: s32[2,8], index: 1, kind: input, shape index: {}]   ;;  %s10172_s2 = inlined_call_operand.vmem [shape: bf16[50,16], index: 2, kind: input, shape index: {}]   ;;  %s10173_s3 = inlined_call_operand.vmem [shape: bf16[40,16], index: 3, kind: input, shape index: {}]   ;;  %s10174_s4 = inlined_call_operand.vmem [shape: bf16[3,48,128], index: 4, kind: input, shape index: {}]   ;;  %s10175_s5 = inlined_call_operand.vmem [shape: bf16[3,32,32], index: 5, kind: input, shape index: {}]   ;;  %s10176_s6 = inlined_call_operand.vmem [shape: bf16[64,128], index: 6, kind: input, shape index: {}]   ;;  %s10177_s7 = inlined_call_operand.hbm [shape: bf16[32,32], index: 7, kind: input, shape index: {}]   ;;  %s10178_s8 = inlined_call_operand.vmem [shape: bf16[48,128], index: 8, kind: input, shape index: {}]   ;;  %s10179_s9 = inlined_call_operand.hbm [shape: bf16[32,32], index: 9, kind: input, shape index: {}]   ;;  %s10180_s10 = inlined_call_operand.vmem [shape: bf16[64,32], index: 10, kind: input, shape index: {}]   ;;  %s10181_s11 = inlined_call_operand.vmem [shape: bf16[32,16], index: 11, kind: input, shape index: {}]   ;;  %s10182_s12 = inlined_call_operand.vmem [shape: bf16[16,4], index: 12, kind: input, shape index: {}]   ;;  %s10183_s13 = inlined_call_operand.hbm [shape: f32[18,128], index: 13, kind: input, shape index: {}]   ;;  %s10184_s14 = inlined_call_operand.hbm [shape: f32[2,4], index: 14, kind: output, shape index: {}]  }
   0x1   :  { %20 = vsyncpa [#allocation6], 0 }
   0x2   :  { %21 = vsyncpa [#allocation4], 0  ;;  %s8186_s29 = smov [#allocation5]   ;;  %s8187_s15 = smov [#allocation2]  }
   0x3   :  { %s55_s30 = sshll.u32 %s8186_s29, 4  ;;  %s41_s16 = sshll.u32 %s8187_s15, 4  ;;  %s56_s30 = int_to_ptr.vmem [resolvable:$true] %s55_s30  ;;  %s8274_s16 = int_to_ptr.vmem [resolvable:$true] %s41_s16 }
   0x4   :  { %s8092_s19 = scalar_lea.hbm %s10179_s9, 256 }
   0x5   :  { %p8093_p0 = scmp.ne.s32.totalorder %s10179_s9, %s8092_s19  ;;  %p8096_p1 = scmp.lt.u32.totalorder %s8092_s19, %s10179_s9 }
   0x7   :  { %p8098_p2 = pnand %p8096_p1, %p8093_p0 }
   0x9   :  { %8101 = shalt.err (!%p8098_p2)
}
   0xa   :  { %s8102_s24 = scalar_lea.vmem %s56_s30, 256  ;;  %p8107_p4 = scmp.lt.s32.totalorder %s56_s30, %s56_s30 }
   0xb   :  { %p8103_p3 = scmp.ne.s32.totalorder %s56_s30, %s8102_s24  ;;  %p8108_p5 = scmp.lt.s32.totalorder %s8102_s24, %s8102_s24 }
   0xd   :  { %p8109_p6 = por %p8108_p5, %p8107_p4 }
   0xf   :  { %p8110_p7 = pnand %p8109_p6, %p8103_p3 }
  0x11   :  { %8113 = shalt.err (!%p8110_p7)
}
  0x12   :  { %s8188_s25 = smov 64   ;;  %s8189_s26 = smov 4  }
  0x13   :  { %61 = dma.hbm_to_vmem [thread:$0]  %s10179_s9, 256, %s56_s30, [#allocation6], %s8188_s25, %s8188_s25, %s8189_s26  }
  0x14   :  { %s8114_s17 = scalar_lea.hbm %s10177_s7, 256 }
  0x15   :  { %p8115_p8 = scmp.ne.s32.totalorder %s10177_s7, %s8114_s17  ;;  %p8118_p9 = scmp.lt.u32.totalorder %s8114_s17, %s10177_s7 }
  0x17   :  { %p8120_p10 = pnand %p8118_p9, %p8115_p8 }
  0x19   :  { %8123 = shalt.err (!%p8120_p10)
}
  0x1a   :  { %s8124_s22 = scalar_lea.vmem %s8274_s16, 256  ;;  %p8129_p12 = scmp.lt.s32.totalorder %s8274_s16, %s8274_s16 }
  0x1b   :  { %p8125_p11 = scmp.ne.s32.totalorder %s8274_s16, %s8124_s22  ;;  %p8130_p13 = scmp.lt.s32.totalorder %s8124_s22, %s8124_s22 }
  0x1d   :  { %p8131_p0 = por %p8130_p13, %p8129_p12 }
  0x1f   :  { %p8132_p1 = pnand %p8131_p0, %p8125_p11 }
  0x21   :  { %8135 = shalt.err (!%p8132_p1)
}
  0x22   :  { %47 = dma.hbm_to_vmem [thread:$0]  %s10177_s7, 256, %s8274_s16, [#allocation3], %s8188_s25, %s8188_s25, %s8189_s26  }
  0x23   :  { %s8190_s23 = smov [#allocation7]   ;;  %s8136_s29 = scalar_lea.hbm %s10183_s13, 384 }
  0x24   :  { %s73_s24 = sshll.u32 %s8190_s23, 4  ;;  %p8137_p2 = scmp.ne.s32.totalorder %s10183_s13, %s8136_s29  ;;  %s74_s24 = int_to_ptr.vmem [resolvable:$true] %s73_s24 }
  0x25   :  { %p8140_p3 = scmp.lt.u32.totalorder %s8136_s29, %s10183_s13 }
  0x27   :  { %p8142_p4 = pnand %p8140_p3, %p8137_p2 }
  0x29   :  { %8145 = shalt.err (!%p8142_p4)
}
  0x2a   :  { %s8146_s20 = scalar_lea.vmem %s74_s24, 384  ;;  %p8151_p6 = scmp.lt.s32.totalorder %s74_s24, %s74_s24 }
  0x2b   :  { %p8147_p5 = scmp.ne.s32.totalorder %s74_s24, %s8146_s20  ;;  %p8152_p7 = scmp.lt.s32.totalorder %s8146_s20, %s8146_s20 }
  0x2d   :  { %p8153_p8 = por %p8152_p7, %p8151_p6 }
  0x2f   :  { %p8154_p9 = pnand %p8153_p8, %p8147_p5 }
  0x31   :  { %8157 = shalt.err (!%p8154_p9)
}
  0x32   :  { %s8191_s7 = smov 128   ;;  %s8192_s16 = smov 8  }
  0x33   :  { %79 = dma.hbm_to_vmem [thread:$0]  %s10183_s13, 384, %s74_s24, [#allocation6], %s8191_s7, %s8191_s7, %s8192_s16  }
  0x34   :  { %8180 = dma.done.wait [#allocation3], 256  }
  0x35   :  { %8181 = vsyncadd [#allocation3], 4294967040 }
  0x36   :  { %8182 = dma.done.wait [#allocation6], 640  }
  0x37   :  { %8183 = vsyncadd [#allocation6], 4294966656  ;;  %v102_v0 = vlaneseq  ;;  %v8193_v1 = vmov 0.0   ;;  %vm8194_vm0 = vmmov 0   ;;  %v93_v6 = vld [vmem:[%s10170_s0] sm:$0x7] }
  0x38   :  { %7010 = vmatprep.subr.bf16.mxu0 %v8193_v1  ;;  %7030 = vmatprep.subr.bf16.mxu1 %v8193_v1  ;;  %v8344_v7 = vld [vmem:[%s10170_s0 + $0x4] sm:$0x7]  ;;  %vm192_vm1 = vcmask 1040384   ;;  %v7438_v13 = vld [vmem:[%s10172_s2 + $0x8] sm:$0xff]   ;;  %v7439_v15 = vld [vmem:[%s10172_s2 + $0x10] sm:$0xff]   ;;  %vm182_vm4 = vcmask 408576  }
  0x39   :  { %v8323_v2 = vshrl.u32 %v102_v0, 7  ;;  %7018 = vmatprep.mubr.msk.bf16.mxu0 %vm8194_vm0, %v8193_v1  ;;  %7032 = vmatprep.mubr.msk.bf16.mxu1 %vm8194_vm0, %v8193_v1  ;;  %v7437_v10 = vld [vmem:[%s10172_s2] sm:$0xff]   ;;  %v7440_v14 = vld [vmem:[%s10172_s2 + $0x18] ss:$0 sps:$4 sm:$0x11]   ;;  %v8367_v17 = vand.u32 127, %v102_v0 }
  0x3a   :  { %7011 = vmatpush3.bf16.msra.mxu0 %v7437_v10  ;;  %v194_v16 = vsel %vm192_vm1, %v7440_v14, 0  ;;  %v7441_v28 = vld [vmem:[%s10174_s4] sm:$0xff]   ;;  %v8390_v29 = vld [vmem:[%s10174_s4 + $0x8] sm:$0xff]   ;;  %v8397_v30 = vld [vmem:[%s10174_s4 + $0x10] sm:$0xff]   ;;  %v8195_v31 = vmov 0   ;;  %vm268_vm7 = vcmask 130048  }
  0x3b   :  { %v8326_v3 = vsub.s32 0, %v8323_v2  ;;  %v8329_v4 = vsub.s32 2, %v8323_v2  ;;  %v8336_v5 = vsub.s32 1, %v8323_v2  ;;  %7012 = vmatprep.subr.bf16.mxu0 %v8193_v1  ;;  %7031 = vmatpush3.bf16.msra.mxu1 %v7441_v28  ;;  %v90_v41 = vld [vmem:[#allocation7] sm:$0xff]  ;;  %s8196_s26 = smov 32   ;;  %vm449_vm8 = vcmask 1041409  }
  0x3c   :  { %7036 = vmatprep.subr.bf16.mxu1 %v8193_v1  ;;  %7435 = vset.pattern.permute.xlu0 %v8195_v31  ;;  %vm331_vm9 = vcmask 261120   ;;  %vm557_vm10 = vcmp.eq.s32.totalorder %v8323_v2, 1  ;;  %vm429_vm11 = vcmp.eq.s32.totalorder %v8323_v2, 0  ;;  %vm685_vm12 = vcmp.eq.s32.totalorder %v8323_v2, 2 }
  0x3d   :  { %v107_v8 = vrot.slane %v93_v6, %v8326_v3  ;;  %v121_v9 = vrot.slane %v93_v6, %v8329_v4  ;;  %v114_v11 = vrot.slane %v93_v6, %v8336_v5  ;;  %v128_v12 = vrot.slane %v8344_v7, %v8326_v3  ;;  %7436 = vset.pattern.permute.xlu1 %v8195_v31 }
  0x3e   :  { %7013 = vmatpush3.bf16.msra.mxu0 %v7438_v13  ;;  %v316_v45 = vrot.slane %v90_v41, %v8326_v3  ;;  %vm814_vm13 = vcmp.eq.s32.totalorder %v8323_v2, 3  ;;  %vm943_vm1 = vcmp.eq.s32.totalorder %v8323_v2, 4 }
  0x3f   :  { %109 = vbcast.lane.b32.xlu0 %v107_v8, 256  ;;  %123 = vbcast.lane.b32.xlu1 %v121_v9, 256 }
  0x40   :  { %7014 = vmatprep.subr.bf16.mxu0 %v8193_v1 }
  0x42   :  { %7015 = vmatpush3.bf16.msra.mxu0 %v7439_v15 }
  0x43   :  { %116 = vbcast.lane.b32.xlu0 %v114_v11, 256  ;;  %130 = vbcast.lane.b32.xlu1 %v128_v12, 256 }
  0x44   :  { %7016 = vmatprep.subr.bf16.mxu0 %v8193_v1 }
  0x46   :  { %7017 = vmatpush3.bf16.msra.mxu0 %v194_v16 }
  0x47   :  { %7068 = vmatprep.subr.bf16.mxu0 %v8193_v1 }
  0xb1   :  { %v110_v18 = vpop.permute.xlu0 %109  ;;  %v124_v19 = vpop.permute.xlu1 %123 }
  0xb2   :  { %vm146_vm2 = vcmp.eq.s32.totalorder %v8367_v17, %v110_v18  ;;  %vm148_vm5 = vcmp.eq.s32.totalorder %v8367_v17, %v124_v19 }
  0xb3   :  { %v152_v21 = vsel %vm146_vm2, 1.0, %v8193_v1  ;;  %v154_v25 = vsel %vm148_vm5, 1.0, %v8193_v1  ;;  %vm1072_vm2 = vcmp.eq.s32.totalorder %v8323_v2, 5  ;;  %vm1437_vm5 = vcmask 58368  }
  0xb5   :  { %v117_v20 = vpop.permute.xlu0 %116  ;;  %v131_v23 = vpop.permute.xlu1 %130 }
  0xb6   :  { %vm147_vm3 = vcmp.eq.s32.totalorder %v8367_v17, %v117_v20  ;;  %vm149_vm6 = vcmp.eq.s32.totalorder %v8367_v17, %v131_v23 }
  0xb7   :  { %v153_v22 = vsel %vm147_vm3, 1.0, %v8193_v1  ;;  %v155_v26 = vsel %vm149_vm6, 1.0, %v8193_v1  ;;  %vm1201_vm3 = vcmp.eq.s32.totalorder %v8323_v2, 6  ;;  %vm10185_vm6 = vcmask 1048320  }
  0xb8   :  { %v158_v24 = vpack.c.bf16 %v153_v22, %v152_v21  ;;  %v159_v27 = vpack.c.bf16 %v155_v26, %v154_v25 }
  0xba   :  { %7019 = vmatmul.mubr.msk.bf16.vlgmr.msra.gmra.mrb[0].mxu0 %vm182_vm4, %v158_v24 }
  0xbb   :  { %7022 = vmatprep.mubr.msk.bf16.mxu0 %vm8194_vm0, %v8193_v1  ;;  %7069 = vmatpush3.bf16.msra.mxu0 %v8390_v29 }
  0xbc   :  { %7070 = vmatprep.subr.bf16.mxu0 %v8193_v1 }
  0xbf   :  { %7071 = vmatpush3.bf16.msra.mxu0 %v8397_v30 }
  0xc0   :  { %7084 = vmatprep.subr.bf16.mxu0 %v8193_v1 }
  0xc2   :  { %7023 = vmatmul.mubr.msk.bf16.gmra.mrb[4].mxu0 %vm182_vm4, %v159_v27 }
  0xc3   :  { %7026 = vmatprep.mubr.msk.bf16.mxu0 %vm8194_vm0, %v8193_v1 }
 0x18d   :  { %v230_v32 = vpop.f32.mrb[0].mxu0 }
 0x18e   :  { %v7020_v33 = vpop.f32.mrb[1].mxu0 }
 0x18f   :  { %v8403_v34 = vpop.f32.mrb[2].mxu0 }
 0x190   :  { %v7021_v35 = vpop.f32.mrb[3].mxu0 }
 0x195   :  { %v8405_v36 = vpop.f32.mrb[4].mxu0 }
 0x196   :  { %v7024_v37 = vpop.f32.mrb[5].mxu0 }
 0x197   :  { %v241_v38 = vpop.f32.mrb[6].mxu0 }
 0x198   :  { %v261_v39 = vpack.c.bf16 %v241_v38, %v230_v32  ;;  %v7025_v40 = vpop.f32.mrb[7].mxu0 }
 0x19a   :  { %7033 = vmatmul.mubr.msk.bf16.vlgmr.msra.gmra.mrb[0].mxu1 %vm268_vm7, %v261_v39 }
 0x19b   :  { %7037 = vmatpush3.bf16.msra.mxu1 %v8390_v29  ;;  %7040 = vmatprep.mubr.msk.bf16.mxu1 %vm8194_vm0, %v8193_v1 }
 0x19c   :  { %7038 = vmatprep.subr.bf16.mxu1 %v8193_v1 }
 0x19f   :  { %7039 = vmatpush3.bf16.msra.mxu1 %v8397_v30 }
 0x1a0   :  { %7044 = vmatprep.subr.bf16.mxu1 %v8193_v1 }
 0x1a2   :  { %7041 = vmatmul.mubr.bf16.vlgmr.msra.gmra.mrb[4].mxu1 %v8195_v31 }
 0x1a3   :  { %7045 = vmatpush3.bf16.msra.mxu1 %v8390_v29  ;;  %7048 = vmatprep.mubr.msk.bf16.mxu1 %vm8194_vm0, %v8193_v1 }
 0x1a4   :  { %7046 = vmatprep.subr.bf16.mxu1 %v8193_v1 }
 0x1a7   :  { %7047 = vmatpush3.bf16.msra.mxu1 %v8397_v30 }
 0x1a8   :  { %7052 = vmatprep.subr.bf16.mxu1 %v8193_v1 }
 0x26d   :  { %v306_v42 = vpop.f32.mrb[0].mxu1 }
 0x26e   :  { %v7034_v43 = vpop.f32.mrb[1].mxu1  ;;  %v8422_v47 = vadd.f32 %v316_v45, %v306_v42 }
 0x26f   :  { %v309_v44 = vpop.f32.mrb[2].mxu1 }
 0x270   :  { %v7035_v46 = vpop.f32.mrb[3].mxu1  ;;  %v8424_v49 = vadd.f32 %v316_v45, %v309_v44 }
 0x275   :  { %v369_v48 = vpop.f32.mrb[4].mxu1 }
 0x276   :  { %v376_v50 = vrot.slane %v369_v48, 1  ;;  %v379_v51 = vadd.f32 %v369_v48, %v8422_v47  ;;  %v7042_v52 = vpop.f32.mrb[5].mxu1 }
 0x277   :  { %v372_v53 = vpop.f32.mrb[6].mxu1 }
 0x278   :  { %v380_v54 = vadd.f32 %v376_v50, %v8424_v49  ;;  %7477 = vtanh.f32 %v379_v51  ;;  %v7043_v55 = vpop.f32.mrb[7].mxu1  ;;  %v6690_v58 = vmul.f32 -1.442695, %v379_v51 }
 0x27a   :  { %7479 = vtanh.f32 %v380_v54  ;;  %v6691_v59 = vmul.f32 -1.442695, %v380_v54 }
 0x27b   :  { %7481 = vpow2.f32 %v6690_v58 }
 0x27c   :  { %7483 = vpow2.f32 %v6691_v59 }
 0x282   :  { %v7478_v56 = vpop.eup %7477 }
 0x283   :  { %399 = vrot.lane.b32.xlu1 %v7478_v56, %s8188_s25 }
 0x284   :  { %v7480_v57 = vpop.eup %7479 }
 0x285   :  { %401 = vrot.lane.b32.xlu0 %v7480_v57, %s8188_s25  ;;  %v7482_v60 = vpop.eup %7481 }
 0x286   :  { %v7484_v61 = vpop.eup %7483  ;;  %v387_v62 = vadd.f32 1.0, %v7482_v60 }
 0x287   :  { %v388_v63 = vadd.f32 1.0, %v7484_v61 }
 0x288   :  { %7485 = vrcp.f32 %v387_v62 }
 0x289   :  { %7487 = vrcp.f32 %v388_v63 }
 0x292   :  { %v7486_v0 = vpop.eup %7485 }
 0x293   :  { %v7488_v9 = vpop.eup %7487  ;;  %v395_v12 = vmul.f32 0.0, %v7486_v0 }
 0x294   :  { %v396_v15 = vmul.f32 0.0, %v7488_v9 }
 0x2f5   :  { %v400_v6 = vpop.permute.xlu1 %399 }
 0x2f6   :  { %v405_v8 = vmul.f32 %v7486_v0, %v400_v6 }
 0x2f7   :  { %v402_v10 = vpop.permute.xlu0 %401 }
 0x2f8   :  { %409 = vrot.lane.b32.xlu1 %v405_v8, %s8196_s26  ;;  %v406_v11 = vmul.f32 %v7488_v9, %v402_v10 }
 0x2fa   :  { %411 = vrot.lane.b32.xlu0 %v406_v11, %s8196_s26 }
 0x36a   :  { %v410_v13 = vpop.permute.xlu1 %409 }
 0x36b   :  { %v8432_v14 = vadd.f32 %v410_v13, %v395_v12 }
 0x36c   :  { %v412_v16 = vpop.permute.xlu0 %411 }
 0x36d   :  { %7489 = vtanh.f32 %v8432_v14  ;;  %v416_v18 = vadd.f32 %v412_v16, %v396_v15  ;;  %v519_v63 = vrot.slane %v8432_v14, 7 }
 0x36f   :  { %7491 = vtanh.f32 %v416_v18  ;;  %v520_v61 = vrot.slane %v416_v18, 7 }
 0x377   :  { %v7490_v19 = vpop.eup %7489 }
 0x378   :  { %421 = vrot.lane.b32.xlu1 %v7490_v19, %s8188_s25 }
 0x379   :  { %v7492_v20 = vpop.eup %7491 }
 0x37a   :  { %423 = vrot.lane.b32.xlu0 %v7492_v20, %s8188_s25 }
 0x3ea   :  { %v422_v21 = vpop.permute.xlu1 %421 }
 0x3eb   :  { %v8437_v22 = vmul.f32 %v7486_v0, %v422_v21 }
 0x3ec   :  { %v424_v23 = vpop.permute.xlu0 %423 }
 0x3ed   :  { %v8439_v24 = vmul.f32 %v7488_v9, %v424_v23  ;;  %v442_v25 = vpack.c.bf16 %v8437_v22, %v8437_v22  ;;  %v435_v16 = vrot.slane %v8437_v22, %v8326_v3 }
 0x3ef   :  { %v443_v26 = vpack.c.bf16 %v8439_v24, %v8439_v24  ;;  %v446_v28 = vunpack.c.l.b16 %v442_v25  ;;  %v439_v13 = vrot.slane %v8439_v24, %v8326_v3 }
 0x3f1   :  { %v447_v27 = vunpack.c.l.b16 %v443_v26  ;;  %v441_v20 = vsel %vm429_vm11, %v439_v13, 0.0 }
 0x3f3   :  { %v448_v32 = vrot.slane %v447_v27, 7  ;;  %v440_v27 = vsel %vm429_vm11, %v435_v16, 0.0 }
 0x3f5   :  { %v450_v33 = vsel %vm449_vm8, %v448_v32, %v446_v28 }
 0x3f6   :  { %v451_v35 = vpack.c.b16 %v450_v33, %v450_v33 }
 0x3f8   :  { %452 = vrot.lane.b32.xlu0 %v451_v35, %s8196_s26 }
 0x46a   :  { %v453_v37 = vpop.permute.xlu0 %452 }
 0x46b   :  { %7049 = vmatmul.mubr.msk.bf16.vlgmr.msra.gmra.mrb[8].mxu1 %vm331_vm9, %v453_v37 }
 0x46c   :  { %7053 = vmatpush3.bf16.msra.mxu1 %v8390_v29  ;;  %7056 = vmatprep.mubr.msk.bf16.mxu1 %vm8194_vm0, %v8193_v1 }
 0x46d   :  { %7054 = vmatprep.subr.bf16.mxu1 %v8193_v1 }
 0x470   :  { %7055 = vmatpush3.bf16.msra.mxu1 %v8397_v30 }
 0x471   :  { %7060 = vmatprep.subr.bf16.mxu1 %v8193_v1 }
 0x53e   :  { %v491_v38 = vpop.f32.mrb[8].mxu1 }
 0x53f   :  { %v498_v39 = vrot.slane %v491_v38, 7  ;;  %v502_v40 = vadd.f32 %v491_v38, %v8424_v49  ;;  %v7050_v41 = vpop.f32.mrb[9].mxu1 }
 0x540   :  { %v494_v42 = vpop.f32.mrb[10].mxu1 }
 0x541   :  { %v501_v43 = vadd.f32 %v498_v39, %v8422_v47  ;;  %7493 = vtanh.f32 %v502_v40  ;;  %v7051_v44 = vpop.f32.mrb[11].mxu1  ;;  %v6694_v48 = vmul.f32 -1.442695, %v502_v40 }
 0x543   :  { %7495 = vtanh.f32 %v501_v43  ;;  %v6693_v50 = vmul.f32 -1.442695, %v501_v43 }
 0x544   :  { %7497 = vpow2.f32 %v6694_v48 }
 0x545   :  { %7499 = vpow2.f32 %v6693_v50 }
 0x54b   :  { %v7494_v45 = vpop.eup %7493 }
 0x54c   :  { %529 = vrot.lane.b32.xlu0 %v7494_v45, %s8188_s25 }
 0x54d   :  { %v7496_v46 = vpop.eup %7495 }
 0x54e   :  { %527 = vrot.lane.b32.xlu1 %v7496_v46, %s8188_s25  ;;  %v7498_v51 = vpop.eup %7497 }
 0x54f   :  { %v7500_v52 = vpop.eup %7499  ;;  %v510_v53 = vadd.f32 1.0, %v7498_v51 }
 0x550   :  { %v509_v54 = vadd.f32 1.0, %v7500_v52 }
 0x551   :  { %7501 = vrcp.f32 %v510_v53 }
 0x552   :  { %7503 = vrcp.f32 %v509_v54 }
 0x55b   :  { %v7502_v55 = vpop.eup %7501 }
 0x55c   :  { %v7504_v58 = vpop.eup %7503  ;;  %v524_v62 = vmul.f32 %v7502_v55, %v520_v61 }
 0x55d   :  { %v523_v8 = vmul.f32 %v7504_v58, %v519_v63 }
 0x5be   :  { %v530_v56 = vpop.permute.xlu0 %529 }
 0x5bf   :  { %v534_v57 = vmul.f32 %v7502_v55, %v530_v56 }
 0x5c0   :  { %v528_v59 = vpop.permute.xlu1 %527 }
 0x5c1   :  { %539 = vrot.lane.b32.xlu0 %v534_v57, %s8196_s26  ;;  %v533_v60 = vmul.f32 %v7504_v58, %v528_v59 }
 0x5c3   :  { %537 = vrot.lane.b32.xlu1 %v533_v60, %s8196_s26 }
 0x633   :  { %v540_v0 = vpop.permute.xlu0 %539 }
 0x634   :  { %v8461_v6 = vadd.f32 %v540_v0, %v524_v62 }
 0x635   :  { %v538_v9 = vpop.permute.xlu1 %537 }
 0x636   :  { %7505 = vtanh.f32 %v8461_v6  ;;  %v8464_v10 = vadd.f32 %v538_v9, %v523_v8  ;;  %v648_v0 = vrot.slane %v8461_v6, 7 }
 0x638   :  { %7507 = vtanh.f32 %v8464_v10  ;;  %v647_v63 = vrot.slane %v8464_v10, 7 }
 0x640   :  { %v7506_v11 = vpop.eup %7505 }
 0x641   :  { %551 = vrot.lane.b32.xlu0 %v7506_v11, %s8188_s25 }
 0x642   :  { %v7508_v12 = vpop.eup %7507 }
 0x643   :  { %549 = vrot.lane.b32.xlu1 %v7508_v12, %s8188_s25 }
 0x6b3   :  { %v552_v14 = vpop.permute.xlu0 %551 }
 0x6b4   :  { %v556_v15 = vmul.f32 %v7502_v55, %v552_v14 }
 0x6b5   :  { %v550_v19 = vpop.permute.xlu1 %549 }
 0x6b6   :  { %v567_v18 = vrot.slane %v556_v15, %v8336_v5  ;;  %v555_v21 = vmul.f32 %v7504_v58, %v550_v19  ;;  %v571_v24 = vpack.c.bf16 %v556_v15, %v556_v15 }
 0x6b8   :  { %v8480_v23 = vsel %vm557_vm10, %v567_v18, %v441_v20  ;;  %v563_v25 = vrot.slane %v555_v21, %v8336_v5  ;;  %v570_v26 = vpack.c.bf16 %v555_v21, %v555_v21  ;;  %v575_v32 = vunpack.c.l.b16 %v571_v24 }
 0x6ba   :  { %v8487_v22 = vsel %vm557_vm10, %v563_v25, %v440_v27  ;;  %v574_v28 = vunpack.c.l.b16 %v570_v26 }
 0x6bc   :  { %v576_v33 = vrot.slane %v574_v28, 1 }
 0x6be   :  { %v577_v35 = vsel %vm449_vm8, %v575_v32, %v576_v33 }
 0x6bf   :  { %v578_v37 = vpack.c.b16 %v577_v35, %v577_v35 }
 0x6c1   :  { %579 = vrot.lane.b32.xlu1 %v578_v37, %s8196_s26 }
 0x733   :  { %v580_v38 = vpop.permute.xlu1 %579 }
 0x734   :  { %7057 = vmatmul.mubr.msk.bf16.vlgmr.msra.gmra.mrb[12].mxu1 %vm331_vm9, %v580_v38 }
 0x735   :  { %7061 = vmatpush3.bf16.msra.mxu1 %v8390_v29  ;;  %7064 = vmatprep.mubr.msk.bf16.mxu1 %vm8194_vm0, %v8193_v1 }
 0x736   :  { %7062 = vmatprep.subr.bf16.mxu1 %v8193_v1 }
 0x739   :  { %7063 = vmatpush3.bf16.msra.mxu1 %v8397_v30 }
 0x73a   :  { %7076 = vmatprep.subr.bf16.mxu1 %v8193_v1 }
 0x807   :  { %v618_v39 = vpop.f32.mrb[12].mxu1 }
 0x808   :  { %v625_v40 = vrot.slane %v618_v39, 6  ;;  %v626_v41 = vrot.slane %v618_v39, 7  ;;  %v7058_v42 = vpop.f32.mrb[13].mxu1 }
 0x809   :  { %v621_v43 = vpop.f32.mrb[14].mxu1 }
 0x80a   :  { %v629_v44 = vadd.f32 %v625_v40, %v8422_v47  ;;  %v630_v45 = vadd.f32 %v626_v41, %v8424_v49  ;;  %v7059_v46 = vpop.f32.mrb[15].mxu1 }
 0x80c   :  { %7509 = vtanh.f32 %v629_v44  ;;  %v6696_v51 = vmul.f32 -1.442695, %v629_v44  ;;  %v6697_v52 = vmul.f32 -1.442695, %v630_v45 }
 0x80d   :  { %7511 = vtanh.f32 %v630_v45 }
 0x80e   :  { %7513 = vpow2.f32 %v6696_v51 }
 0x80f   :  { %7515 = vpow2.f32 %v6697_v52 }
 0x816   :  { %v7510_v48 = vpop.eup %7509 }
 0x817   :  { %v7512_v50 = vpop.eup %7511  ;;  %655 = vrot.lane.b32.xlu0 %v7510_v48, %s8188_s25 }
 0x818   :  { %657 = vrot.lane.b32.xlu1 %v7512_v50, %s8188_s25  ;;  %v7514_v53 = vpop.eup %7513 }
 0x819   :  { %v7516_v54 = vpop.eup %7515  ;;  %v637_v55 = vadd.f32 1.0, %v7514_v53 }
 0x81a   :  { %v638_v56 = vadd.f32 1.0, %v7516_v54 }
 0x81b   :  { %7517 = vrcp.f32 %v637_v55 }
 0x81c   :  { %7519 = vrcp.f32 %v638_v56 }
 0x825   :  { %v7518_v57 = vpop.eup %7517 }
 0x826   :  { %v7520_v59 = vpop.eup %7519  ;;  %v651_v8 = vmul.f32 %v7518_v57, %v647_v63 }
 0x827   :  { %v652_v9 = vmul.f32 %v7520_v59, %v648_v0 }
 0x889   :  { %v656_v58 = vpop.permute.xlu0 %655 }
 0x88a   :  { %v658_v60 = vpop.permute.xlu1 %657  ;;  %v661_v61 = vmul.f32 %v7518_v57, %v656_v58 }
 0x88b   :  { %v662_v62 = vmul.f32 %v7520_v59, %v658_v60 }
 0x88c   :  { %665 = vrot.lane.b32.xlu0 %v661_v61, %s8196_s26 }
 0x88d   :  { %667 = vrot.lane.b32.xlu1 %v662_v62, %s8196_s26 }
 0x8fe   :  { %v666_v11 = vpop.permute.xlu0 %665 }
 0x8ff   :  { %v668_v12 = vpop.permute.xlu1 %667  ;;  %v8506_v13 = vadd.f32 %v666_v11, %v651_v8 }
 0x900   :  { %v8508_v14 = vadd.f32 %v668_v12, %v652_v9 }
 0x901   :  { %7521 = vtanh.f32 %v8506_v13  ;;  %v776_v62 = vrot.slane %v8506_v13, 7  ;;  %v135_v13 = vrot.slane %v8344_v7, %v8336_v5 }
 0x902   :  { %7523 = vtanh.f32 %v8508_v14  ;;  %v777_v63 = vrot.slane %v8508_v14, 7  ;;  %v142_v14 = vrot.slane %v8344_v7, %v8329_v4 }
 0x90b   :  { %v7522_v15 = vpop.eup %7521 }
 0x90c   :  { %v7524_v16 = vpop.eup %7523  ;;  %677 = vrot.lane.b32.xlu0 %v7522_v15, %s8188_s25 }
 0x90d   :  { %679 = vrot.lane.b32.xlu1 %v7524_v16, %s8188_s25 }
 0x97e   :  { %v678_v10 = vpop.permute.xlu0 %677 }
 0x97f   :  { %v680_v6 = vpop.permute.xlu1 %679  ;;  %v683_v18 = vmul.f32 %v7518_v57, %v678_v10 }
 0x980   :  { %v684_v19 = vmul.f32 %v7520_v59, %v680_v6  ;;  %v8557_v6 = vsub.s32 3, %v8323_v2 }
 0x981   :  { %v691_v20 = vrot.slane %v683_v18, %v8329_v4  ;;  %v698_v21 = vpack.c.bf16 %v683_v18, %v683_v18 }
 0x982   :  { %v695_v24 = vrot.slane %v684_v19, %v8329_v4  ;;  %v699_v25 = vpack.c.bf16 %v684_v19, %v684_v19 }
 0x983   :  { %v8520_v26 = vsel %vm685_vm12, %v691_v20, %v8487_v22  ;;  %v702_v27 = vunpack.c.l.b16 %v698_v21 }
 0x984   :  { %v8525_v28 = vsel %vm685_vm12, %v695_v24, %v8480_v23  ;;  %v703_v32 = vunpack.c.l.b16 %v699_v25 }
 0x985   :  { %v704_v33 = vrot.slane %v702_v27, 2 }
 0x986   :  { %v705_v35 = vrot.slane %v703_v32, 1 }
 0x988   :  { %v706_v37 = vsel %vm449_vm8, %v705_v35, %v704_v33 }
 0x989   :  { %v707_v38 = vpack.c.b16 %v706_v37, %v706_v37 }
 0x98b   :  { %708 = vrot.lane.b32.xlu0 %v707_v38, %s8196_s26 }
 0x9fd   :  { %v709_v39 = vpop.permute.xlu0 %708 }
 0x9fe   :  { %7065 = vmatmul.mubr.msk.bf16.vlgmr.msra.gmra.mrb[16].mxu1 %vm331_vm9, %v709_v39 }
 0x9ff   :  { %7077 = vmatpush3.bf16.msra.mxu1 %v8390_v29  ;;  %7080 = vmatprep.mubr.msk.bf16.mxu1 %vm8194_vm0, %v8193_v1 }
 0xa00   :  { %7078 = vmatprep.subr.bf16.mxu1 %v8193_v1 }
 0xa03   :  { %7079 = vmatpush3.bf16.msra.mxu1 %v8397_v30 }
 0xa04   :  { %7092 = vmatprep.subr.bf16.mxu1 %v8193_v1 }
 0xad1   :  { %v747_v23 = vpop.f32.mrb[16].mxu1 }
 0xad2   :  { %v754_v22 = vrot.slane %v747_v23, 5  ;;  %v755_v40 = vrot.slane %v747_v23, 6  ;;  %v7066_v41 = vpop.f32.mrb[17].mxu1 }
 0xad3   :  { %v750_v42 = vpop.f32.mrb[18].mxu1 }
 0xad4   :  { %v758_v43 = vadd.f32 %v754_v22, %v8422_v47  ;;  %v759_v44 = vadd.f32 %v755_v40, %v8424_v49  ;;  %v7067_v45 = vpop.f32.mrb[19].mxu1 }
 0xad6   :  { %7525 = vtanh.f32 %v758_v43  ;;  %v6699_v50 = vmul.f32 -1.442695, %v758_v43  ;;  %v6700_v51 = vmul.f32 -1.442695, %v759_v44 }
 0xad7   :  { %7527 = vtanh.f32 %v759_v44 }
 0xad8   :  { %7529 = vpow2.f32 %v6699_v50 }
 0xad9   :  { %7531 = vpow2.f32 %v6700_v51 }
 0xae0   :  { %v7526_v46 = vpop.eup %7525 }
 0xae1   :  { %v7528_v48 = vpop.eup %7527  ;;  %784 = vrot.lane.b32.xlu1 %v7526_v46, %s8188_s25 }
 0xae2   :  { %786 = vrot.lane.b32.xlu0 %v7528_v48, %s8188_s25  ;;  %v7530_v52 = vpop.eup %7529 }
 0xae3   :  { %v7532_v53 = vpop.eup %7531  ;;  %v766_v54 = vadd.f32 1.0, %v7530_v52 }
 0xae4   :  { %v767_v55 = vadd.f32 1.0, %v7532_v53 }
 0xae5   :  { %7533 = vrcp.f32 %v766_v54 }
 0xae6   :  { %7535 = vrcp.f32 %v767_v55 }
 0xaef   :  { %v7534_v56 = vpop.eup %7533 }
 0xaf0   :  { %v7536_v58 = vpop.eup %7535  ;;  %v780_v0 = vmul.f32 %v7534_v56, %v776_v62 }
 0xaf1   :  { %v781_v8 = vmul.f32 %v7536_v58, %v777_v63 }
 0xb53   :  { %v785_v57 = vpop.permute.xlu1 %784 }
 0xb54   :  { %v787_v59 = vpop.permute.xlu0 %786  ;;  %v790_v60 = vmul.f32 %v7534_v56, %v785_v57 }
 0xb55   :  { %v791_v61 = vmul.f32 %v7536_v58, %v787_v59 }
 0xb56   :  { %794 = vrot.lane.b32.xlu1 %v790_v60, %s8196_s26 }
 0xb57   :  { %796 = vrot.lane.b32.xlu0 %v791_v61, %s8196_s26 }
 0xbc8   :  { %v795_v9 = vpop.permute.xlu1 %794 }
 0xbc9   :  { %v797_v11 = vpop.permute.xlu0 %796  ;;  %v8544_v12 = vadd.f32 %v795_v9, %v780_v0 }
 0xbca   :  { %v8546_v15 = vadd.f32 %v797_v11, %v781_v8 }
 0xbcb   :  { %7537 = vtanh.f32 %v8544_v12 }
 0xbcc   :  { %7539 = vtanh.f32 %v8546_v15 }
 0xbd5   :  { %v7538_v16 = vpop.eup %7537 }
 0xbd6   :  { %v7540_v10 = vpop.eup %7539  ;;  %806 = vrot.lane.b32.xlu1 %v7538_v16, %s8188_s25 }
 0xbd7   :  { %808 = vrot.lane.b32.xlu0 %v7540_v10, %s8188_s25 }
 0xbda   :  { %137 = vbcast.lane.b32.xlu1 %v135_v13, 256 }
 0xbdb   :  { %144 = vbcast.lane.b32.xlu0 %v142_v14, 256 }
 0xc48   :  { %v807_v18 = vpop.permute.xlu1 %806 }
 0xc49   :  { %v809_v19 = vpop.permute.xlu0 %808  ;;  %v812_v20 = vmul.f32 %v7534_v56, %v807_v18 }
 0xc4a   :  { %v813_v21 = vmul.f32 %v7536_v58, %v809_v19 }
 0xc4b   :  { %v820_v24 = vrot.slane %v812_v20, %v8557_v6  ;;  %v827_v25 = vpack.c.bf16 %v812_v20, %v812_v20  ;;  %v905_v20 = vrot.slane %v8544_v12, 7  ;;  %v8613_v12 = vsub.s32 4, %v8323_v2 }
 0xc4c   :  { %v824_v27 = vrot.slane %v813_v21, %v8557_v6  ;;  %v828_v32 = vpack.c.bf16 %v813_v21, %v813_v21  ;;  %v138_v33 = vpop.permute.xlu1 %137  ;;  %v906_v21 = vrot.slane %v8546_v15, 7 }
 0xc4d   :  { %v8565_v7 = vsel %vm814_vm13, %v820_v24, %v8520_v26  ;;  %v831_v35 = vunpack.c.l.b16 %v827_v25  ;;  %v145_v37 = vpop.permute.xlu0 %144  ;;  %vm150_vm14 = vcmp.eq.s32.totalorder %v8367_v17, %v138_v33 }
 0xc4e   :  { %v8571_v38 = vsel %vm814_vm13, %v824_v27, %v8525_v28  ;;  %v832_v39 = vunpack.c.l.b16 %v828_v32  ;;  %vm151_vm15 = vcmp.eq.s32.totalorder %v8367_v17, %v145_v37  ;;  %v156_v23 = vsel %vm150_vm14, 1.0, %v8193_v1 }
 0xc4f   :  { %v833_v22 = vrot.slane %v831_v35, 3  ;;  %v157_v40 = vsel %vm151_vm15, 1.0, %v8193_v1  ;;  %vm5118_vm14 = vcmask 1043456  }
 0xc50   :  { %v834_v41 = vrot.slane %v832_v39, 2  ;;  %v160_v26 = vpack.c.bf16 %v157_v40, %v156_v23 }
 0xc52   :  { %7027 = vmatmul.mubr.msk.bf16.gmra.mrb[8].mxu0 %vm182_vm4, %v160_v26  ;;  %v835_v42 = vsel %vm449_vm8, %v834_v41, %v833_v22  ;;  %vm1330_vm4 = vcmp.eq.s32.totalorder %v8323_v2, 7 }
 0xc53   :  { %v836_v43 = vpack.c.b16 %v835_v42, %v835_v42  ;;  %7072 = vmatprep.mubr.msk.bf16.mxu0 %vm8194_vm0, %v8193_v1 }
 0xc55   :  { %837 = vrot.lane.b32.xlu1 %v836_v43, %s8196_s26 }
 0xcc7   :  { %v838_v28 = vpop.permute.xlu1 %837 }
 0xcc8   :  { %7073 = vmatmul.mubr.msk.bf16.vlgmr.msra.gmra.mrb[12].mxu0 %vm331_vm9, %v838_v28 }
 0xcc9   :  { %7085 = vmatpush3.bf16.msra.mxu0 %v8390_v29  ;;  %7088 = vmatprep.mubr.msk.bf16.mxu0 %vm8194_vm0, %v8193_v1 }
 0xcca   :  { %7086 = vmatprep.subr.bf16.mxu0 %v8193_v1 }
 0xccd   :  { %7087 = vmatpush3.bf16.msra.mxu0 %v8397_v30 }
 0xcce   :  { %7100 = vmatprep.subr.bf16.mxu0 %v8193_v1 }
 0xd25   :  { %v8588_v44 = vpop.f32.mrb[8].mxu0 }
 0xd26   :  { %v1529_v45 = vpack.c.bf16 %v8588_v44, %v8403_v34  ;;  %v7028_v46 = vpop.f32.mrb[9].mxu0 }
 0xd27   :  { %v8592_v48 = vpop.f32.mrb[10].mxu0 }
 0xd28   :  { %v2766_v50 = vpack.c.bf16 %v8592_v48, %v8405_v36  ;;  %v7029_v51 = vpop.f32.mrb[11].mxu0 }
 0xd9b   :  { %v876_v52 = vpop.f32.mrb[12].mxu0 }
 0xd9c   :  { %v883_v53 = vrot.slane %v876_v52, 4  ;;  %v884_v54 = vrot.slane %v876_v52, 5  ;;  %v7074_v55 = vpop.f32.mrb[13].mxu0 }
 0xd9d   :  { %v879_v56 = vpop.f32.mrb[14].mxu0 }
 0xd9e   :  { %v887_v57 = vadd.f32 %v883_v53, %v8422_v47  ;;  %v888_v58 = vadd.f32 %v884_v54, %v8424_v49  ;;  %v7075_v59 = vpop.f32.mrb[15].mxu0 }
 0xda0   :  { %7541 = vtanh.f32 %v887_v57  ;;  %v6702_v62 = vmul.f32 -1.442695, %v887_v57  ;;  %v6703_v63 = vmul.f32 -1.442695, %v888_v58 }
 0xda1   :  { %7543 = vtanh.f32 %v888_v58 }
 0xda2   :  { %7545 = vpow2.f32 %v6702_v62 }
 0xda3   :  { %7547 = vpow2.f32 %v6703_v63 }
 0xdaa   :  { %v7542_v60 = vpop.eup %7541 }
 0xdab   :  { %v7544_v61 = vpop.eup %7543  ;;  %913 = vrot.lane.b32.xlu0 %v7542_v60, %s8188_s25 }
 0xdac   :  { %915 = vrot.lane.b32.xlu1 %v7544_v61, %s8188_s25  ;;  %v7546_v0 = vpop.eup %7545 }
 0xdad   :  { %v7548_v8 = vpop.eup %7547  ;;  %v895_v9 = vadd.f32 1.0, %v7546_v0 }
 0xdae   :  { %v896_v11 = vadd.f32 1.0, %v7548_v8 }
 0xdaf   :  { %7549 = vrcp.f32 %v895_v9 }
 0xdb0   :  { %7551 = vrcp.f32 %v896_v11 }
 0xdb9   :  { %v7550_v16 = vpop.eup %7549 }
 0xdba   :  { %v7552_v13 = vpop.eup %7551  ;;  %v909_v24 = vmul.f32 %v7550_v16, %v905_v20 }
 0xdbb   :  { %v910_v25 = vmul.f32 %v7552_v13, %v906_v21 }
 0xe1d   :  { %v914_v10 = vpop.permute.xlu0 %913 }
 0xe1e   :  { %v916_v14 = vpop.permute.xlu1 %915  ;;  %v919_v18 = vmul.f32 %v7550_v16, %v914_v10 }
 0xe1f   :  { %v920_v19 = vmul.f32 %v7552_v13, %v916_v14 }
 0xe20   :  { %923 = vrot.lane.b32.xlu0 %v919_v18, %s8196_s26 }
 0xe21   :  { %925 = vrot.lane.b32.xlu1 %v920_v19, %s8196_s26 }
 0xe92   :  { %v924_v27 = vpop.permute.xlu0 %923 }
 0xe93   :  { %v926_v32 = vpop.permute.xlu1 %925  ;;  %v8604_v33 = vadd.f32 %v924_v27, %v909_v24 }
 0xe94   :  { %v8606_v35 = vadd.f32 %v926_v32, %v910_v25 }
 0xe95   :  { %7553 = vtanh.f32 %v8604_v33  ;;  %v1034_v24 = vrot.slane %v8604_v33, 7  ;;  %v8654_v33 = vsub.s32 5, %v8323_v2 }
 0xe96   :  { %7555 = vtanh.f32 %v8606_v35  ;;  %v1035_v25 = vrot.slane %v8606_v35, 7 }
 0xe9f   :  { %v7554_v37 = vpop.eup %7553 }
 0xea0   :  { %v7556_v39 = vpop.eup %7555  ;;  %935 = vrot.lane.b32.xlu0 %v7554_v37, %s8188_s25 }
 0xea1   :  { %937 = vrot.lane.b32.xlu1 %v7556_v39, %s8188_s25 }
 0xf12   :  { %v936_v15 = vpop.permute.xlu0 %935 }
 0xf13   :  { %v938_v23 = vpop.permute.xlu1 %937  ;;  %v941_v22 = vmul.f32 %v7550_v16, %v936_v15 }
 0xf14   :  { %v942_v40 = vmul.f32 %v7552_v13, %v938_v23 }
 0xf15   :  { %v949_v41 = vrot.slane %v941_v22, %v8613_v12  ;;  %v956_v26 = vpack.c.bf16 %v941_v22, %v941_v22 }
 0xf16   :  { %v953_v42 = vrot.slane %v942_v40, %v8613_v12  ;;  %v957_v43 = vpack.c.bf16 %v942_v40, %v942_v40 }
 0xf17   :  { %v8621_v28 = vsel %vm943_vm1, %v949_v41, %v8565_v7  ;;  %v960_v46 = vunpack.c.l.b16 %v956_v26 }
 0xf18   :  { %v8626_v51 = vsel %vm943_vm1, %v953_v42, %v8571_v38  ;;  %v961_v52 = vunpack.c.l.b16 %v957_v43 }
 0xf19   :  { %v962_v53 = vrot.slane %v960_v46, 4 }
 0xf1a   :  { %v963_v54 = vrot.slane %v961_v52, 3 }
 0xf1c   :  { %v964_v55 = vsel %vm449_vm8, %v963_v54, %v962_v53 }
 0xf1d   :  { %v965_v56 = vpack.c.b16 %v964_v55, %v964_v55 }
 0xf1f   :  { %966 = vrot.lane.b32.xlu0 %v965_v56, %s8196_s26 }
 0xf91   :  { %v967_v57 = vpop.permute.xlu0 %966 }
 0xf92   :  { %7081 = vmatmul.mubr.msk.bf16.vlgmr.msra.gmra.mrb[20].mxu1 %vm331_vm9, %v967_v57 }
 0xf93   :  { %7093 = vmatpush3.bf16.msra.mxu1 %v8390_v29  ;;  %7096 = vmatprep.mubr.msk.bf16.mxu1 %vm8194_vm0, %v8193_v1 }
 0xf94   :  { %7094 = vmatprep.subr.bf16.mxu1 %v8193_v1 }
 0xf97   :  { %7095 = vmatpush3.bf16.msra.mxu1 %v8397_v30 }
 0xf98   :  { %7108 = vmatprep.subr.bf16.mxu1 %v8193_v1 }
0x1065   :  { %v1005_v7 = vpop.f32.mrb[20].mxu1 }
0x1066   :  { %v1012_v38 = vrot.slane %v1005_v7, 3  ;;  %v1013_v58 = vrot.slane %v1005_v7, 4  ;;  %v7082_v59 = vpop.f32.mrb[21].mxu1 }
0x1067   :  { %v1008_v60 = vpop.f32.mrb[22].mxu1 }
0x1068   :  { %v1016_v61 = vadd.f32 %v1012_v38, %v8422_v47  ;;  %v1017_v62 = vadd.f32 %v1013_v58, %v8424_v49  ;;  %v7083_v63 = vpop.f32.mrb[23].mxu1 }
0x106a   :  { %7557 = vtanh.f32 %v1016_v61  ;;  %v6705_v30 = vmul.f32 -1.442695, %v1016_v61  ;;  %v6706_v8 = vmul.f32 -1.442695, %v1017_v62 }
0x106b   :  { %7559 = vtanh.f32 %v1017_v62 }
0x106c   :  { %7561 = vpow2.f32 %v6705_v30 }
0x106d   :  { %7563 = vpow2.f32 %v6706_v8 }
0x1074   :  { %v7558_v29 = vpop.eup %7557 }
0x1075   :  { %v7560_v0 = vpop.eup %7559  ;;  %1042 = vrot.lane.b32.xlu1 %v7558_v29, %s8188_s25 }
0x1076   :  { %1044 = vrot.lane.b32.xlu0 %v7560_v0, %s8188_s25  ;;  %v7562_v9 = vpop.eup %7561 }
0x1077   :  { %v7564_v11 = vpop.eup %7563  ;;  %v1024_v16 = vadd.f32 1.0, %v7562_v9 }
0x1078   :  { %v1025_v10 = vadd.f32 1.0, %v7564_v11 }
0x1079   :  { %7565 = vrcp.f32 %v1024_v16 }
0x107a   :  { %7567 = vrcp.f32 %v1025_v10 }
0x1083   :  { %v7566_v13 = vpop.eup %7565 }
0x1084   :  { %v7568_v18 = vpop.eup %7567  ;;  %v1038_v27 = vmul.f32 %v7566_v13, %v1034_v24 }
0x1085   :  { %v1039_v32 = vmul.f32 %v7568_v18, %v1035_v25 }
0x10e7   :  { %v1043_v14 = vpop.permute.xlu1 %1042 }
0x10e8   :  { %v1045_v19 = vpop.permute.xlu0 %1044  ;;  %v1048_v20 = vmul.f32 %v7566_v13, %v1043_v14 }
0x10e9   :  { %v1049_v21 = vmul.f32 %v7568_v18, %v1045_v19 }
0x10ea   :  { %1052 = vrot.lane.b32.xlu1 %v1048_v20, %s8196_s26 }
0x10eb   :  { %1054 = vrot.lane.b32.xlu0 %v1049_v21, %s8196_s26 }
0x115c   :  { %v1053_v37 = vpop.permute.xlu1 %1052 }
0x115d   :  { %v1055_v39 = vpop.permute.xlu0 %1054  ;;  %v8645_v15 = vadd.f32 %v1053_v37, %v1038_v27 }
0x115e   :  { %v8647_v23 = vadd.f32 %v1055_v39, %v1039_v32 }
0x115f   :  { %7569 = vtanh.f32 %v8645_v15  ;;  %v1163_v32 = vrot.slane %v8645_v15, 7  ;;  %v8691_v15 = vsub.s32 6, %v8323_v2 }
0x1160   :  { %7571 = vtanh.f32 %v8647_v23  ;;  %v1164_v37 = vrot.slane %v8647_v23, 7 }
0x1169   :  { %v7570_v22 = vpop.eup %7569 }
0x116a   :  { %v7572_v40 = vpop.eup %7571  ;;  %1064 = vrot.lane.b32.xlu1 %v7570_v22, %s8188_s25 }
0x116b   :  { %1066 = vrot.lane.b32.xlu0 %v7572_v40, %s8188_s25 }
0x11dc   :  { %v1065_v35 = vpop.permute.xlu1 %1064 }
0x11dd   :  { %v1067_v41 = vpop.permute.xlu0 %1066  ;;  %v1070_v26 = vmul.f32 %v7566_v13, %v1065_v35 }
0x11de   :  { %v1071_v42 = vmul.f32 %v7568_v18, %v1067_v41 }
0x11df   :  { %v1078_v43 = vrot.slane %v1070_v26, %v8654_v33  ;;  %v1085_v46 = vpack.c.bf16 %v1070_v26, %v1070_v26 }
0x11e0   :  { %v1082_v52 = vrot.slane %v1071_v42, %v8654_v33  ;;  %v1086_v53 = vpack.c.bf16 %v1071_v42, %v1071_v42 }
0x11e1   :  { %v8662_v54 = vsel %vm1072_vm2, %v1078_v43, %v8621_v28  ;;  %v1089_v55 = vunpack.c.l.b16 %v1085_v46 }
0x11e2   :  { %v8667_v56 = vsel %vm1072_vm2, %v1082_v52, %v8626_v51  ;;  %v1090_v57 = vunpack.c.l.b16 %v1086_v53 }
0x11e3   :  { %v1091_v7 = vrot.slane %v1089_v55, 5 }
0x11e4   :  { %v1092_v38 = vrot.slane %v1090_v57, 4 }
0x11e6   :  { %v1093_v58 = vsel %vm449_vm8, %v1092_v38, %v1091_v7 }
0x11e7   :  { %v1094_v59 = vpack.c.b16 %v1093_v58, %v1093_v58 }
0x11e9   :  { %1095 = vrot.lane.b32.xlu1 %v1094_v59, %s8196_s26 }
0x125b   :  { %v1096_v60 = vpop.permute.xlu1 %1095 }
0x125c   :  { %7089 = vmatmul.mubr.msk.bf16.vlgmr.msra.gmra.mrb[16].mxu0 %vm331_vm9, %v1096_v60 }
0x125d   :  { %7104 = vmatprep.mubr.msk.bf16.mxu0 %vm8194_vm0, %v8193_v1 }
0x132f   :  { %v1134_v28 = vpop.f32.mrb[16].mxu0 }
0x1330   :  { %v1141_v61 = vrot.slane %v1134_v28, 2  ;;  %v1142_v62 = vrot.slane %v1134_v28, 3  ;;  %v7090_v63 = vpop.f32.mrb[17].mxu0 }
0x1331   :  { %v1137_v51 = vpop.f32.mrb[18].mxu0 }
0x1332   :  { %v1145_v29 = vadd.f32 %v1141_v61, %v8422_v47  ;;  %v1146_v0 = vadd.f32 %v1142_v62, %v8424_v49  ;;  %v7091_v30 = vpop.f32.mrb[19].mxu0 }
0x1334   :  { %7573 = vtanh.f32 %v1145_v29  ;;  %v6708_v11 = vmul.f32 -1.442695, %v1145_v29  ;;  %v6709_v16 = vmul.f32 -1.442695, %v1146_v0  ;;  %v7444_v29 = vld [vmem:[%s10174_s4 + $0x18] sm:$0xff]  }
0x1335   :  { %7575 = vtanh.f32 %v1146_v0 }
0x1336   :  { %7577 = vpow2.f32 %v6708_v11 }
0x1337   :  { %7579 = vpow2.f32 %v6709_v16 }
0x133e   :  { %v7574_v8 = vpop.eup %7573 }
0x133f   :  { %v7576_v9 = vpop.eup %7575  ;;  %1171 = vrot.lane.b32.xlu0 %v7574_v8, %s8188_s25 }
0x1340   :  { %1173 = vrot.lane.b32.xlu1 %v7576_v9, %s8188_s25  ;;  %v7578_v10 = vpop.eup %7577 }
0x1341   :  { %v7580_v13 = vpop.eup %7579  ;;  %v1153_v14 = vadd.f32 1.0, %v7578_v10 }
0x1342   :  { %v1154_v18 = vadd.f32 1.0, %v7580_v13 }
0x1343   :  { %7581 = vrcp.f32 %v1153_v14 }
0x1344   :  { %7583 = vrcp.f32 %v1154_v18 }
0x134d   :  { %v7582_v19 = vpop.eup %7581 }
0x134e   :  { %v7584_v21 = vpop.eup %7583  ;;  %v1167_v39 = vmul.f32 %v7582_v19, %v1163_v32 }
0x134f   :  { %v1168_v22 = vmul.f32 %v7584_v21, %v1164_v37 }
0x13b1   :  { %v1172_v20 = vpop.permute.xlu0 %1171 }
0x13b2   :  { %v1174_v24 = vpop.permute.xlu1 %1173  ;;  %v1177_v25 = vmul.f32 %v7582_v19, %v1172_v20 }
0x13b3   :  { %v1178_v27 = vmul.f32 %v7584_v21, %v1174_v24 }
0x13b4   :  { %1181 = vrot.lane.b32.xlu0 %v1177_v25, %s8196_s26 }
0x13b5   :  { %1183 = vrot.lane.b32.xlu1 %v1178_v27, %s8196_s26 }
0x1426   :  { %v1182_v40 = vpop.permute.xlu0 %1181 }
0x1427   :  { %v1184_v35 = vpop.permute.xlu1 %1183  ;;  %v8682_v41 = vadd.f32 %v1182_v40, %v1167_v39 }
0x1428   :  { %v8684_v26 = vadd.f32 %v1184_v35, %v1168_v22 }
0x1429   :  { %7585 = vtanh.f32 %v8682_v41  ;;  %v1292_v40 = vrot.slane %v8682_v41, 7 }
0x142a   :  { %7587 = vtanh.f32 %v8684_v26  ;;  %v1293_v35 = vrot.slane %v8684_v26, 7 }
0x1433   :  { %v7586_v42 = vpop.eup %7585 }
0x1434   :  { %v7588_v43 = vpop.eup %7587  ;;  %1193 = vrot.lane.b32.xlu0 %v7586_v42, %s8188_s25 }
0x1435   :  { %1195 = vrot.lane.b32.xlu1 %v7588_v43, %s8188_s25 }
0x14a6   :  { %v1194_v23 = vpop.permute.xlu0 %1193 }
0x14a7   :  { %v1196_v46 = vpop.permute.xlu1 %1195  ;;  %v1199_v52 = vmul.f32 %v7582_v19, %v1194_v23 }
0x14a8   :  { %v1200_v53 = vmul.f32 %v7584_v21, %v1196_v46 }
0x14a9   :  { %v1207_v55 = vrot.slane %v1199_v52, %v8691_v15  ;;  %v1214_v57 = vpack.c.bf16 %v1199_v52, %v1199_v52 }
0x14aa   :  { %v1211_v7 = vrot.slane %v1200_v53, %v8691_v15  ;;  %v1215_v38 = vpack.c.bf16 %v1200_v53, %v1200_v53 }
0x14ab   :  { %v1218_v58 = vunpack.c.l.b16 %v1214_v57  ;;  %v8699_v59 = vsel %vm1201_vm3, %v1207_v55, %v8662_v54  ;;  %v7445_v55 = vld [vmem:[%s10175_s5] sm:$0xff]   ;;  %v7446_v57 = vld [vmem:[%s10175_s5 + $0x8] sm:$0xff]  }
0x14ac   :  { %v1219_v60 = vunpack.c.l.b16 %v1215_v38  ;;  %v8704_v28 = vsel %vm1201_vm3, %v1211_v7, %v8667_v56  ;;  %7101 = vmatpush3.bf16.msra.mxu0 %v7445_v55  ;;  %v8746_v7 = vld [vmem:[%s10174_s4 + $0x20] sm:$0xff]   ;;  %v8751_v38 = vsub.s32 7, %v8323_v2 }
0x14ad   :  { %v1220_v61 = vrot.slane %v1218_v58, 6  ;;  %7102 = vmatprep.subr.bf16.mxu0 %v8193_v1  ;;  %v8756_v58 = vld [vmem:[%s10174_s4 + $0x28] sm:$0xff]  }
0x14ae   :  { %v1221_v62 = vrot.slane %v1219_v60, 5 }
0x14b0   :  { %v1222_v63 = vsel %vm449_vm8, %v1221_v62, %v1220_v61  ;;  %7103 = vmatpush3.bf16.msra.mxu0 %v7446_v57 }
0x14b1   :  { %v1223_v51 = vpack.c.b16 %v1222_v63, %v1222_v63  ;;  %7114 = vmatprep.subr.bf16.mxu0 %v8193_v1 }
0x14b3   :  { %1224 = vrot.lane.b32.xlu0 %v1223_v51, %s8196_s26 }
0x1525   :  { %v1225_v0 = vpop.permute.xlu0 %1224 }
0x1526   :  { %7097 = vmatmul.mubr.msk.bf16.vlgmr.msra.gmra.mrb[24].mxu1 %vm331_vm9, %v1225_v0 }
0x1527   :  { %7109 = vmatpush3.bf16.msra.mxu1 %v7444_v29  ;;  %7110 = vmatprep.mubr.msk.bf16.mxu1 %vm8194_vm0, %v8193_v1 }
0x1528   :  { %7122 = vmatprep.subr.bf16.mxu1 %v8193_v1 }
0x152e   :  { %7111 = vmatmul.mubr.msk.bf16.vlgmr.msra.gmra.mrb[28].mxu1 %vm268_vm7, %v1529_v45 }
0x152f   :  { %7126 = vmatprep.mubr.msk.bf16.mxu1 %vm8194_vm0, %v8193_v1  ;;  %7123 = vmatpush3.bf16.msra.mxu1 %v8746_v7 }
0x1530   :  { %7124 = vmatprep.subr.bf16.mxu1 %v8193_v1 }
0x1533   :  { %7125 = vmatpush3.bf16.msra.mxu1 %v8756_v58 }
0x1534   :  { %7138 = vmatprep.subr.bf16.mxu1 %v8193_v1 }
0x15f9   :  { %v1263_v54 = vpop.f32.mrb[24].mxu1 }
0x15fa   :  { %v1270_v56 = vrot.slane %v1263_v54, 1  ;;  %v1271_v30 = vrot.slane %v1263_v54, 2  ;;  %v7098_v8 = vpop.f32.mrb[25].mxu1 }
0x15fb   :  { %v1266_v9 = vpop.f32.mrb[26].mxu1 }
0x15fc   :  { %v1274_v11 = vadd.f32 %v1270_v56, %v8422_v47  ;;  %v1275_v16 = vadd.f32 %v1271_v30, %v8424_v49  ;;  %v7099_v10 = vpop.f32.mrb[27].mxu1 }
0x15fe   :  { %7589 = vtanh.f32 %v1274_v11  ;;  %v6711_v19 = vmul.f32 -1.442695, %v1274_v11  ;;  %v6712_v20 = vmul.f32 -1.442695, %v1275_v16 }
0x15ff   :  { %7591 = vtanh.f32 %v1275_v16 }
0x1600   :  { %7593 = vpow2.f32 %v6711_v19 }
0x1601   :  { %v8723_v13 = vpop.f32.mrb[28].mxu1  ;;  %7595 = vpow2.f32 %v6712_v20 }
0x1602   :  { %v7112_v34 = vpop.f32.mrb[29].mxu1 }
0x1603   :  { %v8725_v44 = vpop.f32.mrb[30].mxu1 }
0x1604   :  { %v7113_v45 = vpop.f32.mrb[31].mxu1 }
0x1608   :  { %v7590_v14 = vpop.eup %7589 }
0x1609   :  { %v7592_v18 = vpop.eup %7591  ;;  %1300 = vrot.lane.b32.xlu1 %v7590_v14, %s8188_s25 }
0x160a   :  { %1302 = vrot.lane.b32.xlu0 %v7592_v18, %s8188_s25  ;;  %v7594_v47 = vpop.eup %7593 }
0x160b   :  { %v7596_v49 = vpop.eup %7595  ;;  %v1282_v21 = vadd.f32 1.0, %v7594_v47 }
0x160c   :  { %v1283_v24 = vadd.f32 1.0, %v7596_v49 }
0x160d   :  { %7597 = vrcp.f32 %v1282_v21 }
0x160e   :  { %7599 = vrcp.f32 %v1283_v24 }
0x1617   :  { %v7598_v25 = vpop.eup %7597 }
0x1618   :  { %v7600_v32 = vpop.eup %7599  ;;  %v1296_v42 = vmul.f32 %v7598_v25, %v1292_v40 }
0x1619   :  { %v1297_v43 = vmul.f32 %v7600_v32, %v1293_v35 }
0x167b   :  { %v1301_v27 = vpop.permute.xlu1 %1300 }
0x167c   :  { %v1303_v37 = vpop.permute.xlu0 %1302  ;;  %v1306_v39 = vmul.f32 %v7598_v25, %v1301_v27 }
0x167d   :  { %v1307_v22 = vmul.f32 %v7600_v32, %v1303_v37 }
0x167e   :  { %1310 = vrot.lane.b32.xlu1 %v1306_v39, %s8196_s26 }
0x167f   :  { %1312 = vrot.lane.b32.xlu0 %v1307_v22, %s8196_s26 }
0x16f0   :  { %v1311_v23 = vpop.permute.xlu1 %1310 }
0x16f1   :  { %v1313_v46 = vpop.permute.xlu0 %1312  ;;  %v1316_v52 = vadd.f32 %v1311_v23, %v1296_v42 }
0x16f2   :  { %v1317_v53 = vadd.f32 %v1313_v46, %v1297_v43 }
0x16f3   :  { %7601 = vtanh.f32 %v1316_v52 }
0x16f4   :  { %7603 = vtanh.f32 %v1317_v53 }
0x16fd   :  { %v7602_v41 = vpop.eup %7601 }
0x16fe   :  { %v7604_v26 = vpop.eup %7603  ;;  %1322 = vrot.lane.b32.xlu1 %v7602_v41, %s8188_s25 }
0x16ff   :  { %1324 = vrot.lane.b32.xlu0 %v7604_v26, %s8188_s25 }
0x1770   :  { %v1323_v60 = vpop.permute.xlu1 %1322 }
0x1771   :  { %v1325_v61 = vpop.permute.xlu0 %1324  ;;  %v1328_v62 = vmul.f32 %v7598_v25, %v1323_v60  ;;  %v91_v25 = vld [vmem:[#allocation7 + $0x8] sm:$0xff] }
0x1772   :  { %v1329_v63 = vmul.f32 %v7600_v32, %v1325_v61  ;;  %v8806_v27 = vrot.slane %v91_v25, %v8326_v3 }
0x1773   :  { %v1336_v51 = vrot.slane %v1328_v62, %v8751_v38 }
0x1774   :  { %v1340_v29 = vrot.slane %v1329_v63, %v8751_v38 }
0x1775   :  { %v8766_v0 = vsel %vm1330_vm4, %v1336_v51, %v8699_v59 }
0x1776   :  { %v8771_v54 = vsel %vm1330_vm4, %v1340_v29, %v8704_v28  ;;  %v8085_v28 = vld [vmem:[#allocation7] sm:$0xff] }
0x1777   :  { %v1347_v56 = vpack.c.bf16 %v8771_v54, %v8766_v0  ;;  %v8793_v8 = vrot.slane %v8085_v28, %v8654_v33  ;;  %v1583_v16 = vrot.slane %v8085_v28, %v8336_v5 }
0x1779   :  { %1353 = vrot.lane.b32.xlu1 %v1347_v56, %s8196_s26  ;;  %v8798_v45 = vadd.f32 %v1583_v16, %v8723_v13  ;;  %v8801_v18 = vadd.f32 %v1583_v16, %v8725_v44 }
0x17eb   :  { %v1354_v30 = vpop.permute.xlu1 %1353 }
0x17ec   :  { %7105 = vmatmul.mubr.msk.bf16.vlgmr.msra.gmra.mrb[20].mxu0 %vm331_vm9, %v1354_v30 }
0x17ed   :  { %7115 = vmatpush3.bf16.msra.mxu0 %v8746_v7  ;;  %7118 = vmatprep.mubr.msk.bf16.mxu0 %vm8194_vm0, %v8193_v1 }
0x17ee   :  { %7116 = vmatprep.subr.bf16.mxu0 %v8193_v1 }
0x17f1   :  { %7117 = vmatpush3.bf16.msra.mxu0 %v8756_v58 }
0x17f2   :  { %7130 = vmatprep.subr.bf16.mxu0 %v8193_v1 }
0x17f4   :  { %7119 = vmatmul.mubr.bf16.vlgmr.msra.gmra.mrb[24].mxu0 %v8195_v31 }
0x17f5   :  { %7131 = vmatpush3.bf16.msra.mxu0 %v8746_v7  ;;  %7134 = vmatprep.mubr.msk.bf16.mxu0 %vm8194_vm0, %v8193_v1 }
0x17f6   :  { %7132 = vmatprep.subr.bf16.mxu0 %v8193_v1 }
0x17f9   :  { %7133 = vmatpush3.bf16.msra.mxu0 %v8756_v58 }
0x17fa   :  { %7146 = vmatprep.subr.bf16.mxu0 %v8193_v1 }
0x18bf   :  { %v8790_v59 = vpop.f32.mrb[20].mxu0 }
0x18c0   :  { %v7106_v9 = vpop.f32.mrb[21].mxu0 }
0x18c1   :  { %v1407_v11 = vpop.f32.mrb[22].mxu0 }
0x18c2   :  { %v1408_v10 = vadd.f32 %v1407_v11, %v8793_v8  ;;  %v7107_v34 = vpop.f32.mrb[23].mxu0 }
0x18c4   :  { %7605 = vtanh.f32 %v1408_v10 }
0x18c7   :  { %v1632_v14 = vpop.f32.mrb[24].mxu0 }
0x18c8   :  { %v1639_v19 = vrot.slane %v1632_v14, 1  ;;  %v1642_v20 = vadd.f32 %v1632_v14, %v8798_v45  ;;  %v7120_v47 = vpop.f32.mrb[25].mxu0 }
0x18c9   :  { %v1635_v49 = vpop.f32.mrb[26].mxu0 }
0x18ca   :  { %v1643_v21 = vadd.f32 %v1639_v19, %v8801_v18  ;;  %7607 = vtanh.f32 %v1642_v20  ;;  %v7121_v24 = vpop.f32.mrb[27].mxu0  ;;  %v6726_v39 = vmul.f32 -1.442695, %v1642_v20 }
0x18cc   :  { %7609 = vtanh.f32 %v1643_v21  ;;  %v6727_v22 = vmul.f32 -1.442695, %v1643_v21 }
0x18cd   :  { %7611 = vpow2.f32 %v6726_v39 }
0x18ce   :  { %v7606_v13 = vpop.eup %7605  ;;  %7613 = vpow2.f32 %v6727_v22 }
0x18cf   :  { %v8809_v32 = vmul.f32 %v7606_v13, %v8806_v27 }
0x18d4   :  { %v7608_v44 = vpop.eup %7607 }
0x18d5   :  { %1662 = vrot.lane.b32.xlu1 %v7608_v44, %s8188_s25 }
0x18d6   :  { %v7610_v37 = vpop.eup %7609 }
0x18d7   :  { %1664 = vrot.lane.b32.xlu0 %v7610_v37, %s8188_s25  ;;  %v7612_v40 = vpop.eup %7611 }
0x18d8   :  { %v7614_v35 = vpop.eup %7613  ;;  %v1650_v42 = vadd.f32 1.0, %v7612_v40 }
0x18d9   :  { %v1651_v43 = vadd.f32 1.0, %v7614_v35 }
0x18da   :  { %7615 = vrcp.f32 %v1650_v42 }
0x18db   :  { %7617 = vrcp.f32 %v1651_v43 }
0x18e4   :  { %v7616_v23 = vpop.eup %7615 }
0x18e5   :  { %v7618_v53 = vpop.eup %7617  ;;  %v1658_v41 = vmul.f32 0.0, %v7616_v23 }
0x18e6   :  { %v1659_v61 = vmul.f32 0.0, %v7618_v53 }
0x1947   :  { %v1663_v46 = vpop.permute.xlu1 %1662 }
0x1948   :  { %v1668_v52 = vmul.f32 %v7616_v23, %v1663_v46 }
0x1949   :  { %v1665_v55 = vpop.permute.xlu0 %1664 }
0x194a   :  { %1672 = vrot.lane.b32.xlu1 %v1668_v52, %s8196_s26  ;;  %v1669_v57 = vmul.f32 %v7618_v53, %v1665_v55 }
0x194c   :  { %1674 = vrot.lane.b32.xlu0 %v1669_v57, %s8196_s26 }
0x19bc   :  { %v1673_v26 = vpop.permute.xlu1 %1672 }
0x19bd   :  { %v8815_v60 = vadd.f32 %v1673_v26, %v1658_v41 }
0x19be   :  { %v1675_v62 = vpop.permute.xlu0 %1674 }
0x19bf   :  { %7619 = vtanh.f32 %v8815_v60  ;;  %v1679_v63 = vadd.f32 %v1675_v62, %v1659_v61 }
0x19c1   :  { %7621 = vtanh.f32 %v1679_v63  ;;  %v1779_v61 = vrot.slane %v1679_v63, 7 }
0x19c9   :  { %v7620_v51 = vpop.eup %7619 }
0x19ca   :  { %1684 = vrot.lane.b32.xlu1 %v7620_v51, %s8188_s25  ;;  %v1778_v51 = vrot.slane %v8815_v60, 7 }
0x19cb   :  { %v7622_v29 = vpop.eup %7621 }
0x19cc   :  { %1686 = vrot.lane.b32.xlu0 %v7622_v29, %s8188_s25 }
0x1a3c   :  { %v1685_v56 = vpop.permute.xlu1 %1684 }
0x1a3d   :  { %v8820_v30 = vmul.f32 %v7616_v23, %v1685_v56 }
0x1a3e   :  { %v1687_v28 = vpop.permute.xlu0 %1686 }
0x1a3f   :  { %v8822_v9 = vmul.f32 %v7618_v53, %v1687_v28  ;;  %v1702_v11 = vpack.c.bf16 %v8820_v30, %v8820_v30 }
0x1a41   :  { %v1703_v16 = vpack.c.bf16 %v8822_v9, %v8822_v9  ;;  %v1706_v34 = vunpack.c.l.b16 %v1702_v11  ;;  %v1699_v60 = vrot.slane %v8822_v9, %v8326_v3 }
0x1a43   :  { %v1707_v10 = vunpack.c.l.b16 %v1703_v16 }
0x1a45   :  { %v1708_v14 = vrot.slane %v1707_v10, 7 }
0x1a47   :  { %v1709_v19 = vsel %vm449_vm8, %v1708_v14, %v1706_v34 }
0x1a48   :  { %v1710_v20 = vpack.c.b16 %v1709_v19, %v1709_v19  ;;  %v1695_v19 = vrot.slane %v8820_v30, %v8326_v3 }
0x1a4a   :  { %1711 = vrot.lane.b32.xlu0 %v1710_v20, %s8196_s26 }
0x1abc   :  { %v1712_v47 = vpop.permute.xlu0 %1711 }
0x1abd   :  { %7127 = vmatmul.mubr.msk.bf16.vlgmr.msra.gmra.mrb[32].mxu1 %vm331_vm9, %v1712_v47 }
0x1abe   :  { %7139 = vmatpush3.bf16.msra.mxu1 %v8746_v7  ;;  %7142 = vmatprep.mubr.msk.bf16.mxu1 %vm8194_vm0, %v8193_v1 }
0x1abf   :  { %7140 = vmatprep.subr.bf16.mxu1 %v8193_v1 }
0x1ac2   :  { %7141 = vmatpush3.bf16.msra.mxu1 %v8756_v58 }
0x1ac3   :  { %7154 = vmatprep.subr.bf16.mxu1 %v8193_v1 }
0x1b90   :  { %v1750_v49 = vpop.f32.mrb[32].mxu1 }
0x1b91   :  { %v1757_v21 = vrot.slane %v1750_v49, 7  ;;  %v1761_v24 = vadd.f32 %v1750_v49, %v8801_v18  ;;  %v7128_v25 = vpop.f32.mrb[33].mxu1  ;;  %v1701_v49 = vsel %vm429_vm11, %v1699_v60, 0.0 }
0x1b92   :  { %v1753_v13 = vpop.f32.mrb[34].mxu1 }
0x1b93   :  { %v1760_v44 = vadd.f32 %v1757_v21, %v8798_v45  ;;  %7623 = vtanh.f32 %v1761_v24  ;;  %v7129_v37 = vpop.f32.mrb[35].mxu1  ;;  %v6730_v40 = vmul.f32 -1.442695, %v1761_v24 }
0x1b95   :  { %7625 = vtanh.f32 %v1760_v44  ;;  %v6729_v35 = vmul.f32 -1.442695, %v1760_v44  ;;  %v1700_v44 = vsel %vm429_vm11, %v1695_v19, 0.0 }
0x1b96   :  { %7627 = vpow2.f32 %v6730_v40 }
0x1b97   :  { %7629 = vpow2.f32 %v6729_v35 }
0x1b9d   :  { %v7624_v39 = vpop.eup %7623 }
0x1b9e   :  { %1788 = vrot.lane.b32.xlu0 %v7624_v39, %s8188_s25 }
0x1b9f   :  { %v7626_v22 = vpop.eup %7625 }
0x1ba0   :  { %1786 = vrot.lane.b32.xlu1 %v7626_v22, %s8188_s25  ;;  %v7628_v42 = vpop.eup %7627 }
0x1ba1   :  { %v7630_v43 = vpop.eup %7629  ;;  %v1769_v23 = vadd.f32 1.0, %v7628_v42 }
0x1ba2   :  { %v1768_v46 = vadd.f32 1.0, %v7630_v43 }
0x1ba3   :  { %7631 = vrcp.f32 %v1769_v23 }
0x1ba4   :  { %7633 = vrcp.f32 %v1768_v46 }
0x1bad   :  { %v7632_v52 = vpop.eup %7631 }
0x1bae   :  { %v7634_v57 = vpop.eup %7633  ;;  %v1783_v62 = vmul.f32 %v7632_v52, %v1779_v61 }
0x1baf   :  { %v1782_v28 = vmul.f32 %v7634_v57, %v1778_v51 }
0x1c10   :  { %v1789_v53 = vpop.permute.xlu0 %1788 }
0x1c11   :  { %v1793_v55 = vmul.f32 %v7632_v52, %v1789_v53 }
0x1c12   :  { %v1787_v41 = vpop.permute.xlu1 %1786 }
0x1c13   :  { %1798 = vrot.lane.b32.xlu0 %v1793_v55, %s8196_s26  ;;  %v1792_v26 = vmul.f32 %v7634_v57, %v1787_v41 }
0x1c15   :  { %1796 = vrot.lane.b32.xlu1 %v1792_v26, %s8196_s26 }
0x1c85   :  { %v1799_v29 = vpop.permute.xlu0 %1798 }
0x1c86   :  { %v8844_v56 = vadd.f32 %v1799_v29, %v1783_v62 }
0x1c87   :  { %v1797_v11 = vpop.permute.xlu1 %1796 }
0x1c88   :  { %7635 = vtanh.f32 %v8844_v56  ;;  %v8847_v16 = vadd.f32 %v1797_v11, %v1782_v28 }
0x1c8a   :  { %7637 = vtanh.f32 %v8847_v16 }
0x1c92   :  { %v7636_v10 = vpop.eup %7635 }
0x1c93   :  { %1810 = vrot.lane.b32.xlu0 %v7636_v10, %s8188_s25 }
0x1c94   :  { %v7638_v34 = vpop.eup %7637 }
0x1c95   :  { %1808 = vrot.lane.b32.xlu1 %v7638_v34, %s8188_s25 }
0x1d05   :  { %v1811_v63 = vpop.permute.xlu0 %1810 }
0x1d06   :  { %v1815_v14 = vmul.f32 %v7632_v52, %v1811_v63 }
0x1d07   :  { %v1809_v47 = vpop.permute.xlu1 %1808 }
0x1d08   :  { %v1823_v20 = vrot.slane %v1815_v14, %v8336_v5  ;;  %v1814_v21 = vmul.f32 %v7634_v57, %v1809_v47  ;;  %v1827_v25 = vpack.c.bf16 %v1815_v14, %v1815_v14  ;;  %v1903_v47 = vrot.slane %v8847_v16, 7 }
0x1d0a   :  { %v8861_v24 = vsel %vm557_vm10, %v1823_v20, %v1701_v49  ;;  %v1819_v13 = vrot.slane %v1814_v21, %v8336_v5  ;;  %v1826_v9 = vpack.c.bf16 %v1814_v21, %v1814_v21  ;;  %v1831_v39 = vunpack.c.l.b16 %v1827_v25 }
0x1d0b   :  { %v1904_v49 = vrot.slane %v8844_v56, 7 }
0x1d0c   :  { %v8868_v30 = vsel %vm557_vm10, %v1819_v13, %v1700_v44  ;;  %v1830_v37 = vunpack.c.l.b16 %v1826_v9 }
0x1d0e   :  { %v1832_v22 = vrot.slane %v1830_v37, 1 }
0x1d10   :  { %v1833_v40 = vsel %vm449_vm8, %v1831_v39, %v1832_v22 }
0x1d11   :  { %v1834_v35 = vpack.c.b16 %v1833_v40, %v1833_v40 }
0x1d13   :  { %1835 = vrot.lane.b32.xlu1 %v1834_v35, %s8196_s26 }
0x1d85   :  { %v1836_v42 = vpop.permute.xlu1 %1835 }
0x1d86   :  { %7135 = vmatmul.mubr.msk.bf16.vlgmr.msra.gmra.mrb[28].mxu0 %vm331_vm9, %v1836_v42 }
0x1d87   :  { %7147 = vmatpush3.bf16.msra.mxu0 %v8746_v7  ;;  %7150 = vmatprep.mubr.msk.bf16.mxu0 %vm8194_vm0, %v8193_v1 }
0x1d88   :  { %7148 = vmatprep.subr.bf16.mxu0 %v8193_v1 }
0x1d8b   :  { %7149 = vmatpush3.bf16.msra.mxu0 %v8756_v58 }
0x1d8c   :  { %7162 = vmatprep.subr.bf16.mxu0 %v8193_v1 }
0x1e59   :  { %v1874_v43 = vpop.f32.mrb[28].mxu0 }
0x1e5a   :  { %v1881_v23 = vrot.slane %v1874_v43, 6  ;;  %v1882_v46 = vrot.slane %v1874_v43, 7  ;;  %v7136_v52 = vpop.f32.mrb[29].mxu0 }
0x1e5b   :  { %v1877_v53 = vpop.f32.mrb[30].mxu0 }
0x1e5c   :  { %v1885_v55 = vadd.f32 %v1881_v23, %v8798_v45  ;;  %v1886_v57 = vadd.f32 %v1882_v46, %v8801_v18  ;;  %v7137_v41 = vpop.f32.mrb[31].mxu0 }
0x1e5e   :  { %7639 = vtanh.f32 %v1885_v55  ;;  %v6732_v62 = vmul.f32 -1.442695, %v1885_v55  ;;  %v6733_v51 = vmul.f32 -1.442695, %v1886_v57 }
0x1e5f   :  { %7641 = vtanh.f32 %v1886_v57 }
0x1e60   :  { %7643 = vpow2.f32 %v6732_v62 }
0x1e61   :  { %7645 = vpow2.f32 %v6733_v51 }
0x1e68   :  { %v7640_v26 = vpop.eup %7639 }
0x1e69   :  { %v7642_v61 = vpop.eup %7641  ;;  %1911 = vrot.lane.b32.xlu0 %v7640_v26, %s8188_s25 }
0x1e6a   :  { %1913 = vrot.lane.b32.xlu1 %v7642_v61, %s8188_s25  ;;  %v7644_v29 = vpop.eup %7643 }
0x1e6b   :  { %v7646_v28 = vpop.eup %7645  ;;  %v1893_v11 = vadd.f32 1.0, %v7644_v29 }
0x1e6c   :  { %v1894_v10 = vadd.f32 1.0, %v7646_v28 }
0x1e6d   :  { %7647 = vrcp.f32 %v1893_v11 }
0x1e6e   :  { %7649 = vrcp.f32 %v1894_v10 }
0x1e77   :  { %v7648_v34 = vpop.eup %7647 }
0x1e78   :  { %v7650_v63 = vpop.eup %7649  ;;  %v1907_v21 = vmul.f32 %v7648_v34, %v1903_v47 }
0x1e79   :  { %v1908_v25 = vmul.f32 %v7650_v63, %v1904_v49 }
0x1edb   :  { %v1912_v60 = vpop.permute.xlu0 %1911 }
0x1edc   :  { %v1914_v14 = vpop.permute.xlu1 %1913  ;;  %v1917_v19 = vmul.f32 %v7648_v34, %v1912_v60 }
0x1edd   :  { %v1918_v20 = vmul.f32 %v7650_v63, %v1914_v14 }
0x1ede   :  { %1921 = vrot.lane.b32.xlu0 %v1917_v19, %s8196_s26 }
0x1edf   :  { %1923 = vrot.lane.b32.xlu1 %v1918_v20, %s8196_s26 }
0x1f50   :  { %v1922_v13 = vpop.permute.xlu0 %1921 }
0x1f51   :  { %v1924_v9 = vpop.permute.xlu1 %1923  ;;  %v8887_v44 = vadd.f32 %v1922_v13, %v1907_v21 }
0x1f52   :  { %v8889_v37 = vadd.f32 %v1924_v9, %v1908_v25 }
0x1f53   :  { %7651 = vtanh.f32 %v8887_v44 }
0x1f54   :  { %7653 = vtanh.f32 %v8889_v37 }
0x1f5d   :  { %v7652_v39 = vpop.eup %7651 }
0x1f5e   :  { %v7654_v22 = vpop.eup %7653  ;;  %1933 = vrot.lane.b32.xlu0 %v7652_v39, %s8188_s25 }
0x1f5f   :  { %1935 = vrot.lane.b32.xlu1 %v7654_v22, %s8188_s25 }
0x1fd0   :  { %v1934_v16 = vpop.permute.xlu0 %1933 }
0x1fd1   :  { %v1936_v56 = vpop.permute.xlu1 %1935  ;;  %v1939_v40 = vmul.f32 %v7648_v34, %v1934_v16 }
0x1fd2   :  { %v1940_v35 = vmul.f32 %v7650_v63, %v1936_v56 }
0x1fd3   :  { %v1944_v42 = vrot.slane %v1939_v40, %v8329_v4  ;;  %v1951_v43 = vpack.c.bf16 %v1939_v40, %v1939_v40  ;;  %v2029_v40 = vrot.slane %v8887_v44, 7 }
0x1fd4   :  { %v1948_v23 = vrot.slane %v1940_v35, %v8329_v4  ;;  %v1952_v46 = vpack.c.bf16 %v1940_v35, %v1940_v35  ;;  %v2030_v35 = vrot.slane %v8889_v37, 7 }
0x1fd5   :  { %v8900_v52 = vsel %vm685_vm12, %v1944_v42, %v8868_v30  ;;  %v1955_v53 = vunpack.c.l.b16 %v1951_v43 }
0x1fd6   :  { %v8905_v55 = vsel %vm685_vm12, %v1948_v23, %v8861_v24  ;;  %v1956_v57 = vunpack.c.l.b16 %v1952_v46 }
0x1fd7   :  { %v1957_v41 = vrot.slane %v1955_v53, 2 }
0x1fd8   :  { %v1958_v26 = vrot.slane %v1956_v57, 1 }
0x1fda   :  { %v1959_v61 = vsel %vm449_vm8, %v1958_v26, %v1957_v41 }
0x1fdb   :  { %v1960_v62 = vpack.c.b16 %v1959_v61, %v1959_v61 }
0x1fdd   :  { %1961 = vrot.lane.b32.xlu0 %v1960_v62, %s8196_s26 }
0x204f   :  { %v1962_v51 = vpop.permute.xlu0 %1961 }
0x2050   :  { %7143 = vmatmul.mubr.msk.bf16.vlgmr.msra.gmra.mrb[36].mxu1 %vm331_vm9, %v1962_v51 }
0x2051   :  { %7155 = vmatpush3.bf16.msra.mxu1 %v8746_v7  ;;  %7158 = vmatprep.mubr.msk.bf16.mxu1 %vm8194_vm0, %v8193_v1 }
0x2052   :  { %7156 = vmatprep.subr.bf16.mxu1 %v8193_v1 }
0x2055   :  { %7157 = vmatpush3.bf16.msra.mxu1 %v8756_v58 }
0x2056   :  { %7170 = vmatprep.subr.bf16.mxu1 %v8193_v1 }
0x2123   :  { %v2000_v24 = vpop.f32.mrb[36].mxu1 }
0x2124   :  { %v2007_v30 = vrot.slane %v2000_v24, 5  ;;  %v2008_v29 = vrot.slane %v2000_v24, 6  ;;  %v7144_v28 = vpop.f32.mrb[37].mxu1 }
0x2125   :  { %v2003_v11 = vpop.f32.mrb[38].mxu1 }
0x2126   :  { %v2011_v10 = vadd.f32 %v2007_v30, %v8798_v45  ;;  %v2012_v34 = vadd.f32 %v2008_v29, %v8801_v18  ;;  %v7145_v60 = vpop.f32.mrb[39].mxu1 }
0x2128   :  { %7655 = vtanh.f32 %v2011_v10  ;;  %v6735_v19 = vmul.f32 -1.442695, %v2011_v10  ;;  %v6736_v20 = vmul.f32 -1.442695, %v2012_v34 }
0x2129   :  { %7657 = vtanh.f32 %v2012_v34 }
0x212a   :  { %7659 = vpow2.f32 %v6735_v19 }
0x212b   :  { %7661 = vpow2.f32 %v6736_v20 }
0x2132   :  { %v7656_v63 = vpop.eup %7655 }
0x2133   :  { %v7658_v14 = vpop.eup %7657  ;;  %2037 = vrot.lane.b32.xlu1 %v7656_v63, %s8188_s25 }
0x2134   :  { %2039 = vrot.lane.b32.xlu0 %v7658_v14, %s8188_s25  ;;  %v7660_v47 = vpop.eup %7659 }
0x2135   :  { %v7662_v49 = vpop.eup %7661  ;;  %v2019_v21 = vadd.f32 1.0, %v7660_v47 }
0x2136   :  { %v2020_v25 = vadd.f32 1.0, %v7662_v49 }
0x2137   :  { %7663 = vrcp.f32 %v2019_v21 }
0x2138   :  { %7665 = vrcp.f32 %v2020_v25 }
0x2141   :  { %v7664_v13 = vpop.eup %7663 }
0x2142   :  { %v7666_v39 = vpop.eup %7665  ;;  %v2033_v42 = vmul.f32 %v7664_v13, %v2029_v40 }
0x2143   :  { %v2034_v43 = vmul.f32 %v7666_v39, %v2030_v35 }
0x21a5   :  { %v2038_v9 = vpop.permute.xlu1 %2037 }
0x21a6   :  { %v2040_v22 = vpop.permute.xlu0 %2039  ;;  %v2043_v16 = vmul.f32 %v7664_v13, %v2038_v9 }
0x21a7   :  { %v2044_v56 = vmul.f32 %v7666_v39, %v2040_v22 }
0x21a8   :  { %2047 = vrot.lane.b32.xlu1 %v2043_v16, %s8196_s26 }
0x21a9   :  { %2049 = vrot.lane.b32.xlu0 %v2044_v56, %s8196_s26 }
0x221a   :  { %v2048_v23 = vpop.permute.xlu1 %2047 }
0x221b   :  { %v2050_v46 = vpop.permute.xlu0 %2049  ;;  %v8924_v53 = vadd.f32 %v2048_v23, %v2033_v42 }
0x221c   :  { %v8926_v57 = vadd.f32 %v2050_v46, %v2034_v43 }
0x221d   :  { %7667 = vtanh.f32 %v8924_v53 }
0x221e   :  { %7669 = vtanh.f32 %v8926_v57 }
0x2227   :  { %v7668_v41 = vpop.eup %7667 }
0x2228   :  { %v7670_v26 = vpop.eup %7669  ;;  %2059 = vrot.lane.b32.xlu1 %v7668_v41, %s8188_s25 }
0x2229   :  { %2061 = vrot.lane.b32.xlu0 %v7670_v26, %s8188_s25 }
0x229a   :  { %v2060_v44 = vpop.permute.xlu1 %2059 }
0x229b   :  { %v2062_v37 = vpop.permute.xlu0 %2061  ;;  %v2065_v61 = vmul.f32 %v7664_v13, %v2060_v44 }
0x229c   :  { %v2066_v62 = vmul.f32 %v7666_v39, %v2062_v37 }
0x229d   :  { %v2070_v51 = vrot.slane %v2065_v61, %v8557_v6  ;;  %v2077_v24 = vpack.c.bf16 %v2065_v61, %v2065_v61  ;;  %v2155_v61 = vrot.slane %v8924_v53, 7 }
0x229e   :  { %v2074_v30 = vrot.slane %v2066_v62, %v8557_v6  ;;  %v2078_v29 = vpack.c.bf16 %v2066_v62, %v2066_v62  ;;  %v2156_v62 = vrot.slane %v8926_v57, 7 }
0x229f   :  { %v8937_v28 = vsel %vm814_vm13, %v2070_v51, %v8900_v52  ;;  %v2081_v11 = vunpack.c.l.b16 %v2077_v24 }
0x22a0   :  { %v8942_v10 = vsel %vm814_vm13, %v2074_v30, %v8905_v55  ;;  %v2082_v34 = vunpack.c.l.b16 %v2078_v29 }
0x22a1   :  { %v2083_v60 = vrot.slane %v2081_v11, 3 }
0x22a2   :  { %v2084_v63 = vrot.slane %v2082_v34, 2 }
0x22a4   :  { %v2085_v14 = vsel %vm449_vm8, %v2084_v63, %v2083_v60 }
0x22a5   :  { %v2086_v19 = vpack.c.b16 %v2085_v14, %v2085_v14 }
0x22a7   :  { %2087 = vrot.lane.b32.xlu1 %v2086_v19, %s8196_s26 }
0x2319   :  { %v2088_v20 = vpop.permute.xlu1 %2087 }
0x231a   :  { %7151 = vmatmul.mubr.msk.bf16.vlgmr.msra.gmra.mrb[32].mxu0 %vm331_vm9, %v2088_v20 }
0x231b   :  { %7163 = vmatpush3.bf16.msra.mxu0 %v8746_v7  ;;  %7166 = vmatprep.mubr.msk.bf16.mxu0 %vm8194_vm0, %v8193_v1 }
0x231c   :  { %7164 = vmatprep.subr.bf16.mxu0 %v8193_v1 }
0x231f   :  { %7165 = vmatpush3.bf16.msra.mxu0 %v8756_v58 }
0x2320   :  { %7178 = vmatprep.subr.bf16.mxu0 %v8193_v1 }
0x23ed   :  { %v2126_v52 = vpop.f32.mrb[32].mxu0 }
0x23ee   :  { %v2133_v55 = vrot.slane %v2126_v52, 4  ;;  %v2134_v47 = vrot.slane %v2126_v52, 5  ;;  %v7152_v49 = vpop.f32.mrb[33].mxu0 }
0x23ef   :  { %v2129_v21 = vpop.f32.mrb[34].mxu0 }
0x23f0   :  { %v2137_v25 = vadd.f32 %v2133_v55, %v8798_v45  ;;  %v2138_v13 = vadd.f32 %v2134_v47, %v8801_v18  ;;  %v7153_v9 = vpop.f32.mrb[35].mxu0 }
0x23f2   :  { %7671 = vtanh.f32 %v2137_v25  ;;  %v6738_v16 = vmul.f32 -1.442695, %v2137_v25  ;;  %v6739_v56 = vmul.f32 -1.442695, %v2138_v13 }
0x23f3   :  { %7673 = vtanh.f32 %v2138_v13 }
0x23f4   :  { %7675 = vpow2.f32 %v6738_v16 }
0x23f5   :  { %7677 = vpow2.f32 %v6739_v56 }
0x23fc   :  { %v7672_v39 = vpop.eup %7671 }
0x23fd   :  { %v7674_v22 = vpop.eup %7673  ;;  %2163 = vrot.lane.b32.xlu0 %v7672_v39, %s8188_s25 }
0x23fe   :  { %2165 = vrot.lane.b32.xlu1 %v7674_v22, %s8188_s25  ;;  %v7676_v40 = vpop.eup %7675 }
0x23ff   :  { %v7678_v35 = vpop.eup %7677  ;;  %v2145_v42 = vadd.f32 1.0, %v7676_v40 }
0x2400   :  { %v2146_v43 = vadd.f32 1.0, %v7678_v35 }
0x2401   :  { %7679 = vrcp.f32 %v2145_v42 }
0x2402   :  { %7681 = vrcp.f32 %v2146_v43 }
0x240b   :  { %v7680_v23 = vpop.eup %7679 }
0x240c   :  { %v7682_v41 = vpop.eup %7681  ;;  %v2159_v51 = vmul.f32 %v7680_v23, %v2155_v61 }
0x240d   :  { %v2160_v24 = vmul.f32 %v7682_v41, %v2156_v62 }
0x246f   :  { %v2164_v46 = vpop.permute.xlu0 %2163 }
0x2470   :  { %v2166_v26 = vpop.permute.xlu1 %2165  ;;  %v2169_v44 = vmul.f32 %v7680_v23, %v2164_v46 }
0x2471   :  { %v2170_v37 = vmul.f32 %v7682_v41, %v2166_v26 }
0x2472   :  { %2173 = vrot.lane.b32.xlu0 %v2169_v44, %s8196_s26 }
0x2473   :  { %2175 = vrot.lane.b32.xlu1 %v2170_v37, %s8196_s26 }
0x24e4   :  { %v2174_v30 = vpop.permute.xlu0 %2173 }
0x24e5   :  { %v2176_v29 = vpop.permute.xlu1 %2175  ;;  %v8961_v11 = vadd.f32 %v2174_v30, %v2159_v51 }
0x24e6   :  { %v8963_v34 = vadd.f32 %v2176_v29, %v2160_v24 }
0x24e7   :  { %7683 = vtanh.f32 %v8961_v11 }
0x24e8   :  { %7685 = vtanh.f32 %v8963_v34 }
0x24f1   :  { %v7684_v60 = vpop.eup %7683 }
0x24f2   :  { %v7686_v63 = vpop.eup %7685  ;;  %2185 = vrot.lane.b32.xlu0 %v7684_v60, %s8188_s25 }
0x24f3   :  { %2187 = vrot.lane.b32.xlu1 %v7686_v63, %s8188_s25 }
0x2564   :  { %v2186_v53 = vpop.permute.xlu0 %2185 }
0x2565   :  { %v2188_v57 = vpop.permute.xlu1 %2187  ;;  %v2191_v14 = vmul.f32 %v7680_v23, %v2186_v53  ;;  %v2281_v53 = vrot.slane %v8961_v11, 7 }
0x2566   :  { %v2192_v19 = vmul.f32 %v7682_v41, %v2188_v57  ;;  %v2282_v57 = vrot.slane %v8963_v34, 7 }
0x2567   :  { %v2196_v20 = vrot.slane %v2191_v14, %v8613_v12  ;;  %v2203_v52 = vpack.c.bf16 %v2191_v14, %v2191_v14 }
0x2568   :  { %v2200_v55 = vrot.slane %v2192_v19, %v8613_v12  ;;  %v2204_v47 = vpack.c.bf16 %v2192_v19, %v2192_v19 }
0x2569   :  { %v8974_v49 = vsel %vm943_vm1, %v2196_v20, %v8937_v28  ;;  %v2207_v21 = vunpack.c.l.b16 %v2203_v52 }
0x256a   :  { %v8979_v25 = vsel %vm943_vm1, %v2200_v55, %v8942_v10  ;;  %v2208_v13 = vunpack.c.l.b16 %v2204_v47 }
0x256b   :  { %v2209_v9 = vrot.slane %v2207_v21, 4 }
0x256c   :  { %v2210_v39 = vrot.slane %v2208_v13, 3 }
0x256e   :  { %v2211_v22 = vsel %vm449_vm8, %v2210_v39, %v2209_v9 }
0x256f   :  { %v2212_v16 = vpack.c.b16 %v2211_v22, %v2211_v22 }
0x2571   :  { %2213 = vrot.lane.b32.xlu0 %v2212_v16, %s8196_s26 }
0x25e3   :  { %v2214_v56 = vpop.permute.xlu0 %2213 }
0x25e4   :  { %7159 = vmatmul.mubr.msk.bf16.vlgmr.msra.gmra.mrb[40].mxu1 %vm331_vm9, %v2214_v56 }
0x25e5   :  { %7171 = vmatpush3.bf16.msra.mxu1 %v8746_v7  ;;  %7174 = vmatprep.mubr.msk.bf16.mxu1 %vm8194_vm0, %v8193_v1 }
0x25e6   :  { %7172 = vmatprep.subr.bf16.mxu1 %v8193_v1 }
0x25e9   :  { %7173 = vmatpush3.bf16.msra.mxu1 %v8756_v58 }
0x25ea   :  { %7186 = vmatprep.subr.bf16.mxu1 %v8193_v1 }
0x26b7   :  { %v2252_v28 = vpop.f32.mrb[40].mxu1 }
0x26b8   :  { %v2259_v10 = vrot.slane %v2252_v28, 3  ;;  %v2260_v40 = vrot.slane %v2252_v28, 4  ;;  %v7160_v35 = vpop.f32.mrb[41].mxu1 }
0x26b9   :  { %v2255_v42 = vpop.f32.mrb[42].mxu1 }
0x26ba   :  { %v2263_v43 = vadd.f32 %v2259_v10, %v8798_v45  ;;  %v2264_v23 = vadd.f32 %v2260_v40, %v8801_v18  ;;  %v7161_v46 = vpop.f32.mrb[43].mxu1 }
0x26bc   :  { %7687 = vtanh.f32 %v2263_v43  ;;  %v6741_v58 = vmul.f32 -1.442695, %v2263_v43  ;;  %v6742_v26 = vmul.f32 -1.442695, %v2264_v23 }
0x26bd   :  { %7689 = vtanh.f32 %v2264_v23 }
0x26be   :  { %7691 = vpow2.f32 %v6741_v58 }
0x26bf   :  { %7693 = vpow2.f32 %v6742_v26 }
0x26c6   :  { %v7688_v7 = vpop.eup %7687 }
0x26c7   :  { %v7690_v41 = vpop.eup %7689  ;;  %2289 = vrot.lane.b32.xlu1 %v7688_v7, %s8188_s25 }
0x26c8   :  { %2291 = vrot.lane.b32.xlu0 %v7690_v41, %s8188_s25  ;;  %v7692_v44 = vpop.eup %7691 }
0x26c9   :  { %v7694_v37 = vpop.eup %7693  ;;  %v2271_v61 = vadd.f32 1.0, %v7692_v44 }
0x26ca   :  { %v2272_v62 = vadd.f32 1.0, %v7694_v37 }
0x26cb   :  { %7695 = vrcp.f32 %v2271_v61 }
0x26cc   :  { %7697 = vrcp.f32 %v2272_v62 }
0x26d5   :  { %v7696_v51 = vpop.eup %7695 }
0x26d6   :  { %v7698_v30 = vpop.eup %7697  ;;  %v2285_v14 = vmul.f32 %v7696_v51, %v2281_v53 }
0x26d7   :  { %v2286_v19 = vmul.f32 %v7698_v30, %v2282_v57 }
0x2739   :  { %v2290_v24 = vpop.permute.xlu1 %2289 }
0x273a   :  { %v2292_v29 = vpop.permute.xlu0 %2291  ;;  %v2295_v60 = vmul.f32 %v7696_v51, %v2290_v24 }
0x273b   :  { %v2296_v63 = vmul.f32 %v7698_v30, %v2292_v29 }
0x273c   :  { %2299 = vrot.lane.b32.xlu1 %v2295_v60, %s8196_s26 }
0x273d   :  { %2301 = vrot.lane.b32.xlu0 %v2296_v63, %s8196_s26 }
0x27ae   :  { %v2300_v20 = vpop.permute.xlu1 %2299 }
0x27af   :  { %v2302_v52 = vpop.permute.xlu0 %2301  ;;  %v8998_v55 = vadd.f32 %v2300_v20, %v2285_v14 }
0x27b0   :  { %v9000_v47 = vadd.f32 %v2302_v52, %v2286_v19 }
0x27b1   :  { %7699 = vtanh.f32 %v8998_v55 }
0x27b2   :  { %7701 = vtanh.f32 %v9000_v47 }
0x27bb   :  { %v7700_v21 = vpop.eup %7699 }
0x27bc   :  { %v7702_v13 = vpop.eup %7701  ;;  %2311 = vrot.lane.b32.xlu1 %v7700_v21, %s8188_s25 }
0x27bd   :  { %2313 = vrot.lane.b32.xlu0 %v7702_v13, %s8188_s25 }
0x282e   :  { %v2312_v11 = vpop.permute.xlu1 %2311 }
0x282f   :  { %v2314_v34 = vpop.permute.xlu0 %2313  ;;  %v2317_v9 = vmul.f32 %v7696_v51, %v2312_v11  ;;  %v2407_v11 = vrot.slane %v8998_v55, 7 }
0x2830   :  { %v2318_v39 = vmul.f32 %v7698_v30, %v2314_v34  ;;  %v2408_v34 = vrot.slane %v9000_v47, 7 }
0x2831   :  { %v2322_v22 = vrot.slane %v2317_v9, %v8654_v33  ;;  %v2329_v16 = vpack.c.bf16 %v2317_v9, %v2317_v9 }
0x2832   :  { %v2326_v56 = vrot.slane %v2318_v39, %v8654_v33  ;;  %v2330_v28 = vpack.c.bf16 %v2318_v39, %v2318_v39 }
0x2833   :  { %v9011_v10 = vsel %vm1072_vm2, %v2322_v22, %v8974_v49  ;;  %v2333_v40 = vunpack.c.l.b16 %v2329_v16 }
0x2834   :  { %v9016_v35 = vsel %vm1072_vm2, %v2326_v56, %v8979_v25  ;;  %v2334_v42 = vunpack.c.l.b16 %v2330_v28 }
0x2835   :  { %v2335_v43 = vrot.slane %v2333_v40, 5 }
0x2836   :  { %v2336_v23 = vrot.slane %v2334_v42, 4 }
0x2838   :  { %v2337_v46 = vsel %vm449_vm8, %v2336_v23, %v2335_v43 }
0x2839   :  { %v2338_v7 = vpack.c.b16 %v2337_v46, %v2337_v46 }
0x283b   :  { %2339 = vrot.lane.b32.xlu1 %v2338_v7, %s8196_s26 }
0x28ad   :  { %v2340_v41 = vpop.permute.xlu1 %2339 }
0x28ae   :  { %7167 = vmatmul.mubr.msk.bf16.vlgmr.msra.gmra.mrb[36].mxu0 %vm331_vm9, %v2340_v41 }
0x28af   :  { %7182 = vmatprep.mubr.msk.bf16.mxu0 %vm8194_vm0, %v8193_v1 }
0x2981   :  { %v2378_v49 = vpop.f32.mrb[36].mxu0 }
0x2982   :  { %v2385_v58 = vrot.slane %v2378_v49, 2  ;;  %v2386_v26 = vrot.slane %v2378_v49, 3  ;;  %v7168_v44 = vpop.f32.mrb[37].mxu0 }
0x2983   :  { %v2381_v25 = vpop.f32.mrb[38].mxu0 }
0x2984   :  { %v2389_v37 = vadd.f32 %v2385_v58, %v8798_v45  ;;  %v2390_v61 = vadd.f32 %v2386_v26, %v8801_v18  ;;  %v7169_v62 = vpop.f32.mrb[39].mxu0 }
0x2986   :  { %7703 = vtanh.f32 %v2389_v37  ;;  %v6744_v30 = vmul.f32 -1.442695, %v2389_v37  ;;  %v6745_v29 = vmul.f32 -1.442695, %v2390_v61 }
0x2987   :  { %7705 = vtanh.f32 %v2390_v61 }
0x2988   :  { %7707 = vpow2.f32 %v6744_v30 }
0x2989   :  { %7709 = vpow2.f32 %v6745_v29 }
0x2990   :  { %v7704_v51 = vpop.eup %7703 }
0x2991   :  { %v7706_v24 = vpop.eup %7705  ;;  %2415 = vrot.lane.b32.xlu0 %v7704_v51, %s8188_s25 }
0x2992   :  { %2417 = vrot.lane.b32.xlu1 %v7706_v24, %s8188_s25  ;;  %v7708_v60 = vpop.eup %7707  ;;  %v7449_v24 = vld [vmem:[%s10174_s4 + $0x30] sm:$0xff]  }
0x2993   :  { %v7710_v63 = vpop.eup %7709  ;;  %v2397_v53 = vadd.f32 1.0, %v7708_v60 }
0x2994   :  { %v2398_v57 = vadd.f32 1.0, %v7710_v63 }
0x2995   :  { %7711 = vrcp.f32 %v2397_v53 }
0x2996   :  { %7713 = vrcp.f32 %v2398_v57 }
0x299f   :  { %v7712_v14 = vpop.eup %7711 }
0x29a0   :  { %v7714_v20 = vpop.eup %7713  ;;  %v2411_v9 = vmul.f32 %v7712_v14, %v2407_v11 }
0x29a1   :  { %v2412_v39 = vmul.f32 %v7714_v20, %v2408_v34 }
0x2a03   :  { %v2416_v19 = vpop.permute.xlu0 %2415 }
0x2a04   :  { %v2418_v52 = vpop.permute.xlu1 %2417  ;;  %v2421_v21 = vmul.f32 %v7712_v14, %v2416_v19 }
0x2a05   :  { %v2422_v13 = vmul.f32 %v7714_v20, %v2418_v52 }
0x2a06   :  { %2425 = vrot.lane.b32.xlu0 %v2421_v21, %s8196_s26 }
0x2a07   :  { %2427 = vrot.lane.b32.xlu1 %v2422_v13, %s8196_s26 }
0x2a78   :  { %v2426_v22 = vpop.permute.xlu0 %2425 }
0x2a79   :  { %v2428_v16 = vpop.permute.xlu1 %2427  ;;  %v9031_v56 = vadd.f32 %v2426_v22, %v2411_v9 }
0x2a7a   :  { %v9033_v28 = vadd.f32 %v2428_v16, %v2412_v39 }
0x2a7b   :  { %7715 = vtanh.f32 %v9031_v56 }
0x2a7c   :  { %7717 = vtanh.f32 %v9033_v28 }
0x2a85   :  { %v7716_v40 = vpop.eup %7715 }
0x2a86   :  { %v7718_v42 = vpop.eup %7717  ;;  %2437 = vrot.lane.b32.xlu0 %v7716_v40, %s8188_s25 }
0x2a87   :  { %2439 = vrot.lane.b32.xlu1 %v7718_v42, %s8188_s25 }
0x2af8   :  { %v2438_v55 = vpop.permute.xlu0 %2437 }
0x2af9   :  { %v2440_v47 = vpop.permute.xlu1 %2439  ;;  %v2443_v43 = vmul.f32 %v7712_v14, %v2438_v55  ;;  %v2533_v55 = vrot.slane %v9031_v56, 7 }
0x2afa   :  { %v2444_v23 = vmul.f32 %v7714_v20, %v2440_v47  ;;  %v2534_v47 = vrot.slane %v9033_v28, 7 }
0x2afb   :  { %v2448_v46 = vrot.slane %v2443_v43, %v8691_v15  ;;  %v2455_v7 = vpack.c.bf16 %v2443_v43, %v2443_v43 }
0x2afc   :  { %v2452_v41 = vrot.slane %v2444_v23, %v8691_v15  ;;  %v2456_v49 = vpack.c.bf16 %v2444_v23, %v2444_v23 }
0x2afd   :  { %v9044_v58 = vsel %vm1201_vm3, %v2448_v46, %v9011_v10  ;;  %v2459_v26 = vunpack.c.l.b16 %v2455_v7 }
0x2afe   :  { %v9049_v44 = vsel %vm1201_vm3, %v2452_v41, %v9016_v35  ;;  %v2460_v25 = vunpack.c.l.b16 %v2456_v49 }
0x2aff   :  { %v2461_v37 = vrot.slane %v2459_v26, 6  ;;  %v7450_v26 = vld [vmem:[%s10175_s5 + $0x10] sm:$0xff]  }
0x2b00   :  { %v2462_v61 = vrot.slane %v2460_v25, 5  ;;  %7179 = vmatpush3.bf16.msra.mxu0 %v7450_v26  ;;  %v7451_v25 = vld [vmem:[%s10175_s5 + $0x18] sm:$0xff]  }
0x2b01   :  { %7180 = vmatprep.subr.bf16.mxu0 %v8193_v1 }
0x2b02   :  { %v2463_v62 = vsel %vm449_vm8, %v2462_v61, %v2461_v37  ;;  %v9091_v37 = vld [vmem:[%s10174_s4 + $0x38] sm:$0xff]   ;;  %v9098_v61 = vld [vmem:[%s10174_s4 + $0x40] sm:$0xff]  }
0x2b03   :  { %v2464_v51 = vpack.c.b16 %v2463_v62, %v2463_v62 }
0x2b04   :  { %7181 = vmatpush3.bf16.msra.mxu0 %v7451_v25 }
0x2b05   :  { %2465 = vrot.lane.b32.xlu0 %v2464_v51, %s8196_s26  ;;  %7192 = vmatprep.subr.bf16.mxu0 %v8193_v1 }
0x2b77   :  { %v2466_v10 = vpop.permute.xlu0 %2465 }
0x2b78   :  { %7175 = vmatmul.mubr.msk.bf16.vlgmr.msra.gmra.mrb[44].mxu1 %vm331_vm9, %v2466_v10 }
0x2b79   :  { %7187 = vmatpush3.bf16.msra.mxu1 %v7449_v24  ;;  %7188 = vmatprep.mubr.msk.bf16.mxu1 %vm8194_vm0, %v8193_v1 }
0x2b7a   :  { %7200 = vmatprep.subr.bf16.mxu1 %v8193_v1 }
0x2b80   :  { %7189 = vmatmul.mubr.msk.bf16.vlgmr.msra.gmra.mrb[48].mxu1 %vm268_vm7, %v2766_v50 }
0x2b81   :  { %7204 = vmatprep.mubr.msk.bf16.mxu1 %vm8194_vm0, %v8193_v1  ;;  %7201 = vmatpush3.bf16.msra.mxu1 %v9091_v37 }
0x2b82   :  { %7202 = vmatprep.subr.bf16.mxu1 %v8193_v1 }
0x2b85   :  { %7203 = vmatpush3.bf16.msra.mxu1 %v9098_v61 }
0x2b86   :  { %7216 = vmatprep.subr.bf16.mxu1 %v8193_v1 }
0x2c4b   :  { %v2504_v35 = vpop.f32.mrb[44].mxu1 }
0x2c4c   :  { %v2511_v30 = vrot.slane %v2504_v35, 1  ;;  %v2512_v29 = vrot.slane %v2504_v35, 2  ;;  %v7176_v60 = vpop.f32.mrb[45].mxu1 }
0x2c4d   :  { %v2507_v63 = vpop.f32.mrb[46].mxu1 }
0x2c4e   :  { %v2515_v53 = vadd.f32 %v2511_v30, %v8798_v45  ;;  %v2516_v57 = vadd.f32 %v2512_v29, %v8801_v18  ;;  %v7177_v14 = vpop.f32.mrb[47].mxu1 }
0x2c4f   :  { %v8086_v14 = vld [vmem:[#allocation7] sm:$0xff] }
0x2c50   :  { %7719 = vtanh.f32 %v2515_v53  ;;  %v6747_v21 = vmul.f32 -1.442695, %v2515_v53  ;;  %v6748_v13 = vmul.f32 -1.442695, %v2516_v57 }
0x2c51   :  { %7721 = vtanh.f32 %v2516_v57 }
0x2c52   :  { %7723 = vpow2.f32 %v6747_v21 }
0x2c53   :  { %v9068_v19 = vpop.f32.mrb[48].mxu1  ;;  %7725 = vpow2.f32 %v6748_v13 }
0x2c54   :  { %v7190_v36 = vpop.f32.mrb[49].mxu1 }
0x2c55   :  { %v9070_v48 = vpop.f32.mrb[50].mxu1  ;;  %v2820_v36 = vrot.slane %v8086_v14, %v8329_v4 }
0x2c56   :  { %v7191_v50 = vpop.f32.mrb[51].mxu1 }
0x2c57   :  { %v9140_v21 = vadd.f32 %v2820_v36, %v9070_v48 }
0x2c5a   :  { %v7720_v20 = vpop.eup %7719 }
0x2c5b   :  { %v7722_v52 = vpop.eup %7721  ;;  %2541 = vrot.lane.b32.xlu1 %v7720_v20, %s8188_s25  ;;  %v9137_v20 = vadd.f32 %v2820_v36, %v9068_v19 }
0x2c5c   :  { %2543 = vrot.lane.b32.xlu0 %v7722_v52, %s8188_s25  ;;  %v7724_v45 = vpop.eup %7723 }
0x2c5d   :  { %v7726_v18 = vpop.eup %7725  ;;  %v2523_v11 = vadd.f32 1.0, %v7724_v45 }
0x2c5e   :  { %v2524_v34 = vadd.f32 1.0, %v7726_v18 }
0x2c5f   :  { %7727 = vrcp.f32 %v2523_v11 }
0x2c60   :  { %7729 = vrcp.f32 %v2524_v34 }
0x2c69   :  { %v7728_v9 = vpop.eup %7727 }
0x2c6a   :  { %v7730_v22 = vpop.eup %7729  ;;  %v2537_v43 = vmul.f32 %v7728_v9, %v2533_v55 }
0x2c6b   :  { %v2538_v23 = vmul.f32 %v7730_v22, %v2534_v47 }
0x2ccd   :  { %v2542_v39 = vpop.permute.xlu1 %2541 }
0x2cce   :  { %v2544_v16 = vpop.permute.xlu0 %2543  ;;  %v2547_v40 = vmul.f32 %v7728_v9, %v2542_v39 }
0x2ccf   :  { %v2548_v42 = vmul.f32 %v7730_v22, %v2544_v16 }
0x2cd0   :  { %2551 = vrot.lane.b32.xlu1 %v2547_v40, %s8196_s26 }
0x2cd1   :  { %2553 = vrot.lane.b32.xlu0 %v2548_v42, %s8196_s26 }
0x2d42   :  { %v2552_v46 = vpop.permute.xlu1 %2551 }
0x2d43   :  { %v2554_v7 = vpop.permute.xlu0 %2553  ;;  %v2557_v41 = vadd.f32 %v2552_v46, %v2537_v43 }
0x2d44   :  { %v2558_v49 = vadd.f32 %v2554_v7, %v2538_v23 }
0x2d45   :  { %7731 = vtanh.f32 %v2557_v41 }
0x2d46   :  { %7733 = vtanh.f32 %v2558_v49 }
0x2d4f   :  { %v7732_v56 = vpop.eup %7731 }
0x2d50   :  { %v7734_v28 = vpop.eup %7733  ;;  %2563 = vrot.lane.b32.xlu1 %v7732_v56, %s8188_s25 }
0x2d51   :  { %2565 = vrot.lane.b32.xlu0 %v7734_v28, %s8188_s25 }
0x2dc2   :  { %v2564_v62 = vpop.permute.xlu1 %2563 }
0x2dc3   :  { %v2566_v51 = vpop.permute.xlu0 %2565  ;;  %v2569_v24 = vmul.f32 %v7728_v9, %v2564_v62 }
0x2dc4   :  { %v2570_v10 = vmul.f32 %v7730_v22, %v2566_v51 }
0x2dc5   :  { %v2574_v35 = vrot.slane %v2569_v24, %v8751_v38 }
0x2dc6   :  { %v2578_v30 = vrot.slane %v2570_v10, %v8751_v38 }
0x2dc7   :  { %v9107_v29 = vsel %vm1330_vm4, %v2574_v35, %v9044_v58 }
0x2dc8   :  { %v9112_v60 = vsel %vm1330_vm4, %v2578_v30, %v9049_v44 }
0x2dc9   :  { %v2586_v63 = vpack.c.bf16 %v9112_v60, %v9107_v29 }
0x2dcb   :  { %2592 = vrot.lane.b32.xlu1 %v2586_v63, %s8196_s26 }
0x2e3d   :  { %v2593_v53 = vpop.permute.xlu1 %2592 }
0x2e3e   :  { %7183 = vmatmul.mubr.msk.bf16.vlgmr.msra.gmra.mrb[40].mxu0 %vm331_vm9, %v2593_v53 }
0x2e3f   :  { %7193 = vmatpush3.bf16.msra.mxu0 %v9091_v37  ;;  %7196 = vmatprep.mubr.msk.bf16.mxu0 %vm8194_vm0, %v8193_v1 }
0x2e40   :  { %7194 = vmatprep.subr.bf16.mxu0 %v8193_v1 }
0x2e43   :  { %7195 = vmatpush3.bf16.msra.mxu0 %v9098_v61 }
0x2e44   :  { %7208 = vmatprep.subr.bf16.mxu0 %v8193_v1 }
0x2e46   :  { %7197 = vmatmul.mubr.bf16.vlgmr.msra.gmra.mrb[44].mxu0 %v8195_v31 }
0x2e47   :  { %7209 = vmatpush3.bf16.msra.mxu0 %v9091_v37  ;;  %7212 = vmatprep.mubr.msk.bf16.mxu0 %vm8194_vm0, %v8193_v1 }
0x2e48   :  { %7210 = vmatprep.subr.bf16.mxu0 %v8193_v1 }
0x2e4b   :  { %7211 = vmatpush3.bf16.msra.mxu0 %v9098_v61 }
0x2e4c   :  { %7224 = vmatprep.subr.bf16.mxu0 %v8193_v1 }
0x2f11   :  { %v9131_v58 = vpop.f32.mrb[40].mxu0 }
0x2f12   :  { %v7184_v44 = vpop.f32.mrb[41].mxu0 }
0x2f13   :  { %v9133_v57 = vpop.f32.mrb[42].mxu0 }
0x2f14   :  { %v7185_v50 = vpop.f32.mrb[43].mxu0 }
0x2f19   :  { %v2869_v52 = vpop.f32.mrb[44].mxu0 }
0x2f1a   :  { %v2876_v13 = vrot.slane %v2869_v52, 1  ;;  %v2879_v45 = vadd.f32 %v2869_v52, %v9137_v20  ;;  %v7198_v18 = vpop.f32.mrb[45].mxu0 }
0x2f1b   :  { %v2872_v11 = vpop.f32.mrb[46].mxu0 }
0x2f1c   :  { %v2880_v34 = vadd.f32 %v2876_v13, %v9140_v21  ;;  %7735 = vtanh.f32 %v2879_v45  ;;  %v7199_v9 = vpop.f32.mrb[47].mxu0  ;;  %v6766_v19 = vmul.f32 -1.442695, %v2879_v45 }
0x2f1e   :  { %7737 = vtanh.f32 %v2880_v34  ;;  %v6767_v16 = vmul.f32 -1.442695, %v2880_v34 }
0x2f1f   :  { %7739 = vpow2.f32 %v6766_v19 }
0x2f20   :  { %7741 = vpow2.f32 %v6767_v16 }
0x2f26   :  { %v7736_v39 = vpop.eup %7735 }
0x2f27   :  { %2899 = vrot.lane.b32.xlu1 %v7736_v39, %s8188_s25 }
0x2f28   :  { %v7738_v22 = vpop.eup %7737 }
0x2f29   :  { %2901 = vrot.lane.b32.xlu0 %v7738_v22, %s8188_s25  ;;  %v7740_v48 = vpop.eup %7739 }
0x2f2a   :  { %v7742_v40 = vpop.eup %7741  ;;  %v2887_v42 = vadd.f32 1.0, %v7740_v48 }
0x2f2b   :  { %v2888_v55 = vadd.f32 1.0, %v7742_v40 }
0x2f2c   :  { %7743 = vrcp.f32 %v2887_v42 }
0x2f2d   :  { %7745 = vrcp.f32 %v2888_v55 }
0x2f36   :  { %v7744_v47 = vpop.eup %7743 }
0x2f37   :  { %v7746_v46 = vpop.eup %7745  ;;  %v2895_v49 = vmul.f32 0.0, %v7744_v47 }
0x2f38   :  { %v2896_v56 = vmul.f32 0.0, %v7746_v46 }
0x2f99   :  { %v2900_v43 = vpop.permute.xlu1 %2899 }
0x2f9a   :  { %v2905_v23 = vmul.f32 %v7744_v47, %v2900_v43 }
0x2f9b   :  { %v2902_v7 = vpop.permute.xlu0 %2901 }
0x2f9c   :  { %2909 = vrot.lane.b32.xlu1 %v2905_v23, %s8196_s26  ;;  %v2906_v41 = vmul.f32 %v7746_v46, %v2902_v7 }
0x2f9e   :  { %2911 = vrot.lane.b32.xlu0 %v2906_v41, %s8196_s26 }
0x300e   :  { %v2910_v26 = vpop.permute.xlu1 %2909 }
0x300f   :  { %v9148_v25 = vadd.f32 %v2910_v26, %v2895_v49 }
0x3010   :  { %v2912_v28 = vpop.permute.xlu0 %2911 }
0x3011   :  { %7747 = vtanh.f32 %v9148_v25  ;;  %v2916_v62 = vadd.f32 %v2912_v28, %v2896_v56 }
0x3013   :  { %7749 = vtanh.f32 %v2916_v62  ;;  %v3016_v28 = vrot.slane %v2916_v62, 7 }
0x301b   :  { %v7748_v51 = vpop.eup %7747 }
0x301c   :  { %2921 = vrot.lane.b32.xlu1 %v7748_v51, %s8188_s25 }
0x301d   :  { %v7750_v24 = vpop.eup %7749 }
0x301e   :  { %2923 = vrot.lane.b32.xlu0 %v7750_v24, %s8188_s25  ;;  %v3015_v24 = vrot.slane %v9148_v25, 7 }
0x308e   :  { %v2922_v10 = vpop.permute.xlu1 %2921 }
0x308f   :  { %v9153_v35 = vmul.f32 %v7744_v47, %v2922_v10 }
0x3090   :  { %v2924_v30 = vpop.permute.xlu0 %2923 }
0x3091   :  { %v9155_v63 = vmul.f32 %v7746_v46, %v2924_v30  ;;  %v2939_v53 = vpack.c.bf16 %v9153_v35, %v9153_v35 }
0x3093   :  { %v2940_v44 = vpack.c.bf16 %v9155_v63, %v9155_v63  ;;  %v2943_v36 = vunpack.c.l.b16 %v2939_v53  ;;  %v2936_v25 = vrot.slane %v9155_v63, %v8326_v3 }
0x3095   :  { %v2944_v14 = vunpack.c.l.b16 %v2940_v44 }
0x3097   :  { %v2945_v50 = vrot.slane %v2944_v14, 7 }
0x3099   :  { %v2946_v52 = vsel %vm449_vm8, %v2945_v50, %v2943_v36 }
0x309a   :  { %v2947_v13 = vpack.c.b16 %v2946_v52, %v2946_v52 }
0x309c   :  { %2948 = vrot.lane.b32.xlu0 %v2947_v13, %s8196_s26  ;;  %v2932_v13 = vrot.slane %v9153_v35, %v8326_v3 }
0x310e   :  { %v2949_v45 = vpop.permute.xlu0 %2948 }
0x310f   :  { %7205 = vmatmul.mubr.msk.bf16.vlgmr.msra.gmra.mrb[52].mxu1 %vm331_vm9, %v2949_v45 }
0x3110   :  { %7217 = vmatpush3.bf16.msra.mxu1 %v9091_v37  ;;  %7220 = vmatprep.mubr.msk.bf16.mxu1 %vm8194_vm0, %v8193_v1 }
0x3111   :  { %7218 = vmatprep.subr.bf16.mxu1 %v8193_v1 }
0x3114   :  { %7219 = vmatpush3.bf16.msra.mxu1 %v9098_v61 }
0x3115   :  { %7232 = vmatprep.subr.bf16.mxu1 %v8193_v1 }
0x31e2   :  { %v2987_v18 = vpop.f32.mrb[52].mxu1 }
0x31e3   :  { %v2994_v11 = vrot.slane %v2987_v18, 7  ;;  %v2998_v34 = vadd.f32 %v2987_v18, %v9140_v21  ;;  %v7206_v9 = vpop.f32.mrb[53].mxu1 }
0x31e4   :  { %v2990_v39 = vpop.f32.mrb[54].mxu1 }
0x31e5   :  { %v2997_v22 = vadd.f32 %v2994_v11, %v9137_v20  ;;  %7751 = vtanh.f32 %v2998_v34  ;;  %v7207_v19 = vpop.f32.mrb[55].mxu1  ;;  %v6770_v40 = vmul.f32 -1.442695, %v2998_v34  ;;  %v2938_v11 = vsel %vm429_vm11, %v2936_v25, 0.0 }
0x31e6   :  { %v2937_v19 = vsel %vm429_vm11, %v2932_v13, 0.0 }
0x31e7   :  { %7753 = vtanh.f32 %v2997_v22  ;;  %v6769_v42 = vmul.f32 -1.442695, %v2997_v22 }
0x31e8   :  { %7755 = vpow2.f32 %v6770_v40 }
0x31e9   :  { %7757 = vpow2.f32 %v6769_v42 }
0x31ef   :  { %v7752_v16 = vpop.eup %7751 }
0x31f0   :  { %3025 = vrot.lane.b32.xlu0 %v7752_v16, %s8188_s25 }
0x31f1   :  { %v7754_v48 = vpop.eup %7753 }
0x31f2   :  { %3023 = vrot.lane.b32.xlu1 %v7754_v48, %s8188_s25  ;;  %v7756_v55 = vpop.eup %7755 }
0x31f3   :  { %v7758_v47 = vpop.eup %7757  ;;  %v3006_v43 = vadd.f32 1.0, %v7756_v55 }
0x31f4   :  { %v3005_v23 = vadd.f32 1.0, %v7758_v47 }
0x31f5   :  { %7759 = vrcp.f32 %v3006_v43 }
0x31f6   :  { %7761 = vrcp.f32 %v3005_v23 }
0x31ff   :  { %v7760_v46 = vpop.eup %7759 }
0x3200   :  { %v7762_v49 = vpop.eup %7761  ;;  %v3020_v51 = vmul.f32 %v7760_v46, %v3016_v28 }
0x3201   :  { %v3019_v53 = vmul.f32 %v7762_v49, %v3015_v24 }
0x3262   :  { %v3026_v7 = vpop.permute.xlu0 %3025 }
0x3263   :  { %v3030_v41 = vmul.f32 %v7760_v46, %v3026_v7 }
0x3264   :  { %v3024_v26 = vpop.permute.xlu1 %3023 }
0x3265   :  { %3035 = vrot.lane.b32.xlu0 %v3030_v41, %s8196_s26  ;;  %v3029_v56 = vmul.f32 %v7762_v49, %v3024_v26 }
0x3267   :  { %3033 = vrot.lane.b32.xlu1 %v3029_v56, %s8196_s26 }
0x32d7   :  { %v3036_v10 = vpop.permute.xlu0 %3035 }
0x32d8   :  { %v9177_v30 = vadd.f32 %v3036_v10, %v3020_v51 }
0x32d9   :  { %v3034_v44 = vpop.permute.xlu1 %3033 }
0x32da   :  { %7763 = vtanh.f32 %v9177_v30  ;;  %v9180_v14 = vadd.f32 %v3034_v44, %v3019_v53 }
0x32dc   :  { %7765 = vtanh.f32 %v9180_v14 }
0x32e4   :  { %v7764_v36 = vpop.eup %7763 }
0x32e5   :  { %3047 = vrot.lane.b32.xlu0 %v7764_v36, %s8188_s25 }
0x32e6   :  { %v7766_v50 = vpop.eup %7765 }
0x32e7   :  { %3045 = vrot.lane.b32.xlu1 %v7766_v50, %s8188_s25 }
0x3357   :  { %v3048_v62 = vpop.permute.xlu0 %3047 }
0x3358   :  { %v3052_v52 = vmul.f32 %v7760_v46, %v3048_v62 }
0x3359   :  { %v3046_v18 = vpop.permute.xlu1 %3045 }
0x335a   :  { %v3060_v45 = vrot.slane %v3052_v52, %v8336_v5  ;;  %v3051_v34 = vmul.f32 %v7762_v49, %v3046_v18  ;;  %v3064_v39 = vpack.c.bf16 %v3052_v52, %v3052_v52 }
0x335c   :  { %v9194_v9 = vsel %vm557_vm10, %v3060_v45, %v2938_v11  ;;  %v3056_v22 = vrot.slane %v3051_v34, %v8336_v5  ;;  %v3063_v63 = vpack.c.bf16 %v3051_v34, %v3051_v34  ;;  %v3068_v48 = vunpack.c.l.b16 %v3064_v39 }
0x335d   :  { %v3140_v11 = vrot.slane %v9180_v14, 7  ;;  %v3141_v34 = vrot.slane %v9177_v30, 7 }
0x335e   :  { %v9201_v35 = vsel %vm557_vm10, %v3056_v22, %v2937_v19  ;;  %v3067_v16 = vunpack.c.l.b16 %v3063_v63 }
0x3360   :  { %v3069_v40 = vrot.slane %v3067_v16, 1 }
0x3362   :  { %v3070_v42 = vsel %vm449_vm8, %v3068_v48, %v3069_v40 }
0x3363   :  { %v3071_v55 = vpack.c.b16 %v3070_v42, %v3070_v42 }
0x3365   :  { %3072 = vrot.lane.b32.xlu1 %v3071_v55, %s8196_s26 }
0x33d7   :  { %v3073_v47 = vpop.permute.xlu1 %3072 }
0x33d8   :  { %7213 = vmatmul.mubr.msk.bf16.vlgmr.msra.gmra.mrb[48].mxu0 %vm331_vm9, %v3073_v47 }
0x33d9   :  { %7225 = vmatpush3.bf16.msra.mxu0 %v9091_v37  ;;  %7228 = vmatprep.mubr.msk.bf16.mxu0 %vm8194_vm0, %v8193_v1 }
0x33da   :  { %7226 = vmatprep.subr.bf16.mxu0 %v8193_v1 }
0x33dd   :  { %7227 = vmatpush3.bf16.msra.mxu0 %v9098_v61 }
0x33de   :  { %7240 = vmatprep.subr.bf16.mxu0 %v8193_v1 }
0x34ab   :  { %v3111_v43 = vpop.f32.mrb[48].mxu0 }
0x34ac   :  { %v3118_v23 = vrot.slane %v3111_v43, 6  ;;  %v3119_v46 = vrot.slane %v3111_v43, 7  ;;  %v7214_v7 = vpop.f32.mrb[49].mxu0 }
0x34ad   :  { %v3114_v41 = vpop.f32.mrb[50].mxu0 }
0x34ae   :  { %v3122_v49 = vadd.f32 %v3118_v23, %v9137_v20  ;;  %v3123_v26 = vadd.f32 %v3119_v46, %v9140_v21  ;;  %v7215_v56 = vpop.f32.mrb[51].mxu0 }
0x34b0   :  { %7767 = vtanh.f32 %v3122_v49  ;;  %v6772_v24 = vmul.f32 -1.442695, %v3122_v49  ;;  %v6773_v10 = vmul.f32 -1.442695, %v3123_v26 }
0x34b1   :  { %7769 = vtanh.f32 %v3123_v26 }
0x34b2   :  { %7771 = vpow2.f32 %v6772_v24 }
0x34b3   :  { %7773 = vpow2.f32 %v6773_v10 }
0x34ba   :  { %v7768_v28 = vpop.eup %7767 }
0x34bb   :  { %v7770_v51 = vpop.eup %7769  ;;  %3148 = vrot.lane.b32.xlu0 %v7768_v28, %s8188_s25 }
0x34bc   :  { %3150 = vrot.lane.b32.xlu1 %v7770_v51, %s8188_s25  ;;  %v7772_v53 = vpop.eup %7771 }
0x34bd   :  { %v7774_v44 = vpop.eup %7773  ;;  %v3130_v36 = vadd.f32 1.0, %v7772_v53 }
0x34be   :  { %v3131_v50 = vadd.f32 1.0, %v7774_v44 }
0x34bf   :  { %7775 = vrcp.f32 %v3130_v36 }
0x34c0   :  { %7777 = vrcp.f32 %v3131_v50 }
0x34c9   :  { %v7776_v25 = vpop.eup %7775 }
0x34ca   :  { %v7778_v52 = vpop.eup %7777  ;;  %v3144_v39 = vmul.f32 %v7776_v25, %v3140_v11 }
0x34cb   :  { %v3145_v22 = vmul.f32 %v7778_v52, %v3141_v34 }
0x352d   :  { %v3149_v62 = vpop.permute.xlu0 %3148 }
0x352e   :  { %v3151_v13 = vpop.permute.xlu1 %3150  ;;  %v3154_v45 = vmul.f32 %v7776_v25, %v3149_v62 }
0x352f   :  { %v3155_v18 = vmul.f32 %v7778_v52, %v3151_v13 }
0x3530   :  { %3158 = vrot.lane.b32.xlu0 %v3154_v45, %s8196_s26 }
0x3531   :  { %3160 = vrot.lane.b32.xlu1 %v3155_v18, %s8196_s26 }
0x35a2   :  { %v3159_v63 = vpop.permute.xlu0 %3158 }
0x35a3   :  { %v3161_v19 = vpop.permute.xlu1 %3160  ;;  %v9220_v16 = vadd.f32 %v3159_v63, %v3144_v39 }
0x35a4   :  { %v9222_v48 = vadd.f32 %v3161_v19, %v3145_v22 }
0x35a5   :  { %7779 = vtanh.f32 %v9220_v16 }
0x35a6   :  { %7781 = vtanh.f32 %v9222_v48 }
0x35af   :  { %v7780_v40 = vpop.eup %7779 }
0x35b0   :  { %v7782_v42 = vpop.eup %7781  ;;  %3170 = vrot.lane.b32.xlu0 %v7780_v40, %s8188_s25 }
0x35b1   :  { %3172 = vrot.lane.b32.xlu1 %v7782_v42, %s8188_s25 }
0x3622   :  { %v3171_v14 = vpop.permute.xlu0 %3170 }
0x3623   :  { %v3173_v30 = vpop.permute.xlu1 %3172  ;;  %v3176_v55 = vmul.f32 %v7776_v25, %v3171_v14 }
0x3624   :  { %v3177_v47 = vmul.f32 %v7778_v52, %v3173_v30 }
0x3625   :  { %v3181_v43 = vrot.slane %v3176_v55, %v8329_v4  ;;  %v3188_v23 = vpack.c.bf16 %v3176_v55, %v3176_v55 }
0x3626   :  { %v3185_v46 = vrot.slane %v3177_v47, %v8329_v4  ;;  %v3189_v7 = vpack.c.bf16 %v3177_v47, %v3177_v47  ;;  %v3266_v47 = vrot.slane %v9220_v16, 7 }
0x3627   :  { %v9233_v41 = vsel %vm685_vm12, %v3181_v43, %v9201_v35  ;;  %v3192_v49 = vunpack.c.l.b16 %v3188_v23  ;;  %v3267_v43 = vrot.slane %v9222_v48, 7 }
0x3628   :  { %v9238_v26 = vsel %vm685_vm12, %v3185_v46, %v9194_v9  ;;  %v3193_v56 = vunpack.c.l.b16 %v3189_v7 }
0x3629   :  { %v3194_v28 = vrot.slane %v3192_v49, 2 }
0x362a   :  { %v3195_v51 = vrot.slane %v3193_v56, 1 }
0x362c   :  { %v3196_v24 = vsel %vm449_vm8, %v3195_v51, %v3194_v28 }
0x362d   :  { %v3197_v10 = vpack.c.b16 %v3196_v24, %v3196_v24 }
0x362f   :  { %3198 = vrot.lane.b32.xlu0 %v3197_v10, %s8196_s26 }
0x36a1   :  { %v3199_v53 = vpop.permute.xlu0 %3198 }
0x36a2   :  { %7221 = vmatmul.mubr.msk.bf16.vlgmr.msra.gmra.mrb[56].mxu1 %vm331_vm9, %v3199_v53 }
0x36a3   :  { %7233 = vmatpush3.bf16.msra.mxu1 %v9091_v37  ;;  %7236 = vmatprep.mubr.msk.bf16.mxu1 %vm8194_vm0, %v8193_v1 }
0x36a4   :  { %7234 = vmatprep.subr.bf16.mxu1 %v8193_v1 }
0x36a7   :  { %7235 = vmatpush3.bf16.msra.mxu1 %v9098_v61 }
0x36a8   :  { %7248 = vmatprep.subr.bf16.mxu1 %v8193_v1 }
0x3775   :  { %v3237_v9 = vpop.f32.mrb[56].mxu1 }
0x3776   :  { %v3244_v35 = vrot.slane %v3237_v9, 5  ;;  %v3245_v44 = vrot.slane %v3237_v9, 6  ;;  %v7222_v36 = vpop.f32.mrb[57].mxu1 }
0x3777   :  { %v3240_v50 = vpop.f32.mrb[58].mxu1 }
0x3778   :  { %v3248_v25 = vadd.f32 %v3244_v35, %v9137_v20  ;;  %v3249_v62 = vadd.f32 %v3245_v44, %v9140_v21  ;;  %v7223_v52 = vpop.f32.mrb[59].mxu1 }
0x377a   :  { %7783 = vtanh.f32 %v3248_v25  ;;  %v6775_v18 = vmul.f32 -1.442695, %v3248_v25  ;;  %v6776_v11 = vmul.f32 -1.442695, %v3249_v62 }
0x377b   :  { %7785 = vtanh.f32 %v3249_v62 }
0x377c   :  { %7787 = vpow2.f32 %v6775_v18 }
0x377d   :  { %7789 = vpow2.f32 %v6776_v11 }
0x3784   :  { %v7784_v13 = vpop.eup %7783 }
0x3785   :  { %v7786_v45 = vpop.eup %7785  ;;  %3274 = vrot.lane.b32.xlu1 %v7784_v13, %s8188_s25 }
0x3786   :  { %3276 = vrot.lane.b32.xlu0 %v7786_v45, %s8188_s25  ;;  %v7788_v34 = vpop.eup %7787 }
0x3787   :  { %v7790_v39 = vpop.eup %7789  ;;  %v3256_v22 = vadd.f32 1.0, %v7788_v34 }
0x3788   :  { %v3257_v63 = vadd.f32 1.0, %v7790_v39 }
0x3789   :  { %7791 = vrcp.f32 %v3256_v22 }
0x378a   :  { %7793 = vrcp.f32 %v3257_v63 }
0x3793   :  { %v7792_v19 = vpop.eup %7791 }
0x3794   :  { %v7794_v42 = vpop.eup %7793  ;;  %v3270_v23 = vmul.f32 %v7792_v19, %v3266_v47 }
0x3795   :  { %v3271_v46 = vmul.f32 %v7794_v42, %v3267_v43 }
0x37f7   :  { %v3275_v40 = vpop.permute.xlu1 %3274 }
0x37f8   :  { %v3277_v14 = vpop.permute.xlu0 %3276  ;;  %v3280_v30 = vmul.f32 %v7792_v19, %v3275_v40 }
0x37f9   :  { %v3281_v55 = vmul.f32 %v7794_v42, %v3277_v14 }
0x37fa   :  { %3284 = vrot.lane.b32.xlu1 %v3280_v30, %s8196_s26 }
0x37fb   :  { %3286 = vrot.lane.b32.xlu0 %v3281_v55, %s8196_s26 }
0x386c   :  { %v3285_v7 = vpop.permute.xlu1 %3284 }
0x386d   :  { %v3287_v49 = vpop.permute.xlu0 %3286  ;;  %v9257_v56 = vadd.f32 %v3285_v7, %v3270_v23 }
0x386e   :  { %v9259_v28 = vadd.f32 %v3287_v49, %v3271_v46 }
0x386f   :  { %7795 = vtanh.f32 %v9257_v56 }
0x3870   :  { %7797 = vtanh.f32 %v9259_v28 }
0x3879   :  { %v7796_v51 = vpop.eup %7795 }
0x387a   :  { %v7798_v24 = vpop.eup %7797  ;;  %3296 = vrot.lane.b32.xlu1 %v7796_v51, %s8188_s25 }
0x387b   :  { %3298 = vrot.lane.b32.xlu0 %v7798_v24, %s8188_s25 }
0x38ec   :  { %v3297_v16 = vpop.permute.xlu1 %3296 }
0x38ed   :  { %v3299_v48 = vpop.permute.xlu0 %3298  ;;  %v3302_v10 = vmul.f32 %v7792_v19, %v3297_v16 }
0x38ee   :  { %v3303_v53 = vmul.f32 %v7794_v42, %v3299_v48 }
0x38ef   :  { %v3307_v9 = vrot.slane %v3302_v10, %v8557_v6  ;;  %v3314_v35 = vpack.c.bf16 %v3302_v10, %v3302_v10 }
0x38f0   :  { %v3311_v44 = vrot.slane %v3303_v53, %v8557_v6  ;;  %v3315_v36 = vpack.c.bf16 %v3303_v53, %v3303_v53  ;;  %v3392_v53 = vrot.slane %v9257_v56, 7 }
0x38f1   :  { %v9270_v50 = vsel %vm814_vm13, %v3307_v9, %v9233_v41  ;;  %v3318_v25 = vunpack.c.l.b16 %v3314_v35  ;;  %v3393_v9 = vrot.slane %v9259_v28, 7 }
0x38f2   :  { %v9275_v62 = vsel %vm814_vm13, %v3311_v44, %v9238_v26  ;;  %v3319_v52 = vunpack.c.l.b16 %v3315_v36 }
0x38f3   :  { %v3320_v13 = vrot.slane %v3318_v25, 3 }
0x38f4   :  { %v3321_v45 = vrot.slane %v3319_v52, 2 }
0x38f6   :  { %v3322_v18 = vsel %vm449_vm8, %v3321_v45, %v3320_v13 }
0x38f7   :  { %v3323_v11 = vpack.c.b16 %v3322_v18, %v3322_v18 }
0x38f9   :  { %3324 = vrot.lane.b32.xlu1 %v3323_v11, %s8196_s26 }
0x396b   :  { %v3325_v34 = vpop.permute.xlu1 %3324 }
0x396c   :  { %7229 = vmatmul.mubr.msk.bf16.vlgmr.msra.gmra.mrb[52].mxu0 %vm331_vm9, %v3325_v34 }
0x396d   :  { %7241 = vmatpush3.bf16.msra.mxu0 %v9091_v37  ;;  %7244 = vmatprep.mubr.msk.bf16.mxu0 %vm8194_vm0, %v8193_v1 }
0x396e   :  { %7242 = vmatprep.subr.bf16.mxu0 %v8193_v1 }
0x3971   :  { %7243 = vmatpush3.bf16.msra.mxu0 %v9098_v61 }
0x3972   :  { %7256 = vmatprep.subr.bf16.mxu0 %v8193_v1 }
0x3a3f   :  { %v3363_v41 = vpop.f32.mrb[52].mxu0 }
0x3a40   :  { %v3370_v26 = vrot.slane %v3363_v41, 4  ;;  %v3371_v39 = vrot.slane %v3363_v41, 5  ;;  %v7230_v22 = vpop.f32.mrb[53].mxu0 }
0x3a41   :  { %v3366_v63 = vpop.f32.mrb[54].mxu0 }
0x3a42   :  { %v3374_v19 = vadd.f32 %v3370_v26, %v9137_v20  ;;  %v3375_v40 = vadd.f32 %v3371_v39, %v9140_v21  ;;  %v7231_v42 = vpop.f32.mrb[55].mxu0 }
0x3a44   :  { %7799 = vtanh.f32 %v3374_v19  ;;  %v6778_v55 = vmul.f32 -1.442695, %v3374_v19  ;;  %v6779_v47 = vmul.f32 -1.442695, %v3375_v40 }
0x3a45   :  { %7801 = vtanh.f32 %v3375_v40 }
0x3a46   :  { %7803 = vpow2.f32 %v6778_v55 }
0x3a47   :  { %7805 = vpow2.f32 %v6779_v47 }
0x3a4e   :  { %v7800_v14 = vpop.eup %7799 }
0x3a4f   :  { %v7802_v30 = vpop.eup %7801  ;;  %3400 = vrot.lane.b32.xlu0 %v7800_v14, %s8188_s25 }
0x3a50   :  { %3402 = vrot.lane.b32.xlu1 %v7802_v30, %s8188_s25  ;;  %v7804_v43 = vpop.eup %7803 }
0x3a51   :  { %v7806_v23 = vpop.eup %7805  ;;  %v3382_v46 = vadd.f32 1.0, %v7804_v43 }
0x3a52   :  { %v3383_v7 = vadd.f32 1.0, %v7806_v23 }
0x3a53   :  { %7807 = vrcp.f32 %v3382_v46 }
0x3a54   :  { %7809 = vrcp.f32 %v3383_v7 }
0x3a5d   :  { %v7808_v49 = vpop.eup %7807 }
0x3a5e   :  { %v7810_v24 = vpop.eup %7809  ;;  %v3396_v35 = vmul.f32 %v7808_v49, %v3392_v53 }
0x3a5f   :  { %v3397_v44 = vmul.f32 %v7810_v24, %v3393_v9 }
0x3ac1   :  { %v3401_v51 = vpop.permute.xlu0 %3400 }
0x3ac2   :  { %v3403_v16 = vpop.permute.xlu1 %3402  ;;  %v3406_v48 = vmul.f32 %v7808_v49, %v3401_v51 }
0x3ac3   :  { %v3407_v10 = vmul.f32 %v7810_v24, %v3403_v16 }
0x3ac4   :  { %3410 = vrot.lane.b32.xlu0 %v3406_v48, %s8196_s26 }
0x3ac5   :  { %3412 = vrot.lane.b32.xlu1 %v3407_v10, %s8196_s26 }
0x3b36   :  { %v3411_v36 = vpop.permute.xlu0 %3410 }
0x3b37   :  { %v3413_v25 = vpop.permute.xlu1 %3412  ;;  %v9294_v52 = vadd.f32 %v3411_v36, %v3396_v35 }
0x3b38   :  { %v9296_v13 = vadd.f32 %v3413_v25, %v3397_v44 }
0x3b39   :  { %7811 = vtanh.f32 %v9294_v52 }
0x3b3a   :  { %7813 = vtanh.f32 %v9296_v13 }
0x3b43   :  { %v7812_v45 = vpop.eup %7811 }
0x3b44   :  { %v7814_v18 = vpop.eup %7813  ;;  %3422 = vrot.lane.b32.xlu0 %v7812_v45, %s8188_s25 }
0x3b45   :  { %3424 = vrot.lane.b32.xlu1 %v7814_v18, %s8188_s25 }
0x3bb6   :  { %v3423_v56 = vpop.permute.xlu0 %3422 }
0x3bb7   :  { %v3425_v28 = vpop.permute.xlu1 %3424  ;;  %v3428_v11 = vmul.f32 %v7808_v49, %v3423_v56 }
0x3bb8   :  { %v3429_v34 = vmul.f32 %v7810_v24, %v3425_v28  ;;  %v3518_v28 = vrot.slane %v9294_v52, 7 }
0x3bb9   :  { %v3433_v41 = vrot.slane %v3428_v11, %v8613_v12  ;;  %v3440_v26 = vpack.c.bf16 %v3428_v11, %v3428_v11  ;;  %v3519_v11 = vrot.slane %v9296_v13, 7 }
0x3bba   :  { %v3437_v39 = vrot.slane %v3429_v34, %v8613_v12  ;;  %v3441_v22 = vpack.c.bf16 %v3429_v34, %v3429_v34 }
0x3bbb   :  { %v9307_v63 = vsel %vm943_vm1, %v3433_v41, %v9270_v50  ;;  %v3444_v19 = vunpack.c.l.b16 %v3440_v26 }
0x3bbc   :  { %v9312_v40 = vsel %vm943_vm1, %v3437_v39, %v9275_v62  ;;  %v3445_v42 = vunpack.c.l.b16 %v3441_v22 }
0x3bbd   :  { %v3446_v14 = vrot.slane %v3444_v19, 4 }
0x3bbe   :  { %v3447_v30 = vrot.slane %v3445_v42, 3 }
0x3bc0   :  { %v3448_v55 = vsel %vm449_vm8, %v3447_v30, %v3446_v14 }
0x3bc1   :  { %v3449_v47 = vpack.c.b16 %v3448_v55, %v3448_v55 }
0x3bc3   :  { %3450 = vrot.lane.b32.xlu0 %v3449_v47, %s8196_s26 }
0x3c35   :  { %v3451_v43 = vpop.permute.xlu0 %3450 }
0x3c36   :  { %7237 = vmatmul.mubr.msk.bf16.vlgmr.msra.gmra.mrb[60].mxu1 %vm331_vm9, %v3451_v43 }
0x3c37   :  { %7249 = vmatpush3.bf16.msra.mxu1 %v9091_v37  ;;  %7252 = vmatprep.mubr.msk.bf16.mxu1 %vm8194_vm0, %v8193_v1 }
0x3c38   :  { %7250 = vmatprep.subr.bf16.mxu1 %v8193_v1 }
0x3c3b   :  { %7251 = vmatpush3.bf16.msra.mxu1 %v9098_v61 }
0x3c3c   :  { %7264 = vmatprep.subr.bf16.mxu1 %v8193_v1 }
0x3d09   :  { %v3489_v50 = vpop.f32.mrb[60].mxu1 }
0x3d0a   :  { %v3496_v62 = vrot.slane %v3489_v50, 3  ;;  %v3497_v23 = vrot.slane %v3489_v50, 4  ;;  %v7238_v46 = vpop.f32.mrb[61].mxu1 }
0x3d0b   :  { %v3492_v7 = vpop.f32.mrb[62].mxu1 }
0x3d0c   :  { %v3500_v49 = vadd.f32 %v3496_v62, %v9137_v20  ;;  %v3501_v51 = vadd.f32 %v3497_v23, %v9140_v21  ;;  %v7239_v24 = vpop.f32.mrb[63].mxu1 }
0x3d0e   :  { %7815 = vtanh.f32 %v3500_v49  ;;  %v6781_v61 = vmul.f32 -1.442695, %v3500_v49  ;;  %v6782_v48 = vmul.f32 -1.442695, %v3501_v51 }
0x3d0f   :  { %7817 = vtanh.f32 %v3501_v51 }
0x3d10   :  { %7819 = vpow2.f32 %v6781_v61 }
0x3d11   :  { %7821 = vpow2.f32 %v6782_v48 }
0x3d18   :  { %v7816_v37 = vpop.eup %7815 }
0x3d19   :  { %v7818_v16 = vpop.eup %7817  ;;  %3526 = vrot.lane.b32.xlu1 %v7816_v37, %s8188_s25 }
0x3d1a   :  { %3528 = vrot.lane.b32.xlu0 %v7818_v16, %s8188_s25  ;;  %v7820_v10 = vpop.eup %7819 }
0x3d1b   :  { %v7822_v53 = vpop.eup %7821  ;;  %v3508_v9 = vadd.f32 1.0, %v7820_v10 }
0x3d1c   :  { %v3509_v35 = vadd.f32 1.0, %v7822_v53 }
0x3d1d   :  { %7823 = vrcp.f32 %v3508_v9 }
0x3d1e   :  { %7825 = vrcp.f32 %v3509_v35 }
0x3d27   :  { %v7824_v44 = vpop.eup %7823 }
0x3d28   :  { %v7826_v25 = vpop.eup %7825  ;;  %v3522_v34 = vmul.f32 %v7824_v44, %v3518_v28 }
0x3d29   :  { %v3523_v41 = vmul.f32 %v7826_v25, %v3519_v11 }
0x3d8b   :  { %v3527_v36 = vpop.permute.xlu1 %3526 }
0x3d8c   :  { %v3529_v45 = vpop.permute.xlu0 %3528  ;;  %v3532_v18 = vmul.f32 %v7824_v44, %v3527_v36 }
0x3d8d   :  { %v3533_v56 = vmul.f32 %v7826_v25, %v3529_v45 }
0x3d8e   :  { %3536 = vrot.lane.b32.xlu1 %v3532_v18, %s8196_s26 }
0x3d8f   :  { %3538 = vrot.lane.b32.xlu0 %v3533_v56, %s8196_s26 }
0x3e00   :  { %v3537_v26 = vpop.permute.xlu1 %3536 }
0x3e01   :  { %v3539_v39 = vpop.permute.xlu0 %3538  ;;  %v9331_v22 = vadd.f32 %v3537_v26, %v3522_v34 }
0x3e02   :  { %v9333_v19 = vadd.f32 %v3539_v39, %v3523_v41 }
0x3e03   :  { %7827 = vtanh.f32 %v9331_v22 }
0x3e04   :  { %7829 = vtanh.f32 %v9333_v19 }
0x3e0d   :  { %v7828_v42 = vpop.eup %7827 }
0x3e0e   :  { %v7830_v14 = vpop.eup %7829  ;;  %3548 = vrot.lane.b32.xlu1 %v7828_v42, %s8188_s25 }
0x3e0f   :  { %3550 = vrot.lane.b32.xlu0 %v7830_v14, %s8188_s25 }
0x3e80   :  { %v3549_v52 = vpop.permute.xlu1 %3548 }
0x3e81   :  { %v3551_v13 = vpop.permute.xlu0 %3550  ;;  %v3554_v30 = vmul.f32 %v7824_v44, %v3549_v52 }
0x3e82   :  { %v3555_v55 = vmul.f32 %v7826_v25, %v3551_v13  ;;  %v3644_v13 = vrot.slane %v9331_v22, 7 }
0x3e83   :  { %v3559_v47 = vrot.slane %v3554_v30, %v8654_v33  ;;  %v3566_v43 = vpack.c.bf16 %v3554_v30, %v3554_v30  ;;  %v3645_v30 = vrot.slane %v9333_v19, 7 }
0x3e84   :  { %v3563_v50 = vrot.slane %v3555_v55, %v8654_v33  ;;  %v3567_v62 = vpack.c.bf16 %v3555_v55, %v3555_v55 }
0x3e85   :  { %v9344_v23 = vsel %vm1072_vm2, %v3559_v47, %v9307_v63  ;;  %v3570_v46 = vunpack.c.l.b16 %v3566_v43 }
0x3e86   :  { %v9349_v7 = vsel %vm1072_vm2, %v3563_v50, %v9312_v40  ;;  %v3571_v49 = vunpack.c.l.b16 %v3567_v62 }
0x3e87   :  { %v3572_v51 = vrot.slane %v3570_v46, 5 }
0x3e88   :  { %v3573_v24 = vrot.slane %v3571_v49, 4 }
0x3e8a   :  { %v3574_v37 = vsel %vm449_vm8, %v3573_v24, %v3572_v51 }
0x3e8b   :  { %v3575_v16 = vpack.c.b16 %v3574_v37, %v3574_v37 }
0x3e8d   :  { %3576 = vrot.lane.b32.xlu1 %v3575_v16, %s8196_s26 }
0x3eff   :  { %v3577_v61 = vpop.permute.xlu1 %3576 }
0x3f00   :  { %7245 = vmatmul.mubr.msk.bf16.vlgmr.msra.gmra.mrb[56].mxu0 %vm331_vm9, %v3577_v61 }
0x3f01   :  { %7260 = vmatprep.mubr.msk.bf16.mxu0 %vm8194_vm0, %v8193_v1 }
0x3fd3   :  { %v3615_v63 = vpop.f32.mrb[56].mxu0 }
0x3fd4   :  { %v3622_v48 = vrot.slane %v3615_v63, 2  ;;  %v3623_v10 = vrot.slane %v3615_v63, 3  ;;  %v7246_v53 = vpop.f32.mrb[57].mxu0 }
0x3fd5   :  { %v3618_v40 = vpop.f32.mrb[58].mxu0 }
0x3fd6   :  { %v3626_v9 = vadd.f32 %v3622_v48, %v9137_v20  ;;  %v3627_v35 = vadd.f32 %v3623_v10, %v9140_v21  ;;  %v7247_v44 = vpop.f32.mrb[59].mxu0 }
0x3fd8   :  { %7831 = vtanh.f32 %v3626_v9  ;;  %v6784_v45 = vmul.f32 -1.442695, %v3626_v9  ;;  %v6785_v18 = vmul.f32 -1.442695, %v3627_v35 }
0x3fd9   :  { %7833 = vtanh.f32 %v3627_v35 }
0x3fda   :  { %7835 = vpow2.f32 %v6784_v45 }
0x3fdb   :  { %7837 = vpow2.f32 %v6785_v18 }
0x3fe2   :  { %v7832_v36 = vpop.eup %7831 }
0x3fe3   :  { %v7834_v25 = vpop.eup %7833  ;;  %3652 = vrot.lane.b32.xlu0 %v7832_v36, %s8188_s25 }
0x3fe4   :  { %3654 = vrot.lane.b32.xlu1 %v7834_v25, %s8188_s25  ;;  %v7836_v56 = vpop.eup %7835 }
0x3fe5   :  { %v7838_v28 = vpop.eup %7837  ;;  %v3634_v11 = vadd.f32 1.0, %v7836_v56 }
0x3fe6   :  { %v3635_v34 = vadd.f32 1.0, %v7838_v28 }
0x3fe7   :  { %7839 = vrcp.f32 %v3634_v11 }
0x3fe8   :  { %7841 = vrcp.f32 %v3635_v34 }
0x3ff1   :  { %v7840_v41 = vpop.eup %7839 }
0x3ff2   :  { %v7842_v39 = vpop.eup %7841  ;;  %v3648_v55 = vmul.f32 %v7840_v41, %v3644_v13 }
0x3ff3   :  { %v3649_v47 = vmul.f32 %v7842_v39, %v3645_v30 }
0x4055   :  { %v3653_v26 = vpop.permute.xlu0 %3652 }
0x4056   :  { %v3655_v42 = vpop.permute.xlu1 %3654  ;;  %v3658_v14 = vmul.f32 %v7840_v41, %v3653_v26 }
0x4057   :  { %v3659_v52 = vmul.f32 %v7842_v39, %v3655_v42 }
0x4058   :  { %3662 = vrot.lane.b32.xlu0 %v3658_v14, %s8196_s26 }
0x4059   :  { %3664 = vrot.lane.b32.xlu1 %v3659_v52, %s8196_s26 }
0x40ca   :  { %v3663_v43 = vpop.permute.xlu0 %3662 }
0x40cb   :  { %v3665_v50 = vpop.permute.xlu1 %3664  ;;  %v9364_v62 = vadd.f32 %v3663_v43, %v3648_v55 }
0x40cc   :  { %v9366_v46 = vadd.f32 %v3665_v50, %v3649_v47 }
0x40cd   :  { %7843 = vtanh.f32 %v9364_v62 }
0x40ce   :  { %7845 = vtanh.f32 %v9366_v46 }
0x40d7   :  { %v7844_v49 = vpop.eup %7843 }
0x40d8   :  { %v7846_v51 = vpop.eup %7845  ;;  %3674 = vrot.lane.b32.xlu0 %v7844_v49, %s8188_s25 }
0x40d9   :  { %3676 = vrot.lane.b32.xlu1 %v7846_v51, %s8188_s25  ;;  %v3770_v51 = vrot.slane %v9364_v62, 7  ;;  %v9401_v62 = vld [vmem:[#allocation7] sm:$0xff] }
0x414a   :  { %v3675_v22 = vpop.permute.xlu0 %3674 }
0x414b   :  { %v3677_v19 = vpop.permute.xlu1 %3676  ;;  %v3680_v24 = vmul.f32 %v7840_v41, %v3675_v22  ;;  %v3771_v22 = vrot.slane %v9366_v46, 7  ;;  %v2590_v46 = vrot.slane %v9401_v62, %v8691_v15 }
0x414c   :  { %v3681_v37 = vmul.f32 %v7842_v39, %v3677_v19 }
0x414d   :  { %v3685_v16 = vrot.slane %v3680_v24, %v8691_v15  ;;  %v3692_v61 = vpack.c.bf16 %v3680_v24, %v3680_v24 }
0x414e   :  { %v3689_v63 = vrot.slane %v3681_v37, %v8691_v15  ;;  %v3693_v48 = vpack.c.bf16 %v3681_v37, %v3681_v37 }
0x414f   :  { %v9377_v10 = vsel %vm1201_vm3, %v3685_v16, %v9344_v23  ;;  %v3696_v53 = vunpack.c.l.b16 %v3692_v61 }
0x4150   :  { %v9382_v40 = vsel %vm1201_vm3, %v3689_v63, %v9349_v7  ;;  %v3697_v9 = vunpack.c.l.b16 %v3693_v48 }
0x4151   :  { %v3698_v35 = vrot.slane %v3696_v53, 6 }
0x4152   :  { %v3699_v44 = vrot.slane %v3697_v9, 5  ;;  %v1405_v9 = vadd.f32 %v8790_v59, %v8793_v8 }
0x4154   :  { %v3700_v36 = vsel %vm449_vm8, %v3699_v44, %v3698_v35  ;;  %v2644_v35 = vadd.f32 %v9131_v58, %v2590_v46  ;;  %v2647_v44 = vadd.f32 %v9133_v57, %v2590_v46  ;;  %v7455_v57 = vld [vmem:[%s10175_s5 + $0x28] sm:$0xff]  }
0x4155   :  { %v3701_v25 = vpack.c.b16 %v3700_v36, %v3700_v36 }
0x4157   :  { %3702 = vrot.lane.b32.xlu0 %v3701_v25, %s8196_s26 }
0x41c9   :  { %v3703_v45 = vpop.permute.xlu0 %3702 }
0x41ca   :  { %7253 = vmatmul.mubr.msk.bf16.vlgmr.msra.gmra.mrb[64].mxu1 %vm331_vm9, %v3703_v45  ;;  %v8088_v45 = vld [vmem:[#allocation7 + $0x8] sm:$0xff] }
0x41cb   :  { %7268 = vmatprep.mubr.msk.bf16.mxu1 %vm8194_vm0, %v8193_v1 }
0x429d   :  { %v3741_v23 = vpop.f32.mrb[64].mxu1 }
0x429e   :  { %v3748_v18 = vrot.slane %v3741_v23, 1  ;;  %v3749_v56 = vrot.slane %v3741_v23, 2  ;;  %v7254_v28 = vpop.f32.mrb[65].mxu1  ;;  %v2655_v23 = vrot.slane %v8088_v45, %v8336_v5 }
0x429f   :  { %v3744_v7 = vpop.f32.mrb[66].mxu1 }
0x42a0   :  { %v3752_v11 = vadd.f32 %v3748_v18, %v9137_v20  ;;  %v3753_v34 = vadd.f32 %v3749_v56, %v9140_v21  ;;  %v7255_v41 = vpop.f32.mrb[67].mxu1 }
0x42a2   :  { %7847 = vtanh.f32 %v3752_v11  ;;  %v6787_v42 = vmul.f32 -1.442695, %v3752_v11  ;;  %v6788_v14 = vmul.f32 -1.442695, %v3753_v34 }
0x42a3   :  { %7849 = vtanh.f32 %v3753_v34 }
0x42a4   :  { %7851 = vpow2.f32 %v6787_v42 }
0x42a5   :  { %7853 = vpow2.f32 %v6788_v14 }
0x42ac   :  { %v7848_v26 = vpop.eup %7847 }
0x42ad   :  { %v7850_v39 = vpop.eup %7849  ;;  %3778 = vrot.lane.b32.xlu1 %v7848_v26, %s8188_s25 }
0x42ae   :  { %3780 = vrot.lane.b32.xlu0 %v7850_v39, %s8188_s25  ;;  %v7852_v52 = vpop.eup %7851 }
0x42af   :  { %v7854_v13 = vpop.eup %7853  ;;  %v3760_v30 = vadd.f32 1.0, %v7852_v52 }
0x42b0   :  { %v3761_v55 = vadd.f32 1.0, %v7854_v13 }
0x42b1   :  { %7855 = vrcp.f32 %v3760_v30  ;;  %v1422_v30 = vsel %vm331_vm9, %v8809_v32, 0.0 }
0x42b2   :  { %7857 = vrcp.f32 %v3761_v55 }
0x42bb   :  { %v7856_v20 = vpop.eup %7855 }
0x42bc   :  { %v7858_v47 = vpop.eup %7857  ;;  %v3774_v19 = vmul.f32 %v7856_v20, %v3770_v51 }
0x42bd   :  { %v3775_v24 = vmul.f32 %v7858_v47, %v3771_v22  ;;  %v3892_v22 = vrot.slane %v8088_v45, %v8329_v4 }
0x431f   :  { %v3779_v21 = vpop.permute.xlu1 %3778 }
0x4320   :  { %v3781_v43 = vpop.permute.xlu0 %3780  ;;  %v3784_v50 = vmul.f32 %v7856_v20, %v3779_v21 }
0x4321   :  { %v3785_v49 = vmul.f32 %v7858_v47, %v3781_v43 }
0x4322   :  { %3788 = vrot.lane.b32.xlu1 %v3784_v50, %s8196_s26 }
0x4323   :  { %3790 = vrot.lane.b32.xlu0 %v3785_v49, %s8196_s26 }
0x4394   :  { %v3789_v37 = vpop.permute.xlu1 %3788 }
0x4395   :  { %v3791_v16 = vpop.permute.xlu0 %3790  ;;  %v3794_v61 = vadd.f32 %v3789_v37, %v3774_v19  ;;  %v9445_v19 = vsub.s32 %v8367_v17, %v8323_v2 }
0x4396   :  { %v3795_v63 = vadd.f32 %v3791_v16, %v3775_v24 }
0x4397   :  { %7859 = vtanh.f32 %v3794_v61 }
0x4398   :  { %7861 = vtanh.f32 %v3795_v63 }
0x4399   :  { %7863 = vtanh.f32 %v1405_v9 }
0x439a   :  { %7865 = vtanh.f32 %v2644_v35 }
0x439b   :  { %7867 = vtanh.f32 %v2647_v44 }
0x43a1   :  { %v7860_v48 = vpop.eup %7859 }
0x43a2   :  { %v7862_v53 = vpop.eup %7861  ;;  %3800 = vrot.lane.b32.xlu1 %v7860_v48, %s8188_s25 }
0x43a3   :  { %3802 = vrot.lane.b32.xlu0 %v7862_v53, %s8188_s25  ;;  %v7864_v36 = vpop.eup %7863 }
0x43a4   :  { %v1417_v25 = vmul.f32 %v7864_v36, %v8806_v27  ;;  %v7866_v18 = vpop.eup %7865  ;;  %v7454_v27 = vld [vmem:[%s10175_s5 + $0x20] sm:$0xff]  }
0x43a5   :  { %v2656_v8 = vmul.f32 %v7866_v18, %v2655_v23  ;;  %v7868_v56 = vpop.eup %7867  ;;  %7257 = vmatpush3.bf16.msra.mxu0 %v7454_v27 }
0x43a6   :  { %v1419_v59 = vsel %vm331_vm9, %v1417_v25, 0.0  ;;  %v2657_v7 = vmul.f32 %v7868_v56, %v2655_v23  ;;  %7258 = vmatprep.subr.bf16.mxu0 %v8193_v1 }
0x43a7   :  { %v2658_v28 = vsel %vm331_vm9, %v2656_v8, 0.0 }
0x43a8   :  { %v2661_v58 = vsel %vm331_vm9, %v2657_v7, 0.0 }
0x43a9   :  { %7259 = vmatpush3.bf16.msra.mxu0 %v7455_v57 }
0x43aa   :  { %7272 = vmatprep.subr.bf16.mxu0 %v8193_v1 }
0x43c2   :  { %1420 = vadd.xlane.f32.xlu0 %v1419_v59 }
0x43c6   :  { %2659 = vadd.xlane.f32.xlu0 %v2658_v28 }
0x43ca   :  { %2662 = vadd.xlane.f32.xlu0 %v2661_v58 }
0x4414   :  { %v3801_v11 = vpop.permute.xlu1 %3800 }
0x4415   :  { %v3803_v34 = vpop.permute.xlu0 %3802  ;;  %v3806_v41 = vmul.f32 %v7856_v20, %v3801_v11 }
0x4416   :  { %v3807_v26 = vmul.f32 %v7858_v47, %v3803_v34 }
0x4417   :  { %v3811_v39 = vrot.slane %v3806_v41, %v8751_v38 }
0x4418   :  { %v3815_v42 = vrot.slane %v3807_v26, %v8751_v38 }
0x4419   :  { %v9425_v14 = vsel %vm1330_vm4, %v3811_v39, %v9377_v10  ;;  %v3827_v10 = vrot.slane %v9401_v62, %v8751_v38 }
0x441a   :  { %v9430_v52 = vsel %vm1330_vm4, %v3815_v42, %v9382_v40 }
0x441b   :  { %v3823_v13 = vpack.c.bf16 %v9430_v52, %v9425_v14 }
0x441d   :  { %3829 = vrot.lane.b32.xlu1 %v3823_v13, %s8196_s26 }
0x4441   :  { %1423 = vadd.xlane.f32.xlu1 %v1422_v30 }
0x444f   :  { %v1421_v40 = vpop.xlane.xlu0 %1420 }
0x4450   :  { %v1430_v48 = vrot.slane %v1421_v40, %v9445_v19 }
0x4453   :  { %v2660_v32 = vpop.xlane.xlu0 %2659 }
0x4454   :  { %v2669_v35 = vrot.slane %v2660_v32, %v9445_v19 }
0x4457   :  { %v2663_v24 = vpop.xlane.xlu0 %2662 }
0x4458   :  { %v2673_v53 = vrot.slane %v2663_v24, %v9445_v19 }
0x445a   :  { %v2674_v25 = vsel %vm449_vm8, %v2673_v53, %v2669_v35 }
0x445b   :  { %v2676_v23 = vsel %vm1437_vm5, %v2674_v25, -inf }
0x448f   :  { %v3830_v55 = vpop.permute.xlu1 %3829 }
0x4490   :  { %7261 = vmatmul.mubr.msk.bf16.vlgmr.msra.gmra.mrb[60].mxu0 %vm331_vm9, %v3830_v55 }
0x4491   :  { %7276 = vmatprep.mubr.msk.bf16.mxu0 %vm8194_vm0, %v8193_v1 }
0x44ce   :  { %v1424_v51 = vpop.xlane.xlu1 %1423 }
0x44cf   :  { %v1434_v16 = vrot.slane %v1424_v51, %v9445_v19 }
0x44d1   :  { %v1435_v44 = vsel %vm449_vm8, %v1434_v16, %v1430_v48 }
0x44d2   :  { %v1438_v45 = vsel %vm1437_vm5, %v1435_v44, -inf }
0x4563   :  { %v3880_v20 = vpop.f32.mrb[60].mxu0 }
0x4564   :  { %v3881_v21 = vadd.f32 %v3880_v20, %v3827_v10  ;;  %v7262_v47 = vpop.f32.mrb[61].mxu0 }
0x4565   :  { %v3883_v43 = vpop.f32.mrb[62].mxu0 }
0x4566   :  { %7869 = vtanh.f32 %v3881_v21  ;;  %v3884_v50 = vadd.f32 %v3883_v43, %v3827_v10  ;;  %v7263_v49 = vpop.f32.mrb[63].mxu0 }
0x4568   :  { %7871 = vtanh.f32 %v3884_v50 }
0x4570   :  { %v7870_v37 = vpop.eup %7869 }
0x4571   :  { %v3893_v61 = vmul.f32 %v7870_v37, %v3892_v22 }
0x4572   :  { %v7872_v63 = vpop.eup %7871 }
0x4573   :  { %v3895_v9 = vsel %vm331_vm9, %v3893_v61, 0.0  ;;  %v3894_v46 = vmul.f32 %v7872_v63, %v3892_v22 }
0x4574   :  { %3896 = vadd.xlane.f32.xlu1 %v3895_v9 }
0x4575   :  { %v3898_v36 = vsel %vm331_vm9, %v3894_v46, 0.0 }
0x4576   :  { %3899 = vadd.xlane.f32.xlu0 %v3898_v36 }
0x4578   :  { %1439 = vmax.xlane.f32.xlu1 %v1438_v45 }
0x457a   :  { %2677 = vmax.xlane.f32.xlu0 %v2676_v23 }
0x4601   :  { %v3897_v18 = vpop.xlane.xlu1 %3896 }
0x4602   :  { %v3906_v8 = vrot.slane %v3897_v18, %v9445_v19 }
0x4603   :  { %v3900_v59 = vpop.xlane.xlu0 %3899 }
0x4604   :  { %v3910_v56 = vrot.slane %v3900_v59, %v9445_v19 }
0x4605   :  { %v1440_v28 = vpop.xlane.xlu1 %1439 }
0x4606   :  { %v1445_v7 = vrot.slane %v1440_v28, %v8326_v3  ;;  %v1449_v58 = vrot.slane %v1440_v28, %v8336_v5  ;;  %v3911_v27 = vsel %vm449_vm8, %v3910_v56, %v3906_v8 }
0x4607   :  { %v2678_v57 = vpop.xlane.xlu0 %2677  ;;  %v3913_v11 = vsel %vm1437_vm5, %v3911_v27, -inf }
0x4608   :  { %v1452_v34 = vsub.f32 %v1421_v40, %v1445_v7  ;;  %v1453_v41 = vsub.f32 %v1424_v51, %v1449_v58  ;;  %v2683_v26 = vrot.slane %v2678_v57, %v8326_v3  ;;  %3914 = vmax.xlane.f32.xlu1 %v3913_v11  ;;  %v2687_v13 = vrot.slane %v2678_v57, %v8336_v5 }
0x460a   :  { %v1454_v39 = vmul.f32 1.442695, %v1452_v34  ;;  %v1456_v42 = vmul.f32 1.442695, %v1453_v41  ;;  %v2690_v30 = vsub.f32 %v2660_v32, %v2683_v26  ;;  %v2691_v55 = vsub.f32 %v2663_v24, %v2687_v13 }
0x460c   :  { %7873 = vpow2.f32 %v1454_v39  ;;  %v2692_v10 = vmul.f32 1.442695, %v2690_v30  ;;  %v2694_v20 = vmul.f32 1.442695, %v2691_v55 }
0x460d   :  { %7875 = vpow2.f32 %v1456_v42 }
0x460e   :  { %7877 = vpow2.f32 %v2692_v10 }
0x460f   :  { %7879 = vpow2.f32 %v2694_v20 }
0x4616   :  { %v7874_v21 = vpop.eup %7873 }
0x4617   :  { %1461 = vperm.xlu0 %7435, %v7874_v21   ;;  %v7876_v47 = vpop.eup %7875 }
0x4618   :  { %v7878_v40 = vpop.eup %7877 }
0x4619   :  { %1464 = vperm.xlu1 %7436, %v7876_v47   ;;  %v7880_v43 = vpop.eup %7879 }
0x461d   :  { %2699 = vperm.xlu1 %7436, %v7878_v40  }
0x4621   :  { %2702 = vperm.xlu1 %7436, %v7880_v43  }
0x4695   :  { %v3915_v50 = vpop.xlane.xlu1 %3914 }
0x4696   :  { %v3920_v49 = vrot.slane %v3915_v50, %v8326_v3  ;;  %v3924_v32 = vrot.slane %v3915_v50, %v8336_v5  ;;  %v1462_v36 = vpop.permute.xlu0 %1461 }
0x4697   :  { %v1469_v45 = vrot.slane %v1462_v36, %v9445_v19 }
0x4698   :  { %v3927_v51 = vsub.f32 %v3897_v18, %v3920_v49  ;;  %v3928_v22 = vsub.f32 %v3900_v59, %v3924_v32 }
0x4699   :  { %v1465_v24 = vpop.permute.xlu1 %1464 }
0x469a   :  { %v3929_v37 = vmul.f32 1.442695, %v3927_v51  ;;  %v3931_v16 = vmul.f32 1.442695, %v3928_v22  ;;  %v1473_v25 = vrot.slane %v1465_v24, %v9445_v19  ;;  %v7458_v51 = vld [vmem:[%s10176_s6 + $0x8] sm:$0xff]   ;;  %v9500_v22 = vld [vmem:[%s10176_s6 + $0x18] sm:$0xff]  }
0x469c   :  { %7881 = vpow2.f32 %v3929_v37  ;;  %v1474_v23 = vsel %vm449_vm8, %v1473_v25, %v1469_v45 }
0x469d   :  { %v2700_v61 = vpop.permute.xlu1 %2699  ;;  %7883 = vpow2.f32 %v3931_v16  ;;  %v1476_v18 = vsel %vm1437_vm5, %v1474_v23, 0.0 }
0x469e   :  { %v2707_v48 = vrot.slane %v2700_v61, %v9445_v19 }
0x46a1   :  { %v2703_v63 = vpop.permute.xlu1 %2702 }
0x46a2   :  { %v2711_v53 = vrot.slane %v2703_v63, %v9445_v19 }
0x46a4   :  { %v2712_v9 = vsel %vm449_vm8, %v2711_v53, %v2707_v48 }
0x46a5   :  { %v2714_v46 = vsel %vm1437_vm5, %v2712_v9, 0.0 }
0x46a6   :  { %v7882_v35 = vpop.eup %7881  ;;  %2715 = vadd.xlane.f32.xlu0 %v2714_v46 }
0x46a7   :  { %3936 = vperm.xlu1 %7436, %v7882_v35   ;;  %v7884_v44 = vpop.eup %7883 }
0x46ab   :  { %3939 = vperm.xlu1 %7436, %v7884_v44  }
0x46cf   :  { %1477 = vadd.xlane.f32.xlu1 %v1476_v18 }
0x4726   :  { %v3937_v59 = vpop.permute.xlu1 %3936 }
0x4727   :  { %v3944_v56 = vrot.slane %v3937_v59, %v9445_v19 }
0x472a   :  { %v3940_v8 = vpop.permute.xlu1 %3939 }
0x472b   :  { %v3948_v28 = vrot.slane %v3940_v8, %v9445_v19 }
0x472d   :  { %v3949_v7 = vsel %vm449_vm8, %v3948_v28, %v3944_v56 }
0x472e   :  { %v3951_v58 = vsel %vm1437_vm5, %v3949_v7, 0.0 }
0x472f   :  { %3952 = vadd.xlane.f32.xlu1 %v3951_v58 }
0x4733   :  { %v2716_v27 = vpop.xlane.xlu0 %2715 }
0x4734   :  { %7885 = vrcp.f32 %v2716_v27 }
0x473e   :  { %v7886_v57 = vpop.eup %7885 }
0x473f   :  { %v2722_v11 = vrot.slane %v7886_v57, %v8326_v3  ;;  %v2726_v41 = vrot.slane %v7886_v57, %v8336_v5 }
0x4741   :  { %v2729_v34 = vmul.f32 %v7878_v40, %v2722_v11  ;;  %v2730_v26 = vmul.f32 %v7880_v43, %v2726_v41 }
0x4743   :  { %2733 = vperm.xlu0 %7435, %v2729_v34  }
0x4747   :  { %2738 = vperm.xlu0 %7435, %v2730_v26   ;;  %v8197_v26 = vmov 1966171168  }
0x475c   :  { %v1478_v39 = vpop.xlane.xlu1 %1477 }
0x475d   :  { %7887 = vrcp.f32 %v1478_v39  ;;  %v4007_v39 = vunpack.c.l.s4 %v8197_v26 }
0x4767   :  { %v7888_v42 = vpop.eup %7887 }
0x4768   :  { %v1484_v13 = vrot.slane %v7888_v42, %v8326_v3  ;;  %v1488_v55 = vrot.slane %v7888_v42, %v8336_v5 }
0x476a   :  { %v1491_v30 = vmul.f32 %v7874_v21, %v1484_v13  ;;  %v1492_v10 = vmul.f32 %v7876_v47, %v1488_v55  ;;  %v7456_v21 = vld [vmem:[%s10176_s6] sm:$0xff]   ;;  %v9491_v47 = vld [vmem:[%s10176_s6 + $0x10] sm:$0xff]  }
0x476b   :  { %7265 = vmatpush3.bf16.msra.mxu1 %v7456_v21  ;;  %7273 = vmatpush3.bf16.msra.mxu0 %v9491_v47 }
0x476c   :  { %1495 = vperm.xlu1 %7436, %v1491_v30   ;;  %7266 = vmatprep.subr.bf16.mxu1 %v8193_v1 }
0x476d   :  { %7274 = vmatprep.subr.bf16.mxu0 %v8193_v1 }
0x476f   :  { %7267 = vmatpush3.bf16.msra.mxu1 %v7458_v51  ;;  %7275 = vmatpush3.bf16.msra.mxu0 %v9500_v22 }
0x4770   :  { %1500 = vperm.xlu1 %7436, %v1492_v10   ;;  %7280 = vmatprep.subr.bf16.mxu1 %v8193_v1 }
0x4771   :  { %7288 = vmatprep.subr.bf16.mxu0 %v8193_v1 }
0x4772   :  { %7277 = vmatmul.mubr.bf16.vlgmr.msra.gmra.mrb[64].mxu0 %v8195_v31 }
0x4773   :  { %7289 = vmatpush3.bf16.msra.mxu0 %v9491_v47  ;;  %7292 = vmatprep.mubr.msk.bf16.mxu0 %vm8194_vm0, %v8193_v1 }
0x4774   :  { %7290 = vmatprep.subr.bf16.mxu0 %v8193_v1 }
0x4777   :  { %7291 = vmatpush3.bf16.msra.mxu0 %v9500_v22 }
0x4778   :  { %7304 = vmatprep.subr.bf16.mxu0 %v8193_v1 }
0x47bc   :  { %v3953_v20 = vpop.xlane.xlu1 %3952 }
0x47bd   :  { %7889 = vrcp.f32 %v3953_v20 }
0x47c2   :  { %v2734_v37 = vpop.permute.xlu0 %2733 }
0x47c3   :  { %v2741_v53 = vmul.f32 %v2734_v37, %v9107_v29 }
0x47c6   :  { %v2739_v9 = vpop.permute.xlu0 %2738 }
0x47c7   :  { %v7890_v50 = vpop.eup %7889  ;;  %v2742_v36 = vmul.f32 %v2739_v9, %v9112_v60 }
0x47c8   :  { %v3959_v40 = vrot.slane %v7890_v50, %v8326_v3  ;;  %v3963_v43 = vrot.slane %v7890_v50, %v8336_v5 }
0x47ca   :  { %v3966_v49 = vmul.f32 %v7882_v35, %v3959_v40  ;;  %v3967_v32 = vmul.f32 %v7884_v44, %v3963_v43  ;;  %v2743_v44 = vsel %vm10185_vm6, %v2741_v53, 0.0 }
0x47cb   :  { %v2744_v23 = vrot.slane %v2743_v44, 4 }
0x47cc   :  { %3970 = vperm.xlu1 %7436, %v3966_v49  }
0x47cd   :  { %v2745_v8 = vadd.f32 %v2744_v23, %v2743_v44 }
0x47cf   :  { %v2746_v7 = vrot.slane %v2745_v8, 2 }
0x47d0   :  { %3975 = vperm.xlu1 %7436, %v3967_v32  }
0x47d1   :  { %v2747_v42 = vadd.f32 %v2746_v7, %v2745_v8 }
0x47d3   :  { %v2748_v43 = vrot.slane %v2747_v42, 1 }
0x47eb   :  { %v1496_v24 = vpop.permute.xlu1 %1495 }
0x47ec   :  { %v1503_v16 = vmul.f32 %v1496_v24, %v8766_v0  ;;  %v2750_v0 = vsel %vm10185_vm6, %v2742_v36, 0.0 }
0x47ed   :  { %v2751_v56 = vrot.slane %v2750_v0, 4 }
0x47ee   :  { %v1506_v63 = vsel %vm10185_vm6, %v1503_v16, 0.0 }
0x47ef   :  { %v1501_v61 = vpop.permute.xlu1 %1500  ;;  %v1507_v46 = vrot.slane %v1506_v63, 4  ;;  %v2752_v58 = vadd.f32 %v2751_v56, %v2750_v0 }
0x47f0   :  { %v1504_v48 = vmul.f32 %v1501_v61, %v8771_v54 }
0x47f1   :  { %v1508_v25 = vadd.f32 %v1507_v46, %v1506_v63  ;;  %v2753_v13 = vrot.slane %v2752_v58, 2  ;;  %v2749_v63 = vadd.f32 %v2748_v43, %v2747_v42 }
0x47f2   :  { %v1513_v35 = vsel %vm10185_vm6, %v1504_v48, 0.0 }
0x47f3   :  { %v1514_v45 = vrot.slane %v1513_v35, 4  ;;  %v1509_v18 = vrot.slane %v1508_v25, 2  ;;  %v2754_v32 = vadd.f32 %v2753_v13, %v2752_v58 }
0x47f5   :  { %v1515_v59 = vadd.f32 %v1514_v45, %v1513_v35  ;;  %v1510_v54 = vadd.f32 %v1509_v18, %v1508_v25  ;;  %v2755_v48 = vrot.slane %v2754_v32, 1 }
0x47f7   :  { %v1516_v28 = vrot.slane %v1515_v59, 2  ;;  %v1511_v11 = vrot.slane %v1510_v54, 1  ;;  %v2756_v25 = vadd.f32 %v2755_v48, %v2754_v32 }
0x47f9   :  { %v1517_v60 = vadd.f32 %v1516_v28, %v1515_v59  ;;  %v1512_v20 = vadd.f32 %v1511_v11, %v1510_v54 }
0x47fb   :  { %v1518_v50 = vrot.slane %v1517_v60, 1  ;;  %v1520_v24 = vsel %vm429_vm11, %v1512_v20, 0.0 }
0x47fc   :  { %v2757_v46 = vsel %vm557_vm10, %v2749_v63, %v1520_v24 }
0x47fd   :  { %v1519_v37 = vadd.f32 %v1518_v50, %v1517_v60 }
0x47ff   :  { %v1521_v35 = vsel %vm429_vm11, %v1519_v37, 0.0 }
0x4800   :  { %v2758_v0 = vsel %vm557_vm10, %v2756_v25, %v1521_v35 }
0x4845   :  { %v4289_v20 = vpop.f32.mrb[64].mxu0 }
0x4846   :  { %v7278_v50 = vpop.f32.mrb[65].mxu0 }
0x484b   :  { %v3971_v29 = vpop.permute.xlu1 %3970 }
0x484c   :  { %v3978_v27 = vmul.f32 %v3971_v29, %v9425_v14  ;;  %v4008_v14 = vunpack.c.0.s8 %v4007_v39 }
0x484e   :  { %v3980_v57 = vsel %vm10185_vm6, %v3978_v27, 0.0 }
0x484f   :  { %v3981_v34 = vrot.slane %v3980_v57, 4  ;;  %v3976_v41 = vpop.permute.xlu1 %3975 }
0x4850   :  { %v3979_v30 = vmul.f32 %v3976_v41, %v9430_v52  ;;  %v9529_v52 = vsub.s32 %v4008_v14, %v8323_v2  ;;  %v4209_v14 = vrot.slane %v9401_v62, %v8557_v6 }
0x4851   :  { %v3982_v55 = vadd.f32 %v3981_v34, %v3980_v57 }
0x4852   :  { %v3987_v10 = vsel %vm10185_vm6, %v3979_v30, 0.0  ;;  %v4217_v43 = vrot.slane %v4209_v14, %v9529_v52  ;;  %vm5114_vm6 = vcmask 326656  }
0x4853   :  { %v3983_v40 = vrot.slane %v3982_v55, 2  ;;  %v3988_v49 = vrot.slane %v3987_v10, 4 }
0x4854   :  { %v4218_v32 = vcombine.high %v4217_v43, %v4217_v43 }
0x4855   :  { %v3984_v21 = vadd.f32 %v3983_v40, %v3982_v55  ;;  %v3989_v51 = vadd.f32 %v3988_v49, %v3987_v10  ;;  %v4292_v40 = vpop.f32.mrb[66].mxu0 }
0x4856   :  { %v7279_v49 = vpop.f32.mrb[67].mxu0 }
0x4857   :  { %v3985_v16 = vrot.slane %v3984_v21, 1  ;;  %v3990_v61 = vrot.slane %v3989_v51, 2 }
0x4859   :  { %v3986_v53 = vadd.f32 %v3985_v16, %v3984_v21  ;;  %v3991_v9 = vadd.f32 %v3990_v61, %v3989_v51  ;;  %v4302_v21 = vrot.slane %v4289_v20, %v9529_v52  ;;  %v4232_v16 = vrot.slane %v4218_v32, %v9529_v52 }
0x485b   :  { %v3994_v44 = vsel %vm685_vm12, %v3986_v53, %v2757_v46  ;;  %v3992_v36 = vrot.slane %v3991_v9, 1  ;;  %v4303_v53 = vcombine.high %v4302_v21, %v4302_v21  ;;  %v4310_v46 = vrot.slane %v4302_v21, %v9529_v52 }
0x485c   :  { %v4012_v45 = vrot.slane %v3994_v44, %v9529_v52 }
0x485d   :  { %v3993_v23 = vadd.f32 %v3992_v36, %v3991_v9 }
0x485e   :  { %v4013_v18 = vcombine.high %v4012_v45, %v4012_v45  ;;  %v4020_v59 = vrot.slane %v4012_v45, %v9529_v52 }
0x485f   :  { %v3995_v8 = vsel %vm685_vm12, %v3993_v23, %v2758_v0  ;;  %v4317_v23 = vrot.slane %v4303_v53, %v9529_v52 }
0x4860   :  { %v4035_v56 = vrot.slane %v3995_v8, %v9529_v52  ;;  %v4027_v54 = vrot.slane %v4013_v18, %v9529_v52  ;;  %v4028_v7 = vcombine.high %v4020_v59, %v4020_v59 }
0x4862   :  { %v4036_v28 = vcombine.high %v4035_v56, %v4035_v56  ;;  %v4043_v29 = vrot.slane %v4035_v56, %v9529_v52  ;;  %v4052_v58 = vcombine.low %v4020_v59, %v4027_v54 }
0x4864   :  { %v4050_v27 = vrot.slane %v4036_v28, %v9529_v52  ;;  %v4051_v57 = vcombine.high %v4043_v29, %v4043_v29  ;;  %v4053_v11 = vcombine.low %v4028_v7, %v4043_v29  ;;  %v4061_v34 = vrot.slane %v4052_v58, %v9529_v52 }
0x4866   :  { %v4054_v60 = vcombine.low %v4050_v27, %v4051_v57  ;;  %v4068_v41 = vrot.slane %v4053_v11, %v9529_v52 }
0x4868   :  { %v4075_v26 = vrot.slane %v4054_v60, %v9529_v52  ;;  %v4076_v39 = vcombine.low %v4061_v34, %v4068_v41 }
0x486a   :  { %v4083_v42 = vrot.slane %v4076_v39, %v9529_v52  ;;  %v4090_v13 = vrot.slane %v4075_v26, %v9529_v52 }
0x486c   :  { %v4091_v30 = vcombine.low %v4083_v42, %v4090_v13 }
0x486e   :  { %v4093_v55 = vpack.c.bf16 %v4091_v30, %v4091_v30 }
0x4870   :  { %4095 = vrot.lane.b32.xlu0 %v4093_v55, %s8196_s26 }
0x48e2   :  { %v4096_v10 = vpop.permute.xlu0 %4095 }
0x48e3   :  { %7269 = vmatmul.mubr.msk.bf16.vlgmr.msra.gmra.mrb[68].mxu1 %vm331_vm9, %v4096_v10 }
0x48e4   :  { %7281 = vmatpush3.bf16.msra.mxu1 %v9491_v47  ;;  %7284 = vmatprep.mubr.msk.bf16.mxu1 %vm8194_vm0, %v8193_v1 }
0x48e5   :  { %7282 = vmatprep.subr.bf16.mxu1 %v8193_v1 }
0x48e8   :  { %7283 = vmatpush3.bf16.msra.mxu1 %v9500_v22  ;;  %v9566_v22 = vrot.slane %v4217_v43, %v9529_v52 }
0x48e9   :  { %7296 = vmatprep.subr.bf16.mxu1 %v8193_v1 }
0x49b6   :  { %v4146_v47 = vpop.f32.mrb[68].mxu1 }
0x49b7   :  { %v4153_v51 = vcombine.high %v4146_v47, %v4146_v47  ;;  %v4160_v24 = vrot.slane %v4146_v47, %v9529_v52  ;;  %v7270_v37 = vpop.f32.mrb[69].mxu1 }
0x49b8   :  { %v4149_v61 = vpop.f32.mrb[70].mxu1 }
0x49b9   :  { %v9570_v63 = vrot.slane %v4153_v51, %v9529_v52  ;;  %v4168_v62 = vcombine.high %v4160_v24, %v4160_v24  ;;  %v9573_v48 = vrot.slane %v4160_v24, %v9529_v52  ;;  %v7271_v9 = vpop.f32.mrb[71].mxu1 }
0x49bb   :  { %v4183_v35 = vrot.slane %v9570_v63, %v9529_v52  ;;  %v4190_v44 = vrot.slane %v4168_v62, %v9529_v52  ;;  %v4237_v36 = vadd.f32 %v9566_v22, %v9573_v48 }
0x49bd   :  { %v4199_v25 = vcombine.high %v4190_v44, %v4190_v44  ;;  %v9581_v45 = vadd.f32 %v4232_v16, %v4183_v35  ;;  %v9584_v0 = vadd.f32 %v4232_v16, %v4190_v44  ;;  %v4320_v18 = vadd.f32 %v4310_v46, %v4237_v36 }
0x49bf   :  { %v4240_v59 = vadd.f32 %v9566_v22, %v4199_v25  ;;  %7891 = vtanh.f32 %v4320_v18  ;;  %v6801_v28 = vmul.f32 -1.442695, %v4320_v18 }
0x49c1   :  { %v4321_v8 = vadd.f32 %v4317_v23, %v4240_v59 }
0x49c3   :  { %7893 = vtanh.f32 %v4321_v8  ;;  %v6802_v29 = vmul.f32 -1.442695, %v4321_v8 }
0x49c4   :  { %7895 = vpow2.f32 %v6801_v28 }
0x49c5   :  { %7897 = vpow2.f32 %v6802_v29 }
0x49c9   :  { %v7892_v56 = vpop.eup %7891 }
0x49ca   :  { %4340 = vrot.lane.b32.xlu0 %v7892_v56, %s8188_s25 }
0x49cd   :  { %v7894_v54 = vpop.eup %7893 }
0x49ce   :  { %4342 = vrot.lane.b32.xlu1 %v7894_v54, %s8188_s25  ;;  %v7896_v7 = vpop.eup %7895 }
0x49cf   :  { %v7898_v58 = vpop.eup %7897  ;;  %v4328_v27 = vadd.f32 1.0, %v7896_v7 }
0x49d0   :  { %v4329_v57 = vadd.f32 1.0, %v7898_v58 }
0x49d1   :  { %7899 = vrcp.f32 %v4328_v27 }
0x49d2   :  { %7901 = vrcp.f32 %v4329_v57 }
0x49db   :  { %v7900_v11 = vpop.eup %7899 }
0x49dc   :  { %v7902_v41 = vpop.eup %7901  ;;  %v4336_v42 = vmul.f32 0.0, %v7900_v11 }
0x49dd   :  { %v4337_v55 = vmul.f32 0.0, %v7902_v41 }
0x4a3c   :  { %v4341_v60 = vpop.permute.xlu0 %4340 }
0x4a3d   :  { %v4346_v34 = vmul.f32 %v7900_v11, %v4341_v60 }
0x4a3f   :  { %4350 = vrot.lane.b32.xlu0 %v4346_v34, %s8196_s26 }
0x4a40   :  { %v4343_v26 = vpop.permute.xlu1 %4342 }
0x4a41   :  { %v4347_v39 = vmul.f32 %v7902_v41, %v4343_v26 }
0x4a43   :  { %4352 = vrot.lane.b32.xlu1 %v4347_v39, %s8196_s26 }
0x4ab1   :  { %v4351_v13 = vpop.permute.xlu0 %4350 }
0x4ab2   :  { %v4356_v30 = vadd.f32 %v4351_v13, %v4336_v42 }
0x4ab4   :  { %7903 = vtanh.f32 %v4356_v30 }
0x4ab5   :  { %v4353_v10 = vpop.permute.xlu1 %4352 }
0x4ab6   :  { %v4357_v20 = vadd.f32 %v4353_v10, %v4337_v55 }
0x4ab8   :  { %7905 = vtanh.f32 %v4357_v20 }
0x4abe   :  { %v7904_v50 = vpop.eup %7903 }
0x4abf   :  { %4362 = vrot.lane.b32.xlu0 %v7904_v50, %s8188_s25 }
0x4ac2   :  { %v7906_v40 = vpop.eup %7905 }
0x4ac3   :  { %4364 = vrot.lane.b32.xlu1 %v7906_v40, %s8188_s25 }
0x4b31   :  { %v4363_v49 = vpop.permute.xlu0 %4362 }
0x4b32   :  { %v9593_v14 = vmul.f32 %v7900_v11, %v4363_v49 }
0x4b34   :  { %v4384_v47 = vpack.c.bf16 %v9593_v14, %v9593_v14 }
0x4b35   :  { %v4365_v43 = vpop.permute.xlu1 %4364 }
0x4b36   :  { %v9595_v32 = vmul.f32 %v7902_v41, %v4365_v43  ;;  %v4388_v24 = vunpack.c.l.b16 %v4384_v47 }
0x4b38   :  { %v4385_v21 = vpack.c.bf16 %v9595_v32, %v9595_v32 }
0x4b3a   :  { %v4389_v51 = vunpack.c.l.b16 %v4385_v21 }
0x4b3c   :  { %v4390_v37 = vrot.slane %v4389_v51, 7 }
0x4b3e   :  { %v4391_v16 = vsel %vm449_vm8, %v4390_v37, %v4388_v24 }
0x4b3f   :  { %v4392_v61 = vpack.c.b16 %v4391_v16, %v4391_v16 }
0x4b41   :  { %4393 = vrot.lane.b32.xlu1 %v4392_v61, %s8196_s26 }
0x4bb3   :  { %v4394_v62 = vpop.permute.xlu1 %4393 }
0x4bb4   :  { %7285 = vmatmul.mubr.msk.bf16.vlgmr.msra.gmra.mrb[72].mxu1 %vm331_vm9, %v4394_v62 }
0x4bb5   :  { %7300 = vmatprep.mubr.msk.bf16.mxu1 %vm8194_vm0, %v8193_v1 }
0x4c87   :  { %v4432_v53 = vpop.f32.mrb[72].mxu1 }
0x4c88   :  { %v4445_v9 = vrot.slane %v4432_v53, %v9529_v52  ;;  %v7286_v46 = vpop.f32.mrb[73].mxu1 }
0x4c89   :  { %v4435_v35 = vpop.f32.mrb[74].mxu1 }
0x4c8a   :  { %v4446_v44 = vcombine.high %v4445_v9, %v4445_v9  ;;  %v4453_v36 = vrot.slane %v4445_v9, %v9529_v52  ;;  %v7287_v25 = vpop.f32.mrb[75].mxu1 }
0x4c8c   :  { %v4460_v23 = vrot.slane %v4446_v44, %v9529_v52  ;;  %v4463_v18 = vadd.f32 %v4453_v36, %v9584_v0  ;;  %v5074_v36 = vld [vmem:[%s10171_s1] sm:$0x3] }
0x4c8d   :  { %v5083_v25 = vrot.slane %v5074_v36, %v8326_v3 }
0x4c8e   :  { %v4464_v59 = vadd.f32 %v4460_v23, %v9581_v45  ;;  %7907 = vtanh.f32 %v4463_v18  ;;  %v6804_v54 = vmul.f32 -1.442695, %v4463_v18  ;;  %v7460_v23 = vld [vmem:[%s10173_s3] sm:$0xff]   ;;  %v4169_v18 = vcombine.high %v9570_v63, %v9570_v63 }
0x4c90   :  { %7909 = vtanh.f32 %v4464_v59  ;;  %v6805_v28 = vmul.f32 -1.442695, %v4464_v59  ;;  %v4198_v59 = vcombine.high %v9573_v48, %v9573_v48 }
0x4c91   :  { %7911 = vpow2.f32 %v6804_v54  ;;  %v4197_v54 = vrot.slane %v4169_v18, %v9529_v52  ;;  %v7463_v18 = vld [vmem:[#allocation2] sm:$0xff]  }
0x4c92   :  { %7913 = vpow2.f32 %v6805_v28  ;;  %7297 = vmatpush3.bf16.msra.mxu1 %v7463_v18 }
0x4c93   :  { %7298 = vmatprep.subr.bf16.mxu1 %v8193_v1 }
0x4c98   :  { %v7908_v8 = vpop.eup %7907 }
0x4c99   :  { %4483 = vrot.lane.b32.xlu1 %v7908_v8, %s8188_s25  ;;  %v4233_v8 = vcombine.high %v9566_v22, %v9566_v22  ;;  %v7461_v22 = vld [vmem:[%s10173_s3 + $0x8] sm:$0xff]  }
0x4c9a   :  { %v7910_v56 = vpop.eup %7909 }
0x4c9b   :  { %4485 = vrot.lane.b32.xlu0 %v7910_v56, %s8188_s25  ;;  %v7912_v29 = vpop.eup %7911 }
0x4c9c   :  { %v7914_v7 = vpop.eup %7913  ;;  %v4471_v58 = vadd.f32 1.0, %v7912_v29 }
0x4c9d   :  { %v4472_v27 = vadd.f32 1.0, %v7914_v7 }
0x4c9e   :  { %7915 = vrcp.f32 %v4471_v58  ;;  %v4239_v58 = vadd.f32 %v4233_v8, %v4198_v59  ;;  %v7464_v59 = vld [vmem:[#allocation2 + $0x8] sm:$0xff]  }
0x4c9f   :  { %7917 = vrcp.f32 %v4472_v27  ;;  %7299 = vmatpush3.bf16.msra.mxu1 %v7464_v59 }
0x4ca0   :  { %7314 = vmatprep.subr.bf16.mxu1 %v8193_v1 }
0x4ca8   :  { %v7916_v0 = vpop.eup %7915 }
0x4ca9   :  { %v7918_v11 = vpop.eup %7917  ;;  %v4479_v41 = vmul.f32 %v7916_v0, %v4356_v30  ;;  %v4375_v30 = vrot.slane %v9593_v14, %v8326_v3 }
0x4caa   :  { %v4480_v42 = vmul.f32 %v7918_v11, %v4357_v20  ;;  %v4379_v20 = vrot.slane %v9595_v32, %v8326_v3 }
0x4cab   :  { %v4382_v21 = vsel %vm429_vm11, %v4375_v30, 0.0 }
0x4cac   :  { %v4383_v61 = vsel %vm429_vm11, %v4379_v20, 0.0 }
0x4d0b   :  { %v4484_v45 = vpop.permute.xlu1 %4483 }
0x4d0c   :  { %v4489_v57 = vmul.f32 %v7916_v0, %v4484_v45 }
0x4d0d   :  { %v4486_v60 = vpop.permute.xlu0 %4485 }
0x4d0e   :  { %4493 = vrot.lane.b32.xlu1 %v4489_v57, %s8196_s26  ;;  %v4490_v34 = vmul.f32 %v7918_v11, %v4486_v60  ;;  %v4242_v57 = vadd.f32 %v4233_v8, %v4197_v54  ;;  %v7462_v60 = vld [vmem:[%s10173_s3 + $0x10] ss:$0 sps:$4 sm:$0xff]  }
0x4d10   :  { %4495 = vrot.lane.b32.xlu0 %v4490_v34, %s8196_s26  ;;  %v5120_v34 = vsel %vm5118_vm14, %v7462_v60, 0 }
0x4d80   :  { %v4494_v26 = vpop.permute.xlu1 %4493 }
0x4d81   :  { %v9615_v39 = vadd.f32 %v4494_v26, %v4479_v41  ;;  %v5090_v26 = vrot.slane %v5074_v36, %v8336_v5 }
0x4d82   :  { %v4496_v13 = vpop.permute.xlu0 %4495 }
0x4d83   :  { %7919 = vtanh.f32 %v9615_v39  ;;  %v9618_v55 = vadd.f32 %v4496_v13, %v4480_v42 }
0x4d85   :  { %7921 = vtanh.f32 %v9618_v55 }
0x4d8d   :  { %v7920_v10 = vpop.eup %7919 }
0x4d8e   :  { %4505 = vrot.lane.b32.xlu1 %v7920_v10, %s8188_s25 }
0x4d8f   :  { %v7922_v50 = vpop.eup %7921 }
0x4d90   :  { %4507 = vrot.lane.b32.xlu0 %v7922_v50, %s8188_s25 }
0x4e00   :  { %v4506_v40 = vpop.permute.xlu1 %4505 }
0x4e01   :  { %v4511_v49 = vmul.f32 %v7916_v0, %v4506_v40 }
0x4e02   :  { %v4508_v47 = vpop.permute.xlu0 %4507 }
0x4e03   :  { %v4518_v43 = vrot.slane %v4511_v49, %v8326_v3  ;;  %v4512_v51 = vmul.f32 %v7918_v11, %v4508_v47  ;;  %v4527_v37 = vpack.c.bf16 %v4511_v49, %v4511_v49 }
0x4e05   :  { %v9632_v24 = vsel %vm557_vm10, %v4518_v43, %v4382_v21  ;;  %v4522_v16 = vrot.slane %v4512_v51, %v8326_v3  ;;  %v4528_v14 = vpack.c.bf16 %v4512_v51, %v4512_v51  ;;  %v4531_v53 = vunpack.c.l.b16 %v4527_v37 }
0x4e07   :  { %v9639_v32 = vsel %vm557_vm10, %v4522_v16, %v4383_v61  ;;  %v4532_v62 = vunpack.c.l.b16 %v4528_v14 }
0x4e09   :  { %v4533_v9 = vrot.slane %v4532_v62, 7 }
0x4e0b   :  { %v4534_v46 = vsel %vm449_vm8, %v4533_v9, %v4531_v53 }
0x4e0c   :  { %v4535_v35 = vpack.c.b16 %v4534_v46, %v4534_v46 }
0x4e0e   :  { %4536 = vrot.lane.b32.xlu0 %v4535_v35, %s8196_s26 }
0x4e12   :  { %5085 = vbcast.lane.b32.xlu0 %v5083_v25, 256 }
0x4e80   :  { %v4537_v44 = vpop.permute.xlu0 %4536 }
0x4e81   :  { %7293 = vmatmul.mubr.msk.bf16.vlgmr.msra.gmra.mrb[68].mxu0 %vm331_vm9, %v4537_v44 }
0x4e82   :  { %7310 = vmatprep.mubr.msk.bf16.mxu0 %vm8194_vm0, %v8193_v1  ;;  %7305 = vmatpush3.bf16.msra.mxu0 %v7460_v23 }
0x4e83   :  { %7306 = vmatprep.subr.bf16.mxu0 %v8193_v1 }
0x4e84   :  { %v5086_v20 = vpop.permute.xlu0 %5085 }
0x4e85   :  { %vm5094_vm15 = vcmp.eq.s32.totalorder %v8367_v17, %v5086_v20 }
0x4e86   :  { %7307 = vmatpush3.bf16.msra.mxu0 %v7461_v22  ;;  %v5096_v61 = vsel %vm5094_vm15, 1.0, %v8193_v1 }
0x4e87   :  { %7308 = vmatprep.subr.bf16.mxu0 %v8193_v1 }
0x4e8a   :  { %7309 = vmatpush3.bf16.msra.mxu0 %v5120_v34  ;;  %v9710_v34 = vld [vmem:[%s10178_s8 + $0x8] sm:$0xff]  }
0x4e8b   :  { %7320 = vmatprep.subr.bf16.mxu0 %v8193_v1 }
0x4f54   :  { %v4575_v56 = vpop.f32.mrb[68].mxu0 }
0x4f55   :  { %v4588_v28 = vrot.slane %v4575_v56, %v9529_v52  ;;  %v7294_v29 = vpop.f32.mrb[69].mxu0 }
0x4f56   :  { %v4578_v7 = vpop.f32.mrb[70].mxu0 }
0x4f57   :  { %v4589_v27 = vcombine.high %v4588_v28, %v4588_v28  ;;  %v4596_v0 = vrot.slane %v4588_v28, %v9529_v52  ;;  %v7295_v45 = vpop.f32.mrb[71].mxu0 }
0x4f59   :  { %v4603_v63 = vrot.slane %v4589_v27, %v9529_v52  ;;  %v4606_v11 = vadd.f32 %v4596_v0, %v4239_v58 }
0x4f5b   :  { %v4607_v48 = vadd.f32 %v4603_v63, %v4242_v57  ;;  %7923 = vtanh.f32 %v4606_v11  ;;  %v6807_v13 = vmul.f32 -1.442695, %v4606_v11 }
0x4f5d   :  { %7925 = vtanh.f32 %v4607_v48  ;;  %v6808_v10 = vmul.f32 -1.442695, %v4607_v48 }
0x4f5e   :  { %7927 = vpow2.f32 %v6807_v13 }
0x4f5f   :  { %7929 = vpow2.f32 %v6808_v10 }
0x4f65   :  { %v7924_v41 = vpop.eup %7923 }
0x4f66   :  { %4626 = vrot.lane.b32.xlu1 %v7924_v41, %s8188_s25 }
0x4f67   :  { %v7926_v42 = vpop.eup %7925 }
0x4f68   :  { %4628 = vrot.lane.b32.xlu0 %v7926_v42, %s8188_s25  ;;  %v7928_v50 = vpop.eup %7927 }
0x4f69   :  { %v7930_v30 = vpop.eup %7929  ;;  %v4614_v40 = vadd.f32 1.0, %v7928_v50  ;;  %v9719_v50 = vld [vmem:[%s10178_s8 + $0x10] sm:$0xff]  }
0x4f6a   :  { %5092 = vbcast.lane.b32.xlu1 %v5090_v26, 256  ;;  %v4615_v49 = vadd.f32 1.0, %v7930_v30 }
0x4f6b   :  { %7931 = vrcp.f32 %v4614_v40 }
0x4f6c   :  { %7933 = vrcp.f32 %v4615_v49 }
0x4f75   :  { %v7932_v43 = vpop.eup %7931 }
0x4f76   :  { %v7934_v51 = vpop.eup %7933  ;;  %v4622_v9 = vmul.f32 %v7932_v43, %v9615_v39 }
0x4f77   :  { %v4623_v44 = vmul.f32 %v7934_v51, %v9618_v55 }
0x4fd8   :  { %v4627_v47 = vpop.permute.xlu1 %4626 }
0x4fd9   :  { %v4632_v21 = vmul.f32 %v7932_v43, %v4627_v47 }
0x4fda   :  { %v4629_v37 = vpop.permute.xlu0 %4628 }
0x4fdb   :  { %4636 = vrot.lane.b32.xlu1 %v4632_v21, %s8196_s26  ;;  %v4633_v16 = vmul.f32 %v7934_v51, %v4629_v37 }
0x4fdc   :  { %v5093_v14 = vpop.permute.xlu1 %5092 }
0x4fdd   :  { %vm5095_vm14 = vcmp.eq.s32.totalorder %v8367_v17, %v5093_v14  ;;  %4638 = vrot.lane.b32.xlu0 %v4633_v16, %s8196_s26  ;;  %v7465_v16 = vld [vmem:[%s10178_s8] sm:$0xff]  }
0x4fde   :  { %v5097_v62 = vsel %vm5095_vm14, 1.0, %v8193_v1 }
0x4fdf   :  { %v5098_v53 = vpack.c.bf16 %v5097_v62, %v5096_v61 }
0x4fe1   :  { %7311 = vmatmul.mubr.msk.bf16.vlgmr.msra.gmra.mrb[72].mxu0 %vm5114_vm6, %v5098_v53  ;;  %vm4972_vm6 = vcmask 256000  }
0x4fe2   :  { %7324 = vmatprep.mubr.msk.bf16.mxu0 %vm8194_vm0, %v8193_v1  ;;  %7321 = vmatpush3.bf16.msra.mxu0 %v9710_v34 }
0x4fe3   :  { %7322 = vmatprep.subr.bf16.mxu0 %v8193_v1 }
0x4fe6   :  { %7323 = vmatpush3.bf16.msra.mxu0 %v9719_v50 }
0x4fe7   :  { %7336 = vmatprep.subr.bf16.mxu0 %v8193_v1 }
0x4fe9   :  { %7325 = vmatmul.mubr.bf16.vlgmr.msra.gmra.mrb[76].mxu0 %v8195_v31 }
0x4fea   :  { %7337 = vmatpush3.bf16.msra.mxu0 %v9710_v34  ;;  %7340 = vmatprep.mubr.msk.bf16.mxu0 %vm8194_vm0, %v8193_v1 }
0x4feb   :  { %7338 = vmatprep.subr.bf16.mxu0 %v8193_v1 }
0x4fee   :  { %7339 = vmatpush3.bf16.msra.mxu0 %v9719_v50 }
0x4fef   :  { %7352 = vmatprep.subr.bf16.mxu0 %v8193_v1 }
0x504d   :  { %v4637_v46 = vpop.permute.xlu1 %4636 }
0x504e   :  { %v4642_v35 = vadd.f32 %v4637_v46, %v4622_v9  ;;  %v8089_v9 = vld [vmem:[#allocation7 + $0x8] sm:$0xff] }
0x504f   :  { %v4639_v17 = vpop.permute.xlu0 %4638  ;;  %v4767_v46 = vrot.slane %v8089_v9, %v8557_v6  ;;  %v4884_v59 = vrot.slane %v8089_v9, %v8613_v12 }
0x5050   :  { %7935 = vtanh.f32 %v4642_v35  ;;  %v4643_v36 = vadd.f32 %v4639_v17, %v4623_v44 }
0x5052   :  { %7937 = vtanh.f32 %v4643_v36 }
0x505a   :  { %v7936_v25 = vpop.eup %7935 }
0x505b   :  { %4648 = vrot.lane.b32.xlu1 %v7936_v25, %s8188_s25 }
0x505c   :  { %v7938_v23 = vpop.eup %7937 }
0x505d   :  { %4650 = vrot.lane.b32.xlu0 %v7938_v23, %s8188_s25  ;;  %v8090_v23 = vld [vmem:[#allocation7] sm:$0xff] }
0x505e   :  { %v5223_v18 = vrot.slane %v8090_v23, %v8613_v12 }
0x50b4   :  { %v5156_v39 = vpop.f32.mrb[72].mxu0 }
0x50b5   :  { %v7312_v55 = vpop.f32.mrb[73].mxu0 }
0x50b6   :  { %v5159_v8 = vpop.f32.mrb[74].mxu0 }
0x50b7   :  { %v5169_v56 = vpack.c.bf16 %v5159_v8, %v5156_v39  ;;  %v7313_v54 = vpop.f32.mrb[75].mxu0 }
0x50b8   :  { %v4892_v54 = vrot.slane %v4884_v59, %v9529_v52 }
0x50bc   :  { %v5272_v14 = vpop.f32.mrb[76].mxu0 }
0x50bd   :  { %v7326_v61 = vpop.f32.mrb[77].mxu0  ;;  %v5279_v55 = vrot.slane %v5272_v14, 1 }
0x50be   :  { %v5275_v62 = vpop.f32.mrb[78].mxu0 }
0x50bf   :  { %v7327_v53 = vpop.f32.mrb[79].mxu0 }
0x50cd   :  { %v4649_v28 = vpop.permute.xlu1 %4648 }
0x50ce   :  { %v4654_v29 = vmul.f32 %v7932_v43, %v4649_v28 }
0x50cf   :  { %v4651_v58 = vpop.permute.xlu0 %4650 }
0x50d0   :  { %v4661_v7 = vrot.slane %v4654_v29, %v8326_v3  ;;  %v4655_v27 = vmul.f32 %v7934_v51, %v4651_v58 }
0x50d2   :  { %v9693_v0 = vsel %vm685_vm12, %v4661_v7, %v9632_v24  ;;  %v4665_v57 = vrot.slane %v4655_v27, %v8326_v3 }
0x50d3   :  { %v4682_v45 = vrot.slane %v9693_v0, %v9529_v52 }
0x50d4   :  { %v9702_v22 = vsel %vm685_vm12, %v4665_v57, %v9639_v32  ;;  %v4893_v57 = vcombine.high %v4892_v54, %v4892_v54 }
0x50d5   :  { %v4683_v63 = vcombine.high %v4682_v45, %v4682_v45  ;;  %v4690_v11 = vrot.slane %v4682_v45, %v9529_v52  ;;  %v4705_v48 = vrot.slane %v9702_v22, %v9529_v52 }
0x50d7   :  { %v4697_v60 = vrot.slane %v4683_v63, %v9529_v52  ;;  %v4698_v24 = vcombine.high %v4690_v11, %v4690_v11  ;;  %v4706_v41 = vcombine.high %v4705_v48, %v4705_v48  ;;  %v4713_v26 = vrot.slane %v4705_v48, %v9529_v52 }
0x50d9   :  { %v4722_v42 = vcombine.low %v4690_v11, %v4697_v60  ;;  %v4720_v32 = vrot.slane %v4706_v41, %v9529_v52  ;;  %v4721_v13 = vcombine.high %v4713_v26, %v4713_v26  ;;  %v4723_v10 = vcombine.low %v4698_v24, %v4713_v26 }
0x50da   :  { %v9767_v24 = vrot.slane %v4892_v54, %v9529_v52  ;;  %v9770_v41 = vrot.slane %v4893_v57, %v9529_v52 }
0x50db   :  { %v4731_v30 = vrot.slane %v4722_v42, %v9529_v52  ;;  %v4724_v40 = vcombine.low %v4720_v32, %v4721_v13  ;;  %v4738_v49 = vrot.slane %v4723_v10, %v9529_v52 }
0x50dc   :  { %v9778_v13 = vcombine.high %v9767_v24, %v9767_v24 }
0x50dd   :  { %v4745_v20 = vrot.slane %v4724_v40, %v9529_v52  ;;  %v4746_v43 = vcombine.low %v4731_v30, %v4738_v49 }
0x50df   :  { %v4753_v47 = vrot.slane %v4746_v43, %v9529_v52  ;;  %v4760_v21 = vrot.slane %v4745_v20, %v9529_v52 }
0x50e1   :  { %v4761_v51 = vcombine.low %v4753_v47, %v4760_v21 }
0x50e3   :  { %v4763_v37 = vpack.c.bf16 %v4761_v51, %v4761_v51 }
0x50e5   :  { %4769 = vrot.lane.b32.xlu1 %v4763_v37, %s8196_s26 }
0x5157   :  { %v4770_v31 = vpop.permute.xlu1 %4769 }
0x5158   :  { %7301 = vmatmul.mubr.msk.bf16.vlgmr.msra.gmra.mrb[76].mxu1 %vm331_vm9, %v4770_v31 }
0x5159   :  { %7315 = vmatpush3.bf16.msra.mxu1 %v7465_v16  ;;  %7316 = vmatprep.mubr.msk.bf16.mxu1 %vm8194_vm0, %v8193_v1 }
0x515a   :  { %7328 = vmatprep.subr.bf16.mxu1 %v8193_v1 }
0x5160   :  { %7317 = vmatmul.mubr.msk.bf16.vlgmr.msra.gmra.mrb[80].mxu1 %vm268_vm7, %v5169_v56 }
0x5161   :  { %7329 = vmatpush3.bf16.msra.mxu1 %v9710_v34  ;;  %7332 = vmatprep.mubr.msk.bf16.mxu1 %vm8194_vm0, %v8193_v1 }
0x5162   :  { %7330 = vmatprep.subr.bf16.mxu1 %v8193_v1 }
0x5165   :  { %7331 = vmatpush3.bf16.msra.mxu1 %v9719_v50 }
0x5166   :  { %7344 = vmatprep.subr.bf16.mxu1 %v8193_v1 }
0x522b   :  { %v4820_v35 = vpop.f32.mrb[76].mxu1 }
0x522c   :  { %v4821_v44 = vadd.f32 %v4820_v35, %v4767_v46  ;;  %v7302_v17 = vpop.f32.mrb[77].mxu1 }
0x522d   :  { %v4823_v36 = vpop.f32.mrb[78].mxu1 }
0x522e   :  { %7939 = vtanh.f32 %v4821_v44  ;;  %v7303_v25 = vpop.f32.mrb[79].mxu1 }
0x5233   :  { %v5213_v39 = vpop.f32.mrb[80].mxu1 }
0x5234   :  { %v9753_v8 = vadd.f32 %v5223_v18, %v5213_v39  ;;  %v7318_v56 = vpop.f32.mrb[81].mxu1 }
0x5235   :  { %v5216_v28 = vpop.f32.mrb[82].mxu1 }
0x5236   :  { %v9756_v29 = vadd.f32 %v5223_v18, %v5216_v28  ;;  %v7319_v7 = vpop.f32.mrb[83].mxu1  ;;  %v5282_v58 = vadd.f32 %v5272_v14, %v9753_v8 }
0x5238   :  { %v7940_v27 = vpop.eup %7939  ;;  %7941 = vtanh.f32 %v5282_v58  ;;  %v5283_v45 = vadd.f32 %v5279_v55, %v9756_v29  ;;  %v6820_v61 = vmul.f32 -1.442695, %v5282_v58 }
0x5239   :  { %v4828_v63 = vcombine.high %v7940_v27, %v7940_v27  ;;  %v9761_v11 = vrot.slane %v7940_v27, %v9529_v52 }
0x523a   :  { %7943 = vtanh.f32 %v5283_v45  ;;  %v6821_v62 = vmul.f32 -1.442695, %v5283_v45 }
0x523b   :  { %v4842_v48 = vrot.slane %v4828_v63, %v9529_v52  ;;  %v4843_v60 = vcombine.high %v9761_v11, %v9761_v11  ;;  %7945 = vpow2.f32 %v6820_v61 }
0x523c   :  { %7947 = vpow2.f32 %v6821_v62 }
0x523d   :  { %v9773_v26 = vrot.slane %v4843_v60, %v9529_v52  ;;  %v4844_v42 = vcombine.high %v4842_v48, %v4842_v48  ;;  %v4858_v32 = vrot.slane %v4842_v48, %v9529_v52 }
0x523f   :  { %v4872_v10 = vrot.slane %v4844_v42, %v9529_v52  ;;  %v4874_v30 = vcombine.high %v9773_v26, %v9773_v26  ;;  %v4916_v40 = vmul.f32 %v9770_v41, %v4858_v32 }
0x5241   :  { %v4915_v49 = vmul.f32 %v9767_v24, %v4874_v30  ;;  %v4917_v20 = vmul.f32 %v9778_v13, %v4872_v10 }
0x5242   :  { %v7942_v43 = vpop.eup %7941 }
0x5243   :  { %5302 = vrot.lane.b32.xlu1 %v7942_v43, %s8188_s25  ;;  %v4947_v47 = vcombine.low %v4915_v49, %v4916_v40  ;;  %v4961_v37 = vrot.slane %v4917_v20, %v9529_v52 }
0x5244   :  { %v7944_v21 = vpop.eup %7943 }
0x5245   :  { %5304 = vrot.lane.b32.xlu0 %v7944_v21, %s8188_s25  ;;  %v4954_v51 = vrot.slane %v4947_v47, %v9529_v52  ;;  %v7946_v53 = vpop.eup %7945 }
0x5246   :  { %v7948_v9 = vpop.eup %7947  ;;  %v5290_v46 = vadd.f32 1.0, %v7946_v53 }
0x5247   :  { %v4962_v16 = vcombine.low %v4954_v51, %v4961_v37  ;;  %v5291_v35 = vadd.f32 1.0, %v7948_v9 }
0x5248   :  { %7949 = vrcp.f32 %v5290_v46 }
0x5249   :  { %v4969_v31 = vrot.slane %v4962_v16, %v9529_v52  ;;  %7951 = vrcp.f32 %v5291_v35 }
0x524b   :  { %v9792_v14 = vsel %vm4972_vm6, %v4969_v31, 0.0 }
0x5252   :  { %v7950_v44 = vpop.eup %7949 }
0x5253   :  { %v7952_v25 = vpop.eup %7951  ;;  %v5298_v59 = vmul.f32 0.0, %v7950_v44 }
0x5254   :  { %v5299_v56 = vmul.f32 0.0, %v7952_v25 }
0x52b5   :  { %v5303_v17 = vpop.permute.xlu1 %5302 }
0x52b6   :  { %v5308_v36 = vmul.f32 %v7950_v44, %v5303_v17 }
0x52b7   :  { %v5305_v23 = vpop.permute.xlu0 %5304 }
0x52b8   :  { %v5309_v18 = vmul.f32 %v7952_v25, %v5305_v23  ;;  %5312 = vrot.lane.b32.xlu1 %v5308_v36, %s8196_s26 }
0x52ba   :  { %5314 = vrot.lane.b32.xlu0 %v5309_v18, %s8196_s26 }
0x532a   :  { %v5313_v39 = vpop.permute.xlu1 %5312 }
0x532b   :  { %v9796_v55 = vadd.f32 %v5313_v39, %v5298_v59 }
0x532c   :  { %v5315_v54 = vpop.permute.xlu0 %5314 }
0x532d   :  { %7953 = vtanh.f32 %v9796_v55  ;;  %v5319_v28 = vadd.f32 %v5315_v54, %v5299_v56  ;;  %v5418_v54 = vrot.slane %v9796_v55, 7 }
0x532f   :  { %7955 = vtanh.f32 %v5319_v28  ;;  %v5419_v39 = vrot.slane %v5319_v28, 7 }
0x5337   :  { %v7954_v7 = vpop.eup %7953 }
0x5338   :  { %5324 = vrot.lane.b32.xlu1 %v7954_v7, %s8188_s25 }
0x5339   :  { %v7956_v58 = vpop.eup %7955 }
0x533a   :  { %5326 = vrot.lane.b32.xlu0 %v7956_v58, %s8188_s25 }
0x53aa   :  { %v5325_v27 = vpop.permute.xlu1 %5324 }
0x53ab   :  { %v9801_v45 = vmul.f32 %v7950_v44, %v5325_v27 }
0x53ac   :  { %v5327_v57 = vpop.permute.xlu0 %5326 }
0x53ad   :  { %v9803_v63 = vmul.f32 %v7952_v25, %v5327_v57  ;;  %v5342_v48 = vpack.c.bf16 %v9801_v45, %v9801_v45 }
0x53af   :  { %v5343_v60 = vpack.c.bf16 %v9803_v63, %v9803_v63  ;;  %v5346_v32 = vunpack.c.l.b16 %v5342_v48  ;;  %v5339_v55 = vrot.slane %v9803_v63, %v8326_v3 }
0x53b1   :  { %v5347_v42 = vunpack.c.l.b16 %v5343_v60 }
0x53b3   :  { %v5348_v10 = vrot.slane %v5347_v42, 7 }
0x53b5   :  { %v5349_v30 = vsel %vm449_vm8, %v5348_v10, %v5346_v32  ;;  %v5335_v10 = vrot.slane %v9801_v45, %v8326_v3 }
0x53b6   :  { %v5350_v40 = vpack.c.b16 %v5349_v30, %v5349_v30 }
0x53b8   :  { %5351 = vrot.lane.b32.xlu0 %v5350_v40, %s8196_s26 }
0x542a   :  { %v5352_v49 = vpop.permute.xlu0 %5351 }
0x542b   :  { %7333 = vmatmul.mubr.msk.bf16.vlgmr.msra.gmra.mrb[84].mxu1 %vm331_vm9, %v5352_v49  ;;  %v5341_v49 = vsel %vm429_vm11, %v5339_v55, 0.0 }
0x542c   :  { %7345 = vmatpush3.bf16.msra.mxu1 %v9710_v34  ;;  %7348 = vmatprep.mubr.msk.bf16.mxu1 %vm8194_vm0, %v8193_v1 }
0x542d   :  { %7346 = vmatprep.subr.bf16.mxu1 %v8193_v1 }
0x5430   :  { %7347 = vmatpush3.bf16.msra.mxu1 %v9719_v50 }
0x5431   :  { %7360 = vmatprep.subr.bf16.mxu1 %v8193_v1 }
0x54fe   :  { %v5390_v20 = vpop.f32.mrb[84].mxu1 }
0x54ff   :  { %v5397_v43 = vrot.slane %v5390_v20, 7  ;;  %v5401_v47 = vadd.f32 %v5390_v20, %v9756_v29  ;;  %v7334_v21 = vpop.f32.mrb[85].mxu1 }
0x5500   :  { %v5393_v51 = vpop.f32.mrb[86].mxu1 }
0x5501   :  { %v5400_v37 = vadd.f32 %v5397_v43, %v9753_v8  ;;  %7957 = vtanh.f32 %v5401_v47  ;;  %v7335_v16 = vpop.f32.mrb[87].mxu1  ;;  %v6824_v62 = vmul.f32 -1.442695, %v5401_v47  ;;  %v5340_v51 = vsel %vm429_vm11, %v5335_v10, 0.0 }
0x5502   :  { %vm5059_vm11 = vcmask 1043200  }
0x5503   :  { %7959 = vtanh.f32 %v5400_v37  ;;  %v6823_v53 = vmul.f32 -1.442695, %v5400_v37 }
0x5504   :  { %7961 = vpow2.f32 %v6824_v62 }
0x5505   :  { %7963 = vpow2.f32 %v6823_v53 }
0x550b   :  { %v7958_v31 = vpop.eup %7957 }
0x550c   :  { %5428 = vrot.lane.b32.xlu0 %v7958_v31, %s8188_s25 }
0x550d   :  { %v7960_v61 = vpop.eup %7959 }
0x550e   :  { %5426 = vrot.lane.b32.xlu1 %v7960_v61, %s8188_s25  ;;  %v7962_v9 = vpop.eup %7961 }
0x550f   :  { %v7964_v46 = vpop.eup %7963  ;;  %v5409_v35 = vadd.f32 1.0, %v7962_v9 }
0x5510   :  { %v5408_v44 = vadd.f32 1.0, %v7964_v46 }
0x5511   :  { %7965 = vrcp.f32 %v5409_v35 }
0x5512   :  { %7967 = vrcp.f32 %v5408_v44 }
0x551b   :  { %v7966_v17 = vpop.eup %7965 }
0x551c   :  { %v7968_v23 = vpop.eup %7967  ;;  %v5423_v56 = vmul.f32 %v7966_v17, %v5419_v39 }
0x551d   :  { %v5422_v27 = vmul.f32 %v7968_v23, %v5418_v54 }
0x557e   :  { %v5429_v36 = vpop.permute.xlu0 %5428 }
0x557f   :  { %v5433_v25 = vmul.f32 %v7966_v17, %v5429_v36 }
0x5580   :  { %v5427_v18 = vpop.permute.xlu1 %5426 }
0x5581   :  { %5438 = vrot.lane.b32.xlu0 %v5433_v25, %s8196_s26  ;;  %v5432_v59 = vmul.f32 %v7968_v23, %v5427_v18 }
0x5583   :  { %5436 = vrot.lane.b32.xlu1 %v5432_v59, %s8196_s26 }
0x55f3   :  { %v5439_v7 = vpop.permute.xlu0 %5438 }
0x55f4   :  { %v9825_v58 = vadd.f32 %v5439_v7, %v5423_v56 }
0x55f5   :  { %v5437_v57 = vpop.permute.xlu1 %5436 }
0x55f6   :  { %7969 = vtanh.f32 %v9825_v58  ;;  %v9828_v48 = vadd.f32 %v5437_v57, %v5422_v27 }
0x55f8   :  { %7971 = vtanh.f32 %v9828_v48 }
0x5600   :  { %v7970_v60 = vpop.eup %7969 }
0x5601   :  { %5450 = vrot.lane.b32.xlu0 %v7970_v60, %s8188_s25 }
0x5602   :  { %v7972_v42 = vpop.eup %7971 }
0x5603   :  { %5448 = vrot.lane.b32.xlu1 %v7972_v42, %s8188_s25 }
0x5673   :  { %v5451_v28 = vpop.permute.xlu0 %5450 }
0x5674   :  { %v5455_v32 = vmul.f32 %v7966_v17, %v5451_v28 }
0x5675   :  { %v5449_v40 = vpop.permute.xlu1 %5448 }
0x5676   :  { %v5463_v30 = vrot.slane %v5455_v32, %v8336_v5  ;;  %v5454_v20 = vmul.f32 %v7968_v23, %v5449_v40  ;;  %v5467_v47 = vpack.c.bf16 %v5455_v32, %v5455_v32  ;;  %v5544_v40 = vrot.slane %v9825_v58, 7 }
0x5678   :  { %v9842_v43 = vsel %vm557_vm10, %v5463_v30, %v5341_v49  ;;  %v5459_v21 = vrot.slane %v5454_v20, %v8336_v5  ;;  %v5466_v63 = vpack.c.bf16 %v5454_v20, %v5454_v20  ;;  %v5471_v16 = vunpack.c.l.b16 %v5467_v47 }
0x5679   :  { %v5543_v30 = vrot.slane %v9828_v48, 7 }
0x567a   :  { %v9849_v45 = vsel %vm557_vm10, %v5459_v21, %v5340_v51  ;;  %v5470_v37 = vunpack.c.l.b16 %v5466_v63  ;;  %vm4991_vm10 = vcmask 17408  }
0x567c   :  { %v5472_v31 = vrot.slane %v5470_v37, 1 }
0x567e   :  { %v5473_v61 = vsel %vm449_vm8, %v5471_v16, %v5472_v31 }
0x567f   :  { %v5474_v62 = vpack.c.b16 %v5473_v61, %v5473_v61 }
0x5681   :  { %5475 = vrot.lane.b32.xlu1 %v5474_v62, %s8196_s26 }
0x56f3   :  { %v5476_v53 = vpop.permute.xlu1 %5475 }
0x56f4   :  { %7341 = vmatmul.mubr.msk.bf16.vlgmr.msra.gmra.mrb[80].mxu0 %vm331_vm9, %v5476_v53 }
0x56f5   :  { %7353 = vmatpush3.bf16.msra.mxu0 %v9710_v34  ;;  %7356 = vmatprep.mubr.msk.bf16.mxu0 %vm8194_vm0, %v8193_v1 }
0x56f6   :  { %7354 = vmatprep.subr.bf16.mxu0 %v8193_v1 }
0x56f9   :  { %7355 = vmatpush3.bf16.msra.mxu0 %v9719_v50 }
0x56fa   :  { %7368 = vmatprep.subr.bf16.mxu0 %v8193_v1 }
0x57c7   :  { %v5514_v9 = vpop.f32.mrb[80].mxu0 }
0x57c8   :  { %v5521_v46 = vrot.slane %v5514_v9, 6  ;;  %v5522_v35 = vrot.slane %v5514_v9, 7  ;;  %v7342_v44 = vpop.f32.mrb[81].mxu0 }
0x57c9   :  { %v5517_v17 = vpop.f32.mrb[82].mxu0 }
0x57ca   :  { %v5525_v36 = vadd.f32 %v5521_v46, %v9753_v8  ;;  %v5526_v25 = vadd.f32 %v5522_v35, %v9756_v29  ;;  %v7343_v23 = vpop.f32.mrb[83].mxu0 }
0x57cc   :  { %7973 = vtanh.f32 %v5525_v36  ;;  %v6826_v39 = vmul.f32 -1.442695, %v5525_v36  ;;  %v6827_v56 = vmul.f32 -1.442695, %v5526_v25 }
0x57cd   :  { %7975 = vtanh.f32 %v5526_v25 }
0x57ce   :  { %7977 = vpow2.f32 %v6826_v39 }
0x57cf   :  { %7979 = vpow2.f32 %v6827_v56 }
0x57d6   :  { %v7974_v18 = vpop.eup %7973 }
0x57d7   :  { %v7976_v59 = vpop.eup %7975  ;;  %5551 = vrot.lane.b32.xlu0 %v7974_v18, %s8188_s25 }
0x57d8   :  { %5553 = vrot.lane.b32.xlu1 %v7976_v59, %s8188_s25  ;;  %v7978_v54 = vpop.eup %7977 }
0x57d9   :  { %v7980_v7 = vpop.eup %7979  ;;  %v5533_v27 = vadd.f32 1.0, %v7978_v54 }
0x57da   :  { %v5534_v57 = vadd.f32 1.0, %v7980_v7 }
0x57db   :  { %7981 = vrcp.f32 %v5533_v27 }
0x57dc   :  { %7983 = vrcp.f32 %v5534_v57 }
0x57e5   :  { %v7982_v60 = vpop.eup %7981 }
0x57e6   :  { %v7984_v55 = vpop.eup %7983  ;;  %v5547_v49 = vmul.f32 %v7982_v60, %v5543_v30 }
0x57e7   :  { %v5548_v20 = vmul.f32 %v7984_v55, %v5544_v40 }
0x5849   :  { %v5552_v42 = vpop.permute.xlu0 %5551 }
0x584a   :  { %v5554_v28 = vpop.permute.xlu1 %5553  ;;  %v5557_v32 = vmul.f32 %v7982_v60, %v5552_v42 }
0x584b   :  { %v5558_v10 = vmul.f32 %v7984_v55, %v5554_v28 }
0x584c   :  { %5561 = vrot.lane.b32.xlu0 %v5557_v32, %s8196_s26 }
0x584d   :  { %5563 = vrot.lane.b32.xlu1 %v5558_v10, %s8196_s26 }
0x58be   :  { %v5562_v47 = vpop.permute.xlu0 %5561 }
0x58bf   :  { %v5564_v21 = vpop.permute.xlu1 %5563  ;;  %v9868_v63 = vadd.f32 %v5562_v47, %v5547_v49 }
0x58c0   :  { %v9870_v51 = vadd.f32 %v5564_v21, %v5548_v20 }
0x58c1   :  { %7985 = vtanh.f32 %v9868_v63 }
0x58c2   :  { %7987 = vtanh.f32 %v9870_v51 }
0x58cb   :  { %v7986_v37 = vpop.eup %7985 }
0x58cc   :  { %v7988_v16 = vpop.eup %7987  ;;  %5573 = vrot.lane.b32.xlu0 %v7986_v37, %s8188_s25 }
0x58cd   :  { %5575 = vrot.lane.b32.xlu1 %v7988_v16, %s8188_s25 }
0x593e   :  { %v5574_v48 = vpop.permute.xlu0 %5573 }
0x593f   :  { %v5576_v58 = vpop.permute.xlu1 %5575  ;;  %v5579_v31 = vmul.f32 %v7982_v60, %v5574_v48  ;;  %v5669_v48 = vrot.slane %v9868_v63, 7 }
0x5940   :  { %v5580_v61 = vmul.f32 %v7984_v55, %v5576_v58  ;;  %v5670_v58 = vrot.slane %v9870_v51, 7 }
0x5941   :  { %v5584_v62 = vrot.slane %v5579_v31, %v8329_v4  ;;  %v5591_v53 = vpack.c.bf16 %v5579_v31, %v5579_v31 }
0x5942   :  { %v5588_v9 = vrot.slane %v5580_v61, %v8329_v4  ;;  %v5592_v46 = vpack.c.bf16 %v5580_v61, %v5580_v61 }
0x5943   :  { %v9881_v35 = vsel %vm685_vm12, %v5584_v62, %v9849_v45  ;;  %v5595_v44 = vunpack.c.l.b16 %v5591_v53 }
0x5944   :  { %v9886_v17 = vsel %vm685_vm12, %v5588_v9, %v9842_v43  ;;  %v5596_v36 = vunpack.c.l.b16 %v5592_v46  ;;  %vm10186_vm12 = vcmask 1048320  }
0x5945   :  { %v5597_v25 = vrot.slane %v5595_v44, 2 }
0x5946   :  { %v5598_v23 = vrot.slane %v5596_v36, 1 }
0x5948   :  { %v5599_v18 = vsel %vm449_vm8, %v5598_v23, %v5597_v25 }
0x5949   :  { %v5600_v59 = vpack.c.b16 %v5599_v18, %v5599_v18 }
0x594b   :  { %5601 = vrot.lane.b32.xlu0 %v5600_v59, %s8196_s26 }
0x59bd   :  { %v5602_v4 = vpop.permute.xlu0 %5601 }
0x59be   :  { %7349 = vmatmul.mubr.msk.bf16.vlgmr.msra.gmra.mrb[88].mxu1 %vm331_vm9, %v5602_v4 }
0x59bf   :  { %7361 = vmatpush3.bf16.msra.mxu1 %v9710_v34  ;;  %7364 = vmatprep.mubr.msk.bf16.mxu1 %vm8194_vm0, %v8193_v1 }
0x59c0   :  { %7362 = vmatprep.subr.bf16.mxu1 %v8193_v1 }
0x59c3   :  { %7363 = vmatpush3.bf16.msra.mxu1 %v9719_v50 }
0x59c4   :  { %7376 = vmatprep.subr.bf16.mxu1 %v8193_v1 }
0x5a91   :  { %v5640_v43 = vpop.f32.mrb[88].mxu1 }
0x5a92   :  { %v5647_v45 = vrot.slane %v5640_v43, 5  ;;  %v5648_v39 = vrot.slane %v5640_v43, 6  ;;  %v7350_v56 = vpop.f32.mrb[89].mxu1 }
0x5a93   :  { %v5643_v54 = vpop.f32.mrb[90].mxu1 }
0x5a94   :  { %v5651_v7 = vadd.f32 %v5647_v45, %v9753_v8  ;;  %v5652_v27 = vadd.f32 %v5648_v39, %v9756_v29  ;;  %v7351_v57 = vpop.f32.mrb[91].mxu1 }
0x5a96   :  { %7989 = vtanh.f32 %v5651_v7  ;;  %v6829_v55 = vmul.f32 -1.442695, %v5651_v7  ;;  %v6830_v28 = vmul.f32 -1.442695, %v5652_v27 }
0x5a97   :  { %7991 = vtanh.f32 %v5652_v27 }
0x5a98   :  { %7993 = vpow2.f32 %v6829_v55 }
0x5a99   :  { %7995 = vpow2.f32 %v6830_v28 }
0x5aa0   :  { %v7990_v60 = vpop.eup %7989 }
0x5aa1   :  { %v7992_v42 = vpop.eup %7991  ;;  %5677 = vrot.lane.b32.xlu1 %v7990_v60, %s8188_s25 }
0x5aa2   :  { %5679 = vrot.lane.b32.xlu0 %v7992_v42, %s8188_s25  ;;  %v7994_v32 = vpop.eup %7993 }
0x5aa3   :  { %v7996_v10 = vpop.eup %7995  ;;  %v5659_v30 = vadd.f32 1.0, %v7994_v32 }
0x5aa4   :  { %v5660_v40 = vadd.f32 1.0, %v7996_v10 }
0x5aa5   :  { %7997 = vrcp.f32 %v5659_v30 }
0x5aa6   :  { %7999 = vrcp.f32 %v5660_v40 }
0x5aaf   :  { %v7998_v49 = vpop.eup %7997 }
0x5ab0   :  { %v8000_v47 = vpop.eup %7999  ;;  %v5673_v31 = vmul.f32 %v7998_v49, %v5669_v48 }
0x5ab1   :  { %v5674_v61 = vmul.f32 %v8000_v47, %v5670_v58 }
0x5b13   :  { %v5678_v20 = vpop.permute.xlu1 %5677 }
0x5b14   :  { %v5680_v21 = vpop.permute.xlu0 %5679  ;;  %v5683_v37 = vmul.f32 %v7998_v49, %v5678_v20 }
0x5b15   :  { %v5684_v16 = vmul.f32 %v8000_v47, %v5680_v21 }
0x5b16   :  { %5687 = vrot.lane.b32.xlu1 %v5683_v37, %s8196_s26 }
0x5b17   :  { %5689 = vrot.lane.b32.xlu0 %v5684_v16, %s8196_s26 }
0x5b88   :  { %v5688_v62 = vpop.permute.xlu1 %5687 }
0x5b89   :  { %v5690_v53 = vpop.permute.xlu0 %5689  ;;  %v9905_v9 = vadd.f32 %v5688_v62, %v5673_v31 }
0x5b8a   :  { %v9907_v46 = vadd.f32 %v5690_v53, %v5674_v61 }
0x5b8b   :  { %8001 = vtanh.f32 %v9905_v9 }
0x5b8c   :  { %8003 = vtanh.f32 %v9907_v46 }
0x5b95   :  { %v8002_v44 = vpop.eup %8001 }
0x5b96   :  { %v8004_v36 = vpop.eup %8003  ;;  %5699 = vrot.lane.b32.xlu1 %v8002_v44, %s8188_s25 }
0x5b97   :  { %5701 = vrot.lane.b32.xlu0 %v8004_v36, %s8188_s25  ;;  %v5795_v36 = vrot.slane %v9905_v9, 7 }
0x5c08   :  { %v5700_v63 = vpop.permute.xlu1 %5699 }
0x5c09   :  { %v5702_v51 = vpop.permute.xlu0 %5701  ;;  %v5705_v25 = vmul.f32 %v7998_v49, %v5700_v63  ;;  %v5796_v63 = vrot.slane %v9907_v46, 7 }
0x5c0a   :  { %v5706_v23 = vmul.f32 %v8000_v47, %v5702_v51 }
0x5c0b   :  { %v5710_v18 = vrot.slane %v5705_v25, %v8557_v6  ;;  %v5717_v59 = vpack.c.bf16 %v5705_v25, %v5705_v25 }
0x5c0c   :  { %v5714_v4 = vrot.slane %v5706_v23, %v8557_v6  ;;  %v5718_v43 = vpack.c.bf16 %v5706_v23, %v5706_v23 }
0x5c0d   :  { %v9918_v45 = vsel %vm814_vm13, %v5710_v18, %v9881_v35  ;;  %v5721_v39 = vunpack.c.l.b16 %v5717_v59 }
0x5c0e   :  { %v9923_v56 = vsel %vm814_vm13, %v5714_v4, %v9886_v17  ;;  %v5722_v54 = vunpack.c.l.b16 %v5718_v43  ;;  %vm10187_vm13 = vmmov %vm10186_vm12 }
0x5c0f   :  { %v5723_v7 = vrot.slane %v5721_v39, 3 }
0x5c10   :  { %v5724_v27 = vrot.slane %v5722_v54, 2 }
0x5c12   :  { %v5725_v57 = vsel %vm449_vm8, %v5724_v27, %v5723_v7 }
0x5c13   :  { %v5726_v60 = vpack.c.b16 %v5725_v57, %v5725_v57 }
0x5c15   :  { %5727 = vrot.lane.b32.xlu1 %v5726_v60, %s8196_s26 }
0x5c87   :  { %v5728_v6 = vpop.permute.xlu1 %5727 }
0x5c88   :  { %7357 = vmatmul.mubr.msk.bf16.vlgmr.msra.gmra.mrb[84].mxu0 %vm331_vm9, %v5728_v6 }
0x5c89   :  { %7369 = vmatpush3.bf16.msra.mxu0 %v9710_v34  ;;  %7372 = vmatprep.mubr.msk.bf16.mxu0 %vm8194_vm0, %v8193_v1 }
0x5c8a   :  { %7370 = vmatprep.subr.bf16.mxu0 %v8193_v1 }
0x5c8d   :  { %7371 = vmatpush3.bf16.msra.mxu0 %v9719_v50 }
0x5c8e   :  { %7384 = vmatprep.subr.bf16.mxu0 %v8193_v1 }
0x5d5b   :  { %v5766_v35 = vpop.f32.mrb[84].mxu0 }
0x5d5c   :  { %v5773_v17 = vrot.slane %v5766_v35, 4  ;;  %v5774_v42 = vrot.slane %v5766_v35, 5  ;;  %v7358_v55 = vpop.f32.mrb[85].mxu0 }
0x5d5d   :  { %v5769_v28 = vpop.f32.mrb[86].mxu0 }
0x5d5e   :  { %v5777_v32 = vadd.f32 %v5773_v17, %v9753_v8  ;;  %v5778_v10 = vadd.f32 %v5774_v42, %v9756_v29  ;;  %v7359_v30 = vpop.f32.mrb[87].mxu0 }
0x5d60   :  { %8005 = vtanh.f32 %v5777_v32  ;;  %v6832_v20 = vmul.f32 -1.442695, %v5777_v32  ;;  %v6833_v47 = vmul.f32 -1.442695, %v5778_v10 }
0x5d61   :  { %8007 = vtanh.f32 %v5778_v10 }
0x5d62   :  { %8009 = vpow2.f32 %v6832_v20 }
0x5d63   :  { %8011 = vpow2.f32 %v6833_v47 }
0x5d6a   :  { %v8006_v40 = vpop.eup %8005 }
0x5d6b   :  { %v8008_v49 = vpop.eup %8007  ;;  %5803 = vrot.lane.b32.xlu0 %v8006_v40, %s8188_s25 }
0x5d6c   :  { %5805 = vrot.lane.b32.xlu1 %v8008_v49, %s8188_s25  ;;  %v8010_v21 = vpop.eup %8009 }
0x5d6d   :  { %v8012_v37 = vpop.eup %8011  ;;  %v5785_v16 = vadd.f32 1.0, %v8010_v21 }
0x5d6e   :  { %v5786_v48 = vadd.f32 1.0, %v8012_v37 }
0x5d6f   :  { %8013 = vrcp.f32 %v5785_v16 }
0x5d70   :  { %8015 = vrcp.f32 %v5786_v48 }
0x5d79   :  { %v8014_v58 = vpop.eup %8013 }
0x5d7a   :  { %v8016_v61 = vpop.eup %8015  ;;  %v5799_v51 = vmul.f32 %v8014_v58, %v5795_v36 }
0x5d7b   :  { %v5800_v25 = vmul.f32 %v8016_v61, %v5796_v63 }
0x5ddd   :  { %v5804_v31 = vpop.permute.xlu0 %5803 }
0x5dde   :  { %v5806_v62 = vpop.permute.xlu1 %5805  ;;  %v5809_v53 = vmul.f32 %v8014_v58, %v5804_v31 }
0x5ddf   :  { %v5810_v44 = vmul.f32 %v8016_v61, %v5806_v62 }
0x5de0   :  { %5813 = vrot.lane.b32.xlu0 %v5809_v53, %s8196_s26 }
0x5de1   :  { %5815 = vrot.lane.b32.xlu1 %v5810_v44, %s8196_s26 }
0x5e52   :  { %v5814_v23 = vpop.permute.xlu0 %5813 }
0x5e53   :  { %v5816_v18 = vpop.permute.xlu1 %5815  ;;  %v9942_v59 = vadd.f32 %v5814_v23, %v5799_v51 }
0x5e54   :  { %v9944_v4 = vadd.f32 %v5816_v18, %v5800_v25 }
0x5e55   :  { %8017 = vtanh.f32 %v9942_v59  ;;  %v5921_v23 = vrot.slane %v9942_v59, 7 }
0x5e56   :  { %8019 = vtanh.f32 %v9944_v4  ;;  %v5922_v18 = vrot.slane %v9944_v4, 7 }
0x5e5f   :  { %v8018_v43 = vpop.eup %8017 }
0x5e60   :  { %v8020_v39 = vpop.eup %8019  ;;  %5825 = vrot.lane.b32.xlu0 %v8018_v43, %s8188_s25 }
0x5e61   :  { %5827 = vrot.lane.b32.xlu1 %v8020_v39, %s8188_s25 }
0x5ed2   :  { %v5826_v9 = vpop.permute.xlu0 %5825 }
0x5ed3   :  { %v5828_v46 = vpop.permute.xlu1 %5827  ;;  %v5831_v54 = vmul.f32 %v8014_v58, %v5826_v9 }
0x5ed4   :  { %v5832_v7 = vmul.f32 %v8016_v61, %v5828_v46 }
0x5ed5   :  { %v5836_v27 = vrot.slane %v5831_v54, %v8613_v12  ;;  %v5843_v57 = vpack.c.bf16 %v5831_v54, %v5831_v54 }
0x5ed6   :  { %v5840_v60 = vrot.slane %v5832_v7, %v8613_v12  ;;  %v5844_v6 = vpack.c.bf16 %v5832_v7, %v5832_v7 }
0x5ed7   :  { %v9955_v35 = vsel %vm943_vm1, %v5836_v27, %v9918_v45  ;;  %v5847_v17 = vunpack.c.l.b16 %v5843_v57 }
0x5ed8   :  { %v9960_v42 = vsel %vm943_vm1, %v5840_v60, %v9923_v56  ;;  %v5848_v55 = vunpack.c.l.b16 %v5844_v6 }
0x5ed9   :  { %v5849_v28 = vrot.slane %v5847_v17, 4 }
0x5eda   :  { %v5850_v32 = vrot.slane %v5848_v55, 3 }
0x5edc   :  { %v5851_v10 = vsel %vm449_vm8, %v5850_v32, %v5849_v28 }
0x5edd   :  { %v5852_v30 = vpack.c.b16 %v5851_v10, %v5851_v10 }
0x5edf   :  { %5853 = vrot.lane.b32.xlu0 %v5852_v30, %s8196_s26 }
0x5f51   :  { %v5854_v12 = vpop.permute.xlu0 %5853 }
0x5f52   :  { %7365 = vmatmul.mubr.msk.bf16.vlgmr.msra.gmra.mrb[92].mxu1 %vm331_vm9, %v5854_v12 }
0x5f53   :  { %7377 = vmatpush3.bf16.msra.mxu1 %v9710_v34  ;;  %7380 = vmatprep.mubr.msk.bf16.mxu1 %vm8194_vm0, %v8193_v1 }
0x5f54   :  { %7378 = vmatprep.subr.bf16.mxu1 %v8193_v1 }
0x5f57   :  { %7379 = vmatpush3.bf16.msra.mxu1 %v9719_v50 }
0x5f58   :  { %7392 = vmatprep.subr.bf16.mxu1 %v8193_v1 }
0x6025   :  { %v5892_v45 = vpop.f32.mrb[92].mxu1 }
0x6026   :  { %v5899_v56 = vrot.slane %v5892_v45, 3  ;;  %v5900_v40 = vrot.slane %v5892_v45, 4  ;;  %v7366_v49 = vpop.f32.mrb[93].mxu1 }
0x6027   :  { %v5895_v20 = vpop.f32.mrb[94].mxu1 }
0x6028   :  { %v5903_v47 = vadd.f32 %v5899_v56, %v9753_v8  ;;  %v5904_v21 = vadd.f32 %v5900_v40, %v9756_v29  ;;  %v7367_v37 = vpop.f32.mrb[95].mxu1 }
0x602a   :  { %8021 = vtanh.f32 %v5903_v47  ;;  %v6835_v50 = vmul.f32 -1.442695, %v5903_v47  ;;  %v6836_v48 = vmul.f32 -1.442695, %v5904_v21 }
0x602b   :  { %8023 = vtanh.f32 %v5904_v21 }
0x602c   :  { %8025 = vpow2.f32 %v6835_v50 }
0x602d   :  { %8027 = vpow2.f32 %v6836_v48 }
0x6034   :  { %v8022_v34 = vpop.eup %8021 }
0x6035   :  { %v8024_v16 = vpop.eup %8023  ;;  %5929 = vrot.lane.b32.xlu1 %v8022_v34, %s8188_s25 }
0x6036   :  { %5931 = vrot.lane.b32.xlu0 %v8024_v16, %s8188_s25  ;;  %v8026_v58 = vpop.eup %8025 }
0x6037   :  { %v8028_v31 = vpop.eup %8027  ;;  %v5911_v61 = vadd.f32 1.0, %v8026_v58 }
0x6038   :  { %v5912_v62 = vadd.f32 1.0, %v8028_v31 }
0x6039   :  { %8029 = vrcp.f32 %v5911_v61 }
0x603a   :  { %8031 = vrcp.f32 %v5912_v62 }
0x6043   :  { %v8030_v53 = vpop.eup %8029 }
0x6044   :  { %v8032_v36 = vpop.eup %8031  ;;  %v5925_v43 = vmul.f32 %v8030_v53, %v5921_v23 }
0x6045   :  { %v5926_v39 = vmul.f32 %v8032_v36, %v5922_v18 }
0x60a7   :  { %v5930_v44 = vpop.permute.xlu1 %5929 }
0x60a8   :  { %v5932_v63 = vpop.permute.xlu0 %5931  ;;  %v5935_v51 = vmul.f32 %v8030_v53, %v5930_v44 }
0x60a9   :  { %v5936_v25 = vmul.f32 %v8032_v36, %v5932_v63 }
0x60aa   :  { %5939 = vrot.lane.b32.xlu1 %v5935_v51, %s8196_s26 }
0x60ab   :  { %5941 = vrot.lane.b32.xlu0 %v5936_v25, %s8196_s26 }
0x611c   :  { %v5940_v9 = vpop.permute.xlu1 %5939 }
0x611d   :  { %v5942_v46 = vpop.permute.xlu0 %5941  ;;  %v9979_v54 = vadd.f32 %v5940_v9, %v5925_v43 }
0x611e   :  { %v9981_v7 = vadd.f32 %v5942_v46, %v5926_v39 }
0x611f   :  { %8033 = vtanh.f32 %v9979_v54  ;;  %v6047_v9 = vrot.slane %v9979_v54, 7 }
0x6120   :  { %8035 = vtanh.f32 %v9981_v7  ;;  %v6048_v46 = vrot.slane %v9981_v7, 7 }
0x6129   :  { %v8034_v27 = vpop.eup %8033 }
0x612a   :  { %v8036_v57 = vpop.eup %8035  ;;  %5951 = vrot.lane.b32.xlu1 %v8034_v27, %s8188_s25 }
0x612b   :  { %5953 = vrot.lane.b32.xlu0 %v8036_v57, %s8188_s25 }
0x619c   :  { %v5952_v59 = vpop.permute.xlu1 %5951 }
0x619d   :  { %v5954_v4 = vpop.permute.xlu0 %5953  ;;  %v5957_v60 = vmul.f32 %v8030_v53, %v5952_v59 }
0x619e   :  { %v5958_v6 = vmul.f32 %v8032_v36, %v5954_v4 }
0x619f   :  { %v5962_v17 = vrot.slane %v5957_v60, %v8654_v33  ;;  %v5969_v55 = vpack.c.bf16 %v5957_v60, %v5957_v60 }
0x61a0   :  { %v5966_v28 = vrot.slane %v5958_v6, %v8654_v33  ;;  %v5970_v32 = vpack.c.bf16 %v5958_v6, %v5958_v6 }
0x61a1   :  { %v9992_v10 = vsel %vm1072_vm2, %v5962_v17, %v9955_v35  ;;  %v5973_v30 = vunpack.c.l.b16 %v5969_v55 }
0x61a2   :  { %v9997_v12 = vsel %vm1072_vm2, %v5966_v28, %v9960_v42  ;;  %v5974_v45 = vunpack.c.l.b16 %v5970_v32 }
0x61a3   :  { %v5975_v56 = vrot.slane %v5973_v30, 5 }
0x61a4   :  { %v5976_v40 = vrot.slane %v5974_v45, 4 }
0x61a6   :  { %v5977_v49 = vsel %vm449_vm8, %v5976_v40, %v5975_v56 }
0x61a7   :  { %v5978_v20 = vpack.c.b16 %v5977_v49, %v5977_v49 }
0x61a9   :  { %5979 = vrot.lane.b32.xlu1 %v5978_v20, %s8196_s26 }
0x621b   :  { %v5980_v47 = vpop.permute.xlu1 %5979 }
0x621c   :  { %7373 = vmatmul.mubr.msk.bf16.vlgmr.msra.gmra.mrb[88].mxu0 %vm331_vm9, %v5980_v47 }
0x621d   :  { %7388 = vmatprep.mubr.msk.bf16.mxu0 %vm8194_vm0, %v8193_v1 }
0x62ef   :  { %v6018_v35 = vpop.f32.mrb[88].mxu0 }
0x62f0   :  { %v6025_v21 = vrot.slane %v6018_v35, 2  ;;  %v6026_v37 = vrot.slane %v6018_v35, 3  ;;  %v7374_v34 = vpop.f32.mrb[89].mxu0 }
0x62f1   :  { %v6021_v42 = vpop.f32.mrb[90].mxu0 }
0x62f2   :  { %v6029_v16 = vadd.f32 %v6025_v21, %v9753_v8  ;;  %v6030_v50 = vadd.f32 %v6026_v37, %v9756_v29  ;;  %v7375_v48 = vpop.f32.mrb[91].mxu0 }
0x62f4   :  { %8037 = vtanh.f32 %v6029_v16  ;;  %v6838_v61 = vmul.f32 -1.442695, %v6029_v16  ;;  %v6839_v62 = vmul.f32 -1.442695, %v6030_v50 }
0x62f5   :  { %8039 = vtanh.f32 %v6030_v50 }
0x62f6   :  { %8041 = vpow2.f32 %v6838_v61 }
0x62f7   :  { %8043 = vpow2.f32 %v6839_v62 }
0x62fe   :  { %v8038_v58 = vpop.eup %8037 }
0x62ff   :  { %v8040_v31 = vpop.eup %8039  ;;  %6055 = vrot.lane.b32.xlu0 %v8038_v58, %s8188_s25 }
0x6300   :  { %6057 = vrot.lane.b32.xlu1 %v8040_v31, %s8188_s25  ;;  %v8042_v53 = vpop.eup %8041 }
0x6301   :  { %v8044_v44 = vpop.eup %8043  ;;  %v6037_v36 = vadd.f32 1.0, %v8042_v53 }
0x6302   :  { %v6038_v63 = vadd.f32 1.0, %v8044_v44 }
0x6303   :  { %8045 = vrcp.f32 %v6037_v36 }
0x6304   :  { %8047 = vrcp.f32 %v6038_v63 }
0x630d   :  { %v8046_v51 = vpop.eup %8045 }
0x630e   :  { %v8048_v23 = vpop.eup %8047  ;;  %v6051_v27 = vmul.f32 %v8046_v51, %v6047_v9 }
0x630f   :  { %v6052_v57 = vmul.f32 %v8048_v23, %v6048_v46 }
0x6371   :  { %v6056_v25 = vpop.permute.xlu0 %6055 }
0x6372   :  { %v6058_v18 = vpop.permute.xlu1 %6057  ;;  %v6061_v43 = vmul.f32 %v8046_v51, %v6056_v25 }
0x6373   :  { %v6062_v39 = vmul.f32 %v8048_v23, %v6058_v18 }
0x6374   :  { %6065 = vrot.lane.b32.xlu0 %v6061_v43, %s8196_s26 }
0x6375   :  { %6067 = vrot.lane.b32.xlu1 %v6062_v39, %s8196_s26 }
0x63e6   :  { %v6066_v59 = vpop.permute.xlu0 %6065 }
0x63e7   :  { %v6068_v4 = vpop.permute.xlu1 %6067  ;;  %v10012_v60 = vadd.f32 %v6066_v59, %v6051_v27 }
0x63e8   :  { %v10014_v6 = vadd.f32 %v6068_v4, %v6052_v57 }
0x63e9   :  { %8049 = vtanh.f32 %v10012_v60  ;;  %v6173_v27 = vrot.slane %v10012_v60, 7  ;;  %v4913_v60 = vmul.f32 %v9770_v41, %v9773_v26 }
0x63ea   :  { %8051 = vtanh.f32 %v10014_v6  ;;  %v6174_v57 = vrot.slane %v10014_v6, 7 }
0x63f3   :  { %v8050_v17 = vpop.eup %8049 }
0x63f4   :  { %v8052_v55 = vpop.eup %8051  ;;  %6077 = vrot.lane.b32.xlu0 %v8050_v17, %s8188_s25 }
0x63f5   :  { %6079 = vrot.lane.b32.xlu1 %v8052_v55, %s8188_s25 }
0x6466   :  { %v6078_v54 = vpop.permute.xlu0 %6077 }
0x6467   :  { %v6080_v7 = vpop.permute.xlu1 %6079  ;;  %v6083_v28 = vmul.f32 %v8046_v51, %v6078_v54 }
0x6468   :  { %v6084_v32 = vmul.f32 %v8048_v23, %v6080_v7 }
0x6469   :  { %v6088_v30 = vrot.slane %v6083_v28, %v8691_v15  ;;  %v6095_v45 = vpack.c.bf16 %v6083_v28, %v6083_v28 }
0x646a   :  { %v6092_v56 = vrot.slane %v6084_v32, %v8691_v15  ;;  %v6096_v40 = vpack.c.bf16 %v6084_v32, %v6084_v32 }
0x646b   :  { %v10025_v49 = vsel %vm1201_vm3, %v6088_v30, %v9992_v10  ;;  %v6099_v20 = vunpack.c.l.b16 %v6095_v45  ;;  %v4851_v30 = vrot.slane %v9761_v11, %v9529_v52  ;;  %v7468_v11 = vld [vmem:[#allocation5] sm:$0xff]  }
0x646c   :  { %v10030_v47 = vsel %vm1201_vm3, %v6092_v56, %v9997_v12  ;;  %v6100_v35 = vunpack.c.l.b16 %v6096_v40  ;;  %7385 = vmatpush3.bf16.msra.mxu0 %v7468_v11 }
0x646d   :  { %v6101_v21 = vrot.slane %v6099_v20, 6  ;;  %v4873_v6 = vcombine.high %v4851_v30, %v4851_v30  ;;  %v4912_v45 = vmul.f32 %v9767_v24, %v4851_v30  ;;  %7386 = vmatprep.subr.bf16.mxu0 %v8193_v1 }
0x646e   :  { %v6102_v37 = vrot.slane %v6100_v35, 5 }
0x646f   :  { %v4924_v56 = vcombine.low %v4912_v45, %v4913_v60  ;;  %v4914_v40 = vmul.f32 %v9778_v13, %v4873_v6 }
0x6470   :  { %v6103_v34 = vsel %vm449_vm8, %v6102_v37, %v6101_v21 }
0x6471   :  { %v6104_v42 = vpack.c.b16 %v6103_v34, %v6103_v34  ;;  %v4931_v20 = vrot.slane %v4924_v56, %v9529_v52  ;;  %v4938_v35 = vrot.slane %v4914_v40, %v9529_v52 }
0x6473   :  { %6105 = vrot.lane.b32.xlu0 %v6104_v42, %s8196_s26  ;;  %v4939_v21 = vcombine.low %v4931_v20, %v4938_v35  ;;  %v7469_v42 = vld [vmem:[#allocation5 + $0x8] sm:$0xff]  }
0x6474   :  { %7387 = vmatpush3.bf16.msra.mxu0 %v7469_v42 }
0x6475   :  { %v4946_v37 = vrot.slane %v4939_v21, %v9529_v52  ;;  %7400 = vmatprep.subr.bf16.mxu0 %v8193_v1 }
0x6477   :  { %v4973_v34 = vsel %vm4972_vm6, %v4946_v37, 0.0 }
0x64e5   :  { %v6106_v16 = vpop.permute.xlu0 %6105 }
0x64e6   :  { %7381 = vmatmul.mubr.msk.bf16.vlgmr.msra.gmra.mrb[96].mxu1 %vm331_vm9, %v6106_v16 }
0x64e7   :  { %7396 = vmatprep.mubr.msk.bf16.mxu1 %vm8194_vm0, %v8193_v1 }
0x65b9   :  { %v6144_v10 = vpop.f32.mrb[96].mxu1 }
0x65ba   :  { %v6151_v50 = vrot.slane %v6144_v10, 1  ;;  %v6152_v48 = vrot.slane %v6144_v10, 2  ;;  %v7382_v58 = vpop.f32.mrb[97].mxu1 }
0x65bb   :  { %v6147_v12 = vpop.f32.mrb[98].mxu1 }
0x65bc   :  { %v6155_v31 = vadd.f32 %v6151_v50, %v9753_v8  ;;  %v6156_v61 = vadd.f32 %v6152_v48, %v9756_v29  ;;  %v7383_v62 = vpop.f32.mrb[99].mxu1 }
0x65be   :  { %8053 = vtanh.f32 %v6155_v31  ;;  %v6841_v36 = vmul.f32 -1.442695, %v6155_v31  ;;  %v6842_v63 = vmul.f32 -1.442695, %v6156_v61 }
0x65bf   :  { %8055 = vtanh.f32 %v6156_v61 }
0x65c0   :  { %8057 = vpow2.f32 %v6841_v36 }
0x65c1   :  { %8059 = vpow2.f32 %v6842_v63 }
0x65c8   :  { %v8054_v53 = vpop.eup %8053 }
0x65c9   :  { %v8056_v44 = vpop.eup %8055  ;;  %6181 = vrot.lane.b32.xlu1 %v8054_v53, %s8188_s25 }
0x65ca   :  { %6183 = vrot.lane.b32.xlu0 %v8056_v44, %s8188_s25  ;;  %v8058_v51 = vpop.eup %8057 }
0x65cb   :  { %v8060_v25 = vpop.eup %8059  ;;  %v6163_v23 = vadd.f32 1.0, %v8058_v51 }
0x65cc   :  { %v6164_v18 = vadd.f32 1.0, %v8060_v25 }
0x65cd   :  { %8061 = vrcp.f32 %v6163_v23 }
0x65ce   :  { %8063 = vrcp.f32 %v6164_v18 }
0x65d7   :  { %v8062_v8 = vpop.eup %8061 }
0x65d8   :  { %v8064_v43 = vpop.eup %8063  ;;  %v6177_v59 = vmul.f32 %v8062_v8, %v6173_v27 }
0x65d9   :  { %v6178_v4 = vmul.f32 %v8064_v43, %v6174_v57 }
0x663b   :  { %v6182_v29 = vpop.permute.xlu1 %6181 }
0x663c   :  { %v6184_v39 = vpop.permute.xlu0 %6183  ;;  %v6187_v9 = vmul.f32 %v8062_v8, %v6182_v29 }
0x663d   :  { %v6188_v46 = vmul.f32 %v8064_v43, %v6184_v39 }
0x663e   :  { %6191 = vrot.lane.b32.xlu1 %v6187_v9, %s8196_s26 }
0x663f   :  { %6193 = vrot.lane.b32.xlu0 %v6188_v46, %s8196_s26 }
0x66b0   :  { %v6192_v17 = vpop.permute.xlu1 %6191 }
0x66b1   :  { %v6194_v55 = vpop.permute.xlu0 %6193  ;;  %v6197_v54 = vadd.f32 %v6192_v17, %v6177_v59 }
0x66b2   :  { %v6198_v7 = vadd.f32 %v6194_v55, %v6178_v4 }
0x66b3   :  { %8065 = vtanh.f32 %v6197_v54 }
0x66b4   :  { %8067 = vtanh.f32 %v6198_v7 }
0x66bd   :  { %v8066_v28 = vpop.eup %8065 }
0x66be   :  { %v8068_v32 = vpop.eup %8067  ;;  %6203 = vrot.lane.b32.xlu1 %v8066_v28, %s8188_s25 }
0x66bf   :  { %6205 = vrot.lane.b32.xlu0 %v8068_v32, %s8188_s25 }
0x66de   :  { %4974 = vadd.xlane.f32.xlu0 %v4973_v34 }
0x6730   :  { %v6204_v24 = vpop.permute.xlu1 %6203 }
0x6731   :  { %v6206_v41 = vpop.permute.xlu0 %6205  ;;  %v6209_v26 = vmul.f32 %v8062_v8, %v6204_v24 }
0x6732   :  { %v6210_v13 = vmul.f32 %v8064_v43, %v6206_v41 }
0x6733   :  { %v6214_v16 = vrot.slane %v6209_v26, %v8751_v38 }
0x6734   :  { %v6218_v10 = vrot.slane %v6210_v13, %v8751_v38 }
0x6735   :  { %v10064_v52 = vsel %vm1330_vm4, %v6214_v16, %v10025_v49 }
0x6736   :  { %v10069_v50 = vsel %vm1330_vm4, %v6218_v10, %v10030_v47 }
0x6737   :  { %v6225_v48 = vpack.c.bf16 %v10069_v50, %v10064_v52 }
0x6739   :  { %6231 = vrot.lane.b32.xlu1 %v6225_v48, %s8196_s26 }
0x675d   :  { %4977 = vadd.xlane.f32.xlu1 %v9792_v14  ;;  %v10082_v14 = vld [vmem:[#allocation7 + $0x8] sm:$0xff] }
0x675e   :  { %v6229_v53 = vrot.slane %v10082_v14, %v8654_v33  ;;  %v6294_v43 = vrot.slane %v10082_v14, %v8691_v15 }
0x676b   :  { %v4975_v49 = vpop.xlane.xlu0 %4974 }
0x676c   :  { %v4984_v31 = vrot.slane %v4975_v49, %v9445_v19 }
0x67ab   :  { %v6232_v58 = vpop.permute.xlu1 %6231 }
0x67ac   :  { %7389 = vmatmul.mubr.msk.bf16.vlgmr.msra.gmra.mrb[92].mxu0 %vm331_vm9, %v6232_v58 }
0x67ad   :  { %7404 = vmatprep.mubr.msk.bf16.mxu0 %vm8194_vm0, %v8193_v1 }
0x67ea   :  { %v4978_v12 = vpop.xlane.xlu1 %4977 }
0x67eb   :  { %v4988_v2 = vrot.slane %v4978_v12, %v9445_v19 }
0x67ed   :  { %v4989_v47 = vsel %vm449_vm8, %v4988_v2, %v4984_v31 }
0x67ee   :  { %v4992_v61 = vsel %vm4991_vm10, %v4989_v47, -inf }
0x67ef   :  { %4993 = vmax.xlane.f32.xlu1 %v4992_v61 }
0x687c   :  { %v4994_v62 = vpop.xlane.xlu1 %4993 }
0x687d   :  { %v4999_v44 = vrot.slane %v4994_v62, %v8326_v3  ;;  %v5003_v7 = vrot.slane %v4994_v62, %v8336_v5 }
0x687f   :  { %v5006_v36 = vsub.f32 %v4975_v49, %v4999_v44  ;;  %v6282_v63 = vpop.f32.mrb[92].mxu0  ;;  %v5007_v32 = vsub.f32 %v4978_v12, %v5003_v7 }
0x6880   :  { %v6283_v51 = vadd.f32 %v6282_v63, %v6229_v53  ;;  %v7390_v25 = vpop.f32.mrb[93].mxu0 }
0x6881   :  { %v5008_v23 = vmul.f32 1.442695, %v5006_v36  ;;  %v6285_v18 = vpop.f32.mrb[94].mxu0  ;;  %v5010_v30 = vmul.f32 1.442695, %v5007_v32 }
0x6882   :  { %8069 = vtanh.f32 %v6283_v51  ;;  %v6286_v8 = vadd.f32 %v6285_v18, %v6229_v53  ;;  %v7391_v29 = vpop.f32.mrb[95].mxu0 }
0x6883   :  { %8071 = vpow2.f32 %v5008_v23 }
0x6884   :  { %8073 = vtanh.f32 %v6286_v8 }
0x6885   :  { %8075 = vpow2.f32 %v5010_v30 }
0x688c   :  { %v8070_v39 = vpop.eup %8069 }
0x688d   :  { %v8072_v9 = vpop.eup %8071  ;;  %v6295_v46 = vmul.f32 %v8070_v39, %v6294_v43 }
0x688e   :  { %5015 = vperm.xlu1 %7436, %v8072_v9   ;;  %v8074_v33 = vpop.eup %8073 }
0x688f   :  { %v6297_v27 = vsel %vm331_vm9, %v6295_v46, 0.0  ;;  %v6296_v57 = vmul.f32 %v8074_v33, %v6294_v43  ;;  %v8076_v60 = vpop.eup %8075 }
0x6890   :  { %6298 = vadd.xlane.f32.xlu0 %v6297_v27 }
0x6891   :  { %v6300_v59 = vsel %vm331_vm9, %v6296_v57, 0.0 }
0x6894   :  { %6301 = vadd.xlane.f32.xlu0 %v6300_v59 }
0x690d   :  { %v5016_v21 = vpop.permute.xlu1 %5015 }
0x690e   :  { %v5023_v11 = vrot.slane %v5016_v21, %v9445_v19 }
0x691d   :  { %v6299_v4 = vpop.xlane.xlu0 %6298 }
0x691e   :  { %v6308_v55 = vrot.slane %v6299_v4, %v9445_v19 }
0x6921   :  { %v6302_v17 = vpop.xlane.xlu0 %6301 }
0x6922   :  { %v6312_v54 = vrot.slane %v6302_v17, %v9445_v19 }
0x6924   :  { %v6313_v15 = vsel %vm449_vm8, %v6312_v54, %v6308_v55 }
0x6925   :  { %v6315_v28 = vsel %vm1437_vm5, %v6313_v15, -inf }
0x6926   :  { %6316 = vmax.xlane.f32.xlu0 %v6315_v28 }
0x693c   :  { %5018 = vperm.xlu0 %7435, %v8076_v60  }
0x69b3   :  { %v6317_v6 = vpop.xlane.xlu0 %6316 }
0x69b4   :  { %v6322_v45 = vrot.slane %v6317_v6, %v8326_v3  ;;  %v6326_v56 = vrot.slane %v6317_v6, %v8336_v5 }
0x69b6   :  { %v6329_v40 = vsub.f32 %v6299_v4, %v6322_v45  ;;  %v6330_v20 = vsub.f32 %v6302_v17, %v6326_v56  ;;  %v7472_v56 = vld [vmem:[%s10180_s10 + $0x10] sm:$0xff]  }
0x69b7   :  { %7393 = vmatpush3.bf16.msra.mxu1 %v7472_v56 }
0x69b8   :  { %v6331_v35 = vmul.f32 1.442695, %v6329_v40  ;;  %v6333_v37 = vmul.f32 1.442695, %v6330_v20  ;;  %v7473_v40 = vld [vmem:[%s10180_s10 + $0x18] sm:$0xff]   ;;  %7394 = vmatprep.subr.bf16.mxu1 %v8193_v1 }
0x69ba   :  { %8077 = vpow2.f32 %v6331_v35 }
0x69bb   :  { %v5019_v34 = vpop.permute.xlu0 %5018  ;;  %8079 = vpow2.f32 %v6333_v37  ;;  %7395 = vmatpush3.bf16.msra.mxu1 %v7473_v40 }
0x69bc   :  { %v5027_v42 = vrot.slane %v5019_v34, %v9445_v19  ;;  %7408 = vmatprep.subr.bf16.mxu1 %v8193_v1 }
0x69be   :  { %v5028_v24 = vsel %vm449_vm8, %v5027_v42, %v5023_v11 }
0x69bf   :  { %v5030_v41 = vsel %vm4991_vm10, %v5028_v24, 0.0 }
0x69c0   :  { %5031 = vadd.xlane.f32.xlu0 %v5030_v41 }
0x69c4   :  { %v8078_v26 = vpop.eup %8077 }
0x69c5   :  { %6338 = vperm.xlu1 %7436, %v8078_v26   ;;  %v8080_v13 = vpop.eup %8079 }
0x69c9   :  { %6341 = vperm.xlu1 %7436, %v8080_v13  }
0x6a44   :  { %v6339_v16 = vpop.permute.xlu1 %6338 }
0x6a45   :  { %v6346_v48 = vrot.slane %v6339_v16, %v9445_v19 }
0x6a48   :  { %v6342_v10 = vpop.permute.xlu1 %6341 }
0x6a49   :  { %v6350_v58 = vrot.slane %v6342_v10, %v9445_v19  ;;  %v7470_v19 = vld [vmem:[%s10180_s10] sm:$0xff]  }
0x6a4a   :  { %7401 = vmatpush3.bf16.msra.mxu0 %v7470_v19 }
0x6a4b   :  { %v6351_v49 = vsel %vm449_vm8, %v6350_v58, %v6346_v48  ;;  %7402 = vmatprep.subr.bf16.mxu0 %v8193_v1 }
0x6a4c   :  { %v6353_v12 = vsel %vm1437_vm5, %v6351_v49, 0.0 }
0x6a4d   :  { %6354 = vadd.xlane.f32.xlu1 %v6353_v12  ;;  %v5032_v31 = vpop.xlane.xlu0 %5031 }
0x6a4e   :  { %8081 = vrcp.f32 %v5032_v31 }
0x6a58   :  { %v8082_v2 = vpop.eup %8081 }
0x6a59   :  { %v5038_v47 = vrot.slane %v8082_v2, %v8326_v3  ;;  %v5042_v61 = vrot.slane %v8082_v2, %v8336_v5 }
0x6a5b   :  { %v5045_v62 = vmul.f32 %v8072_v9, %v5038_v47  ;;  %v5046_v53 = vmul.f32 %v8076_v60, %v5042_v61 }
0x6a5d   :  { %5049 = vperm.xlu0 %7435, %v5045_v62  }
0x6a5e   :  { %5054 = vperm.xlu1 %7436, %v5046_v53  }
0x6ada   :  { %v6355_v44 = vpop.xlane.xlu1 %6354 }
0x6adb   :  { %8083 = vrcp.f32 %v6355_v44 }
0x6adc   :  { %v5050_v36 = vpop.permute.xlu0 %5049 }
0x6add   :  { %v5057_v63 = vmul.f32 %v5050_v36, %v9693_v0 }
0x6ade   :  { %v5055_v51 = vpop.permute.xlu1 %5054 }
0x6adf   :  { %v5060_v25 = vsel %vm5059_vm11, %v5057_v63, 0.0  ;;  %v5058_v23 = vmul.f32 %v5055_v51, %v9702_v22  ;;  %v7471_v22 = vld [vmem:[%s10180_s10 + $0x8] sm:$0xff]  }
0x6ae0   :  { %v5061_v18 = vrot.slane %v5060_v25, 4  ;;  %7403 = vmatpush3.bf16.msra.mxu0 %v7471_v22 }
0x6ae1   :  { %v5067_v8 = vsel %vm5059_vm11, %v5058_v23, 0.0  ;;  %7416 = vmatprep.subr.bf16.mxu0 %v8193_v1  ;;  %v7475_v23 = vld [vmem:[%s10181_s11 + $0x8] sm:$0xff]  }
0x6ae2   :  { %v5062_v29 = vadd.f32 %v5061_v18, %v5060_v25  ;;  %v5068_v43 = vrot.slane %v5067_v8, 4  ;;  %v7474_v25 = vld [vmem:[%s10181_s11] sm:$0xff]   ;;  %s8198_s11 = smov [#allocation8]  }
0x6ae3   :  { %v7476_v18 = vld [vmem:[%s10182_s12] sm:$0xff]   ;;  %s6669_s12 = sshll.u32 %s8198_s11, 4  ;;  %s6670_s12 = int_to_ptr.vmem [resolvable:$true] %s6669_s12 }
0x6ae4   :  { %v5063_v39 = vrot.slane %v5062_v29, 2  ;;  %v5069_v9 = vadd.f32 %v5068_v43, %v5067_v8  ;;  %v6537_v8 = vrot.slane %v10082_v14, %v8751_v38  ;;  %s8158_s6 = scalar_lea.vmem %s6670_s12, 32  ;;  %p8163_p11 = scmp.lt.s32.totalorder %s6670_s12, %s6670_s12 }
0x6ae5   :  { %v8084_v46 = vpop.eup %8083  ;;  %p8159_p10 = scmp.ne.s32.totalorder %s6670_s12, %s8158_s6  ;;  %p8164_p12 = scmp.lt.s32.totalorder %s8158_s6, %s8158_s6 }
0x6ae6   :  { %v5064_v33 = vadd.f32 %v5063_v39, %v5062_v29  ;;  %v5070_v27 = vrot.slane %v5069_v9, 2  ;;  %v6365_v57 = vrot.slane %v8084_v46, %v8336_v5  ;;  %v6361_v59 = vrot.slane %v8084_v46, %v8326_v3 }
0x6ae7   :  { %p8165_p13 = por %p8164_p12, %p8163_p11 }
0x6ae8   :  { %v5065_v4 = vrot.slane %v5064_v33, 1  ;;  %v5071_v17 = vadd.f32 %v5070_v27, %v5069_v9  ;;  %v6369_v0 = vmul.f32 %v8080_v13, %v6365_v57  ;;  %v6368_v55 = vmul.f32 %v8078_v26, %v6361_v59  ;;  %v92_v57 = vld [vmem:[#allocation7 + $0x10] sm:$0x3] }
0x6ae9   :  { %v6548_v59 = vrot.slane %v92_v57, %v8326_v3  ;;  %v6611_v14 = vrot.slane %v92_v57, %v8336_v5  ;;  %p8166_p0 = pnand %p8165_p13, %p8159_p10 }
0x6aea   :  { %v5066_v54 = vadd.f32 %v5065_v4, %v5064_v33  ;;  %v5072_v15 = vrot.slane %v5071_v17, 1  ;;  %6377 = vperm.xlu1 %7436, %v6369_v0   ;;  %6372 = vperm.xlu0 %7435, %v6368_v55  }
0x6aec   :  { %v6404_v7 = vpack.c.bf16 %v5066_v54, %v5066_v54  ;;  %v5073_v28 = vadd.f32 %v5072_v15, %v5071_v17 }
0x6aee   :  { %v6405_v32 = vpack.c.bf16 %v5073_v28, %v5073_v28  ;;  %v6473_v30 = vunpack.c.l.b16 %v6404_v7 }
0x6af0   :  { %v6474_v60 = vunpack.c.l.b16 %v6405_v32 }
0x6af2   :  { %v6475_v6 = vsel %vm449_vm8, %v6474_v60, %v6473_v30 }
0x6af3   :  { %v6476_v45 = vpack.c.b16 %v6475_v6, %v6475_v6 }
0x6af5   :  { %6477 = vrot.lane.b32.xlu1 %v6476_v45, %s8196_s26 }
0x6b69   :  { %v6378_v20 = vpop.permute.xlu1 %6377  ;;  %v6373_v35 = vpop.permute.xlu0 %6372 }
0x6b6a   :  { %v6381_v21 = vmul.f32 %v6378_v20, %v10069_v50  ;;  %v6380_v37 = vmul.f32 %v6373_v35, %v10064_v52 }
0x6b6c   :  { %v6389_v34 = vsel %vm10186_vm12, %v6381_v21, 0.0  ;;  %v6382_v11 = vsel %vm10187_vm13, %v6380_v37, 0.0 }
0x6b6d   :  { %v6390_v42 = vrot.slane %v6389_v34, 4  ;;  %v6383_v24 = vrot.slane %v6382_v11, 4  ;;  %v6478_v41 = vpop.permute.xlu1 %6477 }
0x6b6e   :  { %7405 = vmatmul.mubr.msk.bf16.vlgmr.msra.gmra.mrb[96].mxu0 %vm331_vm9, %v6478_v41 }
0x6b6f   :  { %v6391_v26 = vadd.f32 %v6390_v42, %v6389_v34  ;;  %v6384_v13 = vadd.f32 %v6383_v24, %v6382_v11  ;;  %7418 = vmatprep.mubr.msk.bf16.mxu0 %vm8194_vm0, %v8193_v1  ;;  %7417 = vmatpush3.bf16.msra.mxu0 %v7476_v18 }
0x6b71   :  { %v6392_v16 = vrot.slane %v6391_v26, 2  ;;  %v6385_v10 = vrot.slane %v6384_v13, 2 }
0x6b73   :  { %v6393_v48 = vadd.f32 %v6392_v16, %v6391_v26  ;;  %v6386_v50 = vadd.f32 %v6385_v10, %v6384_v13 }
0x6b75   :  { %v6394_v58 = vrot.slane %v6393_v48, 1  ;;  %v6387_v52 = vrot.slane %v6386_v50, 1 }
0x6b77   :  { %v6395_v49 = vadd.f32 %v6394_v58, %v6393_v48  ;;  %v6388_v12 = vadd.f32 %v6387_v52, %v6386_v50 }
0x6b79   :  { %v6407_v31 = vpack.c.bf16 %v6395_v49, %v6395_v49  ;;  %v6406_v2 = vpack.c.bf16 %v6388_v12, %v6388_v12 }
0x6b7b   :  { %v6411_v47 = vunpack.c.l.b16 %v6407_v31  ;;  %v6410_v61 = vunpack.c.l.b16 %v6406_v2 }
0x6b7d   :  { %v6412_v62 = vsel %vm449_vm8, %v6411_v47, %v6410_v61 }
0x6b7e   :  { %v6413_v53 = vpack.c.b16 %v6412_v62, %v6412_v62 }
0x6b80   :  { %6414 = vrot.lane.b32.xlu0 %v6413_v53, %s8196_s26 }
0x6bf2   :  { %v6415_v19 = vpop.permute.xlu0 %6414 }
0x6bf3   :  { %7397 = vmatmul.mubr.msk.bf16.vlgmr.msra.gmra.mrb[100].mxu1 %vm331_vm9, %v6415_v19 }
0x6bf4   :  { %7412 = vmatprep.mubr.msk.bf16.mxu1 %vm8194_vm0, %v8193_v1  ;;  %7409 = vmatpush3.bf16.msra.mxu1 %v7474_v25  ;;  %vm6661_vm0 = vcmask 25600  }
0x6bf5   :  { %7410 = vmatprep.subr.bf16.mxu1 %v8193_v1 }
0x6bf8   :  { %7411 = vmatpush3.bf16.msra.mxu1 %v7475_v23 }
0x6c41   :  { %v6528_v44 = vpop.f32.mrb[96].mxu0 }
0x6c42   :  { %v7406_v36 = vpop.f32.mrb[97].mxu0 }
0x6c43   :  { %v6531_v63 = vpop.f32.mrb[98].mxu0 }
0x6c44   :  { %v7407_v51 = vpop.f32.mrb[99].mxu0 }
0x6cc6   :  { %v6465_v29 = vpop.f32.mrb[100].mxu1 }
0x6cc7   :  { %v6529_v43 = vadd.f32 %v6528_v44, %v6465_v29  ;;  %v7398_v39 = vpop.f32.mrb[101].mxu1 }
0x6cc8   :  { %v6468_v9 = vpop.f32.mrb[102].mxu1 }
0x6cc9   :  { %v6538_v46 = vadd.f32 %v6537_v8, %v6529_v43  ;;  %v7399_v33 = vpop.f32.mrb[103].mxu1 }
0x6ccb   :  { %v6539_v1 = vmax.f32 %v6538_v46, 0.0 }
0x6ccd   :  { %v6540_v27 = vpack.c.bf16 %v6539_v1, %v6539_v1 }
0x6ccf   :  { %7413 = vmatmul.mubr.msk.bf16.vlgmr.msra.gmra.mrb[104].mxu1 %vm331_vm9, %v6540_v27 }
0x6da2   :  { %v6598_v4 = vpop.f32.mrb[104].mxu1 }
0x6da3   :  { %v6599_v17 = vadd.f32 %v6598_v4, %v6548_v59  ;;  %v7414_v0 = vpop.f32.mrb[105].mxu1 }
0x6da4   :  { %v6601_v55 = vpop.f32.mrb[106].mxu1 }
0x6da5   :  { %v6604_v54 = vmax.f32 %v6599_v17, 0.0  ;;  %v7415_v15 = vpop.f32.mrb[107].mxu1 }
0x6da7   :  { %v6605_v38 = vpack.c.bf16 %v6604_v54, %v6604_v54 }
0x6da9   :  { %7419 = vmatmul.mubr.msk.bf16.vlgmr.msra.gmra.mrb[100].mxu0 %vm268_vm7, %v6605_v38 }
0x6e7c   :  { %v6655_v22 = vpop.f32.mrb[100].mxu0 }
0x6e7d   :  { %v6656_v7 = vadd.f32 %v6655_v22, %v6611_v14  ;;  %v7420_v28 = vpop.f32.mrb[101].mxu0 }
0x6e7e   :  { %v6658_v32 = vpop.f32.mrb[102].mxu0 }
0x6e7f   :  { %v7421_v3 = vpop.f32.mrb[103].mxu0  ;;  %6662 = vst.msk [vmem:[#allocation8] sm:$0x3] %vm6661_vm0, %v6656_v7 }
0x6e80   :  { %8169 = shalt.err (!%p8166_p0)
}
0x6e81   :  { %s8170_s2 = scalar_lea.hbm %s10184_s14, 32 }
0x6e82   :  { %p8171_p1 = scmp.ne.s32.totalorder %s10184_s14, %s8170_s2  ;;  %p8174_p2 = scmp.lt.u32.totalorder %s8170_s2, %s10184_s14 }
0x6e84   :  { %p8176_p3 = pnand %p8174_p2, %p8171_p1 }
0x6e86   :  { %8179 = shalt.err (!%p8176_p3)
}
0x6e87   :  { %6672 = dma.vmem_to_hbm [thread:$0]  %s6670_s12, 32, %s10184_s14, [#allocation4]  }
0x6e88   :  { %8184 = dma.done.wait [#allocation4], 32  }
0x6e89   :  { %8185 = vsyncadd [#allocation4], 4294967264 }
0x6e8a   :  { %6676 = vsyncpa [#allocation3], 1 }
0x6e8b   :  { %6677 = vsyncpa [#allocation6], 1 }
0x6e8c   :  { %6678 = vsyncpa [#allocation4], 1 }

</bundles_post_ra>
